<compile_context>
chip_gen: v7x
topology: tpu7x:2x2x1
jax: 0.10.0
libtpu: 0.0.40
codegen_flags: <defaults>
</compile_context>

<pallas_src>
import functools

import numpy as np
import jax
import jax.numpy as jnp
from jax.experimental import pallas as pl
from jax.experimental.pallas import tpu as pltpu

# Network constants fixed by the PyTorch module (MNIST-shaped input).
B = 2                 # batch
H1 = W1 = 28          # conv1 spatial size
C1 = 16               # conv1 output channels
H2 = W2 = 14          # conv2 spatial size (after pool1)
C2 = 32               # conv2 output channels
H3 = W3 = 7           # spatial size after pool2
NCLS = 10
KSZ = 5               # conv kernel size (stride 1, padding 2)


# ------------------------------ Pallas kernel ------------------------------ #
def _cnn_kernel(x_ref, tv1_ref, k1_ref, b1_ref, rv1_ref, ch1_ref,
                tv2_ref, k2_ref, b2_ref, rv2_ref, ch2_ref,
                w2d_ref, bl_ref, logits_ref, flat_ref, p2_scr):
    """One grid step == one image. Activations: rows = height, cols = (chan, width)."""
    f32 = jnp.float32
    dot = functools.partial(jnp.dot, preferred_element_type=f32)

    # ---- conv1 (5x5, pad 2) + ReLU ---------------------------------------- #
    x = x_ref[0]                                           # (28, 28)
    acc1 = dot(dot(tv1_ref[0], x), k1_ref[0])              # (28, 448)
    for di in range(1, KSZ):
        acc1 = acc1 + dot(dot(tv1_ref[di], x), k1_ref[di])
    y1 = jnp.maximum(acc1 + b1_ref[...], 0.0)              # (28, 448)

    # ---- maxpool 2x2 (row pairs, then column pairs) ------------------------ #
    v1 = jnp.maximum(dot(rv1_ref[0], y1), dot(rv1_ref[1], y1))   # (14, 448)
    p1 = jnp.maximum(dot(v1, ch1_ref[0]), dot(v1, ch1_ref[1]))   # (14, 224)

    # ---- conv2 (5x5, pad 2) + ReLU ---------------------------------------- #
    acc2 = dot(dot(tv2_ref[0], p1), k2_ref[0])             # (14, 448)
    for di in range(1, KSZ):
        acc2 = acc2 + dot(dot(tv2_ref[di], p1), k2_ref[di])
    y2 = jnp.maximum(acc2 + b2_ref[...], 0.0)              # (14, 448)

    # ---- maxpool 2x2 ------------------------------------------------------- #
    v2 = jnp.maximum(dot(rv2_ref[0], y2), dot(rv2_ref[1], y2))   # (7, 448)
    p2 = jnp.maximum(dot(v2, ch2_ref[0]), dot(v2, ch2_ref[1]))   # (7, 224)
    p2_scr[...] = p2                                        # rows = h, cols = (c, w)

    # ---- flattened features in exact torch (c, h, w) order ----------------- #
    for c in range(C2):
        flat_ref[0, c, :, :] = p2_scr[:, c * W3:(c + 1) * W3]    # (7, 7) tile

    # ---- Linear(1568 -> 10): flatten permutation folded into w2d ----------- #
    z = dot(p2, w2d_ref[...])                               # (7, 70)
    lg = bl_ref[...]                                        # (1, 10)
    for h in range(H3):
        lg = lg + z[h:h + 1, h * NCLS:(h + 1) * NCLS]
    logits_ref[0] = lg


# ----------------------------- pallas_call glue ----------------------------- #
def _const_spec(shape):
    n = len(shape)
    return pl.BlockSpec(shape, lambda i: (0,) * n)


def _cnn_pallas_call(x3, c):
    args = (x3, c["tv1"], c["k1"], c["b1r"], c["rv1"], c["ch1"],
            c["tv2"], c["k2"], c["b2r"], c["rv2"], c["ch2"],
            c["w2d"], c["blr"])
    in_specs = [pl.BlockSpec((1, H1, W1), lambda i: (i, 0, 0))]
    in_specs += [_const_spec(a.shape) for a in args[1:]]
    out_shape = (jax.ShapeDtypeStruct((B, 1, NCLS), jnp.float32),
                 jax.ShapeDtypeStruct((B, C2, H3, W3), jnp.float32))
    out_specs = (pl.BlockSpec((1, 1, NCLS), lambda i: (i, 0, 0)),
                 pl.BlockSpec((1, C2, H3, W3), lambda i: (i, 0, 0, 0)))
    return pl.pallas_call(
        _cnn_kernel,
        out_shape=out_shape,
        grid=(B,),
        in_specs=in_specs,
        out_specs=out_specs,
        scratch_shapes=[pltpu.VMEM((H3, C2 * W3), jnp.float32)],
        compiler_params=pltpu.CompilerParams(dimension_semantics=("parallel",)),
    )(*args)


@jax.jit
def cnn_forward(x, consts):
    """x: (B, 1, 28, 28) NCHW. Returns (logits (B, 10), flat features (B, 1568))."""
    x3 = x.reshape(B, H1, W1)                  # Cin == 1: pure relabel, no data movement
    logits, flat4 = _cnn_pallas_call(x3, consts)
    return logits.reshape(B, NCLS), flat4.reshape(B, C2 * H3 * W3)


# -------------------- host-side (trace-time) weight folding ----------------- #
def prepare_constants(params):
    w1 = np.asarray(params["w1"], np.float32)   # (16, 1, 5, 5)
    b1 = np.asarray(params["b1"], np.float32)
    w2 = np.asarray(params["w2"], np.float32)   # (32, 16, 5, 5)
    b2 = np.asarray(params["b2"], np.float32)
    wl = np.asarray(params["wl"], np.float32)   # (10, 1568)
    bl = np.asarray(params["bl"], np.float32)

    def vert_shift(n):
        # (5, n, n): row h of (T[di] @ X) is row h + di - 2 of X (zero outside).
        t = np.zeros((KSZ, n, n), np.float32)
        for di in range(KSZ):
            for h in range(n):
                hs = h + di - 2
                if 0 <= hs < n:
                    t[di, h, hs] = 1.0
        return t

    def conv_cols(w, width):
        # (5, Cin*W, Cout*W): K[di, ci*W + wi, co*W + wo] = w[co, ci, di, wi - wo + 2]
        cout, cin = w.shape[0], w.shape[1]
        k = np.zeros((KSZ, cin * width, cout * width), np.float32)
        ci_idx = np.arange(cin) * width
        co_idx = np.arange(cout) * width
        for di in range(KSZ):
            for dj in range(KSZ):
                for wo in range(width):
                    wi = wo + dj - 2
                    if 0 <= wi < width:
                        k[di][np.ix_(ci_idx + wi, co_idx + wo)] = w[:, :, di, dj].T
        return k

    def pool_rows(n):
        # (2, n//2, n): output row i reads input row 2*i + a
        r = np.zeros((2, n // 2, n), np.float32)
        for a in range(2):
            for i in range(n // 2):
                r[a, i, 2 * i + a] = 1.0
        return r

    def pool_cols(chan, width):
        # (2, chan*width, chan*(width//2)): output col (c, i) reads input col (c, 2i + a)
        wo = width // 2
        m = np.zeros((2, chan * width, chan * wo), np.float32)
        for a in range(2):
            for c in range(chan):
                for i in range(wo):
                    m[a, c * width + 2 * i + a, c * wo + i] = 1.0
        return m

    # Linear weight with torch's (c, h, w) flatten order folded in:
    #   w2d[c*7 + w, h*10 + k] = wl[k, c*49 + h*7 + w]
    wl_r = wl.reshape(NCLS, C2, H3, W3)
    w2d = np.zeros((C2 * W3, H3 * NCLS), np.float32)
    for h in range(H3):
        for k in range(NCLS):
            w2d[:, h * NCLS + k] = wl_r[k, :, h, :].reshape(-1)

    c = dict(
        tv1=vert_shift(H1), k1=conv_cols(w1, W1), b1r=np.repeat(b1, W1)[None, :],
        rv1=pool_rows(H1), ch1=pool_cols(C1, W1),
        tv2=vert_shift(H2), k2=conv_cols(w2, W2), b2r=np.repeat(b2, W2)[None, :],
        rv2=pool_rows(H2), ch2=pool_cols(C2, W2),
        w2d=w2d, blr=bl[None, :],
    )
    return {k: jnp.asarray(v) for k, v in c.items()}


# ------------------------------ pure-JAX reference -------------------------- #
def reference_forward(x, params):
    def conv_block(h, w, b):
        y = jax.lax.conv_general_dilated(
            h, w, window_strides=(1, 1), padding=((2, 2), (2, 2)),
            dimension_numbers=("NCHW", "OIHW", "NCHW"))
        y = jnp.maximum(y + b[None, :, None, None], 0.0)
        return jax.lax.reduce_window(
            y, -jnp.inf, jax.lax.max,
            window_dimensions=(1, 1, 2, 2), window_strides=(1, 1, 2, 2),
            padding="VALID")

    h = conv_block(x, params["w1"], params["b1"])
    h = conv_block(h, params["w2"], params["b2"])
    flat = h.reshape(h.shape[0], -1)
    return flat @ params["wl"].T + params["bl"], flat


# ----------------------------------- main ----------------------------------- #
if __name__ == "__main__":
    x = jax.random.normal(jax.random.PRNGKey(0), (B, 1, 28, 28), jnp.float32)

    ks = jax.random.split(jax.random.PRNGKey(42), 6)
    params = {
        "w1": 0.10 * jax.random.normal(ks[0], (16, 1, 5, 5), jnp.float32),
        "b1": 0.10 * jax.random.normal(ks[1], (16,), jnp.float32),
        "w2": 0.05 * jax.random.normal(ks[2], (32, 16, 5, 5), jnp.float32),
        "b2": 0.10 * jax.random.normal(ks[3], (32,), jnp.float32),
        "wl": 0.02 * jax.random.normal(ks[4], (10, 32 * 7 * 7), jnp.float32),
        "bl": 0.10 * jax.random.normal(ks[5], (10,), jnp.float32),
    }

    consts = prepare_constants(params)          # host-side weight folding, done once
    logits, feats = cnn_forward(x, consts)
    jax.block_until_ready((logits, feats))

    assert logits.shape == (B, 10) and logits.dtype == jnp.float32
    assert feats.shape == (B, 32 * 7 * 7) and feats.dtype == jnp.float32

    ref_logits, ref_feats = jax.jit(reference_forward)(x, params)
    np.testing.assert_allclose(np.asarray(feats), np.asarray(ref_feats),
                               rtol=3e-2, atol=3e-2)
    np.testing.assert_allclose(np.asarray(logits), np.asarray(ref_logits),
                               rtol=3e-2, atol=3e-2)
    print("KERNEL_OK")
</pallas_src>

<mosaic_0001>
module attributes {stable_mosaic.version = 11 : i64} {
  func.func @_cnn_kernel(%arg0: i32, %arg1: memref<1x28x28xf32, #tpu.memory_space<vmem>>, %arg2: memref<5x28x28xf32, #tpu.memory_space<vmem>>, %arg3: memref<5x28x448xf32, #tpu.memory_space<vmem>>, %arg4: memref<1x448xf32, #tpu.memory_space<vmem>>, %arg5: memref<2x14x28xf32, #tpu.memory_space<vmem>>, %arg6: memref<2x448x224xf32, #tpu.memory_space<vmem>>, %arg7: memref<5x14x14xf32, #tpu.memory_space<vmem>>, %arg8: memref<5x224x448xf32, #tpu.memory_space<vmem>>, %arg9: memref<1x448xf32, #tpu.memory_space<vmem>>, %arg10: memref<2x7x14xf32, #tpu.memory_space<vmem>>, %arg11: memref<2x448x224xf32, #tpu.memory_space<vmem>>, %arg12: memref<224x70xf32, #tpu.memory_space<vmem>>, %arg13: memref<1x10xf32, #tpu.memory_space<vmem>>, %arg14: memref<1x1x10xf32, #tpu.memory_space<vmem>>, %arg15: memref<1x32x7x7xf32, #tpu.memory_space<vmem>>, %arg16: memref<7x224xf32, #tpu.memory_space<vmem>>) attributes {dimension_semantics = [#tpu.dimension_semantics<parallel>], iteration_bounds = array<i64: 2>, scalar_prefetch = 0 : i64, scratch_operands = 1 : i64, tpu.core_type = #tpu.core_type<tc>, window_params = [{transform_indices = @transform_0, window_bounds = array<i64: 1, 28, 28>}, {pipeline_mode = #tpu.pipeline_mode<synchronous>, transform_indices = @transform_1, window_bounds = array<i64: 5, 28, 28>}, {pipeline_mode = #tpu.pipeline_mode<synchronous>, transform_indices = @transform_2, window_bounds = array<i64: 5, 28, 448>}, {pipeline_mode = #tpu.pipeline_mode<synchronous>, transform_indices = @transform_3, window_bounds = array<i64: 1, 448>}, {pipeline_mode = #tpu.pipeline_mode<synchronous>, transform_indices = @transform_4, window_bounds = array<i64: 2, 14, 28>}, {pipeline_mode = #tpu.pipeline_mode<synchronous>, transform_indices = @transform_5, window_bounds = array<i64: 2, 448, 224>}, {pipeline_mode = #tpu.pipeline_mode<synchronous>, transform_indices = @transform_6, window_bounds = array<i64: 5, 14, 14>}, {pipeline_mode = #tpu.pipeline_mode<synchronous>, transform_indices = @transform_7, window_bounds = array<i64: 5, 224, 448>}, {pipeline_mode = #tpu.pipeline_mode<synchronous>, transform_indices = @transform_8, window_bounds = array<i64: 1, 448>}, {pipeline_mode = #tpu.pipeline_mode<synchronous>, transform_indices = @transform_9, window_bounds = array<i64: 2, 7, 14>}, {pipeline_mode = #tpu.pipeline_mode<synchronous>, transform_indices = @transform_10, window_bounds = array<i64: 2, 448, 224>}, {pipeline_mode = #tpu.pipeline_mode<synchronous>, transform_indices = @transform_11, window_bounds = array<i64: 224, 70>}, {pipeline_mode = #tpu.pipeline_mode<synchronous>, transform_indices = @transform_12, window_bounds = array<i64: 1, 10>}, {transform_indices = @transform_13, window_bounds = array<i64: 1, 1, 10>}, {transform_indices = @transform_14, window_bounds = array<i64: 1, 32, 7, 7>}]} {
    %c0 = arith.constant 0 : index
    %c0_0 = arith.constant 0 : index
    %c0_1 = arith.constant 0 : index
    %0 = vector.load %arg1[%c0, %c0_0, %c0_1] : memref<1x28x28xf32, #tpu.memory_space<vmem>>, vector<1x28x28xf32>
    %1 = vector.shape_cast %0 : vector<1x28x28xf32> to vector<28x28xf32>
    %c0_2 = arith.constant 0 : index
    %c0_3 = arith.constant 0 : index
    %c0_4 = arith.constant 0 : index
    %2 = vector.load %arg2[%c0_2, %c0_3, %c0_4] : memref<5x28x28xf32, #tpu.memory_space<vmem>>, vector<1x28x28xf32>
    %3 = vector.shape_cast %2 : vector<1x28x28xf32> to vector<28x28xf32>
    %cst = arith.constant dense<0.000000e+00> : vector<28x28xf32>
    %4 = tpu.matmul %3, %1, %cst {dimension_numbers = #tpu.dot_dimension_numbers<[1], [0], [0], [1], [0, 0, 1, 1], [], []>} : vector<28x28xf32>, vector<28x28xf32>, vector<28x28xf32> -> vector<28x28xf32>
    %c0_5 = arith.constant 0 : index
    %c0_6 = arith.constant 0 : index
    %c0_7 = arith.constant 0 : index
    %5 = vector.load %arg3[%c0_5, %c0_6, %c0_7] : memref<5x28x448xf32, #tpu.memory_space<vmem>>, vector<1x28x448xf32>
    %6 = vector.shape_cast %5 : vector<1x28x448xf32> to vector<28x448xf32>
    %cst_8 = arith.constant dense<0.000000e+00> : vector<28x448xf32>
    %7 = tpu.matmul %4, %6, %cst_8 {dimension_numbers = #tpu.dot_dimension_numbers<[1], [0], [0], [1], [0, 0, 1, 1], [], []>} : vector<28x28xf32>, vector<28x448xf32>, vector<28x448xf32> -> vector<28x448xf32>
    %c1 = arith.constant 1 : index
    %c0_9 = arith.constant 0 : index
    %c0_10 = arith.constant 0 : index
    %8 = vector.load %arg2[%c1, %c0_9, %c0_10] : memref<5x28x28xf32, #tpu.memory_space<vmem>>, vector<1x28x28xf32>
    %9 = vector.shape_cast %8 : vector<1x28x28xf32> to vector<28x28xf32>
    %cst_11 = arith.constant dense<0.000000e+00> : vector<28x28xf32>
    %10 = tpu.matmul %9, %1, %cst_11 {dimension_numbers = #tpu.dot_dimension_numbers<[1], [0], [0], [1], [0, 0, 1, 1], [], []>} : vector<28x28xf32>, vector<28x28xf32>, vector<28x28xf32> -> vector<28x28xf32>
    %c1_12 = arith.constant 1 : index
    %c0_13 = arith.constant 0 : index
    %c0_14 = arith.constant 0 : index
    %11 = vector.load %arg3[%c1_12, %c0_13, %c0_14] : memref<5x28x448xf32, #tpu.memory_space<vmem>>, vector<1x28x448xf32>
    %12 = vector.shape_cast %11 : vector<1x28x448xf32> to vector<28x448xf32>
    %cst_15 = arith.constant dense<0.000000e+00> : vector<28x448xf32>
    %13 = tpu.matmul %10, %12, %cst_15 {dimension_numbers = #tpu.dot_dimension_numbers<[1], [0], [0], [1], [0, 0, 1, 1], [], []>} : vector<28x28xf32>, vector<28x448xf32>, vector<28x448xf32> -> vector<28x448xf32>
    %14 = arith.addf %7, %13 : vector<28x448xf32>
    %c2 = arith.constant 2 : index
    %c0_16 = arith.constant 0 : index
    %c0_17 = arith.constant 0 : index
    %15 = vector.load %arg2[%c2, %c0_16, %c0_17] : memref<5x28x28xf32, #tpu.memory_space<vmem>>, vector<1x28x28xf32>
    %16 = vector.shape_cast %15 : vector<1x28x28xf32> to vector<28x28xf32>
    %cst_18 = arith.constant dense<0.000000e+00> : vector<28x28xf32>
    %17 = tpu.matmul %16, %1, %cst_18 {dimension_numbers = #tpu.dot_dimension_numbers<[1], [0], [0], [1], [0, 0, 1, 1], [], []>} : vector<28x28xf32>, vector<28x28xf32>, vector<28x28xf32> -> vector<28x28xf32>
    %c2_19 = arith.constant 2 : index
    %c0_20 = arith.constant 0 : index
    %c0_21 = arith.constant 0 : index
    %18 = vector.load %arg3[%c2_19, %c0_20, %c0_21] : memref<5x28x448xf32, #tpu.memory_space<vmem>>, vector<1x28x448xf32>
    %19 = vector.shape_cast %18 : vector<1x28x448xf32> to vector<28x448xf32>
    %cst_22 = arith.constant dense<0.000000e+00> : vector<28x448xf32>
    %20 = tpu.matmul %17, %19, %cst_22 {dimension_numbers = #tpu.dot_dimension_numbers<[1], [0], [0], [1], [0, 0, 1, 1], [], []>} : vector<28x28xf32>, vector<28x448xf32>, vector<28x448xf32> -> vector<28x448xf32>
    %21 = arith.addf %14, %20 : vector<28x448xf32>
    %c3 = arith.constant 3 : index
    %c0_23 = arith.constant 0 : index
    %c0_24 = arith.constant 0 : index
    %22 = vector.load %arg2[%c3, %c0_23, %c0_24] : memref<5x28x28xf32, #tpu.memory_space<vmem>>, vector<1x28x28xf32>
    %23 = vector.shape_cast %22 : vector<1x28x28xf32> to vector<28x28xf32>
    %cst_25 = arith.constant dense<0.000000e+00> : vector<28x28xf32>
    %24 = tpu.matmul %23, %1, %cst_25 {dimension_numbers = #tpu.dot_dimension_numbers<[1], [0], [0], [1], [0, 0, 1, 1], [], []>} : vector<28x28xf32>, vector<28x28xf32>, vector<28x28xf32> -> vector<28x28xf32>
    %c3_26 = arith.constant 3 : index
    %c0_27 = arith.constant 0 : index
    %c0_28 = arith.constant 0 : index
    %25 = vector.load %arg3[%c3_26, %c0_27, %c0_28] : memref<5x28x448xf32, #tpu.memory_space<vmem>>, vector<1x28x448xf32>
    %26 = vector.shape_cast %25 : vector<1x28x448xf32> to vector<28x448xf32>
    %cst_29 = arith.constant dense<0.000000e+00> : vector<28x448xf32>
    %27 = tpu.matmul %24, %26, %cst_29 {dimension_numbers = #tpu.dot_dimension_numbers<[1], [0], [0], [1], [0, 0, 1, 1], [], []>} : vector<28x28xf32>, vector<28x448xf32>, vector<28x448xf32> -> vector<28x448xf32>
    %28 = arith.addf %21, %27 : vector<28x448xf32>
    %c4 = arith.constant 4 : index
    %c0_30 = arith.constant 0 : index
    %c0_31 = arith.constant 0 : index
    %29 = vector.load %arg2[%c4, %c0_30, %c0_31] : memref<5x28x28xf32, #tpu.memory_space<vmem>>, vector<1x28x28xf32>
    %30 = vector.shape_cast %29 : vector<1x28x28xf32> to vector<28x28xf32>
    %cst_32 = arith.constant dense<0.000000e+00> : vector<28x28xf32>
    %31 = tpu.matmul %30, %1, %cst_32 {dimension_numbers = #tpu.dot_dimension_numbers<[1], [0], [0], [1], [0, 0, 1, 1], [], []>} : vector<28x28xf32>, vector<28x28xf32>, vector<28x28xf32> -> vector<28x28xf32>
    %c4_33 = arith.constant 4 : index
    %c0_34 = arith.constant 0 : index
    %c0_35 = arith.constant 0 : index
    %32 = vector.load %arg3[%c4_33, %c0_34, %c0_35] : memref<5x28x448xf32, #tpu.memory_space<vmem>>, vector<1x28x448xf32>
    %33 = vector.shape_cast %32 : vector<1x28x448xf32> to vector<28x448xf32>
    %cst_36 = arith.constant dense<0.000000e+00> : vector<28x448xf32>
    %34 = tpu.matmul %31, %33, %cst_36 {dimension_numbers = #tpu.dot_dimension_numbers<[1], [0], [0], [1], [0, 0, 1, 1], [], []>} : vector<28x28xf32>, vector<28x448xf32>, vector<28x448xf32> -> vector<28x448xf32>
    %35 = arith.addf %28, %34 : vector<28x448xf32>
    %c0_37 = arith.constant 0 : index
    %c0_38 = arith.constant 0 : index
    %36 = vector.load %arg4[%c0_37, %c0_38] : memref<1x448xf32, #tpu.memory_space<vmem>>, vector<1x448xf32>
    %37 = vector.broadcast %36 : vector<1x448xf32> to vector<28x448xf32>
    %38 = arith.addf %35, %37 : vector<28x448xf32>
    %cst_39 = arith.constant 0.000000e+00 : f32
    %39 = vector.broadcast %cst_39 : f32 to vector<28x448xf32>
    %40 = arith.maximumf %38, %39 : vector<28x448xf32>
    %c0_40 = arith.constant 0 : index
    %c0_41 = arith.constant 0 : index
    %c0_42 = arith.constant 0 : index
    %41 = vector.load %arg5[%c0_40, %c0_41, %c0_42] : memref<2x14x28xf32, #tpu.memory_space<vmem>>, vector<1x14x28xf32>
    %42 = vector.shape_cast %41 : vector<1x14x28xf32> to vector<14x28xf32>
    %cst_43 = arith.constant dense<0.000000e+00> : vector<14x448xf32>
    %43 = tpu.matmul %42, %40, %cst_43 {dimension_numbers = #tpu.dot_dimension_numbers<[1], [0], [0], [1], [0, 0, 1, 1], [], []>} : vector<14x28xf32>, vector<28x448xf32>, vector<14x448xf32> -> vector<14x448xf32>
    %c1_44 = arith.constant 1 : index
    %c0_45 = arith.constant 0 : index
    %c0_46 = arith.constant 0 : index
    %44 = vector.load %arg5[%c1_44, %c0_45, %c0_46] : memref<2x14x28xf32, #tpu.memory_space<vmem>>, vector<1x14x28xf32>
    %45 = vector.shape_cast %44 : vector<1x14x28xf32> to vector<14x28xf32>
    %cst_47 = arith.constant dense<0.000000e+00> : vector<14x448xf32>
    %46 = tpu.matmul %45, %40, %cst_47 {dimension_numbers = #tpu.dot_dimension_numbers<[1], [0], [0], [1], [0, 0, 1, 1], [], []>} : vector<14x28xf32>, vector<28x448xf32>, vector<14x448xf32> -> vector<14x448xf32>
    %47 = arith.maximumf %43, %46 : vector<14x448xf32>
    %c0_48 = arith.constant 0 : index
    %c0_49 = arith.constant 0 : index
    %c0_50 = arith.constant 0 : index
    %48 = vector.load %arg6[%c0_48, %c0_49, %c0_50] : memref<2x448x224xf32, #tpu.memory_space<vmem>>, vector<1x448x224xf32>
    %49 = vector.shape_cast %48 : vector<1x448x224xf32> to vector<448x224xf32>
    %cst_51 = arith.constant dense<0.000000e+00> : vector<14x224xf32>
    %50 = tpu.matmul %47, %49, %cst_51 {dimension_numbers = #tpu.dot_dimension_numbers<[1], [0], [0], [1], [0, 0, 1, 1], [], []>} : vector<14x448xf32>, vector<448x224xf32>, vector<14x224xf32> -> vector<14x224xf32>
    %c1_52 = arith.constant 1 : index
    %c0_53 = arith.constant 0 : index
    %c0_54 = arith.constant 0 : index
    %51 = vector.load %arg6[%c1_52, %c0_53, %c0_54] : memref<2x448x224xf32, #tpu.memory_space<vmem>>, vector<1x448x224xf32>
    %52 = vector.shape_cast %51 : vector<1x448x224xf32> to vector<448x224xf32>
    %cst_55 = arith.constant dense<0.000000e+00> : vector<14x224xf32>
    %53 = tpu.matmul %47, %52, %cst_55 {dimension_numbers = #tpu.dot_dimension_numbers<[1], [0], [0], [1], [0, 0, 1, 1], [], []>} : vector<14x448xf32>, vector<448x224xf32>, vector<14x224xf32> -> vector<14x224xf32>
    %54 = arith.maximumf %50, %53 : vector<14x224xf32>
    %c0_56 = arith.constant 0 : index
    %c0_57 = arith.constant 0 : index
    %c0_58 = arith.constant 0 : index
    %55 = vector.load %arg7[%c0_56, %c0_57, %c0_58] : memref<5x14x14xf32, #tpu.memory_space<vmem>>, vector<1x14x14xf32>
    %56 = vector.shape_cast %55 : vector<1x14x14xf32> to vector<14x14xf32>
    %cst_59 = arith.constant dense<0.000000e+00> : vector<14x224xf32>
    %57 = tpu.matmul %56, %54, %cst_59 {dimension_numbers = #tpu.dot_dimension_numbers<[1], [0], [0], [1], [0, 0, 1, 1], [], []>} : vector<14x14xf32>, vector<14x224xf32>, vector<14x224xf32> -> vector<14x224xf32>
    %c0_60 = arith.constant 0 : index
    %c0_61 = arith.constant 0 : index
    %c0_62 = arith.constant 0 : index
    %58 = vector.load %arg8[%c0_60, %c0_61, %c0_62] : memref<5x224x448xf32, #tpu.memory_space<vmem>>, vector<1x224x448xf32>
    %59 = vector.shape_cast %58 : vector<1x224x448xf32> to vector<224x448xf32>
    %cst_63 = arith.constant dense<0.000000e+00> : vector<14x448xf32>
    %60 = tpu.matmul %57, %59, %cst_63 {dimension_numbers = #tpu.dot_dimension_numbers<[1], [0], [0], [1], [0, 0, 1, 1], [], []>} : vector<14x224xf32>, vector<224x448xf32>, vector<14x448xf32> -> vector<14x448xf32>
    %c1_64 = arith.constant 1 : index
    %c0_65 = arith.constant 0 : index
    %c0_66 = arith.constant 0 : index
    %61 = vector.load %arg7[%c1_64, %c0_65, %c0_66] : memref<5x14x14xf32, #tpu.memory_space<vmem>>, vector<1x14x14xf32>
    %62 = vector.shape_cast %61 : vector<1x14x14xf32> to vector<14x14xf32>
    %cst_67 = arith.constant dense<0.000000e+00> : vector<14x224xf32>
    %63 = tpu.matmul %62, %54, %cst_67 {dimension_numbers = #tpu.dot_dimension_numbers<[1], [0], [0], [1], [0, 0, 1, 1], [], []>} : vector<14x14xf32>, vector<14x224xf32>, vector<14x224xf32> -> vector<14x224xf32>
    %c1_68 = arith.constant 1 : index
    %c0_69 = arith.constant 0 : index
    %c0_70 = arith.constant 0 : index
    %64 = vector.load %arg8[%c1_68, %c0_69, %c0_70] : memref<5x224x448xf32, #tpu.memory_space<vmem>>, vector<1x224x448xf32>
    %65 = vector.shape_cast %64 : vector<1x224x448xf32> to vector<224x448xf32>
    %cst_71 = arith.constant dense<0.000000e+00> : vector<14x448xf32>
    %66 = tpu.matmul %63, %65, %cst_71 {dimension_numbers = #tpu.dot_dimension_numbers<[1], [0], [0], [1], [0, 0, 1, 1], [], []>} : vector<14x224xf32>, vector<224x448xf32>, vector<14x448xf32> -> vector<14x448xf32>
    %67 = arith.addf %60, %66 : vector<14x448xf32>
    %c2_72 = arith.constant 2 : index
    %c0_73 = arith.constant 0 : index
    %c0_74 = arith.constant 0 : index
    %68 = vector.load %arg7[%c2_72, %c0_73, %c0_74] : memref<5x14x14xf32, #tpu.memory_space<vmem>>, vector<1x14x14xf32>
    %69 = vector.shape_cast %68 : vector<1x14x14xf32> to vector<14x14xf32>
    %cst_75 = arith.constant dense<0.000000e+00> : vector<14x224xf32>
    %70 = tpu.matmul %69, %54, %cst_75 {dimension_numbers = #tpu.dot_dimension_numbers<[1], [0], [0], [1], [0, 0, 1, 1], [], []>} : vector<14x14xf32>, vector<14x224xf32>, vector<14x224xf32> -> vector<14x224xf32>
    %c2_76 = arith.constant 2 : index
    %c0_77 = arith.constant 0 : index
    %c0_78 = arith.constant 0 : index
    %71 = vector.load %arg8[%c2_76, %c0_77, %c0_78] : memref<5x224x448xf32, #tpu.memory_space<vmem>>, vector<1x224x448xf32>
    %72 = vector.shape_cast %71 : vector<1x224x448xf32> to vector<224x448xf32>
    %cst_79 = arith.constant dense<0.000000e+00> : vector<14x448xf32>
    %73 = tpu.matmul %70, %72, %cst_79 {dimension_numbers = #tpu.dot_dimension_numbers<[1], [0], [0], [1], [0, 0, 1, 1], [], []>} : vector<14x224xf32>, vector<224x448xf32>, vector<14x448xf32> -> vector<14x448xf32>
    %74 = arith.addf %67, %73 : vector<14x448xf32>
    %c3_80 = arith.constant 3 : index
    %c0_81 = arith.constant 0 : index
    %c0_82 = arith.constant 0 : index
    %75 = vector.load %arg7[%c3_80, %c0_81, %c0_82] : memref<5x14x14xf32, #tpu.memory_space<vmem>>, vector<1x14x14xf32>
    %76 = vector.shape_cast %75 : vector<1x14x14xf32> to vector<14x14xf32>
    %cst_83 = arith.constant dense<0.000000e+00> : vector<14x224xf32>
    %77 = tpu.matmul %76, %54, %cst_83 {dimension_numbers = #tpu.dot_dimension_numbers<[1], [0], [0], [1], [0, 0, 1, 1], [], []>} : vector<14x14xf32>, vector<14x224xf32>, vector<14x224xf32> -> vector<14x224xf32>
    %c3_84 = arith.constant 3 : index
    %c0_85 = arith.constant 0 : index
    %c0_86 = arith.constant 0 : index
    %78 = vector.load %arg8[%c3_84, %c0_85, %c0_86] : memref<5x224x448xf32, #tpu.memory_space<vmem>>, vector<1x224x448xf32>
    %79 = vector.shape_cast %78 : vector<1x224x448xf32> to vector<224x448xf32>
    %cst_87 = arith.constant dense<0.000000e+00> : vector<14x448xf32>
    %80 = tpu.matmul %77, %79, %cst_87 {dimension_numbers = #tpu.dot_dimension_numbers<[1], [0], [0], [1], [0, 0, 1, 1], [], []>} : vector<14x224xf32>, vector<224x448xf32>, vector<14x448xf32> -> vector<14x448xf32>
    %81 = arith.addf %74, %80 : vector<14x448xf32>
    %c4_88 = arith.constant 4 : index
    %c0_89 = arith.constant 0 : index
    %c0_90 = arith.constant 0 : index
    %82 = vector.load %arg7[%c4_88, %c0_89, %c0_90] : memref<5x14x14xf32, #tpu.memory_space<vmem>>, vector<1x14x14xf32>
    %83 = vector.shape_cast %82 : vector<1x14x14xf32> to vector<14x14xf32>
    %cst_91 = arith.constant dense<0.000000e+00> : vector<14x224xf32>
    %84 = tpu.matmul %83, %54, %cst_91 {dimension_numbers = #tpu.dot_dimension_numbers<[1], [0], [0], [1], [0, 0, 1, 1], [], []>} : vector<14x14xf32>, vector<14x224xf32>, vector<14x224xf32> -> vector<14x224xf32>
    %c4_92 = arith.constant 4 : index
    %c0_93 = arith.constant 0 : index
    %c0_94 = arith.constant 0 : index
    %85 = vector.load %arg8[%c4_92, %c0_93, %c0_94] : memref<5x224x448xf32, #tpu.memory_space<vmem>>, vector<1x224x448xf32>
    %86 = vector.shape_cast %85 : vector<1x224x448xf32> to vector<224x448xf32>
    %cst_95 = arith.constant dense<0.000000e+00> : vector<14x448xf32>
    %87 = tpu.matmul %84, %86, %cst_95 {dimension_numbers = #tpu.dot_dimension_numbers<[1], [0], [0], [1], [0, 0, 1, 1], [], []>} : vector<14x224xf32>, vector<224x448xf32>, vector<14x448xf32> -> vector<14x448xf32>
    %88 = arith.addf %81, %87 : vector<14x448xf32>
    %c0_96 = arith.constant 0 : index
    %c0_97 = arith.constant 0 : index
    %89 = vector.load %arg9[%c0_96, %c0_97] : memref<1x448xf32, #tpu.memory_space<vmem>>, vector<1x448xf32>
    %90 = vector.broadcast %89 : vector<1x448xf32> to vector<14x448xf32>
    %91 = arith.addf %88, %90 : vector<14x448xf32>
    %cst_98 = arith.constant 0.000000e+00 : f32
    %92 = vector.broadcast %cst_98 : f32 to vector<14x448xf32>
    %93 = arith.maximumf %91, %92 : vector<14x448xf32>
    %c0_99 = arith.constant 0 : index
    %c0_100 = arith.constant 0 : index
    %c0_101 = arith.constant 0 : index
    %94 = vector.load %arg10[%c0_99, %c0_100, %c0_101] : memref<2x7x14xf32, #tpu.memory_space<vmem>>, vector<1x7x14xf32>
    %95 = vector.shape_cast %94 : vector<1x7x14xf32> to vector<7x14xf32>
    %cst_102 = arith.constant dense<0.000000e+00> : vector<7x448xf32>
    %96 = tpu.matmul %95, %93, %cst_102 {dimension_numbers = #tpu.dot_dimension_numbers<[1], [0], [0], [1], [0, 0, 1, 1], [], []>} : vector<7x14xf32>, vector<14x448xf32>, vector<7x448xf32> -> vector<7x448xf32>
    %c1_103 = arith.constant 1 : index
    %c0_104 = arith.constant 0 : index
    %c0_105 = arith.constant 0 : index
    %97 = vector.load %arg10[%c1_103, %c0_104, %c0_105] : memref<2x7x14xf32, #tpu.memory_space<vmem>>, vector<1x7x14xf32>
    %98 = vector.shape_cast %97 : vector<1x7x14xf32> to vector<7x14xf32>
    %cst_106 = arith.constant dense<0.000000e+00> : vector<7x448xf32>
    %99 = tpu.matmul %98, %93, %cst_106 {dimension_numbers = #tpu.dot_dimension_numbers<[1], [0], [0], [1], [0, 0, 1, 1], [], []>} : vector<7x14xf32>, vector<14x448xf32>, vector<7x448xf32> -> vector<7x448xf32>
    %100 = arith.maximumf %96, %99 : vector<7x448xf32>
    %c0_107 = arith.constant 0 : index
    %c0_108 = arith.constant 0 : index
    %c0_109 = arith.constant 0 : index
    %101 = vector.load %arg11[%c0_107, %c0_108, %c0_109] : memref<2x448x224xf32, #tpu.memory_space<vmem>>, vector<1x448x224xf32>
    %102 = vector.shape_cast %101 : vector<1x448x224xf32> to vector<448x224xf32>
    %cst_110 = arith.constant dense<0.000000e+00> : vector<7x224xf32>
    %103 = tpu.matmul %100, %102, %cst_110 {dimension_numbers = #tpu.dot_dimension_numbers<[1], [0], [0], [1], [0, 0, 1, 1], [], []>} : vector<7x448xf32>, vector<448x224xf32>, vector<7x224xf32> -> vector<7x224xf32>
    %c1_111 = arith.constant 1 : index
    %c0_112 = arith.constant 0 : index
    %c0_113 = arith.constant 0 : index
    %104 = vector.load %arg11[%c1_111, %c0_112, %c0_113] : memref<2x448x224xf32, #tpu.memory_space<vmem>>, vector<1x448x224xf32>
    %105 = vector.shape_cast %104 : vector<1x448x224xf32> to vector<448x224xf32>
    %cst_114 = arith.constant dense<0.000000e+00> : vector<7x224xf32>
    %106 = tpu.matmul %100, %105, %cst_114 {dimension_numbers = #tpu.dot_dimension_numbers<[1], [0], [0], [1], [0, 0, 1, 1], [], []>} : vector<7x448xf32>, vector<448x224xf32>, vector<7x224xf32> -> vector<7x224xf32>
    %107 = arith.maximumf %103, %106 : vector<7x224xf32>
    %c0_115 = arith.constant 0 : index
    %c0_116 = arith.constant 0 : index
    %108 = vector.load %arg16[%c0_115, %c0_116] : memref<7x224xf32, #tpu.memory_space<vmem>>, vector<7x224xf32>
    tpu.vector_store %arg16[%c0_115, %c0_116], %107 {strides = array<i32>} : memref<7x224xf32, #tpu.memory_space<vmem>>, vector<7x224xf32>,
    %c0_117 = arith.constant 0 : index
    %c0_118 = arith.constant 0 : index
    %109 = vector.load %arg16[%c0_117, %c0_118] : memref<7x224xf32, #tpu.memory_space<vmem>>, vector<7x7xf32>
    %c0_119 = arith.constant 0 : index
    %c0_120 = arith.constant 0 : index
    %c0_121 = arith.constant 0 : index
    %c0_122 = arith.constant 0 : index
    %110 = vector.load %arg15[%c0_119, %c0_120, %c0_121, %c0_122] : memref<1x32x7x7xf32, #tpu.memory_space<vmem>>, vector<1x1x7x7xf32>
    %111 = vector.shape_cast %110 : vector<1x1x7x7xf32> to vector<7x7xf32>
    %112 = vector.shape_cast %109 : vector<7x7xf32> to vector<1x1x7x7xf32>
    tpu.vector_store %arg15[%c0_119, %c0_120, %c0_121, %c0_122], %112 {strides = array<i32>} : memref<1x32x7x7xf32, #tpu.memory_space<vmem>>, vector<1x1x7x7xf32>,
    %c0_123 = arith.constant 0 : index
    %c7 = arith.constant 7 : index
    %113 = vector.load %arg16[%c0_123, %c7] : memref<7x224xf32, #tpu.memory_space<vmem>>, vector<7x7xf32>
    %c0_124 = arith.constant 0 : index
    %c1_125 = arith.constant 1 : index
    %c0_126 = arith.constant 0 : index
    %c0_127 = arith.constant 0 : index
    %114 = vector.load %arg15[%c0_124, %c1_125, %c0_126, %c0_127] : memref<1x32x7x7xf32, #tpu.memory_space<vmem>>, vector<1x1x7x7xf32>
    %115 = vector.shape_cast %114 : vector<1x1x7x7xf32> to vector<7x7xf32>
    %116 = vector.shape_cast %113 : vector<7x7xf32> to vector<1x1x7x7xf32>
    tpu.vector_store %arg15[%c0_124, %c1_125, %c0_126, %c0_127], %116 {strides = array<i32>} : memref<1x32x7x7xf32, #tpu.memory_space<vmem>>, vector<1x1x7x7xf32>,
    %c0_128 = arith.constant 0 : index
    %c14 = arith.constant 14 : index
    %117 = vector.load %arg16[%c0_128, %c14] : memref<7x224xf32, #tpu.memory_space<vmem>>, vector<7x7xf32>
    %c0_129 = arith.constant 0 : index
    %c2_130 = arith.constant 2 : index
    %c0_131 = arith.constant 0 : index
    %c0_132 = arith.constant 0 : index
    %118 = vector.load %arg15[%c0_129, %c2_130, %c0_131, %c0_132] : memref<1x32x7x7xf32, #tpu.memory_space<vmem>>, vector<1x1x7x7xf32>
    %119 = vector.shape_cast %118 : vector<1x1x7x7xf32> to vector<7x7xf32>
    %120 = vector.shape_cast %117 : vector<7x7xf32> to vector<1x1x7x7xf32>
    tpu.vector_store %arg15[%c0_129, %c2_130, %c0_131, %c0_132], %120 {strides = array<i32>} : memref<1x32x7x7xf32, #tpu.memory_space<vmem>>, vector<1x1x7x7xf32>,
    %c0_133 = arith.constant 0 : index
    %c21 = arith.constant 21 : index
    %121 = vector.load %arg16[%c0_133, %c21] : memref<7x224xf32, #tpu.memory_space<vmem>>, vector<7x7xf32>
    %c0_134 = arith.constant 0 : index
    %c3_135 = arith.constant 3 : index
    %c0_136 = arith.constant 0 : index
    %c0_137 = arith.constant 0 : index
    %122 = vector.load %arg15[%c0_134, %c3_135, %c0_136, %c0_137] : memref<1x32x7x7xf32, #tpu.memory_space<vmem>>, vector<1x1x7x7xf32>
    %123 = vector.shape_cast %122 : vector<1x1x7x7xf32> to vector<7x7xf32>
    %124 = vector.shape_cast %121 : vector<7x7xf32> to vector<1x1x7x7xf32>
    tpu.vector_store %arg15[%c0_134, %c3_135, %c0_136, %c0_137], %124 {strides = array<i32>} : memref<1x32x7x7xf32, #tpu.memory_space<vmem>>, vector<1x1x7x7xf32>,
    %c0_138 = arith.constant 0 : index
    %c28 = arith.constant 28 : index
    %125 = vector.load %arg16[%c0_138, %c28] : memref<7x224xf32, #tpu.memory_space<vmem>>, vector<7x7xf32>
    %c0_139 = arith.constant 0 : index
    %c4_140 = arith.constant 4 : index
    %c0_141 = arith.constant 0 : index
    %c0_142 = arith.constant 0 : index
    %126 = vector.load %arg15[%c0_139, %c4_140, %c0_141, %c0_142] : memref<1x32x7x7xf32, #tpu.memory_space<vmem>>, vector<1x1x7x7xf32>
    %127 = vector.shape_cast %126 : vector<1x1x7x7xf32> to vector<7x7xf32>
    %128 = vector.shape_cast %125 : vector<7x7xf32> to vector<1x1x7x7xf32>
    tpu.vector_store %arg15[%c0_139, %c4_140, %c0_141, %c0_142], %128 {strides = array<i32>} : memref<1x32x7x7xf32, #tpu.memory_space<vmem>>, vector<1x1x7x7xf32>,
    %c0_143 = arith.constant 0 : index
    %c35 = arith.constant 35 : index
    %129 = vector.load %arg16[%c0_143, %c35] : memref<7x224xf32, #tpu.memory_space<vmem>>, vector<7x7xf32>
    %c0_144 = arith.constant 0 : index
    %c5 = arith.constant 5 : index
    %c0_145 = arith.constant 0 : index
    %c0_146 = arith.constant 0 : index
    %130 = vector.load %arg15[%c0_144, %c5, %c0_145, %c0_146] : memref<1x32x7x7xf32, #tpu.memory_space<vmem>>, vector<1x1x7x7xf32>
    %131 = vector.shape_cast %130 : vector<1x1x7x7xf32> to vector<7x7xf32>
    %132 = vector.shape_cast %129 : vector<7x7xf32> to vector<1x1x7x7xf32>
    tpu.vector_store %arg15[%c0_144, %c5, %c0_145, %c0_146], %132 {strides = array<i32>} : memref<1x32x7x7xf32, #tpu.memory_space<vmem>>, vector<1x1x7x7xf32>,
    %c0_147 = arith.constant 0 : index
    %c42 = arith.constant 42 : index
    %133 = vector.load %arg16[%c0_147, %c42] : memref<7x224xf32, #tpu.memory_space<vmem>>, vector<7x7xf32>
    %c0_148 = arith.constant 0 : index
    %c6 = arith.constant 6 : index
    %c0_149 = arith.constant 0 : index
    %c0_150 = arith.constant 0 : index
    %134 = vector.load %arg15[%c0_148, %c6, %c0_149, %c0_150] : memref<1x32x7x7xf32, #tpu.memory_space<vmem>>, vector<1x1x7x7xf32>
    %135 = vector.shape_cast %134 : vector<1x1x7x7xf32> to vector<7x7xf32>
    %136 = vector.shape_cast %133 : vector<7x7xf32> to vector<1x1x7x7xf32>
    tpu.vector_store %arg15[%c0_148, %c6, %c0_149, %c0_150], %136 {strides = array<i32>} : memref<1x32x7x7xf32, #tpu.memory_space<vmem>>, vector<1x1x7x7xf32>,
    %c0_151 = arith.constant 0 : index
    %c49 = arith.constant 49 : index
    %137 = vector.load %arg16[%c0_151, %c49] : memref<7x224xf32, #tpu.memory_space<vmem>>, vector<7x7xf32>
    %c0_152 = arith.constant 0 : index
    %c7_153 = arith.constant 7 : index
    %c0_154 = arith.constant 0 : index
    %c0_155 = arith.constant 0 : index
    %138 = vector.load %arg15[%c0_152, %c7_153, %c0_154, %c0_155] : memref<1x32x7x7xf32, #tpu.memory_space<vmem>>, vector<1x1x7x7xf32>
    %139 = vector.shape_cast %138 : vector<1x1x7x7xf32> to vector<7x7xf32>
    %140 = vector.shape_cast %137 : vector<7x7xf32> to vector<1x1x7x7xf32>
    tpu.vector_store %arg15[%c0_152, %c7_153, %c0_154, %c0_155], %140 {strides = array<i32>} : memref<1x32x7x7xf32, #tpu.memory_space<vmem>>, vector<1x1x7x7xf32>,
    %c0_156 = arith.constant 0 : index
    %c56 = arith.constant 56 : index
    %141 = vector.load %arg16[%c0_156, %c56] : memref<7x224xf32, #tpu.memory_space<vmem>>, vector<7x7xf32>
    %c0_157 = arith.constant 0 : index
    %c8 = arith.constant 8 : index
    %c0_158 = arith.constant 0 : index
    %c0_159 = arith.constant 0 : index
    %142 = vector.load %arg15[%c0_157, %c8, %c0_158, %c0_159] : memref<1x32x7x7xf32, #tpu.memory_space<vmem>>, vector<1x1x7x7xf32>
    %143 = vector.shape_cast %142 : vector<1x1x7x7xf32> to vector<7x7xf32>
    %144 = vector.shape_cast %141 : vector<7x7xf32> to vector<1x1x7x7xf32>
    tpu.vector_store %arg15[%c0_157, %c8, %c0_158, %c0_159], %144 {strides = array<i32>} : memref<1x32x7x7xf32, #tpu.memory_space<vmem>>, vector<1x1x7x7xf32>,
    %c0_160 = arith.constant 0 : index
    %c63 = arith.constant 63 : index
    %145 = vector.load %arg16[%c0_160, %c63] : memref<7x224xf32, #tpu.memory_space<vmem>>, vector<7x7xf32>
    %c0_161 = arith.constant 0 : index
    %c9 = arith.constant 9 : index
    %c0_162 = arith.constant 0 : index
    %c0_163 = arith.constant 0 : index
    %146 = vector.load %arg15[%c0_161, %c9, %c0_162, %c0_163] : memref<1x32x7x7xf32, #tpu.memory_space<vmem>>, vector<1x1x7x7xf32>
    %147 = vector.shape_cast %146 : vector<1x1x7x7xf32> to vector<7x7xf32>
    %148 = vector.shape_cast %145 : vector<7x7xf32> to vector<1x1x7x7xf32>
    tpu.vector_store %arg15[%c0_161, %c9, %c0_162, %c0_163], %148 {strides = array<i32>} : memref<1x32x7x7xf32, #tpu.memory_space<vmem>>, vector<1x1x7x7xf32>,
    %c0_164 = arith.constant 0 : index
    %c70 = arith.constant 70 : index
    %149 = vector.load %arg16[%c0_164, %c70] : memref<7x224xf32, #tpu.memory_space<vmem>>, vector<7x7xf32>
    %c0_165 = arith.constant 0 : index
    %c10 = arith.constant 10 : index
    %c0_166 = arith.constant 0 : index
    %c0_167 = arith.constant 0 : index
    %150 = vector.load %arg15[%c0_165, %c10, %c0_166, %c0_167] : memref<1x32x7x7xf32, #tpu.memory_space<vmem>>, vector<1x1x7x7xf32>
    %151 = vector.shape_cast %150 : vector<1x1x7x7xf32> to vector<7x7xf32>
    %152 = vector.shape_cast %149 : vector<7x7xf32> to vector<1x1x7x7xf32>
    tpu.vector_store %arg15[%c0_165, %c10, %c0_166, %c0_167], %152 {strides = array<i32>} : memref<1x32x7x7xf32, #tpu.memory_space<vmem>>, vector<1x1x7x7xf32>,
    %c0_168 = arith.constant 0 : index
    %c77 = arith.constant 77 : index
    %153 = vector.load %arg16[%c0_168, %c77] : memref<7x224xf32, #tpu.memory_space<vmem>>, vector<7x7xf32>
    %c0_169 = arith.constant 0 : index
    %c11 = arith.constant 11 : index
    %c0_170 = arith.constant 0 : index
    %c0_171 = arith.constant 0 : index
    %154 = vector.load %arg15[%c0_169, %c11, %c0_170, %c0_171] : memref<1x32x7x7xf32, #tpu.memory_space<vmem>>, vector<1x1x7x7xf32>
    %155 = vector.shape_cast %154 : vector<1x1x7x7xf32> to vector<7x7xf32>
    %156 = vector.shape_cast %153 : vector<7x7xf32> to vector<1x1x7x7xf32>
    tpu.vector_store %arg15[%c0_169, %c11, %c0_170, %c0_171], %156 {strides = array<i32>} : memref<1x32x7x7xf32, #tpu.memory_space<vmem>>, vector<1x1x7x7xf32>,
    %c0_172 = arith.constant 0 : index
    %c84 = arith.constant 84 : index
    %157 = vector.load %arg16[%c0_172, %c84] : memref<7x224xf32, #tpu.memory_space<vmem>>, vector<7x7xf32>
    %c0_173 = arith.constant 0 : index
    %c12 = arith.constant 12 : index
    %c0_174 = arith.constant 0 : index
    %c0_175 = arith.constant 0 : index
    %158 = vector.load %arg15[%c0_173, %c12, %c0_174, %c0_175] : memref<1x32x7x7xf32, #tpu.memory_space<vmem>>, vector<1x1x7x7xf32>
    %159 = vector.shape_cast %158 : vector<1x1x7x7xf32> to vector<7x7xf32>
    %160 = vector.shape_cast %157 : vector<7x7xf32> to vector<1x1x7x7xf32>
    tpu.vector_store %arg15[%c0_173, %c12, %c0_174, %c0_175], %160 {strides = array<i32>} : memref<1x32x7x7xf32, #tpu.memory_space<vmem>>, vector<1x1x7x7xf32>,
    %c0_176 = arith.constant 0 : index
    %c91 = arith.constant 91 : index
    %161 = vector.load %arg16[%c0_176, %c91] : memref<7x224xf32, #tpu.memory_space<vmem>>, vector<7x7xf32>
    %c0_177 = arith.constant 0 : index
    %c13 = arith.constant 13 : index
    %c0_178 = arith.constant 0 : index
    %c0_179 = arith.constant 0 : index
    %162 = vector.load %arg15[%c0_177, %c13, %c0_178, %c0_179] : memref<1x32x7x7xf32, #tpu.memory_space<vmem>>, vector<1x1x7x7xf32>
    %163 = vector.shape_cast %162 : vector<1x1x7x7xf32> to vector<7x7xf32>
    %164 = vector.shape_cast %161 : vector<7x7xf32> to vector<1x1x7x7xf32>
    tpu.vector_store %arg15[%c0_177, %c13, %c0_178, %c0_179], %164 {strides = array<i32>} : memref<1x32x7x7xf32, #tpu.memory_space<vmem>>, vector<1x1x7x7xf32>,
    %c0_180 = arith.constant 0 : index
    %c98 = arith.constant 98 : index
    %165 = vector.load %arg16[%c0_180, %c98] : memref<7x224xf32, #tpu.memory_space<vmem>>, vector<7x7xf32>
    %c0_181 = arith.constant 0 : index
    %c14_182 = arith.constant 14 : index
    %c0_183 = arith.constant 0 : index
    %c0_184 = arith.constant 0 : index
    %166 = vector.load %arg15[%c0_181, %c14_182, %c0_183, %c0_184] : memref<1x32x7x7xf32, #tpu.memory_space<vmem>>, vector<1x1x7x7xf32>
    %167 = vector.shape_cast %166 : vector<1x1x7x7xf32> to vector<7x7xf32>
    %168 = vector.shape_cast %165 : vector<7x7xf32> to vector<1x1x7x7xf32>
    tpu.vector_store %arg15[%c0_181, %c14_182, %c0_183, %c0_184], %168 {strides = array<i32>} : memref<1x32x7x7xf32, #tpu.memory_space<vmem>>, vector<1x1x7x7xf32>,
    %c0_185 = arith.constant 0 : index
    %c105 = arith.constant 105 : index
    %169 = vector.load %arg16[%c0_185, %c105] : memref<7x224xf32, #tpu.memory_space<vmem>>, vector<7x7xf32>
    %c0_186 = arith.constant 0 : index
    %c15 = arith.constant 15 : index
    %c0_187 = arith.constant 0 : index
    %c0_188 = arith.constant 0 : index
    %170 = vector.load %arg15[%c0_186, %c15, %c0_187, %c0_188] : memref<1x32x7x7xf32, #tpu.memory_space<vmem>>, vector<1x1x7x7xf32>
    %171 = vector.shape_cast %170 : vector<1x1x7x7xf32> to vector<7x7xf32>
    %172 = vector.shape_cast %169 : vector<7x7xf32> to vector<1x1x7x7xf32>
    tpu.vector_store %arg15[%c0_186, %c15, %c0_187, %c0_188], %172 {strides = array<i32>} : memref<1x32x7x7xf32, #tpu.memory_space<vmem>>, vector<1x1x7x7xf32>,
    %c0_189 = arith.constant 0 : index
    %c112 = arith.constant 112 : index
    %173 = vector.load %arg16[%c0_189, %c112] : memref<7x224xf32, #tpu.memory_space<vmem>>, vector<7x7xf32>
    %c0_190 = arith.constant 0 : index
    %c16 = arith.constant 16 : index
    %c0_191 = arith.constant 0 : index
    %c0_192 = arith.constant 0 : index
    %174 = vector.load %arg15[%c0_190, %c16, %c0_191, %c0_192] : memref<1x32x7x7xf32, #tpu.memory_space<vmem>>, vector<1x1x7x7xf32>
    %175 = vector.shape_cast %174 : vector<1x1x7x7xf32> to vector<7x7xf32>
    %176 = vector.shape_cast %173 : vector<7x7xf32> to vector<1x1x7x7xf32>
    tpu.vector_store %arg15[%c0_190, %c16, %c0_191, %c0_192], %176 {strides = array<i32>} : memref<1x32x7x7xf32, #tpu.memory_space<vmem>>, vector<1x1x7x7xf32>,
    %c0_193 = arith.constant 0 : index
    %c119 = arith.constant 119 : index
    %177 = vector.load %arg16[%c0_193, %c119] : memref<7x224xf32, #tpu.memory_space<vmem>>, vector<7x7xf32>
    %c0_194 = arith.constant 0 : index
    %c17 = arith.constant 17 : index
    %c0_195 = arith.constant 0 : index
    %c0_196 = arith.constant 0 : index
    %178 = vector.load %arg15[%c0_194, %c17, %c0_195, %c0_196] : memref<1x32x7x7xf32, #tpu.memory_space<vmem>>, vector<1x1x7x7xf32>
    %179 = vector.shape_cast %178 : vector<1x1x7x7xf32> to vector<7x7xf32>
    %180 = vector.shape_cast %177 : vector<7x7xf32> to vector<1x1x7x7xf32>
    tpu.vector_store %arg15[%c0_194, %c17, %c0_195, %c0_196], %180 {strides = array<i32>} : memref<1x32x7x7xf32, #tpu.memory_space<vmem>>, vector<1x1x7x7xf32>,
    %c0_197 = arith.constant 0 : index
    %c126 = arith.constant 126 : index
    %181 = vector.load %arg16[%c0_197, %c126] : memref<7x224xf32, #tpu.memory_space<vmem>>, vector<7x7xf32>
    %c0_198 = arith.constant 0 : index
    %c18 = arith.constant 18 : index
    %c0_199 = arith.constant 0 : index
    %c0_200 = arith.constant 0 : index
    %182 = vector.load %arg15[%c0_198, %c18, %c0_199, %c0_200] : memref<1x32x7x7xf32, #tpu.memory_space<vmem>>, vector<1x1x7x7xf32>
    %183 = vector.shape_cast %182 : vector<1x1x7x7xf32> to vector<7x7xf32>
    %184 = vector.shape_cast %181 : vector<7x7xf32> to vector<1x1x7x7xf32>
    tpu.vector_store %arg15[%c0_198, %c18, %c0_199, %c0_200], %184 {strides = array<i32>} : memref<1x32x7x7xf32, #tpu.memory_space<vmem>>, vector<1x1x7x7xf32>,
    %c0_201 = arith.constant 0 : index
    %c133 = arith.constant 133 : index
    %185 = vector.load %arg16[%c0_201, %c133] : memref<7x224xf32, #tpu.memory_space<vmem>>, vector<7x7xf32>
    %c0_202 = arith.constant 0 : index
    %c19 = arith.constant 19 : index
    %c0_203 = arith.constant 0 : index
    %c0_204 = arith.constant 0 : index
    %186 = vector.load %arg15[%c0_202, %c19, %c0_203, %c0_204] : memref<1x32x7x7xf32, #tpu.memory_space<vmem>>, vector<1x1x7x7xf32>
    %187 = vector.shape_cast %186 : vector<1x1x7x7xf32> to vector<7x7xf32>
    %188 = vector.shape_cast %185 : vector<7x7xf32> to vector<1x1x7x7xf32>
    tpu.vector_store %arg15[%c0_202, %c19, %c0_203, %c0_204], %188 {strides = array<i32>} : memref<1x32x7x7xf32, #tpu.memory_space<vmem>>, vector<1x1x7x7xf32>,
    %c0_205 = arith.constant 0 : index
    %c140 = arith.constant 140 : index
    %189 = vector.load %arg16[%c0_205, %c140] : memref<7x224xf32, #tpu.memory_space<vmem>>, vector<7x7xf32>
    %c0_206 = arith.constant 0 : index
    %c20 = arith.constant 20 : index
    %c0_207 = arith.constant 0 : index
    %c0_208 = arith.constant 0 : index
    %190 = vector.load %arg15[%c0_206, %c20, %c0_207, %c0_208] : memref<1x32x7x7xf32, #tpu.memory_space<vmem>>, vector<1x1x7x7xf32>
    %191 = vector.shape_cast %190 : vector<1x1x7x7xf32> to vector<7x7xf32>
    %192 = vector.shape_cast %189 : vector<7x7xf32> to vector<1x1x7x7xf32>
    tpu.vector_store %arg15[%c0_206, %c20, %c0_207, %c0_208], %192 {strides = array<i32>} : memref<1x32x7x7xf32, #tpu.memory_space<vmem>>, vector<1x1x7x7xf32>,
    %c0_209 = arith.constant 0 : index
    %c147 = arith.constant 147 : index
    %193 = vector.load %arg16[%c0_209, %c147] : memref<7x224xf32, #tpu.memory_space<vmem>>, vector<7x7xf32>
    %c0_210 = arith.constant 0 : index
    %c21_211 = arith.constant 21 : index
    %c0_212 = arith.constant 0 : index
    %c0_213 = arith.constant 0 : index
    %194 = vector.load %arg15[%c0_210, %c21_211, %c0_212, %c0_213] : memref<1x32x7x7xf32, #tpu.memory_space<vmem>>, vector<1x1x7x7xf32>
    %195 = vector.shape_cast %194 : vector<1x1x7x7xf32> to vector<7x7xf32>
    %196 = vector.shape_cast %193 : vector<7x7xf32> to vector<1x1x7x7xf32>
    tpu.vector_store %arg15[%c0_210, %c21_211, %c0_212, %c0_213], %196 {strides = array<i32>} : memref<1x32x7x7xf32, #tpu.memory_space<vmem>>, vector<1x1x7x7xf32>,
    %c0_214 = arith.constant 0 : index
    %c154 = arith.constant 154 : index
    %197 = vector.load %arg16[%c0_214, %c154] : memref<7x224xf32, #tpu.memory_space<vmem>>, vector<7x7xf32>
    %c0_215 = arith.constant 0 : index
    %c22 = arith.constant 22 : index
    %c0_216 = arith.constant 0 : index
    %c0_217 = arith.constant 0 : index
    %198 = vector.load %arg15[%c0_215, %c22, %c0_216, %c0_217] : memref<1x32x7x7xf32, #tpu.memory_space<vmem>>, vector<1x1x7x7xf32>
    %199 = vector.shape_cast %198 : vector<1x1x7x7xf32> to vector<7x7xf32>
    %200 = vector.shape_cast %197 : vector<7x7xf32> to vector<1x1x7x7xf32>
    tpu.vector_store %arg15[%c0_215, %c22, %c0_216, %c0_217], %200 {strides = array<i32>} : memref<1x32x7x7xf32, #tpu.memory_space<vmem>>, vector<1x1x7x7xf32>,
    %c0_218 = arith.constant 0 : index
    %c161 = arith.constant 161 : index
    %201 = vector.load %arg16[%c0_218, %c161] : memref<7x224xf32, #tpu.memory_space<vmem>>, vector<7x7xf32>
    %c0_219 = arith.constant 0 : index
    %c23 = arith.constant 23 : index
    %c0_220 = arith.constant 0 : index
    %c0_221 = arith.constant 0 : index
    %202 = vector.load %arg15[%c0_219, %c23, %c0_220, %c0_221] : memref<1x32x7x7xf32, #tpu.memory_space<vmem>>, vector<1x1x7x7xf32>
    %203 = vector.shape_cast %202 : vector<1x1x7x7xf32> to vector<7x7xf32>
    %204 = vector.shape_cast %201 : vector<7x7xf32> to vector<1x1x7x7xf32>
    tpu.vector_store %arg15[%c0_219, %c23, %c0_220, %c0_221], %204 {strides = array<i32>} : memref<1x32x7x7xf32, #tpu.memory_space<vmem>>, vector<1x1x7x7xf32>,
    %c0_222 = arith.constant 0 : index
    %c168 = arith.constant 168 : index
    %205 = vector.load %arg16[%c0_222, %c168] : memref<7x224xf32, #tpu.memory_space<vmem>>, vector<7x7xf32>
    %c0_223 = arith.constant 0 : index
    %c24 = arith.constant 24 : index
    %c0_224 = arith.constant 0 : index
    %c0_225 = arith.constant 0 : index
    %206 = vector.load %arg15[%c0_223, %c24, %c0_224, %c0_225] : memref<1x32x7x7xf32, #tpu.memory_space<vmem>>, vector<1x1x7x7xf32>
    %207 = vector.shape_cast %206 : vector<1x1x7x7xf32> to vector<7x7xf32>
    %208 = vector.shape_cast %205 : vector<7x7xf32> to vector<1x1x7x7xf32>
    tpu.vector_store %arg15[%c0_223, %c24, %c0_224, %c0_225], %208 {strides = array<i32>} : memref<1x32x7x7xf32, #tpu.memory_space<vmem>>, vector<1x1x7x7xf32>,
    %c0_226 = arith.constant 0 : index
    %c175 = arith.constant 175 : index
    %209 = vector.load %arg16[%c0_226, %c175] : memref<7x224xf32, #tpu.memory_space<vmem>>, vector<7x7xf32>
    %c0_227 = arith.constant 0 : index
    %c25 = arith.constant 25 : index
    %c0_228 = arith.constant 0 : index
    %c0_229 = arith.constant 0 : index
    %210 = vector.load %arg15[%c0_227, %c25, %c0_228, %c0_229] : memref<1x32x7x7xf32, #tpu.memory_space<vmem>>, vector<1x1x7x7xf32>
    %211 = vector.shape_cast %210 : vector<1x1x7x7xf32> to vector<7x7xf32>
    %212 = vector.shape_cast %209 : vector<7x7xf32> to vector<1x1x7x7xf32>
    tpu.vector_store %arg15[%c0_227, %c25, %c0_228, %c0_229], %212 {strides = array<i32>} : memref<1x32x7x7xf32, #tpu.memory_space<vmem>>, vector<1x1x7x7xf32>,
    %c0_230 = arith.constant 0 : index
    %c182 = arith.constant 182 : index
    %213 = vector.load %arg16[%c0_230, %c182] : memref<7x224xf32, #tpu.memory_space<vmem>>, vector<7x7xf32>
    %c0_231 = arith.constant 0 : index
    %c26 = arith.constant 26 : index
    %c0_232 = arith.constant 0 : index
    %c0_233 = arith.constant 0 : index
    %214 = vector.load %arg15[%c0_231, %c26, %c0_232, %c0_233] : memref<1x32x7x7xf32, #tpu.memory_space<vmem>>, vector<1x1x7x7xf32>
    %215 = vector.shape_cast %214 : vector<1x1x7x7xf32> to vector<7x7xf32>
    %216 = vector.shape_cast %213 : vector<7x7xf32> to vector<1x1x7x7xf32>
    tpu.vector_store %arg15[%c0_231, %c26, %c0_232, %c0_233], %216 {strides = array<i32>} : memref<1x32x7x7xf32, #tpu.memory_space<vmem>>, vector<1x1x7x7xf32>,
    %c0_234 = arith.constant 0 : index
    %c189 = arith.constant 189 : index
    %217 = vector.load %arg16[%c0_234, %c189] : memref<7x224xf32, #tpu.memory_space<vmem>>, vector<7x7xf32>
    %c0_235 = arith.constant 0 : index
    %c27 = arith.constant 27 : index
    %c0_236 = arith.constant 0 : index
    %c0_237 = arith.constant 0 : index
    %218 = vector.load %arg15[%c0_235, %c27, %c0_236, %c0_237] : memref<1x32x7x7xf32, #tpu.memory_space<vmem>>, vector<1x1x7x7xf32>
    %219 = vector.shape_cast %218 : vector<1x1x7x7xf32> to vector<7x7xf32>
    %220 = vector.shape_cast %217 : vector<7x7xf32> to vector<1x1x7x7xf32>
    tpu.vector_store %arg15[%c0_235, %c27, %c0_236, %c0_237], %220 {strides = array<i32>} : memref<1x32x7x7xf32, #tpu.memory_space<vmem>>, vector<1x1x7x7xf32>,
    %c0_238 = arith.constant 0 : index
    %c196 = arith.constant 196 : index
    %221 = vector.load %arg16[%c0_238, %c196] : memref<7x224xf32, #tpu.memory_space<vmem>>, vector<7x7xf32>
    %c0_239 = arith.constant 0 : index
    %c28_240 = arith.constant 28 : index
    %c0_241 = arith.constant 0 : index
    %c0_242 = arith.constant 0 : index
    %222 = vector.load %arg15[%c0_239, %c28_240, %c0_241, %c0_242] : memref<1x32x7x7xf32, #tpu.memory_space<vmem>>, vector<1x1x7x7xf32>
    %223 = vector.shape_cast %222 : vector<1x1x7x7xf32> to vector<7x7xf32>
    %224 = vector.shape_cast %221 : vector<7x7xf32> to vector<1x1x7x7xf32>
    tpu.vector_store %arg15[%c0_239, %c28_240, %c0_241, %c0_242], %224 {strides = array<i32>} : memref<1x32x7x7xf32, #tpu.memory_space<vmem>>, vector<1x1x7x7xf32>,
    %c0_243 = arith.constant 0 : index
    %c203 = arith.constant 203 : index
    %225 = vector.load %arg16[%c0_243, %c203] : memref<7x224xf32, #tpu.memory_space<vmem>>, vector<7x7xf32>
    %c0_244 = arith.constant 0 : index
    %c29 = arith.constant 29 : index
    %c0_245 = arith.constant 0 : index
    %c0_246 = arith.constant 0 : index
    %226 = vector.load %arg15[%c0_244, %c29, %c0_245, %c0_246] : memref<1x32x7x7xf32, #tpu.memory_space<vmem>>, vector<1x1x7x7xf32>
    %227 = vector.shape_cast %226 : vector<1x1x7x7xf32> to vector<7x7xf32>
    %228 = vector.shape_cast %225 : vector<7x7xf32> to vector<1x1x7x7xf32>
    tpu.vector_store %arg15[%c0_244, %c29, %c0_245, %c0_246], %228 {strides = array<i32>} : memref<1x32x7x7xf32, #tpu.memory_space<vmem>>, vector<1x1x7x7xf32>,
    %c0_247 = arith.constant 0 : index
    %c210 = arith.constant 210 : index
    %229 = vector.load %arg16[%c0_247, %c210] : memref<7x224xf32, #tpu.memory_space<vmem>>, vector<7x7xf32>
    %c0_248 = arith.constant 0 : index
    %c30 = arith.constant 30 : index
    %c0_249 = arith.constant 0 : index
    %c0_250 = arith.constant 0 : index
    %230 = vector.load %arg15[%c0_248, %c30, %c0_249, %c0_250] : memref<1x32x7x7xf32, #tpu.memory_space<vmem>>, vector<1x1x7x7xf32>
    %231 = vector.shape_cast %230 : vector<1x1x7x7xf32> to vector<7x7xf32>
    %232 = vector.shape_cast %229 : vector<7x7xf32> to vector<1x1x7x7xf32>
    tpu.vector_store %arg15[%c0_248, %c30, %c0_249, %c0_250], %232 {strides = array<i32>} : memref<1x32x7x7xf32, #tpu.memory_space<vmem>>, vector<1x1x7x7xf32>,
    %c0_251 = arith.constant 0 : index
    %c217 = arith.constant 217 : index
    %233 = vector.load %arg16[%c0_251, %c217] : memref<7x224xf32, #tpu.memory_space<vmem>>, vector<7x7xf32>
    %c0_252 = arith.constant 0 : index
    %c31 = arith.constant 31 : index
    %c0_253 = arith.constant 0 : index
    %c0_254 = arith.constant 0 : index
    %234 = vector.load %arg15[%c0_252, %c31, %c0_253, %c0_254] : memref<1x32x7x7xf32, #tpu.memory_space<vmem>>, vector<1x1x7x7xf32>
    %235 = vector.shape_cast %234 : vector<1x1x7x7xf32> to vector<7x7xf32>
    %236 = vector.shape_cast %233 : vector<7x7xf32> to vector<1x1x7x7xf32>
    tpu.vector_store %arg15[%c0_252, %c31, %c0_253, %c0_254], %236 {strides = array<i32>} : memref<1x32x7x7xf32, #tpu.memory_space<vmem>>, vector<1x1x7x7xf32>,
    %c0_255 = arith.constant 0 : index
    %c0_256 = arith.constant 0 : index
    %237 = vector.load %arg12[%c0_255, %c0_256] : memref<224x70xf32, #tpu.memory_space<vmem>>, vector<224x70xf32>
    %cst_257 = arith.constant dense<0.000000e+00> : vector<7x70xf32>
    %238 = tpu.matmul %107, %237, %cst_257 {dimension_numbers = #tpu.dot_dimension_numbers<[1], [0], [0], [1], [0, 0, 1, 1], [], []>} : vector<7x224xf32>, vector<224x70xf32>, vector<7x70xf32> -> vector<7x70xf32>
    %c0_258 = arith.constant 0 : index
    %c0_259 = arith.constant 0 : index
    %239 = vector.load %arg13[%c0_258, %c0_259] : memref<1x10xf32, #tpu.memory_space<vmem>>, vector<1x10xf32>
    %240 = vector.extract_strided_slice %238 {offsets = [0, 0], sizes = [1, 10], strides = [1, 1]} : vector<7x70xf32> to vector<1x10xf32>
    %241 = arith.addf %239, %240 : vector<1x10xf32>
    %242 = vector.extract_strided_slice %238 {offsets = [1, 10], sizes = [1, 10], strides = [1, 1]} : vector<7x70xf32> to vector<1x10xf32>
    %243 = arith.addf %241, %242 : vector<1x10xf32>
    %244 = vector.extract_strided_slice %238 {offsets = [2, 20], sizes = [1, 10], strides = [1, 1]} : vector<7x70xf32> to vector<1x10xf32>
    %245 = arith.addf %243, %244 : vector<1x10xf32>
    %246 = vector.extract_strided_slice %238 {offsets = [3, 30], sizes = [1, 10], strides = [1, 1]} : vector<7x70xf32> to vector<1x10xf32>
    %247 = arith.addf %245, %246 : vector<1x10xf32>
    %248 = vector.extract_strided_slice %238 {offsets = [4, 40], sizes = [1, 10], strides = [1, 1]} : vector<7x70xf32> to vector<1x10xf32>
    %249 = arith.addf %247, %248 : vector<1x10xf32>
    %250 = vector.extract_strided_slice %238 {offsets = [5, 50], sizes = [1, 10], strides = [1, 1]} : vector<7x70xf32> to vector<1x10xf32>
    %251 = arith.addf %249, %250 : vector<1x10xf32>
    %252 = vector.extract_strided_slice %238 {offsets = [6, 60], sizes = [1, 10], strides = [1, 1]} : vector<7x70xf32> to vector<1x10xf32>
    %253 = arith.addf %251, %252 : vector<1x10xf32>
    %c0_260 = arith.constant 0 : index
    %c0_261 = arith.constant 0 : index
    %c0_262 = arith.constant 0 : index
    %254 = vector.load %arg14[%c0_260, %c0_261, %c0_262] : memref<1x1x10xf32, #tpu.memory_space<vmem>>, vector<1x1x10xf32>
    %255 = vector.shape_cast %254 : vector<1x1x10xf32> to vector<1x10xf32>
    %256 = vector.shape_cast %253 : vector<1x10xf32> to vector<1x1x10xf32>
    tpu.vector_store %arg14[%c0_260, %c0_261, %c0_262], %256 {strides = array<i32>} : memref<1x1x10xf32, #tpu.memory_space<vmem>>, vector<1x1x10xf32>,
    return
  }
  func.func @transform_0(%arg0: i32) -> (i32, i32, i32) {
    %c0_i32 = arith.constant 0 : i32
    %c0_i32_0 = arith.constant 0 : i32
    %c0_i32_1 = arith.constant 0 : i32
    return %arg0, %c0_i32, %c0_i32_0 : i32, i32, i32
  }
  func.func @transform_1(%arg0: i32) -> (i32, i32, i32) {
    %c0_i32 = arith.constant 0 : i32
    %c0_i32_0 = arith.constant 0 : i32
    %c0_i32_1 = arith.constant 0 : i32
    %c0_i32_2 = arith.constant 0 : i32
    return %c0_i32, %c0_i32_0, %c0_i32_1 : i32, i32, i32
  }
  func.func @transform_2(%arg0: i32) -> (i32, i32, i32) {
    %c0_i32 = arith.constant 0 : i32
    %c0_i32_0 = arith.constant 0 : i32
    %c0_i32_1 = arith.constant 0 : i32
    %c0_i32_2 = arith.constant 0 : i32
    return %c0_i32, %c0_i32_0, %c0_i32_1 : i32, i32, i32
  }
  func.func @transform_3(%arg0: i32) -> (i32, i32) {
    %c0_i32 = arith.constant 0 : i32
    %c0_i32_0 = arith.constant 0 : i32
    %c0_i32_1 = arith.constant 0 : i32
    return %c0_i32, %c0_i32_0 : i32, i32
  }
  func.func @transform_4(%arg0: i32) -> (i32, i32, i32) {
    %c0_i32 = arith.constant 0 : i32
    %c0_i32_0 = arith.constant 0 : i32
    %c0_i32_1 = arith.constant 0 : i32
    %c0_i32_2 = arith.constant 0 : i32
    return %c0_i32, %c0_i32_0, %c0_i32_1 : i32, i32, i32
  }
  func.func @transform_5(%arg0: i32) -> (i32, i32, i32) {
    %c0_i32 = arith.constant 0 : i32
    %c0_i32_0 = arith.constant 0 : i32
    %c0_i32_1 = arith.constant 0 : i32
    %c0_i32_2 = arith.constant 0 : i32
    return %c0_i32, %c0_i32_0, %c0_i32_1 : i32, i32, i32
  }
  func.func @transform_6(%arg0: i32) -> (i32, i32, i32) {
    %c0_i32 = arith.constant 0 : i32
    %c0_i32_0 = arith.constant 0 : i32
    %c0_i32_1 = arith.constant 0 : i32
    %c0_i32_2 = arith.constant 0 : i32
    return %c0_i32, %c0_i32_0, %c0_i32_1 : i32, i32, i32
  }
  func.func @transform_7(%arg0: i32) -> (i32, i32, i32) {
    %c0_i32 = arith.constant 0 : i32
    %c0_i32_0 = arith.constant 0 : i32
    %c0_i32_1 = arith.constant 0 : i32
    %c0_i32_2 = arith.constant 0 : i32
    return %c0_i32, %c0_i32_0, %c0_i32_1 : i32, i32, i32
  }
  func.func @transform_8(%arg0: i32) -> (i32, i32) {
    %c0_i32 = arith.constant 0 : i32
    %c0_i32_0 = arith.constant 0 : i32
    %c0_i32_1 = arith.constant 0 : i32
    return %c0_i32, %c0_i32_0 : i32, i32
  }
  func.func @transform_9(%arg0: i32) -> (i32, i32, i32) {
    %c0_i32 = arith.constant 0 : i32
    %c0_i32_0 = arith.constant 0 : i32
    %c0_i32_1 = arith.constant 0 : i32
    %c0_i32_2 = arith.constant 0 : i32
    return %c0_i32, %c0_i32_0, %c0_i32_1 : i32, i32, i32
  }
  func.func @transform_10(%arg0: i32) -> (i32, i32, i32) {
    %c0_i32 = arith.constant 0 : i32
    %c0_i32_0 = arith.constant 0 : i32
    %c0_i32_1 = arith.constant 0 : i32
    %c0_i32_2 = arith.constant 0 : i32
    return %c0_i32, %c0_i32_0, %c0_i32_1 : i32, i32, i32
  }
  func.func @transform_11(%arg0: i32) -> (i32, i32) {
    %c0_i32 = arith.constant 0 : i32
    %c0_i32_0 = arith.constant 0 : i32
    %c0_i32_1 = arith.constant 0 : i32
    return %c0_i32, %c0_i32_0 : i32, i32
  }
  func.func @transform_12(%arg0: i32) -> (i32, i32) {
    %c0_i32 = arith.constant 0 : i32
    %c0_i32_0 = arith.constant 0 : i32
    %c0_i32_1 = arith.constant 0 : i32
    return %c0_i32, %c0_i32_0 : i32, i32
  }
  func.func @transform_13(%arg0: i32) -> (i32, i32, i32) {
    %c0_i32 = arith.constant 0 : i32
    %c0_i32_0 = arith.constant 0 : i32
    %c0_i32_1 = arith.constant 0 : i32
    return %arg0, %c0_i32, %c0_i32_0 : i32, i32, i32
  }
  func.func @transform_14(%arg0: i32) -> (i32, i32, i32, i32) {
    %c0_i32 = arith.constant 0 : i32
    %c0_i32_0 = arith.constant 0 : i32
    %c0_i32_1 = arith.constant 0 : i32
    %c0_i32_2 = arith.constant 0 : i32
    return %arg0, %c0_i32, %c0_i32_0, %c0_i32_1 : i32, i32, i32, i32
  }
}

</mosaic_0001>

<bundles_post_ra>
// kernel: cnn_forward.1
= control target key start
LH: loop header
LB: loop body
LE: loop exit
PB: predicated region body
PF: predicated region fallthrough
CT: control target
= control target key end

     0   :  { %s9827_s0 = inlined_call_operand.vmem [shape: f32[2,28,28], index: 0, kind: input, shape index: {}]   ;;  %s9828_s1 = inlined_call_operand.hbm [shape: f32[5,28,28], index: 1, kind: input, shape index: {}]   ;;  %s9829_s2 = inlined_call_operand.hbm [shape: f32[5,28,448], index: 2, kind: input, shape index: {}]   ;;  %s9830_s3 = inlined_call_operand.hbm [shape: f32[1,448], index: 3, kind: input, shape index: {}]   ;;  %s9831_s4 = inlined_call_operand.vmem [shape: f32[2,14,28], index: 4, kind: input, shape index: {}]   ;;  %s9832_s5 = inlined_call_operand.hbm [shape: f32[2,448,224], index: 5, kind: input, shape index: {}]   ;;  %s9833_s6 = inlined_call_operand.hbm [shape: f32[5,14,14], index: 6, kind: input, shape index: {}]   ;;  %s9834_s7 = inlined_call_operand.hbm [shape: f32[5,224,448], index: 7, kind: input, shape index: {}]   ;;  %s9835_s8 = inlined_call_operand.hbm [shape: f32[1,448], index: 8, kind: input, shape index: {}]   ;;  %s9836_s9 = inlined_call_operand.vmem [shape: f32[2,7,14], index: 9, kind: input, shape index: {}]   ;;  %s9837_s10 = inlined_call_operand.hbm [shape: f32[2,448,224], index: 10, kind: input, shape index: {}]   ;;  %s9838_s11 = inlined_call_operand.vmem [shape: f32[224,70], index: 11, kind: input, shape index: {}]   ;;  %s9839_s12 = inlined_call_operand.hbm [shape: f32[1,10], index: 12, kind: input, shape index: {}]   ;;  %s9840_s13 = inlined_call_operand.hbm [shape: f32[2,1,10], index: 13, kind: output, shape index: {0}]   ;;  %s9841_s14 = inlined_call_operand.vmem [shape: f32[2,32,7,7], index: 14, kind: output, shape index: {1}]  }
   0x1   :  { %9858 = sst [smem:[#allocation33_spill]] %s9829_s2 }
   0x2   :  { %9859 = sst [smem:[#allocation34_spill]] %s9832_s5 }
   0x3   :  { %9860 = sst [smem:[#allocation35_spill]] %s9834_s7 }
   0x4   :  { %9861 = sst [smem:[#allocation36_spill]] %s9840_s13 }
   0x5   :  { %20 = vsyncpa [#allocation4], 0 }
   0x6   :  { %21 = vsyncpa [#allocation7], 0 }
   0x7   :  { %22 = vsyncpa [#allocation10], 0 }
   0x8   :  { %23 = vsyncpa [#allocation13], 0 }
   0x9   :  { %24 = vsyncpa [#allocation16], 0 }
   0xa   :  { %25 = vsyncpa [#allocation5], 0 }
   0xb   :  { %27 = vsyncpa [#allocation5 + $0x1], 0  ;;  %s8869_s29 = smov 0   ;;  %s8871_s30 = smov 0  }
   0xc   :  { %s8873_s15 = smov 0   ;;  %s8875_s16 = smov 0  }
   0xd LB: > { %9862 = sst [smem:[#allocation25_spill]] %s8724_s29  ;;  %s8890_s17 = sadd.s32 4294967295, %s8736_s16   ;;  %s8736_s16 = sphi %s8875_s16, %s9904_s16   ;;  %s8732_s15 = sphi %s8873_s15, %s9907_s15   ;;  %s8728_s30 = sphi %s8871_s30, %s9906_s30   ;;  %s8724_s29 = sphi %s8869_s29, %s9905_s29  }
   0xe   : > { %9863 = sst [smem:[#allocation26_spill]] %s8728_s30  ;;  %s6489_s18 = sadd.s32 4294967294, %s8736_s16  }
   0xf   : > { %9864 = sst [smem:[#allocation27_spill]] %s8732_s15  ;;  %s8894_s19 = sadd.s32 1, %s8736_s16  }
  0x10   : > { %9865 = sst [smem:[#allocation28_spill]] %s8736_s16  ;;  %s318_s20 = sadd.s32 1, %s8732_s15 }
  0x11   : > { %9866 = sst [smem:[#allocation29_spill]] %s8894_s19  ;;  %s315_s21 = ssub.s32 %s8736_s16, %s8894_s19 }
  0x12   : > { %p328_p0 = scmp.ne.s32.totalorder %s8732_s15, %s8728_s30  ;;  %p316_p1 = scmp.eq.s32.totalorder %s315_s21, 0 }
  0x13   : > { %p329_p2 = scmp.eq.s32.totalorder %s8890_s17, 1  ;;  %p334_p3 = scmp.ne.s32.totalorder %s8728_s30, %s8724_s29 }
  0x14   : > { %p335_p4 = scmp.eq.s32.totalorder %s6489_s18, 1  ;;  %p6490_p7 = scmp.ge.s32.totalorder %s8736_s16, 1 }
  0x15   : > { %s8905_s22 = scalar_select %p316_p1, %s8732_s15, %s318_s20  }
  0x16   : > { %p8907_p5 = por %p329_p2, %p328_p0  ;;  %p8911_p6 = por %p335_p4, %p334_p3 }
  0x17   : > { %9867 = sst [smem:[#allocation30_spill]] %s8905_s22  ;;  %p368_p8 = scmp.lt.s32.totalorder %s8736_s16, 3 }
  0x18   : > { %s9868_s23 = scalar_select %p8907_p5, 1, 0 }
  0x19   : > { %s9870_s24 = scalar_select %p8911_p6, 1, 0 }
  0x1a   : > { %9869 = sst [smem:[#allocation31_spill]] %s9868_s23  ;;  %p9847_p9 = scmp.eq.s32.totalorder %s8890_s17, 0 }
  0x1b   : > { %9871 = sst [smem:[#allocation32_spill]] %s9870_s24  ;;  %p8918_p10 = pnand %p6490_p7, %p368_p8 }
  0x1c   : > { %s8738_s26 = smov [#allocation6]   ;;  %s8739_s18 = smov [#allocation9]  }
  0x1d   : > { %s9872_s25 = scalar_select %p8918_p10, 1, 0 }
  0x1e   : > { %s393_s27 = sshll.u32 %s8738_s26, 4  ;;  %p8264_p11 = pneg %p8918_p10  ;;  %s394_s27 = int_to_ptr.vmem [resolvable:$true] %s393_s27 }
  0x1f   : > { %s420_s20 = sshll.u32 %s8739_s18, 4  ;;  %s9874_s2 = sld [smem:[#allocation33_spill]]  ;;  %s8930_s20 = int_to_ptr.vmem [resolvable:$true] %s420_s20 }
  0x20   : > { %p8926_p12 = pnand %p9847_p9, %p8264_p11 }
  0x22   : > { %p8940_p0 = pneg %p8926_p12 }
  0x25   : > { %s8402_s15 = scalar_lea.hbm %s9874_s2, 10240 }
  0x26   : > { %p8403_p13 = scmp.ne.s32.totalorder %s9874_s2, %s8402_s15  ;;  %p8409_p3 = scmp.lt.u32.totalorder %s8402_s15, %s9874_s2 }
  0x28   : > { %p8405_p1 = pnand %p8940_p0, %p8403_p13 }
  0x2a   : > { %p8406_p2 = pneg %p8405_p1 }
  0x2c   : > { %p8411_p4 = pnand %p8409_p3, %p8406_p2 }
  0x2e   : > { %8414 = shalt.err (!%p8411_p4)
}
  0x2f   : > { %s8415_s22 = scalar_lea.vmem %s394_s27, 10240  ;;  %p8423_p9 = scmp.lt.s32.totalorder %s394_s27, %s394_s27 }
  0x30   : > { %p8416_p7 = scmp.ne.s32.totalorder %s394_s27, %s8415_s22  ;;  %p8424_p6 = scmp.lt.s32.totalorder %s8415_s22, %s8415_s22 }
  0x32   : > { %p8418_p8 = pnand %p8416_p7, %p8940_p0  ;;  %p8425_p5 = por %p8424_p6, %p8423_p9 }
  0x34   : > { %p8419_p11 = pneg %p8418_p8 }
  0x36   : > { %p8426_p10 = pnand %p8425_p5, %p8419_p11 }
  0x38   : > { %8429 = shalt.err (!%p8426_p10)
}
  0x39   : > { %s9855_s19 = smov 512   ;;  %s9856_s24 = smov 32  }
  0x3a   : > { %8270 = dma.hbm_to_vmem [thread:$0]  (!%p8926_p12), %s9874_s2, 10240, %s394_s27, [#allocation7], %s9855_s19, %s9855_s19, %s9856_s24  }
  0x3b   : > { %s9876_s5 = sld [smem:[#allocation34_spill]] }
  0x41   : > { %s8430_s16 = scalar_lea.hbm %s9876_s5, 28672 }
  0x42   : > { %p8431_p5 = scmp.ne.s32.totalorder %s9876_s5, %s8430_s16  ;;  %p8437_p10 = scmp.lt.u32.totalorder %s8430_s16, %s9876_s5 }
  0x44   : > { %p8433_p6 = pnand %p8431_p5, %p8940_p0 }
  0x46   : > { %p8434_p9 = pneg %p8433_p6 }
  0x48   : > { %p8439_p13 = pnand %p8437_p10, %p8434_p9 }
  0x4a   : > { %8442 = shalt.err (!%p8439_p13)
}
  0x4b   : > { %s8443_s27 = scalar_lea.vmem %s8930_s20, 28672  ;;  %p8451_p4 = scmp.lt.s32.totalorder %s8930_s20, %s8930_s20 }
  0x4c   : > { %p8444_p1 = scmp.ne.s32.totalorder %s8930_s20, %s8443_s27  ;;  %p8452_p7 = scmp.lt.s32.totalorder %s8443_s27, %s8443_s27 }
  0x4e   : > { %p8446_p2 = pnand %p8444_p1, %p8940_p0  ;;  %p8453_p8 = por %p8452_p7, %p8451_p4 }
  0x50   : > { %p8447_p3 = pneg %p8446_p2 }
  0x52   : > { %p8454_p11 = pnand %p8453_p8, %p8447_p3 }
  0x54   : > { %8457 = shalt.err (!%p8454_p11)
}
  0x55   : > { %s9857_s13 = smov 256   ;;  %s8743_s30 = smov 16  }
  0x56   : > { %8276 = dma.hbm_to_vmem [thread:$0]  (!%p8926_p12), %s9876_s5, 28672, %s8930_s20, [#allocation10], %s9857_s13, %s9857_s13, %s8743_s30  }
  0x57   : > { %s8744_s29 = smov [#allocation12]   ;;  %s8745_s21 = smov [#allocation15]  }
  0x58   : > { %s446_s15 = sshll.u32 %s8744_s29, 4  ;;  %s473_s18 = sshll.u32 %s8745_s21, 4  ;;  %s447_s15 = int_to_ptr.vmem [resolvable:$true] %s446_s15  ;;  %s8985_s18 = int_to_ptr.vmem [resolvable:$true] %s473_s18 }
  0x59   : > { %s9877_s7 = sld [smem:[#allocation35_spill]] }
  0x5f   : > { %s8458_s19 = scalar_lea.hbm %s9877_s7, 71680 }
  0x60   : > { %p8459_p5 = scmp.ne.s32.totalorder %s9877_s7, %s8458_s19  ;;  %p8465_p10 = scmp.lt.u32.totalorder %s8458_s19, %s9877_s7 }
  0x62   : > { %p8461_p6 = pnand %p8459_p5, %p8940_p0 }
  0x64   : > { %p8462_p9 = pneg %p8461_p6 }
  0x66   : > { %p8467_p13 = pnand %p8465_p10, %p8462_p9 }
  0x68   : > { %8470 = shalt.err (!%p8467_p13)
}
  0x69   : > { %s8471_s23 = scalar_lea.vmem %s447_s15, 71680  ;;  %p8479_p4 = scmp.lt.s32.totalorder %s447_s15, %s447_s15 }
  0x6a   : > { %p8472_p1 = scmp.ne.s32.totalorder %s447_s15, %s8471_s23  ;;  %p8480_p7 = scmp.lt.s32.totalorder %s8471_s23, %s8471_s23 }
  0x6c   : > { %p8474_p2 = pnand %p8472_p1, %p8940_p0  ;;  %p8481_p8 = por %p8480_p7, %p8479_p4 }
  0x6e   : > { %p8475_p3 = pneg %p8474_p2 }
  0x70   : > { %p8482_p11 = pnand %p8481_p8, %p8475_p3 }
  0x72   : > { %8485 = shalt.err (!%p8482_p11)
}
  0x73   : > { %s9878_s2 = smov 32   ;;  %s9879_s24 = smov 512  }
  0x74   : > { %8282 = dma.hbm_to_vmem [thread:$0]  (!%p8926_p12), %s9877_s7, 71680, %s447_s15, [#allocation13], %s9879_s24, %s9879_s24, %s9878_s2  }
  0x75   : > { %s8486_s27 = scalar_lea.hbm %s9837_s10, 28672 }
  0x76   : > { %p8487_p5 = scmp.ne.s32.totalorder %s9837_s10, %s8486_s27  ;;  %p8493_p10 = scmp.lt.u32.totalorder %s8486_s27, %s9837_s10 }
  0x78   : > { %p8489_p6 = pnand %p8487_p5, %p8940_p0 }
  0x7a   : > { %p8490_p9 = pneg %p8489_p6 }
  0x7c   : > { %p8495_p13 = pnand %p8493_p10, %p8490_p9 }
  0x7e   : > { %8498 = shalt.err (!%p8495_p13)
}
  0x7f   : > { %s8499_s15 = scalar_lea.vmem %s8985_s18, 28672  ;;  %p8507_p4 = scmp.lt.s32.totalorder %s8985_s18, %s8985_s18 }
  0x80   : > { %p8500_p1 = scmp.ne.s32.totalorder %s8985_s18, %s8499_s15  ;;  %p8508_p7 = scmp.lt.s32.totalorder %s8499_s15, %s8499_s15 }
  0x82   : > { %p8502_p2 = pnand %p8500_p1, %p8940_p0  ;;  %p8509_p8 = por %p8508_p7, %p8507_p4 }
  0x84   : > { %p8503_p3 = pneg %p8502_p2 }
  0x86   : > { %p8510_p11 = pnand %p8509_p8, %p8503_p3 }
  0x88   : > { %8513 = shalt.err (!%p8510_p11)
}
  0x89   : > { %s9880_s13 = smov 256   ;;  %s8746_s29 = smov [#allocation3]  }
  0x8a   : > { %8288 = dma.hbm_to_vmem [thread:$0]  (!%p8926_p12), %s9837_s10, 28672, %s8985_s18, [#allocation16], %s9880_s13, %s9880_s13, %s8743_s30  }
  0x8b   : > { %s380_s19 = sshll.u32 %s8746_s29, 4  ;;  %s8514_s27 = scalar_lea.hbm %s9828_s1, 2560  ;;  %s381_s19 = int_to_ptr.vmem [resolvable:$true] %s380_s19 }
  0x8c   : > { %p8515_p5 = scmp.ne.s32.totalorder %s9828_s1, %s8514_s27  ;;  %p8521_p10 = scmp.lt.u32.totalorder %s8514_s27, %s9828_s1 }
  0x8e   : > { %p8517_p6 = pnand %p8515_p5, %p8940_p0 }
  0x90   : > { %p8518_p9 = pneg %p8517_p6 }
  0x92   : > { %p8523_p13 = pnand %p8521_p10, %p8518_p9 }
  0x94   : > { %8526 = shalt.err (!%p8523_p13)
}
  0x95   : > { %s8527_s30 = scalar_lea.vmem %s381_s19, 2560  ;;  %p8535_p4 = scmp.lt.s32.totalorder %s381_s19, %s381_s19 }
  0x96   : > { %p8528_p1 = scmp.ne.s32.totalorder %s381_s19, %s8527_s30  ;;  %p8536_p7 = scmp.lt.s32.totalorder %s8527_s30, %s8527_s30 }
  0x98   : > { %p8530_p2 = pnand %p8528_p1, %p8940_p0  ;;  %p8537_p8 = por %p8536_p7, %p8535_p4 }
  0x9a   : > { %p8531_p3 = pneg %p8530_p2 }
  0x9c   : > { %p8538_p11 = pnand %p8537_p8, %p8531_p3 }
  0x9e   : > { %8541 = shalt.err (!%p8538_p11)
}
  0x9f   : > { %s8747_s18 = smov 128   ;;  %s8748_s13 = smov 8  }
  0xa0   : > { %8267 = dma.hbm_to_vmem [thread:$0]  (!%p8926_p12), %s9828_s1, 2560, %s381_s19, [#allocation4], %s8747_s18, %s8747_s18, %s8748_s13  }
  0xa1   : > { %s8749_s29 = smov [#allocation8]   ;;  %s8750_s22 = smov [#allocation11]  }
  0xa2   : > { %s407_s21 = sshll.u32 %s8749_s29, 4  ;;  %s433_s27 = sshll.u32 %s8750_s22, 4  ;;  %s408_s21 = int_to_ptr.vmem [resolvable:$true] %s407_s21  ;;  %s434_s27 = int_to_ptr.vmem [resolvable:$true] %s433_s27 }
  0xa3   : > { %s8542_s23 = scalar_lea.hbm %s9830_s3, 64 }
  0xa4   : > { %p8543_p5 = scmp.ne.s32.totalorder %s9830_s3, %s8542_s23  ;;  %p8549_p10 = scmp.lt.u32.totalorder %s8542_s23, %s9830_s3 }
  0xa6   : > { %p8545_p6 = pnand %p8543_p5, %p8940_p0 }
  0xa8   : > { %p8546_p9 = pneg %p8545_p6 }
  0xaa   : > { %p8551_p13 = pnand %p8549_p10, %p8546_p9 }
  0xac   : > { %8554 = shalt.err (!%p8551_p13)
}
  0xad   : > { %s8555_s19 = scalar_lea.vmem %s408_s21, 64  ;;  %p8563_p4 = scmp.lt.s32.totalorder %s408_s21, %s408_s21 }
  0xae   : > { %p8556_p1 = scmp.ne.s32.totalorder %s408_s21, %s8555_s19  ;;  %p8564_p7 = scmp.lt.s32.totalorder %s8555_s19, %s8555_s19 }
  0xb0   : > { %p8558_p2 = pnand %p8556_p1, %p8940_p0  ;;  %p8565_p8 = por %p8564_p7, %p8563_p4 }
  0xb2   : > { %p8559_p3 = pneg %p8558_p2 }
  0xb4   : > { %p8566_p11 = pnand %p8565_p8, %p8559_p3 }
  0xb6   : > { %8569 = shalt.err (!%p8566_p11)
}
  0xb7   : > { %8273 = dma.hbm_to_vmem [thread:$0]  (!%p8926_p12), %s9830_s3, 64, %s408_s21, [#allocation7]  }
  0xb8   : > { %s8570_s29 = scalar_lea.hbm %s9833_s6, 1280 }
  0xb9   : > { %p8571_p5 = scmp.ne.s32.totalorder %s9833_s6, %s8570_s29  ;;  %p8577_p10 = scmp.lt.u32.totalorder %s8570_s29, %s9833_s6 }
  0xbb   : > { %p8573_p6 = pnand %p8571_p5, %p8940_p0 }
  0xbd   : > { %p8574_p9 = pneg %p8573_p6 }
  0xbf   : > { %p8579_p13 = pnand %p8577_p10, %p8574_p9 }
  0xc1   : > { %8582 = shalt.err (!%p8579_p13)
}
  0xc2   : > { %s8583_s15 = scalar_lea.vmem %s434_s27, 1280  ;;  %p8591_p4 = scmp.lt.s32.totalorder %s434_s27, %s434_s27 }
  0xc3   : > { %p8584_p1 = scmp.ne.s32.totalorder %s434_s27, %s8583_s15  ;;  %p8592_p7 = scmp.lt.s32.totalorder %s8583_s15, %s8583_s15 }
  0xc5   : > { %p8586_p2 = pnand %p8584_p1, %p8940_p0  ;;  %p8593_p8 = por %p8592_p7, %p8591_p4 }
  0xc7   : > { %p8587_p3 = pneg %p8586_p2 }
  0xc9   : > { %p8594_p11 = pnand %p8593_p8, %p8587_p3 }
  0xcb   : > { %8597 = shalt.err (!%p8594_p11)
}
  0xcc   : > { %8279 = dma.hbm_to_vmem [thread:$0]  (!%p8926_p12), %s9833_s6, 1280, %s434_s27, [#allocation10], %s8747_s18, %s8747_s18, %s8748_s13  }
  0xcd   : > { %s8751_s19 = smov [#allocation14]   ;;  %s8752_s24 = smov [#allocation17]  }
  0xce   : > { %s460_s2 = sshll.u32 %s8751_s19, 4  ;;  %s490_s5 = sshll.u32 %s8752_s24, 4  ;;  %s461_s2 = int_to_ptr.vmem [resolvable:$true] %s460_s2  ;;  %s491_s5 = int_to_ptr.vmem [resolvable:$true] %s490_s5 }
  0xcf   : > { %s8598_s22 = scalar_lea.hbm %s9835_s8, 64 }
  0xd0   : > { %p8599_p5 = scmp.ne.s32.totalorder %s9835_s8, %s8598_s22  ;;  %p8605_p10 = scmp.lt.u32.totalorder %s8598_s22, %s9835_s8 }
  0xd2   : > { %p8601_p6 = pnand %p8599_p5, %p8940_p0 }
  0xd4   : > { %p8602_p9 = pneg %p8601_p6 }
  0xd6   : > { %p8607_p13 = pnand %p8605_p10, %p8602_p9 }
  0xd8   : > { %8610 = shalt.err (!%p8607_p13)
}
  0xd9   : > { %s8611_s18 = scalar_lea.vmem %s461_s2, 64  ;;  %p8619_p4 = scmp.lt.s32.totalorder %s461_s2, %s461_s2 }
  0xda   : > { %p8612_p1 = scmp.ne.s32.totalorder %s461_s2, %s8611_s18  ;;  %p8620_p7 = scmp.lt.s32.totalorder %s8611_s18, %s8611_s18 }
  0xdc   : > { %p8614_p2 = pnand %p8612_p1, %p8940_p0  ;;  %p8621_p8 = por %p8620_p7, %p8619_p4 }
  0xde   : > { %p8615_p3 = pneg %p8614_p2 }
  0xe0   : > { %p8622_p11 = pnand %p8621_p8, %p8615_p3 }
  0xe2   : > { %8625 = shalt.err (!%p8622_p11)
}
  0xe3   : > { %8285 = dma.hbm_to_vmem [thread:$0]  (!%p8926_p12), %s9835_s8, 64, %s461_s2, [#allocation13]  }
  0xe4   : > { %s8626_s19 = scalar_lea.hbm %s9839_s12, 16 }
  0xe5   : > { %p8627_p5 = scmp.ne.s32.totalorder %s9839_s12, %s8626_s19  ;;  %p8633_p10 = scmp.lt.u32.totalorder %s8626_s19, %s9839_s12 }
  0xe7   : > { %p8629_p6 = pnand %p8627_p5, %p8940_p0 }
  0xe9   : > { %p8630_p9 = pneg %p8629_p6 }
  0xeb   : > { %p8635_p13 = pnand %p8633_p10, %p8630_p9 }
  0xed   : > { %8638 = shalt.err (!%p8635_p13)
}
  0xee   : > { %s8639_s16 = scalar_lea.vmem %s491_s5, 16  ;;  %s8646_s2 = scalar_lea.vmem %s491_s5, 32 }
  0xef   : > { %p8640_p1 = scmp.ne.s32.totalorder %s491_s5, %s8639_s16  ;;  %p8647_p4 = scmp.lt.s32.totalorder %s491_s5, %s491_s5 }
  0xf0   : > { %p8648_p7 = scmp.lt.s32.totalorder %s8646_s2, %s8639_s16 }
  0xf1   : > { %p8642_p2 = pnand %p8640_p1, %p8940_p0 }
  0xf2   : > { %p8649_p8 = por %p8648_p7, %p8647_p4 }
  0xf3   : > { %p8643_p3 = pneg %p8642_p2 }
  0xf5   : > { %p8650_p11 = pnand %p8649_p8, %p8643_p3 }
  0xf7   : > { %8653 = shalt.err (!%p8650_p11)
}
  0xf8   : > { %8291 = dma.hbm_to_vmem [thread:$0]  (!%p8926_p12), %s9839_s12, 16, %s491_s5, [#allocation16]  }
  0xf9   : > { %p9881_p5 = scmp.ne.s32.totalorder %s9872_s25, 0 }
  0xfa   : > { %p9882_p6 = scmp.eq.s32.totalorder (!%p9881_p5), %s8890_s17, 0 }
  0xfb   : > { %511 = sbr.rel (%p9881_p5) target bundleno = 3927 (0xf57), region = 72 }
 0x102   : > { %8699 = dma.done.wait (%p9882_p6), [#allocation4], 2560   ;;  %p9883_p0 = pmov %p9882_p6 }
 0x104   : > { %8701 = vsyncadd (%p9883_p0), [#allocation4], 4294964736  ;;  %p9884_p9 = pmov %p9883_p0 }
 0x105   : > { %p9885_p10 = pmov %p9883_p0 }
 0x106   : > { %8703 = dma.done.wait (%p9884_p9), [#allocation7], 10304  }
 0x107   : > { %8705 = vsyncadd (%p9885_p10), [#allocation7], 4294956992  ;;  %p9886_p13 = pmov %p9883_p0 }
 0x108   : > { %p9887_p12 = pmov %p9883_p0 }
 0x109   : > { %8707 = dma.done.wait (%p9886_p13), [#allocation10], 29952  }
 0x10a   : > { %8709 = vsyncadd (%p9887_p12), [#allocation10], 4294937344  ;;  %p9888_p1 = pmov %p9883_p0 }
 0x10b   : > { %p9889_p2 = pmov %p9883_p0 }
 0x10c   : > { %8711 = dma.done.wait (%p9888_p1), [#allocation13], 71744  }
 0x10d   : > { %8713 = vsyncadd (%p9889_p2), [#allocation13], 4294895552  ;;  %p9890_p3 = pmov %p9883_p0 }
 0x10e   : > { %p9891_p4 = pmov %p9883_p0 }
 0x10f   : > { %8715 = dma.done.wait (%p9890_p3), [#allocation16], 28688  }
 0x110   : > { %8717 = vsyncadd (%p9891_p4), [#allocation16], 4294938608  ;;  %p593_p7 = scmp.lt.s32.totalorder %s8890_s17, 1  ;;  %vm624_vm0 = vcmask 1043456   ;;  %vm611_vm1 = vcmask 228352   ;;  %v607_v5 = vld [vmem:[#allocation3] sm:$0xff] }
 0x111   : > { %vm8753_vm2 = vmmov 1   ;;  %6762 = vmatprep.mubr.msk.f32.mxu1 %vm611_vm1, %v607_v5  ;;  %v714_v8 = vld [vmem:[#allocation6 + $0x8] sm:$0xff]  ;;  %v713_v10 = vld [vmem:[#allocation6] sm:$0xff]  ;;  %v609_v20 = vld [vmem:[#allocation3 + $0x10] sm:$0xff]  ;;  %v8754_v32 = vmov 0.0   ;;  %vm2774_vm4 = vcmask 523264  }
 0x112   : > { %s9154_s25 = scalar_select %p593_p7, %s8890_s17, 1  ;;  %vm9165_vm3 = vmpackc.low %vm624_vm0, %vm8753_vm2  ;;  %v718_v9 = vld [vmem:[#allocation6 + $0x28] sm:$0xff]  ;;  %v717_v12 = vld [vmem:[#allocation6 + $0x20] sm:$0xff]  ;;  %1138 = vmatprep.mubr.f32.mxu0 %v8754_v32  ;;  %vm3215_vm5 = vcmask 1045504   ;;  %vm3208_vm7 = vcmask 113664   ;;  %vm3610_vm8 = vcmask 785408  }
 0x113   : > { %v6864_v11 = vpack.c.bf16 %v718_v9, %v714_v8  ;;  %v722_v13 = vld [vmem:[#allocation6 + $0x48] sm:$0xff]  ;;  %v6866_v15 = vpack.c.bf16 %v717_v12, %v713_v10  ;;  %v721_v17 = vld [vmem:[#allocation6 + $0x40] sm:$0xff]  ;;  %v610_v22 = vld [vmem:[#allocation3 + $0x18] sm:$0xf]  ;;  %vm5894_vm9 = vcmask 784384   ;;  %vm5897_vm10 = vcmask 55296  }
 0x114   : > { %s6712_s28 = sshll.u32 %s9154_s25, 5  ;;  %v726_v14 = vld [vmem:[#allocation6 + $0x68] sm:$0xf]  ;;  %v725_v18 = vld [vmem:[#allocation6 + $0x60] sm:$0xf]  ;;  %v732_v25 = vld [vmem:[#allocation3 + $0x30] sm:$0xff] }
 0x115   : > { %s597_s15 = scalar_lea.vmem %s9827_s0, %s6712_s28  ;;  %v6868_v16 = vpack.c.bf16 %v726_v14, %v722_v13  ;;  %6865 = vmatprep.subr.bf16.mxu0 %v6864_v11  ;;  %v608_v19 = vld [vmem:[#allocation3 + $0x8] sm:$0xff]  ;;  %v6871_v21 = vpack.c.bf16 %v725_v18, %v721_v17  ;;  %v730_v23 = vld [vmem:[#allocation3 + $0x20] sm:$0xff]  ;;  %v733_v26 = vld [vmem:[#allocation3 + $0x38] sm:$0xf]  ;;  %s6713_s28 = sshll.u32 %s9154_s25, 8  ;;  %vm6026_vm11 = vcmask 15360  }
 0x116   : > { %v603_v0 = vld [vmem:[%s597_s15] sm:$0xff]  ;;  %v604_v1 = vld [vmem:[%s597_s15 + $0x8] sm:$0xff]  ;;  %v605_v2 = vld [vmem:[%s597_s15 + $0x10] sm:$0xff]  ;;  %6867 = vmatpush1.bf16.msra.mxu0 %v6866_v15  ;;  %s8756_s18 = smov 107   ;;  %s8757_s13 = smov 121   ;;  %vm6298_vm12 = vcmask 73728  }
 0x117   : > { %v9160_v3 = vpack.c.bf16 %v604_v1, %v603_v0  ;;  %v606_v4 = vld [vmem:[%s597_s15 + $0x18] sm:$0xf]  ;;  %6870 = vmatprep.subr.msk.bf16.mxu0 %vm9165_vm3, %v6868_v16  ;;  %v832_v30 = vld [vmem:[#allocation6 + $0x80] sm:$0xff]  ;;  %v835_v40 = vld [vmem:[#allocation6 + $0x98] sm:$0xff]  ;;  %s9709_s15 = scalar_lea.vmem %s9841_s14, %s6713_s28  ;;  %s8758_s25 = smov 2  }
 0x118   : > { %v9162_v6 = vpack.c.bf16 %v606_v4, %v605_v2  ;;  %v731_v24 = vld [vmem:[#allocation3 + $0x28] sm:$0xff]  ;;  %v836_v31 = vld [vmem:[#allocation6 + $0xa0] sm:$0xff]  ;;  %v839_v41 = vld [vmem:[#allocation6 + $0xb8] sm:$0xff]  ;;  %s8759_s27 = smov 114   ;;  %s8760_s21 = smov 100  }
 0x119   : > { %6825 = vmatprep.subr.bf16.mxu1 %v9160_v3  ;;  %v833_v27 = vld [vmem:[#allocation6 + $0x88] sm:$0xff]  ;;  %v6846_v33 = vpack.c.bf16 %v836_v31, %v832_v30  ;;  %v840_v37 = vld [vmem:[#allocation6 + $0xc0] sm:$0xff]  ;;  %v6854_v42 = vpack.c.bf16 %v839_v41, %v835_v40  ;;  %v834_v50 = vld [vmem:[#allocation6 + $0x90] sm:$0xff]  ;;  %s8761_s30 = smov 93   ;;  %s8762_s19 = smov 86  }
 0x11a   : > { %6827 = vmatpush3.bf16.msra.mxu1 %v9160_v3  ;;  %6873 = vmatpush1.bf16.msk.msra.mxu0 %vm9165_vm3, %v6871_v21  ;;  %v837_v28 = vld [vmem:[#allocation6 + $0xa8] sm:$0xff]  ;;  %v844_v38 = vld [vmem:[#allocation6 + $0xe0] sm:$0xf]  ;;  %v838_v51 = vld [vmem:[#allocation6 + $0xb0] sm:$0xff]  ;;  %s8763_s24 = smov 79   ;;  %s8764_s7 = smov 72  }
 0x11b   : > { %6830 = vmatprep.subr.msk.bf16.mxu1 %vm9165_vm3, %v9162_v6  ;;  %6885 = vmatprep.subr.bf16.mxu0 %v9160_v3  ;;  %v6844_v29 = vpack.c.bf16 %v837_v28, %v833_v27  ;;  %v841_v34 = vld [vmem:[#allocation6 + $0xc8] sm:$0xff]  ;;  %v6851_v39 = vpack.c.bf16 %v844_v38, %v840_v37  ;;  %v843_v52 = vld [vmem:[#allocation6 + $0xd8] sm:$0xff]  ;;  %v6856_v55 = vpack.c.bf16 %v838_v51, %v834_v50  ;;  %v842_v58 = vld [vmem:[#allocation6 + $0xd0] sm:$0xff]  ;;  %s8765_s29 = smov 65   ;;  %s8766_s22 = smov 58  }
 0x11c   : > { %v845_v35 = vld [vmem:[#allocation6 + $0xe8] sm:$0xf]  ;;  %v847_v53 = vld [vmem:[#allocation6 + $0xf8] sm:$0xf]  ;;  %v846_v59 = vld [vmem:[#allocation6 + $0xf0] sm:$0xf] }
 0x11d   : > { %v6848_v36 = vpack.c.bf16 %v845_v35, %v841_v34  ;;  %v1356_v45 = vld [vmem:[#allocation6 + $0x108] sm:$0xff]  ;;  %v6858_v57 = vpack.c.bf16 %v847_v53, %v843_v52  ;;  %v716_v60 = vld [vmem:[#allocation6 + $0x18] sm:$0xff]  ;;  %v1253_v63 = vld [vmem:[#allocation3 + $0x40] sm:$0xff]  ;;  %v6861_v0 = vpack.c.bf16 %v846_v59, %v842_v58  ;;  %s8767_s16 = smov 51   ;;  %s8768_s2 = smov 44  }
 0x11e   : > { %6833 = vmatpush3.bf16.msk.msra.mxu1 %vm9165_vm3, %v9162_v6  ;;  %v1360_v46 = vld [vmem:[#allocation6 + $0x128] sm:$0xff]  ;;  %v720_v61 = vld [vmem:[#allocation6 + $0x38] sm:$0xff]  ;;  %v1355_v4 = vld [vmem:[#allocation6 + $0x100] sm:$0xff]  ;;  %s8769_s20 = smov 37   ;;  %s8770_s23 = smov 30  }
 0x11f   : > { %6835 = vmatprep.subr.bf16.mxu1 %v9160_v3  ;;  %v6894_v48 = vpack.c.bf16 %v1360_v46, %v1356_v45  ;;  %v6874_v2 = vpack.c.bf16 %v720_v61, %v716_v60  ;;  %v1359_v5 = vld [vmem:[#allocation6 + $0x120] sm:$0xff]  ;;  %v1364_v8 = vld [vmem:[#allocation6 + $0x148] sm:$0xff]  ;;  %v1255_v11 = vld [vmem:[#allocation3 + $0x50] sm:$0xff]  ;;  %s8771_s28 = smov 23   ;;  %s8772_s26 = smov 16  }
 0x120   : > { %v1368_v9 = vld [vmem:[#allocation6 + $0x168] sm:$0xf]  ;;  %v6896_v12 = vpack.c.bf16 %v1359_v5, %v1355_v4  ;;  %v1363_v14 = vld [vmem:[#allocation6 + $0x140] sm:$0xff]  ;;  %v1256_v16 = vld [vmem:[#allocation3 + $0x58] sm:$0xf]  ;;  %s8773_s5 = smov 9  }
 0x121   : > { %6763 = vmatmul.mubr.msk.f32.vlgmr.msra.gmra.mrb[0].mxu1 %vm611_vm1, %v608_v19  ;;  %v1254_v10 = vld [vmem:[#allocation3 + $0x48] sm:$0xff]  ;;  %v6898_v13 = vpack.c.bf16 %v1368_v9, %v1364_v8  ;;  %v1367_v15 = vld [vmem:[#allocation6 + $0x160] sm:$0xf]  ;;  %v715_v17 = vld [vmem:[#allocation6 + $0x10] sm:$0xff] }
 0x122   : > { %6837 = vmatpush3.bf16.msra.mxu1 %v9160_v3  ;;  %6765 = vmatprep.mubr.msk.f32.mxu1 %vm611_vm1, %v609_v20  ;;  %v719_v18 = vld [vmem:[#allocation6 + $0x30] sm:$0xff]  ;;  %v6901_v19 = vpack.c.bf16 %v1367_v15, %v1363_v14  ;;  %v724_v20 = vld [vmem:[#allocation6 + $0x58] sm:$0xff]  ;;  %v1693_v40 = vld [vmem:[#allocation6 + $0x188] sm:$0xff] }
 0x123   : > { %6840 = vmatprep.subr.msk.bf16.mxu1 %vm9165_vm3, %v9162_v6  ;;  %v728_v21 = vld [vmem:[#allocation6 + $0x78] sm:$0xf]  ;;  %v1357_v30 = vld [vmem:[#allocation6 + $0x110] sm:$0xff]  ;;  %v1697_v41 = vld [vmem:[#allocation6 + $0x1a8] sm:$0xff] }
 0x124   : > { %v1362_v27 = vld [vmem:[#allocation6 + $0x138] sm:$0xff]  ;;  %v1361_v31 = vld [vmem:[#allocation6 + $0x130] sm:$0xff]  ;;  %v1701_v50 = vld [vmem:[#allocation6 + $0x1c8] sm:$0xff] }
 0x125   : > { %6766 = vmatmul.mubr.msk.f32.gmra.mrb[2].mxu1 %vm611_vm1, %v610_v22  ;;  %v6876_v22 = vpack.c.bf16 %v719_v18, %v715_v17  ;;  %v1370_v34 = vld [vmem:[#allocation6 + $0x178] sm:$0xf]  ;;  %v6906_v35 = vpack.c.bf16 %v1361_v31, %v1357_v30  ;;  %v1365_v37 = vld [vmem:[#allocation6 + $0x150] sm:$0xff]  ;;  %v1705_v51 = vld [vmem:[#allocation6 + $0x1e8] sm:$0xf] }
 0x126   : > { %6843 = vmatpush3.bf16.msk.msra.mxu1 %vm9165_vm3, %v9162_v6  ;;  %6776 = vmatprep.mubr.msk.f32.mxu1 %vm611_vm1, %v730_v23  ;;  %v6878_v23 = vpack.c.bf16 %v728_v21, %v724_v20  ;;  %v1369_v38 = vld [vmem:[#allocation6 + $0x170] sm:$0xf]  ;;  %v1704_v58 = vld [vmem:[#allocation6 + $0x1e0] sm:$0xf]  ;;  %v1695_v59 = vld [vmem:[#allocation6 + $0x198] sm:$0xff] }
 0x127   : > { %6845 = vmatprep.subr.bf16.mxu1 %v6844_v29  ;;  %v1699_v60 = vld [vmem:[#allocation6 + $0x1b8] sm:$0xff]  ;;  %v1590_v4 = vld [vmem:[#allocation3 + $0x60] sm:$0xff]  ;;  %v1694_v5 = vld [vmem:[#allocation6 + $0x190] sm:$0xff] }
 0x128   : > { %v1698_v8 = vld [vmem:[#allocation6 + $0x1b0] sm:$0xff]  ;;  %v1703_v9 = vld [vmem:[#allocation6 + $0x1d8] sm:$0xff]  ;;  %vm9476_vm6 = vmpackc.low %vm3215_vm5, %vm8753_vm2 }
 0x129   : > { %6777 = vmatmul.mubr.msk.f32.vlgmr.msra.gmra.mrb[4].mxu1 %vm611_vm1, %v731_v24  ;;  %v723_v24 = vld [vmem:[#allocation6 + $0x50] sm:$0xff]  ;;  %v1593_v17 = vld [vmem:[#allocation3 + $0x78] sm:$0xf] }
 0x12a   : > { %6779 = vmatprep.mubr.msk.f32.mxu1 %vm611_vm1, %v732_v25  ;;  %6847 = vmatpush1.bf16.msra.mxu1 %v6846_v33  ;;  %v727_v25 = vld [vmem:[#allocation6 + $0x70] sm:$0xf]  ;;  %v1366_v33 = vld [vmem:[#allocation6 + $0x158] sm:$0xff] }
 0x12b   : > { %6850 = vmatprep.subr.msk.bf16.mxu1 %vm9165_vm3, %v6848_v36  ;;  %v6881_v28 = vpack.c.bf16 %v727_v25, %v723_v24  ;;  %v6908_v36 = vpack.c.bf16 %v1370_v34, %v1366_v33  ;;  %v1702_v15 = vld [vmem:[#allocation6 + $0x1d0] sm:$0xff]  ;;  %v2036_v20 = vld [vmem:[#allocation6 + $0x238] sm:$0xff]  ;;  %v2030_v33 = vld [vmem:[#allocation6 + $0x208] sm:$0xff] }
 0x12c   : > { %v2040_v24 = vld [vmem:[#allocation6 + $0x258] sm:$0xff]  ;;  %v2039_v30 = vld [vmem:[#allocation6 + $0x250] sm:$0xff]  ;;  %v2034_v34 = vld [vmem:[#allocation6 + $0x228] sm:$0xff] }
 0x12d   : > { %6780 = vmatmul.mubr.msk.f32.gmra.mrb[6].mxu1 %vm611_vm1, %v733_v26  ;;  %v1358_v26 = vld [vmem:[#allocation6 + $0x118] sm:$0xff]  ;;  %v2043_v31 = vld [vmem:[#allocation6 + $0x270] sm:$0xf] }
 0x12e   : > { %936 = vmatprep.mubr.f32.mxu1 %v8754_v32  ;;  %6853 = vmatpush1.bf16.msk.msra.mxu1 %vm9165_vm3, %v6851_v39  ;;  %v6904_v29 = vpack.c.bf16 %v1362_v27, %v1358_v26  ;;  %v6911_v39 = vpack.c.bf16 %v1369_v38, %v1365_v37  ;;  %v2044_v25 = vld [vmem:[#allocation6 + $0x278] sm:$0xf]  ;;  %v6954_v38 = vpack.c.bf16 %v2034_v34, %v2030_v33 }
 0x12f   : > { %6855 = vmatprep.subr.bf16.mxu1 %v6854_v42  ;;  %v6924_v42 = vpack.c.bf16 %v1697_v41, %v1693_v40  ;;  %v2033_v40 = vld [vmem:[#allocation6 + $0x220] sm:$0xff]  ;;  %v2038_v41 = vld [vmem:[#allocation6 + $0x248] sm:$0xff] }
 0x1f4   : > { %v9204_v43 = vpop.f32.mrb[0].mxu1 }
 0x1f5   : > { %v9206_v44 = vpop.f32.mrb[1].mxu1 }
 0x1f6   : > { %6539 = vmatmul.mubr.msk.f32.vlgmr.msra.gmra.mrb[0].mxu0 %vm611_vm1, %v9206_v44 }
 0x1f7   : > { %1144 = vmatprep.mubr.f32.mxu0 %v8754_v32  ;;  %6887 = vmatpush3.bf16.msra.mxu0 %v9160_v3 }
 0x1f8   : > { %v9212_v47 = vpop.f32.mrb[2].mxu1  ;;  %6890 = vmatprep.subr.msk.bf16.mxu0 %vm9165_vm3, %v9162_v6 }
 0x1f9   : > { %v9217_v49 = vpop.f32.mrb[3].mxu1 }
 0x1fa   : > { %6540 = vmatmul.mubr.msk.f32.gmra.mrb[2].mxu0 %vm611_vm1, %v9204_v43 }
 0x1fb   : > { %1150 = vmatprep.mubr.f32.mxu0 %v8754_v32  ;;  %6893 = vmatpush3.bf16.msk.msra.mxu0 %vm9165_vm3, %v9162_v6 }
 0x1fc   : > { %v9225_v54 = vpop.f32.mrb[4].mxu1  ;;  %6895 = vmatprep.subr.bf16.mxu0 %v6894_v48  ;;  %v1692_v48 = vld [vmem:[#allocation6 + $0x180] sm:$0xff] }
 0x1fd   : > { %v812_v56 = vpop.f32.mrb[5].mxu1 }
 0x1fe   : > { %6527 = vmatmul.mubr.msk.f32.vlgmr.msra.gmra.mrb[8].mxu1 %vm611_vm1, %v812_v56  ;;  %6541 = vmatmul.mubr.msk.f32.gmra.mrb[4].mxu0 %vm611_vm1, %v9217_v49 }
 0x1ff   : > { %942 = vmatprep.mubr.f32.mxu1 %v8754_v32  ;;  %1156 = vmatprep.mubr.f32.mxu0 %v8754_v32 }
 0x200   : > { %v6781_v62 = vpop.f32.mrb[6].mxu1  ;;  %6857 = vmatpush1.bf16.msra.mxu1 %v6856_v55 }
 0x201   : > { %v822_v1 = vpop.f32.mrb[7].mxu1  ;;  %6860 = vmatprep.subr.msk.bf16.mxu1 %vm9165_vm3, %v6858_v57  ;;  %v1700_v57 = vld [vmem:[#allocation6 + $0x1c0] sm:$0xff] }
 0x202   : > { %6528 = vmatmul.mubr.msk.f32.gmra.mrb[10].mxu1 %vm611_vm1, %v9225_v54  ;;  %6542 = vmatmul.mubr.msk.f32.gmra.mrb[6].mxu0 %vm611_vm1, %v9212_v47 }
 0x203   : > { %948 = vmatprep.mubr.f32.mxu1 %v8754_v32  ;;  %6790 = vmatprep.mubr.msk.f32.mxu0 %vm611_vm1, %v1253_v63  ;;  %v6931_v63 = vpack.c.bf16 %v1704_v58, %v1700_v57 }
 0x204   : > { %6863 = vmatpush1.bf16.msk.msra.mxu1 %vm9165_vm3, %v6861_v0 }
 0x205   : > { %6875 = vmatprep.subr.bf16.mxu1 %v6874_v2  ;;  %v6934_v2 = vpack.c.bf16 %v1699_v60, %v1695_v59  ;;  %v2265_v60 = vlaneseq }
 0x206   : > { %6529 = vmatmul.mubr.msk.f32.gmra.mrb[12].mxu1 %vm611_vm1, %v822_v1  ;;  %6791 = vmatmul.mubr.msk.f32.vlgmr.msra.gmra.mrb[8].mxu0 %vm611_vm1, %v1254_v10  ;;  %v1707_v10 = vld [vmem:[#allocation6 + $0x1f8] sm:$0xf] }
 0x207   : > { %954 = vmatprep.mubr.f32.mxu1 %v8754_v32  ;;  %6793 = vmatprep.mubr.msk.f32.mxu0 %vm611_vm1, %v1255_v11  ;;  %v1591_v11 = vld [vmem:[#allocation3 + $0x68] sm:$0xff]  ;;  %v6938_v14 = vpack.c.bf16 %v1707_v10, %v1703_v9 }
 0x208   : > { %6897 = vmatpush1.bf16.msra.mxu0 %v6896_v12  ;;  %v6936_v12 = vpack.c.bf16 %v1698_v8, %v1694_v5 }
 0x209   : > { %6900 = vmatprep.subr.msk.bf16.mxu0 %vm9165_vm3, %v6898_v13  ;;  %v1592_v13 = vld [vmem:[#allocation3 + $0x70] sm:$0xff] }
 0x20a   : > { %6530 = vmatmul.mubr.msk.f32.gmra.mrb[14].mxu1 %vm611_vm1, %v6781_v62  ;;  %6794 = vmatmul.mubr.msk.f32.gmra.mrb[10].mxu0 %vm611_vm1, %v1256_v16  ;;  %v1706_v16 = vld [vmem:[#allocation6 + $0x1f0] sm:$0xf] }
 0x20b   : > { %1025 = vmatprep.mubr.f32.mxu1 %v8754_v32  ;;  %1459 = vmatprep.mubr.f32.mxu0 %v8754_v32  ;;  %v6941_v18 = vpack.c.bf16 %v1706_v16, %v1702_v15 }
 0x20c   : > { %6903 = vmatpush1.bf16.msk.msra.mxu0 %vm9165_vm3, %v6901_v19  ;;  %v2032_v19 = vld [vmem:[#allocation6 + $0x218] sm:$0xff] }
 0x20d   : > { %6925 = vmatprep.subr.bf16.mxu0 %v6924_v42  ;;  %v6964_v21 = vpack.c.bf16 %v2036_v20, %v2032_v19  ;;  %v2042_v42 = vld [vmem:[#allocation6 + $0x268] sm:$0xf] }
 0x20e   : > { %6533 = vmatmul.mubr.msk.f32.vlgmr.msra.gmra.mrb[16].mxu1 %vm611_vm1, %v812_v56  ;;  %v6928_v56 = vpack.c.bf16 %v1705_v51, %v1701_v50  ;;  %v6958_v50 = vpack.c.bf16 %v2042_v42, %v2038_v41  ;;  %v2037_v51 = vld [vmem:[#allocation6 + $0x240] sm:$0xff] }
 0x20f   : > { %1031 = vmatprep.mubr.f32.mxu1 %v8754_v32  ;;  %6877 = vmatpush1.bf16.msra.mxu1 %v6876_v22  ;;  %v2031_v22 = vld [vmem:[#allocation6 + $0x210] sm:$0xff] }
 0x210   : > { %6880 = vmatprep.subr.msk.bf16.mxu1 %vm9165_vm3, %v6878_v23  ;;  %v2035_v23 = vld [vmem:[#allocation6 + $0x230] sm:$0xff] }
 0x211   : > { %v6966_v27 = vpack.c.bf16 %v2035_v23, %v2031_v22 }
 0x212   : > { %6534 = vmatmul.mubr.msk.f32.gmra.mrb[18].mxu1 %vm611_vm1, %v9225_v54 }
 0x213   : > { %1037 = vmatprep.mubr.f32.mxu1 %v8754_v32  ;;  %6883 = vmatpush1.bf16.msk.msra.mxu1 %vm9165_vm3, %v6881_v28 }
 0x214   : > { %6905 = vmatprep.subr.bf16.mxu1 %v6904_v29  ;;  %v6968_v29 = vpack.c.bf16 %v2044_v25, %v2040_v24 }
 0x216   : > { %6535 = vmatmul.mubr.msk.f32.gmra.mrb[20].mxu1 %vm611_vm1, %v822_v1 }
 0x217   : > { %1043 = vmatprep.mubr.f32.mxu1 %v8754_v32 }
 0x21a   : > { %6536 = vmatmul.mubr.msk.f32.gmra.mrb[22].mxu1 %vm611_vm1, %v6781_v62 }
 0x21b   : > { %1227 = vmatprep.mubr.f32.mxu1 %v8754_v32 }
 0x21e   : > { %6545 = vmatmul.mubr.msk.f32.vlgmr.msra.gmra.mrb[16].mxu1 %vm611_vm1, %v9206_v44 }
 0x21f   : > { %1233 = vmatprep.mubr.f32.mxu1 %v8754_v32  ;;  %6907 = vmatpush1.bf16.msra.mxu1 %v6906_v35 }
 0x220   : > { %6910 = vmatprep.subr.msk.bf16.mxu1 %vm9165_vm3, %v6908_v36  ;;  %v6971_v36 = vpack.c.bf16 %v2043_v31, %v2039_v30 }
 0x222   : > { %6546 = vmatmul.mubr.msk.f32.gmra.mrb[18].mxu1 %vm611_vm1, %v9204_v43 }
 0x223   : > { %1239 = vmatprep.mubr.f32.mxu1 %v8754_v32  ;;  %6913 = vmatpush1.bf16.msk.msra.mxu1 %vm9165_vm3, %v6911_v39  ;;  %v2029_v39 = vld [vmem:[#allocation6 + $0x200] sm:$0xff] }
 0x224   : > { %6915 = vmatprep.subr.bf16.mxu1 %v9160_v3 }
 0x226   : > { %6547 = vmatmul.mubr.msk.f32.gmra.mrb[20].mxu1 %vm611_vm1, %v9217_v49  ;;  %v1696_v49 = vld [vmem:[#allocation6 + $0x1a0] sm:$0xff] }
 0x227   : > { %1245 = vmatprep.mubr.f32.mxu1 %v8754_v32  ;;  %v6926_v53 = vpack.c.bf16 %v1696_v49, %v1692_v48  ;;  %v6956_v48 = vpack.c.bf16 %v2033_v40, %v2029_v39  ;;  %v1929_v49 = vld [vmem:[#allocation3 + $0x90] sm:$0xff] }
 0x22a   : > { %6548 = vmatmul.mubr.msk.f32.gmra.mrb[22].mxu1 %vm611_vm1, %v9212_v47 }
 0x22b   : > { %1548 = vmatprep.mubr.f32.mxu1 %v8754_v32 }
 0x2d1   : > { %v9284_v43 = vpop.f32.mrb[8].mxu1 }
 0x2d2   : > { %v9286_v44 = vpop.f32.mrb[9].mxu1 }
 0x2d5   : > { %v9288_v45 = vpop.f32.mrb[10].mxu1 }
 0x2d6   : > { %v9290_v46 = vpop.f32.mrb[11].mxu1 }
 0x2d9   : > { %v6792_v52 = vpop.f32.mrb[8].mxu0  ;;  %v9292_v47 = vpop.f32.mrb[12].mxu1 }
 0x2da   : > { %v1335_v54 = vpop.f32.mrb[9].mxu0  ;;  %v9294_v55 = vpop.f32.mrb[13].mxu1 }
 0x2db   : > { %6556 = vmatmul.mubr.msk.f32.vlgmr.msra.gmra.mrb[0].mxu0 %vm611_vm1, %v1335_v54  ;;  %6562 = vmatmul.mubr.msk.f32.vlgmr.msra.gmra.mrb[16].mxu1 %vm611_vm1, %v1335_v54 }
 0x2dc   : > { %1465 = vmatprep.mubr.f32.mxu0 %v8754_v32  ;;  %1554 = vmatprep.mubr.f32.mxu1 %v8754_v32 }
 0x2dd   : > { %v6795_v61 = vpop.f32.mrb[10].mxu0  ;;  %6917 = vmatpush3.bf16.msra.mxu1 %v9160_v3  ;;  %v9301_v62 = vpop.f32.mrb[14].mxu1  ;;  %6927 = vmatpush1.bf16.msra.mxu0 %v6926_v53  ;;  %v1930_v53 = vld [vmem:[#allocation3 + $0x98] sm:$0xf] }
 0x2de   : > { %v1345_v0 = vpop.f32.mrb[11].mxu0  ;;  %6920 = vmatprep.subr.msk.bf16.mxu1 %vm9165_vm3, %v9162_v6  ;;  %v9306_v1 = vpop.f32.mrb[15].mxu1  ;;  %6930 = vmatprep.subr.msk.bf16.mxu0 %vm9165_vm3, %v6928_v56 }
 0x2df   : > { %6557 = vmatmul.mubr.msk.f32.gmra.mrb[2].mxu0 %vm611_vm1, %v6792_v52  ;;  %6563 = vmatmul.mubr.msk.f32.gmra.mrb[18].mxu1 %vm611_vm1, %v6792_v52  ;;  %v2041_v52 = vld [vmem:[#allocation6 + $0x260] sm:$0xf] }
 0x2e0   : > { %1471 = vmatprep.mubr.f32.mxu0 %v8754_v32  ;;  %1560 = vmatprep.mubr.f32.mxu1 %v8754_v32  ;;  %v6961_v54 = vpack.c.bf16 %v2041_v52, %v2037_v51 }
 0x2e1   : > { %6923 = vmatpush3.bf16.msk.msra.mxu1 %vm9165_vm3, %v9162_v6  ;;  %6933 = vmatpush1.bf16.msk.msra.mxu0 %vm9165_vm3, %v6931_v63 }
 0x2e2   : > { %6935 = vmatprep.subr.bf16.mxu1 %v6934_v2  ;;  %6945 = vmatprep.subr.bf16.mxu0 %v9160_v3 }
 0x2e3   : > { %6558 = vmatmul.mubr.msk.f32.gmra.mrb[4].mxu0 %vm611_vm1, %v1345_v0  ;;  %6564 = vmatmul.mubr.msk.f32.gmra.mrb[20].mxu1 %vm611_vm1, %v1345_v0  ;;  %v2263_v0 = vld [vmem:[#allocation8] sm:$0xf] }
 0x2e4   : > { %1477 = vmatprep.mubr.f32.mxu0 %v8754_v32  ;;  %1566 = vmatprep.mubr.f32.mxu1 %v8754_v32 }
 0x2e7   : > { %6559 = vmatmul.mubr.msk.f32.gmra.mrb[6].mxu0 %vm611_vm1, %v6795_v61  ;;  %6565 = vmatmul.mubr.msk.f32.gmra.mrb[22].mxu1 %vm611_vm1, %v6795_v61  ;;  %v9387_v61 = vshrl.u32 %v2265_v60, 7 }
 0x2e8   : > { %6804 = vmatprep.mubr.msk.f32.mxu1 %vm611_vm1, %v1590_v4  ;;  %1796 = vmatprep.mubr.f32.mxu0 %v8754_v32 }
 0x2e9   : > { %v2275_v63 = vsub.s32 2, %v9387_v61  ;;  %v2279_v2 = vsub.s32 3, %v9387_v61  ;;  %v2267_v4 = vsub.s32 0, %v9387_v61  ;;  %v2271_v5 = vsub.s32 1, %v9387_v61 }
 0x2eb   : > { %6805 = vmatmul.mubr.msk.f32.vlgmr.msra.gmra.mrb[24].mxu1 %vm611_vm1, %v1591_v11  ;;  %v2276_v8 = vrot.slane %v2263_v0, %v2275_v63  ;;  %v2280_v11 = vrot.slane %v2263_v0, %v2279_v2 }
 0x2ec   : > { %6807 = vmatprep.mubr.msk.f32.mxu1 %vm611_vm1, %v1592_v13  ;;  %6937 = vmatpush1.bf16.msra.mxu1 %v6936_v12  ;;  %v2268_v13 = vrot.slane %v2263_v0, %v2267_v4 }
 0x2ed   : > { %6940 = vmatprep.subr.msk.bf16.mxu1 %vm9165_vm3, %v6938_v14 }
 0x2ef   : > { %6808 = vmatmul.mubr.msk.f32.gmra.mrb[26].mxu1 %vm611_vm1, %v1593_v17  ;;  %v2272_v17 = vrot.slane %v2263_v0, %v2271_v5 }
 0x2f0   : > { %6943 = vmatpush1.bf16.msk.msra.mxu1 %vm9165_vm3, %v6941_v18  ;;  %1885 = vmatprep.mubr.f32.mxu1 %v8754_v32 }
 0x2f1   : > { %6965 = vmatprep.subr.bf16.mxu1 %v6964_v21 }
 0x3be   : > { %v6806_v26 = vpop.f32.mrb[24].mxu1 }
 0x3bf   : > { %v1672_v28 = vpop.f32.mrb[25].mxu1 }
 0x3c0   : > { %6573 = vmatmul.mubr.msk.f32.vlgmr.msra.gmra.mrb[0].mxu0 %vm611_vm1, %v1672_v28  ;;  %6579 = vmatmul.mubr.msk.f32.vlgmr.msra.gmra.mrb[16].mxu1 %vm611_vm1, %v1672_v28 }
 0x3c1   : > { %1802 = vmatprep.mubr.f32.mxu0 %v8754_v32  ;;  %1891 = vmatprep.mubr.f32.mxu1 %v8754_v32 }
 0x3c2   : > { %v6809_v35 = vpop.f32.mrb[26].mxu1  ;;  %6947 = vmatpush3.bf16.msra.mxu0 %v9160_v3  ;;  %6967 = vmatpush1.bf16.msra.mxu1 %v6966_v27  ;;  %v1927_v3 = vld [vmem:[#allocation3 + $0x80] sm:$0xff] }
 0x3c3   : > { %v1682_v37 = vpop.f32.mrb[27].mxu1  ;;  %6950 = vmatprep.subr.msk.bf16.mxu0 %vm9165_vm3, %v9162_v6  ;;  %6970 = vmatprep.subr.msk.bf16.mxu1 %vm9165_vm3, %v6968_v29 }
 0x3c4   : > { %6574 = vmatmul.mubr.msk.f32.gmra.mrb[2].mxu0 %vm611_vm1, %v6806_v26  ;;  %6580 = vmatmul.mubr.msk.f32.gmra.mrb[18].mxu1 %vm611_vm1, %v6806_v26 }
 0x3c5   : > { %1808 = vmatprep.mubr.f32.mxu0 %v8754_v32  ;;  %1897 = vmatprep.mubr.f32.mxu1 %v8754_v32 }
 0x3c6   : > { %6953 = vmatpush3.bf16.msk.msra.mxu0 %vm9165_vm3, %v9162_v6  ;;  %6973 = vmatpush1.bf16.msk.msra.mxu1 %vm9165_vm3, %v6971_v36  ;;  %v1928_v6 = vld [vmem:[#allocation3 + $0x88] sm:$0xff] }
 0x3c7   : > { %6955 = vmatprep.subr.bf16.mxu0 %v6954_v38 }
 0x3c8   : > { %6575 = vmatmul.mubr.msk.f32.gmra.mrb[4].mxu0 %vm611_vm1, %v1682_v37  ;;  %6581 = vmatmul.mubr.msk.f32.gmra.mrb[20].mxu1 %vm611_vm1, %v1682_v37 }
 0x3c9   : > { %1814 = vmatprep.mubr.f32.mxu0 %v8754_v32  ;;  %1903 = vmatprep.mubr.f32.mxu1 %v8754_v32 }
 0x3cc   : > { %6576 = vmatmul.mubr.msk.f32.gmra.mrb[6].mxu0 %vm611_vm1, %v6809_v35  ;;  %6582 = vmatmul.mubr.msk.f32.gmra.mrb[22].mxu1 %vm611_vm1, %v6809_v35 }
 0x3cd   : > { %6818 = vmatprep.mubr.msk.f32.mxu0 %vm611_vm1, %v1927_v3  ;;  %2222 = vmatprep.mubr.f32.mxu1 %v8754_v32 }
 0x3d0   : > { %6819 = vmatmul.mubr.msk.f32.vlgmr.msra.gmra.mrb[12].mxu0 %vm611_vm1, %v1928_v6 }
 0x3d1   : > { %6821 = vmatprep.mubr.msk.f32.mxu0 %vm611_vm1, %v1929_v49  ;;  %6957 = vmatpush1.bf16.msra.mxu0 %v6956_v48 }
 0x3d2   : > { %6960 = vmatprep.subr.msk.bf16.mxu0 %vm9165_vm3, %v6958_v50 }
 0x3d4   : > { %6822 = vmatmul.mubr.msk.f32.gmra.mrb[14].mxu0 %vm611_vm1, %v1930_v53 }
 0x3d5   : > { %6963 = vmatpush1.bf16.msk.msra.mxu0 %vm9165_vm3, %v6961_v54  ;;  %2133 = vmatprep.mubr.f32.mxu0 %v8754_v32 }
 0x4a3   : > { %v6820_v56 = vpop.f32.mrb[12].mxu0 }
 0x4a4   : > { %v2009_v57 = vpop.f32.mrb[13].mxu0 }
 0x4a5   : > { %6590 = vmatmul.mubr.msk.f32.vlgmr.msra.gmra.mrb[0].mxu0 %vm611_vm1, %v2009_v57  ;;  %6596 = vmatmul.mubr.msk.f32.vlgmr.msra.gmra.mrb[16].mxu1 %vm611_vm1, %v2009_v57 }
 0x4a6   : > { %2139 = vmatprep.mubr.f32.mxu0 %v8754_v32  ;;  %2228 = vmatprep.mubr.f32.mxu1 %v8754_v32 }
 0x4a7   : > { %v6823_v58 = vpop.f32.mrb[14].mxu0 }
 0x4a8   : > { %v2019_v59 = vpop.f32.mrb[15].mxu0 }
 0x4a9   : > { %6591 = vmatmul.mubr.msk.f32.gmra.mrb[2].mxu0 %vm611_vm1, %v6820_v56  ;;  %6597 = vmatmul.mubr.msk.f32.gmra.mrb[18].mxu1 %vm611_vm1, %v6820_v56 }
 0x4aa   : > { %2145 = vmatprep.mubr.f32.mxu0 %v8754_v32  ;;  %2234 = vmatprep.mubr.f32.mxu1 %v8754_v32 }
 0x4ad   : > { %6592 = vmatmul.mubr.msk.f32.gmra.mrb[4].mxu0 %vm611_vm1, %v2019_v59  ;;  %6598 = vmatmul.mubr.msk.f32.gmra.mrb[20].mxu1 %vm611_vm1, %v2019_v59 }
 0x4ae   : > { %2151 = vmatprep.mubr.f32.mxu0 %v8754_v32  ;;  %2240 = vmatprep.mubr.f32.mxu1 %v8754_v32 }
 0x4b1   : > { %6593 = vmatmul.mubr.msk.f32.gmra.mrb[6].mxu0 %vm611_vm1, %v6823_v58  ;;  %6599 = vmatmul.mubr.msk.f32.gmra.mrb[22].mxu1 %vm611_vm1, %v6823_v58 }
 0x4b2   : > { %2478 = vmatprep.mubr.f32.mxu0 %v8754_v32  ;;  %2401 = vmatprep.mubr.f32.mxu1 %v8754_v32 }
 0x578   : > { %v2135_v9 = vpop.f32.mrb[0].mxu0  ;;  %v2224_v10 = vpop.f32.mrb[16].mxu1 }
 0x579   : > { %v8118_v12 = vadd.f32 %v2135_v9, %v9284_v43  ;;  %v2137_v14 = vpop.f32.mrb[1].mxu0  ;;  %v2226_v15 = vpop.f32.mrb[17].mxu1  ;;  %v2287_v18 = vadd.f32 %v2276_v8, %v2224_v10 }
 0x57a   : > { %v8119_v16 = vadd.f32 %v2137_v14, %v9286_v44  ;;  %v2288_v19 = vadd.f32 %v2280_v11, %v2226_v15 }
 0x57b   : > { %v2285_v22 = vadd.f32 %v8118_v12, %v2268_v13  ;;  %v2303_v29 = vmax.f32 %v2287_v18, 0.0 }
 0x57c   : > { %v2141_v20 = vpop.f32.mrb[2].mxu0  ;;  %v2230_v21 = vpop.f32.mrb[18].mxu1  ;;  %v2286_v26 = vadd.f32 %v8119_v16, %v2272_v17  ;;  %v2304_v31 = vmax.f32 %v2288_v19, 0.0 }
 0x57d   : > { %v8120_v23 = vadd.f32 %v2141_v20, %v9288_v45  ;;  %v2291_v24 = vadd.f32 %v2276_v8, %v2230_v21  ;;  %v2143_v25 = vpop.f32.mrb[3].mxu0  ;;  %v2232_v43 = vpop.f32.mrb[19].mxu1  ;;  %v2301_v37 = vmax.f32 %v2285_v22, 0.0 }
 0x57e   : > { %v8121_v27 = vadd.f32 %v2143_v25, %v9290_v46  ;;  %v2292_v28 = vadd.f32 %v2280_v11, %v2232_v43  ;;  %v2302_v41 = vmax.f32 %v2286_v26, 0.0  ;;  %v2936_v25 = vld [vmem:[#allocation9 + $0x380] sm:$0xff]  ;;  %v2938_v43 = vld [vmem:[#allocation9 + $0x390] sm:$0xff] }
 0x57f   : > { %v2289_v30 = vadd.f32 %v8120_v23, %v2268_v13  ;;  %v2307_v44 = vmax.f32 %v2291_v24, 0.0  ;;  %v2665_v23 = vld [vmem:[#allocation9 + $0x18] sm:$0xff] }
 0x580   : > { %v2290_v33 = vadd.f32 %v8121_v27, %v2272_v17  ;;  %v2308_v34 = vmax.f32 %v2292_v28, 0.0  ;;  %v2147_v35 = vpop.f32.mrb[4].mxu0  ;;  %v2236_v36 = vpop.f32.mrb[20].mxu1  ;;  %v2318_v26 = vld [vmem:[%s9831_s4 + $0x8] sm:$0x3f]  ;;  %v2941_v27 = vld [vmem:[#allocation9 + $0x3a8] sm:$0xff] }
 0x581   : > { %v2305_v38 = vmax.f32 %v2289_v30, 0.0  ;;  %v6986_v3 = vpack.c.bf16 %v2307_v44, %v2303_v29  ;;  %v8122_v45 = vadd.f32 %v2147_v35, %v9292_v47  ;;  %v2149_v39 = vpop.f32.mrb[5].mxu0  ;;  %v2238_v40 = vpop.f32.mrb[21].mxu1  ;;  %v2295_v49 = vadd.f32 %v2276_v8, %v2236_v36  ;;  %v2943_v28 = vld [vmem:[#allocation9 + $0x3b8] sm:$0xff]  ;;  %v2662_v30 = vld [vmem:[#allocation9] sm:$0xff]  ;;  %v2664_v44 = vld [vmem:[#allocation9 + $0x10] sm:$0xff] }
 0x582   : > { %v2306_v42 = vmax.f32 %v2290_v33, 0.0  ;;  %v6984_v6 = vpack.c.bf16 %v2308_v34, %v2304_v31  ;;  %v8123_v46 = vadd.f32 %v2149_v39, %v9294_v55  ;;  %v2296_v50 = vadd.f32 %v2280_v11, %v2238_v40  ;;  %v2667_v33 = vld [vmem:[#allocation9 + $0x28] sm:$0xff]  ;;  %v2669_v34 = vld [vmem:[#allocation9 + $0x38] sm:$0xff]  ;;  %v2940_v36 = vld [vmem:[#allocation9 + $0x3a0] sm:$0xff] }
 0x583   : > { %v6976_v48 = vpack.c.bf16 %v2305_v38, %v2301_v37  ;;  %v2293_v54 = vadd.f32 %v8122_v45, %v2268_v13  ;;  %v2311_v55 = vmax.f32 %v2295_v49, 0.0  ;;  %v7128_v31 = vpack.c.bf16 %v2938_v43, %v2936_v25  ;;  %v2942_v37 = vld [vmem:[#allocation9 + $0x3b0] sm:$0xff]  ;;  %v6608_v38 = vld [vmem:[%s9831_s4 + $0x10] sm:$0xff]  ;;  %v2945_v45 = vld [vmem:[#allocation9 + $0x3c8] sm:$0xff] }
 0x584   : > { %v2153_v51 = vpop.f32.mrb[6].mxu0  ;;  %v2242_v52 = vpop.f32.mrb[22].mxu1  ;;  %6985 = vmatprep.subr.bf16.mxu0 %v6984_v6  ;;  %v6974_v53 = vpack.c.bf16 %v2306_v42, %v2302_v41  ;;  %v2294_v59 = vadd.f32 %v8123_v46, %v2272_v17  ;;  %v2312_v12 = vmax.f32 %v2296_v50, 0.0  ;;  %v7130_v35 = vpack.c.bf16 %v2943_v28, %v2941_v27  ;;  %v2947_v39 = vld [vmem:[#allocation9 + $0x3d8] sm:$0xff]  ;;  %v2666_v41 = vld [vmem:[#allocation9 + $0x20] sm:$0xff]  ;;  %v2668_v42 = vld [vmem:[#allocation9 + $0x30] sm:$0xff] }
 0x585   : > { %v8124_v56 = vadd.f32 %v2153_v51, %v9301_v62  ;;  %v2299_v57 = vadd.f32 %v2276_v8, %v2242_v52  ;;  %v2155_v58 = vpop.f32.mrb[7].mxu0  ;;  %v2244_v47 = vpop.f32.mrb[23].mxu1  ;;  %6987 = vmatpush1.bf16.msra.mxu0 %v6986_v3  ;;  %v2309_v16 = vmax.f32 %v2293_v54, 0.0  ;;  %v7018_v40 = vpack.c.bf16 %v2669_v34, %v2667_v33  ;;  %v2673_v46 = vld [vmem:[#allocation9 + $0x58] sm:$0xff]  ;;  %v2944_v49 = vld [vmem:[#allocation9 + $0x3c0] sm:$0xff]  ;;  %v2946_v50 = vld [vmem:[#allocation9 + $0x3d0] sm:$0xff] }
 0x586   : > { %v8125_v60 = vadd.f32 %v2155_v58, %v9306_v1  ;;  %v2300_v0 = vadd.f32 %v2280_v11, %v2244_v47  ;;  %6975 = vmatprep.subr.bf16.mxu1 %v6974_v53  ;;  %v2310_v62 = vmax.f32 %v2294_v59, 0.0  ;;  %v2317_v1 = vld [vmem:[%s9831_s4] sm:$0xff]  ;;  %v7132_v7 = vpack.c.bf16 %v2942_v37, %v2940_v36  ;;  %v6609_v51 = vld [vmem:[%s9831_s4 + $0x18] sm:$0x3f]  ;;  %v2951_v54 = vld [vmem:[#allocation9 + $0x3f8] sm:$0xff] }
 0x587   : > { %v2297_v9 = vadd.f32 %v8124_v56, %v2268_v13  ;;  %v2315_v10 = vmax.f32 %v2299_v57, 0.0  ;;  %6977 = vmatpush1.bf16.msra.mxu1 %v6976_v48  ;;  %v2937_v11 = vld [vmem:[#allocation9 + $0x388] sm:$0xff]  ;;  %v2939_v13 = vld [vmem:[#allocation9 + $0x398] sm:$0xff]  ;;  %v7020_v52 = vpack.c.bf16 %v2668_v42, %v2666_v41  ;;  %v2670_v57 = vld [vmem:[#allocation9 + $0x40] sm:$0xff]  ;;  %v7136_v47 = vpack.c.bf16 %v2946_v50, %v2944_v49 }
 0x588   : > { %v2298_v14 = vadd.f32 %v8125_v60, %v2272_v17  ;;  %v2316_v15 = vmax.f32 %v2300_v0, 0.0  ;;  %v2663_v17 = vld [vmem:[#allocation9 + $0x8] sm:$0xff]  ;;  %v7126_v24 = vpack.c.bf16 %v2939_v13, %v2937_v11  ;;  %v2672_v58 = vld [vmem:[#allocation9 + $0x50] sm:$0xff]  ;;  %v2677_v60 = vld [vmem:[#allocation9 + $0x78] sm:$0xff] }
 0x589   : > { %v2313_v18 = vmax.f32 %v2297_v9, 0.0  ;;  %v6991_v19 = vpack.c.bf16 %v2315_v10, %v2311_v55  ;;  %v7014_v29 = vpack.c.bf16 %v2665_v23, %v2663_v17  ;;  %v2675_v59 = vld [vmem:[#allocation9 + $0x68] sm:$0xff]  ;;  %v2948_v55 = vld [vmem:[#allocation9 + $0x3e0] sm:$0xff]  ;;  %v2950_v9 = vld [vmem:[#allocation9 + $0x3f0] sm:$0xff]  ;;  %v7024_v10 = vpack.c.bf16 %v2672_v58, %v2670_v57 }
 0x58a   : > { %v2314_v8 = vmax.f32 %v2298_v14, 0.0  ;;  %v6988_v20 = vpack.c.bf16 %v2316_v15, %v2312_v12  ;;  %v2953_v12 = vld [vmem:[#allocation9 + $0x408] sm:$0xff]  ;;  %v2955_v14 = vld [vmem:[#allocation9 + $0x418] sm:$0xff]  ;;  %v7026_v15 = vpack.c.bf16 %v2677_v60, %v2675_v59  ;;  %v2678_v23 = vld [vmem:[#allocation9 + $0x80] sm:$0xff] }
 0x58b   : > { %v6981_v21 = vpack.c.bf16 %v2313_v18, %v2309_v16  ;;  %v2674_v16 = vld [vmem:[#allocation9 + $0x60] sm:$0xff]  ;;  %v2676_v18 = vld [vmem:[#allocation9 + $0x70] sm:$0xff]  ;;  %v2957_v11 = vld [vmem:[#allocation9 + $0x428] sm:$0xff] }
 0x58c   : > { %v6978_v22 = vpack.c.bf16 %v2314_v8, %v2310_v62  ;;  %6990 = vmatprep.subr.msk.bf16.mxu0 %vm9165_vm3, %v6988_v20  ;;  %v2679_v62 = vld [vmem:[#allocation9 + $0x88] sm:$0xff]  ;;  %v2681_v8 = vld [vmem:[#allocation9 + $0x98] sm:$0xff]  ;;  %v2956_v28 = vld [vmem:[#allocation9 + $0x420] sm:$0xff] }
 0x58d   : > { %6993 = vmatpush1.bf16.msk.msra.mxu0 %vm9165_vm3, %v6991_v19  ;;  %v2959_v13 = vld [vmem:[#allocation9 + $0x438] sm:$0xff]  ;;  %v7030_v17 = vpack.c.bf16 %v2681_v8, %v2679_v62  ;;  %v2683_v43 = vld [vmem:[#allocation9 + $0xa8] sm:$0xff]  ;;  %v2682_v34 = vld [vmem:[#allocation9 + $0xa0] sm:$0xff] }
 0x58e   : > { %6980 = vmatprep.subr.msk.bf16.mxu1 %vm9165_vm3, %v6978_v22  ;;  %7005 = vmatprep.subr.bf16.mxu0 %v6984_v6  ;;  %v2671_v6 = vld [vmem:[#allocation9 + $0x48] sm:$0xff]  ;;  %v7146_v27 = vpack.c.bf16 %v2959_v13, %v2957_v11  ;;  %v2967_v42 = vld [vmem:[#allocation9 + $0x478] sm:$0xff]  ;;  %v2692_v59 = vld [vmem:[#allocation9 + $0xf0] sm:$0xff] }
 0x58f   : > { %6983 = vmatpush1.bf16.msk.msra.mxu1 %vm9165_vm3, %v6981_v21  ;;  %v7022_v56 = vpack.c.bf16 %v2673_v46, %v2671_v6  ;;  %v2687_v37 = vld [vmem:[#allocation9 + $0xc8] sm:$0xff]  ;;  %v2686_v6 = vld [vmem:[#allocation9 + $0xc0] sm:$0xff]  ;;  %v2688_v46 = vld [vmem:[#allocation9 + $0xd0] sm:$0xff] }
 0x590   : > { %6995 = vmatprep.subr.bf16.mxu1 %v6974_v53  ;;  %6606 = vmatmul.mubr.msk.f32.vlgmr.msra.gmra.mrb[16].mxu0 %vm611_vm1, %v2317_v1  ;;  %v2949_v53 = vld [vmem:[#allocation9 + $0x3e8] sm:$0xff]  ;;  %v2693_v50 = vld [vmem:[#allocation9 + $0xf8] sm:$0xff]  ;;  %v2696_v62 = vld [vmem:[#allocation9 + $0x110] sm:$0xff] }
 0x591   : > { %7007 = vmatpush1.bf16.msra.mxu0 %v6986_v3  ;;  %2484 = vmatprep.mubr.f32.mxu0 %v8754_v32  ;;  %v7016_v3 = vpack.c.bf16 %v2664_v44, %v2662_v30  ;;  %v7138_v0 = vpack.c.bf16 %v2951_v54, %v2949_v53  ;;  %v2961_v44 = vld [vmem:[#allocation9 + $0x448] sm:$0xff]  ;;  %v2966_v53 = vld [vmem:[#allocation9 + $0x470] sm:$0xff]  ;;  %v7040_v54 = vpack.c.bf16 %v2688_v46, %v2686_v6  ;;  %v2971_v57 = vld [vmem:[#allocation9 + $0x498] sm:$0xff] }
 0x592   : > { %6602 = vmatmul.mubr.msk.f32.vlgmr.msra.gmra.mrb[28].mxu1 %vm611_vm1, %v2317_v1  ;;  %7010 = vmatprep.subr.msk.bf16.mxu0 %vm9165_vm3, %v6988_v20  ;;  %v7142_v20 = vpack.c.bf16 %v2955_v14, %v2953_v12  ;;  %v7028_v1 = vpack.c.bf16 %v2676_v18, %v2674_v16  ;;  %v2965_v41 = vld [vmem:[#allocation9 + $0x468] sm:$0xff]  ;;  %v2970_v12 = vld [vmem:[#allocation9 + $0x490] sm:$0xff]  ;;  %v2975_v16 = vld [vmem:[#allocation9 + $0x4b8] sm:$0xff] }
 0x593   : > { %6997 = vmatpush1.bf16.msra.mxu1 %v6976_v48  ;;  %2407 = vmatprep.mubr.f32.mxu1 %v8754_v32  ;;  %v7134_v48 = vpack.c.bf16 %v2947_v39, %v2945_v45  ;;  %v2960_v45 = vld [vmem:[#allocation9 + $0x440] sm:$0xff]  ;;  %v2962_v39 = vld [vmem:[#allocation9 + $0x450] sm:$0xff]  ;;  %v2691_v49 = vld [vmem:[#allocation9 + $0xe8] sm:$0xff] }
 0x594   : > { %7000 = vmatprep.subr.msk.bf16.mxu1 %vm9165_vm3, %v6978_v22  ;;  %6607 = vmatmul.mubr.msk.f32.gmra.mrb[18].mxu0 %vm611_vm1, %v2318_v26  ;;  %v2954_v22 = vld [vmem:[#allocation9 + $0x410] sm:$0xff]  ;;  %v7042_v58 = vpack.c.bf16 %v2693_v50, %v2691_v49  ;;  %v2987_v6 = vld [vmem:[#allocation9 + $0x518] sm:$0xff] }
 0x595   : > { %7013 = vmatpush1.bf16.msk.msra.mxu0 %vm9165_vm3, %v6991_v19  ;;  %2641 = vmatprep.mubr.f32.mxu0 %v8754_v32  ;;  %v7140_v19 = vpack.c.bf16 %v2950_v9, %v2948_v55  ;;  %v2697_v55 = vld [vmem:[#allocation9 + $0x118] sm:$0xff]  ;;  %v2974_v11 = vld [vmem:[#allocation9 + $0x4b0] sm:$0xff] }
 0x596   : > { %6603 = vmatmul.mubr.msk.f32.gmra.mrb[30].mxu1 %vm611_vm1, %v2318_v26  ;;  %7127 = vmatprep.subr.bf16.mxu0 %v7126_v24  ;;  %v2680_v24 = vld [vmem:[#allocation9 + $0x90] sm:$0xff]  ;;  %v2685_v26 = vld [vmem:[#allocation9 + $0xb8] sm:$0xff] }
 0x597   : > { %7003 = vmatpush1.bf16.msk.msra.mxu1 %vm9165_vm3, %v6981_v21  ;;  %2564 = vmatprep.mubr.f32.mxu1 %v8754_v32  ;;  %v2952_v21 = vld [vmem:[#allocation9 + $0x400] sm:$0xff]  ;;  %v7032_v30 = vpack.c.bf16 %v2680_v24, %v2678_v23  ;;  %v7034_v33 = vpack.c.bf16 %v2685_v26, %v2683_v43  ;;  %v2979_v23 = vld [vmem:[#allocation9 + $0x4d8] sm:$0xff]  ;;  %v2700_v43 = vld [vmem:[#allocation9 + $0x130] sm:$0xff] }
 0x598   : > { %6616 = vmatmul.mubr.msk.f32.vlgmr.msra.gmra.mrb[20].mxu0 %vm611_vm1, %v6608_v38  ;;  %7015 = vmatprep.subr.bf16.mxu1 %v7014_v29  ;;  %v7144_v25 = vpack.c.bf16 %v2954_v22, %v2952_v21  ;;  %v2958_v29 = vld [vmem:[#allocation9 + $0x430] sm:$0xff]  ;;  %v2701_v21 = vld [vmem:[#allocation9 + $0x138] sm:$0xff] }
 0x599   : > { %2647 = vmatprep.mubr.f32.mxu0 %v8754_v32  ;;  %7129 = vmatpush1.bf16.msra.mxu0 %v7128_v31  ;;  %v2963_v31 = vld [vmem:[#allocation9 + $0x458] sm:$0xff]  ;;  %v7148_v36 = vpack.c.bf16 %v2958_v29, %v2956_v28  ;;  %v2708_v49 = vld [vmem:[#allocation9 + $0x170] sm:$0xff] }
 0x59a   : > { %6612 = vmatmul.mubr.msk.f32.vlgmr.msra.gmra.mrb[32].mxu1 %vm611_vm1, %v6608_v38  ;;  %7131 = vmatprep.subr.bf16.mxu0 %v7130_v35  ;;  %v2684_v35 = vld [vmem:[#allocation9 + $0xb0] sm:$0xff]  ;;  %v2689_v38 = vld [vmem:[#allocation9 + $0xd8] sm:$0xff] }
 0x59b   : > { %2570 = vmatprep.mubr.f32.mxu1 %v8754_v32  ;;  %7017 = vmatpush1.bf16.msra.mxu1 %v7016_v3  ;;  %v7150_v3 = vpack.c.bf16 %v2963_v31, %v2961_v44  ;;  %v2705_v28 = vld [vmem:[#allocation9 + $0x158] sm:$0xff]  ;;  %v2978_v44 = vld [vmem:[#allocation9 + $0x4d0] sm:$0xff] }
 0x59c   : > { %6617 = vmatmul.mubr.msk.f32.gmra.mrb[22].mxu0 %vm611_vm1, %v6609_v51  ;;  %7019 = vmatprep.subr.bf16.mxu1 %v7018_v40  ;;  %v7036_v40 = vpack.c.bf16 %v2684_v35, %v2682_v34  ;;  %v2983_v34 = vld [vmem:[#allocation9 + $0x4f8] sm:$0xff] }
 0x59d   : > { %7133 = vmatpush1.bf16.msra.mxu0 %v7132_v7  ;;  %v7038_v7 = vpack.c.bf16 %v2689_v38, %v2687_v37  ;;  %v2704_v37 = vld [vmem:[#allocation9 + $0x150] sm:$0xff] }
 0x59e   : > { %6613 = vmatmul.mubr.msk.f32.gmra.mrb[34].mxu1 %vm611_vm1, %v6609_v51  ;;  %7135 = vmatprep.subr.bf16.mxu0 %v7134_v48  ;;  %v7152_v48 = vpack.c.bf16 %v2962_v39, %v2960_v45  ;;  %v7154_v51 = vpack.c.bf16 %v2967_v42, %v2965_v41  ;;  %v2709_v45 = vld [vmem:[#allocation9 + $0x178] sm:$0xff]  ;;  %v2982_v41 = vld [vmem:[#allocation9 + $0x4f0] sm:$0xff] }
 0x59f   : > { %7021 = vmatpush1.bf16.msra.mxu1 %v7020_v52  ;;  %v2964_v52 = vld [vmem:[#allocation9 + $0x460] sm:$0xff] }
 0x5a0   : > { %7023 = vmatprep.subr.bf16.mxu1 %v7022_v56  ;;  %v2969_v56 = vld [vmem:[#allocation9 + $0x488] sm:$0xff]  ;;  %v7156_v60 = vpack.c.bf16 %v2966_v53, %v2964_v52  ;;  %v2713_v52 = vld [vmem:[#allocation9 + $0x198] sm:$0xff] }
 0x5a1   : > { %7137 = vmatpush1.bf16.msra.mxu0 %v7136_v47  ;;  %v2690_v47 = vld [vmem:[#allocation9 + $0xe0] sm:$0xff]  ;;  %v7158_v9 = vpack.c.bf16 %v2971_v57, %v2969_v56  ;;  %v2986_v56 = vld [vmem:[#allocation9 + $0x510] sm:$0xff] }
 0x5a2   : > { %7139 = vmatprep.subr.bf16.mxu0 %v7138_v0  ;;  %v2695_v0 = vld [vmem:[#allocation9 + $0x108] sm:$0xff]  ;;  %v7044_v14 = vpack.c.bf16 %v2692_v59, %v2690_v47  ;;  %v2710_v47 = vld [vmem:[#allocation9 + $0x180] sm:$0xff]  ;;  %v2712_v59 = vld [vmem:[#allocation9 + $0x190] sm:$0xff] }
 0x5a3   : > { %7025 = vmatpush1.bf16.msra.mxu1 %v7024_v10  ;;  %v2968_v10 = vld [vmem:[#allocation9 + $0x480] sm:$0xff]  ;;  %v7046_v18 = vpack.c.bf16 %v2697_v55, %v2695_v0  ;;  %v7064_v0 = vpack.c.bf16 %v2712_v59, %v2710_v47  ;;  %v2715_v55 = vld [vmem:[#allocation9 + $0x1a8] sm:$0xff]  ;;  %v3002_v47 = vld [vmem:[#allocation9 + $0x590] sm:$0xff] }
 0x5a4   : > { %7027 = vmatprep.subr.bf16.mxu1 %v7026_v15  ;;  %v2973_v15 = vld [vmem:[#allocation9 + $0x4a8] sm:$0xff]  ;;  %v7160_v8 = vpack.c.bf16 %v2970_v12, %v2968_v10 }
 0x5a5   : > { %7141 = vmatpush1.bf16.msra.mxu0 %v7140_v19  ;;  %v2694_v19 = vld [vmem:[#allocation9 + $0x100] sm:$0xff]  ;;  %v7162_v22 = vpack.c.bf16 %v2975_v16, %v2973_v15  ;;  %v2989_v10 = vld [vmem:[#allocation9 + $0x528] sm:$0xff]  ;;  %v2716_v16 = vld [vmem:[#allocation9 + $0x1b0] sm:$0xff] }
 0x5a6   : > { %7143 = vmatprep.subr.bf16.mxu0 %v7142_v20  ;;  %v2699_v20 = vld [vmem:[#allocation9 + $0x128] sm:$0xff]  ;;  %v7048_v13 = vpack.c.bf16 %v2696_v62, %v2694_v19  ;;  %v2714_v15 = vld [vmem:[#allocation9 + $0x1a0] sm:$0xff] }
 0x5a7   : > { %7029 = vmatpush1.bf16.msra.mxu1 %v7028_v1  ;;  %v2972_v1 = vld [vmem:[#allocation9 + $0x4a0] sm:$0xff]  ;;  %v7050_v24 = vpack.c.bf16 %v2701_v21, %v2699_v20  ;;  %v7068_v19 = vpack.c.bf16 %v2716_v16, %v2714_v15  ;;  %v2719_v21 = vld [vmem:[#allocation9 + $0x1c8] sm:$0xff] }
 0x5a8   : > { %7031 = vmatprep.subr.bf16.mxu1 %v7030_v17  ;;  %v2977_v17 = vld [vmem:[#allocation9 + $0x4c8] sm:$0xff]  ;;  %v7164_v26 = vpack.c.bf16 %v2974_v11, %v2972_v1  ;;  %v2988_v62 = vld [vmem:[#allocation9 + $0x520] sm:$0xff] }
 0x5a9   : > { %7145 = vmatpush1.bf16.msra.mxu0 %v7144_v25  ;;  %v2698_v25 = vld [vmem:[#allocation9 + $0x120] sm:$0xff]  ;;  %v7166_v29 = vpack.c.bf16 %v2979_v23, %v2977_v17  ;;  %v2993_v1 = vld [vmem:[#allocation9 + $0x548] sm:$0xff]  ;;  %v2720_v23 = vld [vmem:[#allocation9 + $0x1d0] sm:$0xff] }
 0x5aa   : > { %7147 = vmatprep.subr.bf16.mxu0 %v7146_v27  ;;  %v2703_v27 = vld [vmem:[#allocation9 + $0x148] sm:$0xff]  ;;  %v7052_v31 = vpack.c.bf16 %v2700_v43, %v2698_v25  ;;  %v2718_v17 = vld [vmem:[#allocation9 + $0x1c0] sm:$0xff] }
 0x5ab   : > { %7033 = vmatpush1.bf16.msra.mxu1 %v7032_v30  ;;  %v2976_v30 = vld [vmem:[#allocation9 + $0x4c0] sm:$0xff]  ;;  %v7054_v35 = vpack.c.bf16 %v2705_v28, %v2703_v27  ;;  %v7072_v25 = vpack.c.bf16 %v2720_v23, %v2718_v17  ;;  %v2723_v28 = vld [vmem:[#allocation9 + $0x1e8] sm:$0xff] }
 0x5ac   : > { %7035 = vmatprep.subr.bf16.mxu1 %v7034_v33  ;;  %v2981_v33 = vld [vmem:[#allocation9 + $0x4e8] sm:$0xff]  ;;  %v7168_v38 = vpack.c.bf16 %v2978_v44, %v2976_v30  ;;  %v2992_v43 = vld [vmem:[#allocation9 + $0x540] sm:$0xff] }
 0x5ad   : > { %7149 = vmatpush1.bf16.msra.mxu0 %v7148_v36  ;;  %v2702_v36 = vld [vmem:[#allocation9 + $0x140] sm:$0xff]  ;;  %v7170_v39 = vpack.c.bf16 %v2983_v34, %v2981_v33  ;;  %v2997_v30 = vld [vmem:[#allocation9 + $0x568] sm:$0xff]  ;;  %v2724_v34 = vld [vmem:[#allocation9 + $0x1f0] sm:$0xff] }
 0x5ae   : > { %7151 = vmatprep.subr.bf16.mxu0 %v7150_v3  ;;  %v2707_v3 = vld [vmem:[#allocation9 + $0x168] sm:$0xff]  ;;  %v7056_v42 = vpack.c.bf16 %v2704_v37, %v2702_v36  ;;  %v2722_v33 = vld [vmem:[#allocation9 + $0x1e0] sm:$0xff] }
 0x5af   : > { %7037 = vmatpush1.bf16.msra.mxu1 %v7036_v40  ;;  %v2980_v40 = vld [vmem:[#allocation9 + $0x4e0] sm:$0xff]  ;;  %v7058_v46 = vpack.c.bf16 %v2709_v45, %v2707_v3  ;;  %v7076_v36 = vpack.c.bf16 %v2724_v34, %v2722_v33  ;;  %v2727_v45 = vld [vmem:[#allocation9 + $0x208] sm:$0xff] }
 0x5b0   : > { %7039 = vmatprep.subr.bf16.mxu1 %v7038_v7  ;;  %v2985_v7 = vld [vmem:[#allocation9 + $0x508] sm:$0xff]  ;;  %v7172_v50 = vpack.c.bf16 %v2982_v41, %v2980_v40  ;;  %v2996_v37 = vld [vmem:[#allocation9 + $0x560] sm:$0xff] }
 0x5b1   : > { %7153 = vmatpush1.bf16.msra.mxu0 %v7152_v48  ;;  %v2706_v48 = vld [vmem:[#allocation9 + $0x160] sm:$0xff]  ;;  %v7174_v53 = vpack.c.bf16 %v2987_v6, %v2985_v7  ;;  %v3001_v40 = vld [vmem:[#allocation9 + $0x588] sm:$0xff] }
 0x5b2   : > { %7155 = vmatprep.subr.bf16.mxu0 %v7154_v51  ;;  %v2711_v51 = vld [vmem:[#allocation9 + $0x188] sm:$0xff]  ;;  %v7060_v57 = vpack.c.bf16 %v2708_v49, %v2706_v48  ;;  %v2734_v34 = vld [vmem:[#allocation9 + $0x240] sm:$0xff] }
 0x5b3   : > { %7041 = vmatpush1.bf16.msra.mxu1 %v7040_v54  ;;  %v2984_v54 = vld [vmem:[#allocation9 + $0x500] sm:$0xff]  ;;  %v2731_v59 = vld [vmem:[#allocation9 + $0x228] sm:$0xff] }
 0x5b4   : > { %7043 = vmatprep.subr.bf16.mxu1 %v7042_v58  ;;  %v7062_v58 = vpack.c.bf16 %v2713_v52, %v2711_v51  ;;  %v2735_v17 = vld [vmem:[#allocation9 + $0x248] sm:$0xff] }
 0x5b5   : > { %7157 = vmatpush1.bf16.msra.mxu0 %v7156_v60  ;;  %v7176_v60 = vpack.c.bf16 %v2986_v56, %v2984_v54  ;;  %v2726_v54 = vld [vmem:[#allocation9 + $0x200] sm:$0xff]  ;;  %v2728_v56 = vld [vmem:[#allocation9 + $0x210] sm:$0xff] }
 0x5b6   : > { %7159 = vmatprep.subr.bf16.mxu0 %v7158_v9  ;;  %v2717_v9 = vld [vmem:[#allocation9 + $0x1b8] sm:$0xff] }
 0x5b7   : > { %7045 = vmatpush1.bf16.msra.mxu1 %v7044_v14  ;;  %v7066_v12 = vpack.c.bf16 %v2717_v9, %v2715_v55  ;;  %v2991_v14 = vld [vmem:[#allocation9 + $0x538] sm:$0xff] }
 0x5b8   : > { %7047 = vmatprep.subr.bf16.mxu1 %v7046_v18  ;;  %v7178_v18 = vpack.c.bf16 %v2991_v14, %v2989_v10  ;;  %v2733_v9 = vld [vmem:[#allocation9 + $0x238] sm:$0xff]  ;;  %v3005_v10 = vld [vmem:[#allocation9 + $0x5a8] sm:$0xff] }
 0x5b9   : > { %7161 = vmatpush1.bf16.msra.mxu0 %v7160_v8  ;;  %v2990_v8 = vld [vmem:[#allocation9 + $0x530] sm:$0xff] }
 0x5ba   : > { %7163 = vmatprep.subr.bf16.mxu0 %v7162_v22  ;;  %v7180_v20 = vpack.c.bf16 %v2990_v8, %v2988_v62  ;;  %v2721_v22 = vld [vmem:[#allocation9 + $0x1d8] sm:$0xff]  ;;  %v2730_v8 = vld [vmem:[#allocation9 + $0x220] sm:$0xff] }
 0x5bb   : > { %7049 = vmatpush1.bf16.msra.mxu1 %v7048_v13  ;;  %v7070_v11 = vpack.c.bf16 %v2721_v22, %v2719_v21  ;;  %v2995_v13 = vld [vmem:[#allocation9 + $0x558] sm:$0xff]  ;;  %v7082_v22 = vpack.c.bf16 %v2733_v9, %v2731_v59  ;;  %v2744_v59 = vld [vmem:[#allocation9 + $0x290] sm:$0xff]  ;;  %v3016_v9 = vld [vmem:[#allocation9 + $0x600] sm:$0xff] }
 0x5bc   : > { %7051 = vmatprep.subr.bf16.mxu1 %v7050_v24  ;;  %v7182_v24 = vpack.c.bf16 %v2995_v13, %v2993_v1  ;;  %v3006_v13 = vld [vmem:[#allocation9 + $0x5b0] sm:$0xff] }
 0x5bd   : > { %7165 = vmatpush1.bf16.msra.mxu0 %v7164_v26  ;;  %v2994_v26 = vld [vmem:[#allocation9 + $0x550] sm:$0xff] }
 0x5be   : > { %7167 = vmatprep.subr.bf16.mxu0 %v7166_v29  ;;  %v7184_v27 = vpack.c.bf16 %v2994_v26, %v2992_v43  ;;  %v2725_v29 = vld [vmem:[#allocation9 + $0x1f8] sm:$0xff]  ;;  %v3009_v26 = vld [vmem:[#allocation9 + $0x5c8] sm:$0xff] }
 0x5bf   : > { %7053 = vmatpush1.bf16.msra.mxu1 %v7052_v31  ;;  %v7074_v44 = vpack.c.bf16 %v2725_v29, %v2723_v28  ;;  %v2999_v31 = vld [vmem:[#allocation9 + $0x578] sm:$0xff] }
 0x5c0   : > { %7055 = vmatprep.subr.bf16.mxu1 %v7054_v35  ;;  %v7186_v35 = vpack.c.bf16 %v2999_v31, %v2997_v30  ;;  %v2737_v43 = vld [vmem:[#allocation9 + $0x258] sm:$0xff] }
 0x5c1   : > { %7169 = vmatpush1.bf16.msra.mxu0 %v7168_v38  ;;  %v2998_v38 = vld [vmem:[#allocation9 + $0x570] sm:$0xff] }
 0x5c2   : > { %7171 = vmatprep.subr.bf16.mxu0 %v7170_v39  ;;  %v7188_v3 = vpack.c.bf16 %v2998_v38, %v2996_v37  ;;  %v2729_v39 = vld [vmem:[#allocation9 + $0x218] sm:$0xff]  ;;  %v3008_v38 = vld [vmem:[#allocation9 + $0x5c0] sm:$0xff] }
 0x5c3   : > { %7057 = vmatpush1.bf16.msra.mxu1 %v7056_v42  ;;  %v7078_v41 = vpack.c.bf16 %v2729_v39, %v2727_v45  ;;  %v3003_v42 = vld [vmem:[#allocation9 + $0x598] sm:$0xff]  ;;  %v2739_v45 = vld [vmem:[#allocation9 + $0x268] sm:$0xff] }
 0x5c4   : > { %7059 = vmatprep.subr.bf16.mxu1 %v7058_v46  ;;  %v7190_v7 = vpack.c.bf16 %v3003_v42, %v3001_v40  ;;  %v2741_v39 = vld [vmem:[#allocation9 + $0x278] sm:$0xff]  ;;  %v3013_v40 = vld [vmem:[#allocation9 + $0x5e8] sm:$0xff] }
 0x5c5   : > { %7173 = vmatpush1.bf16.msra.mxu0 %v7172_v50 }
 0x5c6   : > { %7175 = vmatprep.subr.bf16.mxu0 %v7174_v53 }
 0x5c7   : > { %7061 = vmatpush1.bf16.msra.mxu1 %v7060_v57 }
 0x5c8   : > { %7063 = vmatprep.subr.bf16.mxu1 %v7062_v58  ;;  %v3000_v58 = vld [vmem:[#allocation9 + $0x580] sm:$0xff] }
 0x5c9   : > { %7177 = vmatpush1.bf16.msra.mxu0 %v7176_v60  ;;  %v7192_v62 = vpack.c.bf16 %v3002_v47, %v3000_v58  ;;  %v2742_v47 = vld [vmem:[#allocation9 + $0x280] sm:$0xff] }
 0x5ca   : > { %7179 = vmatprep.subr.bf16.mxu0 %v7178_v18 }
 0x5cb   : > { %7065 = vmatpush1.bf16.msra.mxu1 %v7064_v0 }
 0x5cc   : > { %7067 = vmatprep.subr.bf16.mxu1 %v7066_v12  ;;  %v3007_v12 = vld [vmem:[#allocation9 + $0x5b8] sm:$0xff] }
 0x5cd   : > { %7181 = vmatpush1.bf16.msra.mxu0 %v7180_v20  ;;  %v2732_v20 = vld [vmem:[#allocation9 + $0x230] sm:$0xff]  ;;  %v7194_v1 = vpack.c.bf16 %v3007_v12, %v3005_v10  ;;  %v2747_v12 = vld [vmem:[#allocation9 + $0x2a8] sm:$0xff] }
 0x5ce   : > { %7183 = vmatprep.subr.bf16.mxu0 %v7182_v24  ;;  %v7084_v31 = vpack.c.bf16 %v2732_v20, %v2730_v8  ;;  %v3018_v10 = vld [vmem:[#allocation9 + $0x610] sm:$0xff] }
 0x5cf   : > { %7069 = vmatpush1.bf16.msra.mxu1 %v7068_v19  ;;  %v7080_v19 = vpack.c.bf16 %v2728_v56, %v2726_v54  ;;  %v3017_v54 = vld [vmem:[#allocation9 + $0x608] sm:$0xff]  ;;  %v3019_v56 = vld [vmem:[#allocation9 + $0x618] sm:$0xff]  ;;  %v2748_v8 = vld [vmem:[#allocation9 + $0x2b0] sm:$0xff] }
 0x5d0   : > { %7071 = vmatprep.subr.bf16.mxu1 %v7070_v11  ;;  %v3004_v11 = vld [vmem:[#allocation9 + $0x5a0] sm:$0xff] }
 0x5d1   : > { %7185 = vmatpush1.bf16.msra.mxu0 %v7184_v27  ;;  %v3011_v27 = vld [vmem:[#allocation9 + $0x5d8] sm:$0xff]  ;;  %v7196_v33 = vpack.c.bf16 %v3006_v13, %v3004_v11  ;;  %v2751_v11 = vld [vmem:[#allocation9 + $0x2c8] sm:$0xff] }
 0x5d2   : > { %7187 = vmatprep.subr.bf16.mxu0 %v7186_v35  ;;  %v2736_v35 = vld [vmem:[#allocation9 + $0x250] sm:$0xff]  ;;  %v7198_v37 = vpack.c.bf16 %v3011_v27, %v3009_v26  ;;  %v2753_v13 = vld [vmem:[#allocation9 + $0x2d8] sm:$0xff]  ;;  %v2750_v26 = vld [vmem:[#allocation9 + $0x2c0] sm:$0xff] }
 0x5d3   : > { %7073 = vmatpush1.bf16.msra.mxu1 %v7072_v25  ;;  %v7088_v42 = vpack.c.bf16 %v2736_v35, %v2734_v34  ;;  %v2752_v27 = vld [vmem:[#allocation9 + $0x2d0] sm:$0xff]  ;;  %v2757_v34 = vld [vmem:[#allocation9 + $0x2f8] sm:$0xff]  ;;  %v3029_v35 = vld [vmem:[#allocation9 + $0x668] sm:$0xff] }
 0x5d4   : > { %7075 = vmatprep.subr.bf16.mxu1 %v7074_v44 }
 0x5d5   : > { %7189 = vmatpush1.bf16.msra.mxu0 %v7188_v3  ;;  %v3010_v3 = vld [vmem:[#allocation9 + $0x5d0] sm:$0xff] }
 0x5d6   : > { %7191 = vmatprep.subr.bf16.mxu0 %v7190_v7  ;;  %v7200_v7 = vpack.c.bf16 %v3010_v3, %v3008_v38  ;;  %v2754_v3 = vld [vmem:[#allocation9 + $0x2e0] sm:$0xff] }
 0x5d7   : > { %7077 = vmatpush1.bf16.msra.mxu1 %v7076_v36  ;;  %v7086_v36 = vpack.c.bf16 %v2737_v43, %v2735_v17  ;;  %v3025_v17 = vld [vmem:[#allocation9 + $0x648] sm:$0xff] }
 0x5d8   : > { %7079 = vmatprep.subr.bf16.mxu1 %v7078_v41  ;;  %v3015_v41 = vld [vmem:[#allocation9 + $0x5f8] sm:$0xff] }
 0x663   : > { %v2480_v6 = vpop.f32.mrb[16].mxu0 }
 0x664   : > { %v2482_v46 = vpop.f32.mrb[17].mxu0 }
 0x665   : > { %v2403_v48 = vpop.f32.mrb[28].mxu1 }
 0x666   : > { %v2405_v49 = vpop.f32.mrb[29].mxu1 }
 0x667   : > { %v2486_v50 = vpop.f32.mrb[18].mxu0 }
 0x668   : > { %v2488_v51 = vpop.f32.mrb[19].mxu0 }
 0x669   : > { %v2409_v52 = vpop.f32.mrb[30].mxu1 }
 0x66a   : > { %v2411_v53 = vpop.f32.mrb[31].mxu1 }
 0x66b   : > { %v2643_v57 = vpop.f32.mrb[20].mxu0 }
 0x66c   : > { %v9451_v60 = vmax.f32 %v2480_v6, %v2643_v57  ;;  %v2645_v0 = vpop.f32.mrb[21].mxu0  ;;  %v2738_v6 = vld [vmem:[#allocation9 + $0x260] sm:$0xff] }
 0x66d   : > { %v2566_v55 = vpop.f32.mrb[32].mxu1  ;;  %v9453_v14 = vmax.f32 %v2482_v46, %v2645_v0  ;;  %v2740_v46 = vld [vmem:[#allocation9 + $0x270] sm:$0xff] }
 0x66e   : > { %v2654_v15 = vmax.f32 %v2403_v48, %v2566_v55  ;;  %v2568_v16 = vpop.f32.mrb[33].mxu1  ;;  %v7090_v48 = vpack.c.bf16 %v2741_v39, %v2739_v45  ;;  %v7092_v57 = vpack.c.bf16 %v2740_v46, %v2738_v6  ;;  %v7206_v55 = vpack.c.bf16 %v3019_v56, %v3017_v54  ;;  %v2756_v45 = vld [vmem:[#allocation9 + $0x2f0] sm:$0xff]  ;;  %v2761_v6 = vld [vmem:[#allocation9 + $0x318] sm:$0xff]  ;;  %v3033_v46 = vld [vmem:[#allocation9 + $0x688] sm:$0xff] }
 0x66f   : > { %v2655_v18 = vmax.f32 %v2405_v49, %v2568_v16  ;;  %v2649_v21 = vpop.f32.mrb[22].mxu0  ;;  %v7202_v49 = vpack.c.bf16 %v3015_v41, %v3013_v40  ;;  %v3021_v16 = vld [vmem:[#allocation9 + $0x628] sm:$0xff]  ;;  %v3028_v41 = vld [vmem:[#allocation9 + $0x660] sm:$0xff] }
 0x670   : > { %v9455_v23 = vmax.f32 %v2486_v50, %v2649_v21  ;;  %v2651_v24 = vpop.f32.mrb[23].mxu0  ;;  %v3012_v50 = vld [vmem:[#allocation9 + $0x5e0] sm:$0xff] }
 0x671   : > { %v2572_v25 = vpop.f32.mrb[34].mxu1  ;;  %2845 = vmatprep.mubr.f32.mxu1 %v2655_v18  ;;  %3112 = vmatprep.mubr.f32.mxu0 %v2655_v18  ;;  %v9457_v28 = vmax.f32 %v2488_v51, %v2651_v24  ;;  %v3014_v51 = vld [vmem:[#allocation9 + $0x5f0] sm:$0xff]  ;;  %v3023_v18 = vld [vmem:[#allocation9 + $0x638] sm:$0xff]  ;;  %v3032_v56 = vld [vmem:[#allocation9 + $0x680] sm:$0xff] }
 0x672   : > { %v2658_v29 = vmax.f32 %v2409_v52, %v2572_v25  ;;  %v2574_v30 = vpop.f32.mrb[35].mxu1  ;;  %2846 = vmatmul.mubr.f32.vlgmr.msra.gmra.mrb[36].mxu1 %v2654_v15  ;;  %3113 = vmatmul.mubr.f32.vlgmr.msra.gmra.mrb[24].mxu0 %v2654_v15  ;;  %v2743_v52 = vld [vmem:[#allocation9 + $0x288] sm:$0xff]  ;;  %v7204_v58 = vpack.c.bf16 %v3014_v51, %v3012_v50  ;;  %v2749_v15 = vld [vmem:[#allocation9 + $0x2b8] sm:$0xff]  ;;  %v7210_v21 = vpack.c.bf16 %v3023_v18, %v3021_v16  ;;  %v2758_v51 = vld [vmem:[#allocation9 + $0x300] sm:$0xff] }
 0x673   : > { %v2659_v44 = vmax.f32 %v2411_v53, %v2574_v30  ;;  %7081 = vmatpush1.bf16.msra.mxu1 %v7080_v19  ;;  %7193 = vmatpush1.bf16.msra.mxu0 %v7192_v62  ;;  %v2745_v53 = vld [vmem:[#allocation9 + $0x298] sm:$0xff]  ;;  %v7096_v19 = vpack.c.bf16 %v2744_v59, %v2742_v47  ;;  %v2746_v62 = vld [vmem:[#allocation9 + $0x2a0] sm:$0xff]  ;;  %v7098_v20 = vpack.c.bf16 %v2749_v15, %v2747_v12  ;;  %v3037_v59 = vld [vmem:[#allocation9 + $0x6a8] sm:$0xff] }
 0x674   : > { %7083 = vmatprep.subr.bf16.mxu1 %v7082_v22  ;;  %7195 = vmatprep.subr.bf16.mxu0 %v7194_v1  ;;  %v7094_v0 = vpack.c.bf16 %v2745_v53, %v2743_v52  ;;  %v3020_v22 = vld [vmem:[#allocation9 + $0x620] sm:$0xff]  ;;  %v3022_v1 = vld [vmem:[#allocation9 + $0x630] sm:$0xff]  ;;  %v3027_v24 = vld [vmem:[#allocation9 + $0x658] sm:$0xff]  ;;  %v7100_v25 = vpack.c.bf16 %v2748_v8, %v2746_v62 }
 0x675   : > { %2851 = vmatprep.mubr.f32.mxu1 %v2659_v44  ;;  %3118 = vmatprep.mubr.f32.mxu0 %v2659_v44  ;;  %v7212_v43 = vpack.c.bf16 %v3022_v1, %v3020_v22  ;;  %v7214_v30 = vpack.c.bf16 %v3027_v24, %v3025_v17  ;;  %v3024_v44 = vld [vmem:[#allocation9 + $0x640] sm:$0xff]  ;;  %v2760_v52 = vld [vmem:[#allocation9 + $0x310] sm:$0xff]  ;;  %v2765_v47 = vld [vmem:[#allocation9 + $0x338] sm:$0xff] }
 0x676   : > { %2852 = vmatmul.mubr.f32.gmra.mrb[38].mxu1 %v2658_v29  ;;  %3119 = vmatmul.mubr.f32.gmra.mrb[26].mxu0 %v2658_v29  ;;  %v7102_v29 = vpack.c.bf16 %v2753_v13, %v2751_v11  ;;  %v2764_v12 = vld [vmem:[#allocation9 + $0x330] sm:$0xff]  ;;  %v3036_v18 = vld [vmem:[#allocation9 + $0x6a0] sm:$0xff]  ;;  %v2769_v62 = vld [vmem:[#allocation9 + $0x358] sm:$0xff] }
 0x677   : > { %7085 = vmatpush1.bf16.msra.mxu1 %v7084_v31  ;;  %7197 = vmatpush1.bf16.msra.mxu0 %v7196_v33  ;;  %v3026_v31 = vld [vmem:[#allocation9 + $0x650] sm:$0xff]  ;;  %v2755_v33 = vld [vmem:[#allocation9 + $0x2e8] sm:$0xff]  ;;  %v2766_v1 = vld [vmem:[#allocation9 + $0x340] sm:$0xff] }
 0x678   : > { %7087 = vmatprep.subr.bf16.mxu1 %v7086_v36  ;;  %7199 = vmatprep.subr.bf16.mxu0 %v7198_v37  ;;  %v3031_v36 = vld [vmem:[#allocation9 + $0x678] sm:$0xff]  ;;  %v7104_v37 = vpack.c.bf16 %v2752_v27, %v2750_v26  ;;  %v7216_v38 = vpack.c.bf16 %v3026_v31, %v3024_v44  ;;  %v7106_v39 = vpack.c.bf16 %v2757_v34, %v2755_v33  ;;  %v3041_v8 = vld [vmem:[#allocation9 + $0x6c8] sm:$0xff]  ;;  %v2768_v11 = vld [vmem:[#allocation9 + $0x350] sm:$0xff] }
 0x679   : > { %6618 = vmatprep.mubr.msk.f32.mxu1 %vm2774_vm4, %v9453_v14  ;;  %6620 = vmatprep.mubr.msk.f32.mxu0 %vm2774_vm4, %v9453_v14  ;;  %v7208_v14 = vpack.c.bf16 %v3018_v10, %v3016_v9  ;;  %v7218_v40 = vpack.c.bf16 %v3031_v36, %v3029_v35  ;;  %v2762_v10 = vld [vmem:[#allocation9 + $0x320] sm:$0xff]  ;;  %v2773_v26 = vld [vmem:[#allocation9 + $0x378] sm:$0xff]  ;;  %v3045_v27 = vld [vmem:[#allocation9 + $0x6e8] sm:$0xff] }
 0x67a   : > { %v3040_v24 = vld [vmem:[#allocation9 + $0x6c0] sm:$0xff]  ;;  %v2772_v35 = vld [vmem:[#allocation9 + $0x370] sm:$0xff] }
 0x67b   : > { %7089 = vmatpush1.bf16.msra.mxu1 %v7088_v42  ;;  %7201 = vmatpush1.bf16.msra.mxu0 %v7200_v7  ;;  %v3030_v42 = vld [vmem:[#allocation9 + $0x670] sm:$0xff]  ;;  %v2759_v7 = vld [vmem:[#allocation9 + $0x308] sm:$0xff]  ;;  %v2770_v31 = vld [vmem:[#allocation9 + $0x360] sm:$0xff] }
 0x67c   : > { %7091 = vmatprep.subr.bf16.mxu1 %v7090_v48  ;;  %7203 = vmatprep.subr.bf16.mxu0 %v7202_v49  ;;  %v3035_v48 = vld [vmem:[#allocation9 + $0x698] sm:$0xff]  ;;  %v7108_v49 = vpack.c.bf16 %v2756_v45, %v2754_v3  ;;  %v7220_v50 = vpack.c.bf16 %v3030_v42, %v3028_v41  ;;  %v7110_v53 = vpack.c.bf16 %v2761_v6, %v2759_v7  ;;  %v3044_v36 = vld [vmem:[#allocation9 + $0x6e0] sm:$0xff] }
 0x67d   : > { %v7222_v54 = vpack.c.bf16 %v3035_v48, %v3033_v46  ;;  %v3499_v46 = vld [vmem:[#allocation12 + $0x388] sm:$0xff] }
 0x67f   : > { %7093 = vmatpush1.bf16.msra.mxu1 %v7092_v57  ;;  %7205 = vmatpush1.bf16.msra.mxu0 %v7204_v58  ;;  %v3034_v57 = vld [vmem:[#allocation9 + $0x690] sm:$0xff]  ;;  %v2763_v58 = vld [vmem:[#allocation9 + $0x328] sm:$0xff] }
 0x680   : > { %7095 = vmatprep.subr.bf16.mxu1 %v7094_v0  ;;  %7207 = vmatprep.subr.bf16.mxu0 %v7206_v55  ;;  %v3039_v0 = vld [vmem:[#allocation9 + $0x6b8] sm:$0xff]  ;;  %v7112_v55 = vpack.c.bf16 %v2760_v52, %v2758_v51  ;;  %v7224_v9 = vpack.c.bf16 %v3034_v57, %v3032_v56  ;;  %v7114_v15 = vpack.c.bf16 %v2765_v47, %v2763_v58  ;;  %v3501_v51 = vld [vmem:[#allocation12 + $0x398] sm:$0xff]  ;;  %v3498_v47 = vld [vmem:[#allocation12 + $0x380] sm:$0xff] }
 0x681   : > { %v7226_v16 = vpack.c.bf16 %v3039_v0, %v3037_v59  ;;  %v3502_v59 = vld [vmem:[#allocation12 + $0x3a0] sm:$0xff]  ;;  %v3500_v0 = vld [vmem:[#allocation12 + $0x390] sm:$0xff] }
 0x683   : > { %7097 = vmatpush1.bf16.msra.mxu1 %v7096_v19  ;;  %7209 = vmatpush1.bf16.msra.mxu0 %v7208_v14  ;;  %v3038_v19 = vld [vmem:[#allocation9 + $0x6b0] sm:$0xff]  ;;  %v2767_v14 = vld [vmem:[#allocation9 + $0x348] sm:$0xff] }
 0x684   : > { %7099 = vmatprep.subr.bf16.mxu1 %v7098_v20  ;;  %7211 = vmatprep.subr.bf16.mxu0 %v7210_v21  ;;  %v3043_v20 = vld [vmem:[#allocation9 + $0x6d8] sm:$0xff]  ;;  %v7116_v21 = vpack.c.bf16 %v2764_v12, %v2762_v10  ;;  %v7228_v22 = vpack.c.bf16 %v3038_v19, %v3036_v18  ;;  %v7118_v13 = vpack.c.bf16 %v2769_v62, %v2767_v14  ;;  %v3509_v12 = vld [vmem:[#allocation12 + $0x3d8] sm:$0xff]  ;;  %v3206_v18 = vld [vmem:[#allocation11] sm:$0xff] }
 0x685   : > { %v7230_v17 = vpack.c.bf16 %v3043_v20, %v3041_v8  ;;  %v3511_v10 = vld [vmem:[#allocation12 + $0x3e8] sm:$0xff]  ;;  %v7252_v19 = vpack.c.bf16 %v3502_v59, %v3498_v47  ;;  %v3506_v62 = vld [vmem:[#allocation12 + $0x3c0] sm:$0xff]  ;;  %v3536_v47 = vld [vmem:[#allocation12 + $0x4b0] sm:$0xff] }
 0x686   : > { %v3510_v8 = vld [vmem:[#allocation12 + $0x3e0] sm:$0xff]  ;;  %v3539_v59 = vld [vmem:[#allocation12 + $0x4c8] sm:$0xff] }
 0x687   : > { %7101 = vmatpush1.bf16.msra.mxu1 %v7100_v25  ;;  %7213 = vmatpush1.bf16.msra.mxu0 %v7212_v43  ;;  %v3042_v25 = vld [vmem:[#allocation9 + $0x6d0] sm:$0xff]  ;;  %v2771_v43 = vld [vmem:[#allocation9 + $0x368] sm:$0xff] }
 0x688   : > { %7103 = vmatprep.subr.bf16.mxu1 %v7102_v29  ;;  %7215 = vmatprep.subr.bf16.mxu0 %v7214_v30  ;;  %v3047_v29 = vld [vmem:[#allocation9 + $0x6f8] sm:$0xff]  ;;  %v7120_v30 = vpack.c.bf16 %v2768_v11, %v2766_v1  ;;  %v7232_v44 = vpack.c.bf16 %v3042_v25, %v3040_v24  ;;  %v7122_v33 = vpack.c.bf16 %v2773_v26, %v2771_v43  ;;  %v3512_v1 = vld [vmem:[#allocation12 + $0x3f0] sm:$0xff]  ;;  %v3521_v24 = vld [vmem:[#allocation12 + $0x438] sm:$0xff] }
 0x689   : > { %v7234_v34 = vpack.c.bf16 %v3047_v29, %v3045_v27  ;;  %v3515_v11 = vld [vmem:[#allocation12 + $0x408] sm:$0xff]  ;;  %v3207_v43 = vld [vmem:[#allocation11 + $0x8] sm:$0x3f]  ;;  %v7256_v26 = vpack.c.bf16 %v3510_v8, %v3506_v62  ;;  %v3514_v29 = vld [vmem:[#allocation12 + $0x400] sm:$0xff] }
 0x68a   : > { %v3413_v25 = vld [vmem:[#allocation11 + $0x18] sm:$0x3f]  ;;  %v3544_v62 = vld [vmem:[#allocation12 + $0x4f0] sm:$0xff] }
 0x68b   : > { %7105 = vmatpush1.bf16.msra.mxu1 %v7104_v37  ;;  %7217 = vmatpush1.bf16.msra.mxu0 %v7216_v38  ;;  %v3046_v37 = vld [vmem:[#allocation9 + $0x6f0] sm:$0xff]  ;;  %v7124_v38 = vpack.c.bf16 %v2772_v35, %v2770_v31  ;;  %v3523_v35 = vld [vmem:[#allocation12 + $0x448] sm:$0xff] }
 0x68c   : > { %7107 = vmatprep.subr.bf16.mxu1 %v7106_v39  ;;  %7219 = vmatprep.subr.bf16.mxu0 %v7218_v40  ;;  %v7236_v3 = vpack.c.bf16 %v3046_v37, %v3044_v36  ;;  %v3527_v36 = vld [vmem:[#allocation12 + $0x468] sm:$0xff]  ;;  %v3525_v37 = vld [vmem:[#allocation12 + $0x458] sm:$0xff] }
 0x68d   : > { %v3547_v8 = vld [vmem:[#allocation12 + $0x508] sm:$0xff] }
 0x68f   : > { %7109 = vmatpush1.bf16.msra.mxu1 %v7108_v49  ;;  %7221 = vmatpush1.bf16.msra.mxu0 %v7220_v50  ;;  %v3503_v50 = vld [vmem:[#allocation12 + $0x3a8] sm:$0xff] }
 0x690   : > { %7111 = vmatprep.subr.bf16.mxu1 %v7110_v53  ;;  %7223 = vmatprep.subr.bf16.mxu0 %v7222_v54  ;;  %v7250_v57 = vpack.c.bf16 %v3503_v50, %v3499_v46  ;;  %v3535_v46 = vld [vmem:[#allocation12 + $0x4a8] sm:$0xff]  ;;  %v5398_v54 = vld [vmem:[#allocation15 + $0x98] sm:$0xff] }
 0x693   : > { %7113 = vmatpush1.bf16.msra.mxu1 %v7112_v55  ;;  %7225 = vmatpush1.bf16.msra.mxu0 %v7224_v9  ;;  %v3504_v55 = vld [vmem:[#allocation12 + $0x3b0] sm:$0xff]  ;;  %v3507_v9 = vld [vmem:[#allocation12 + $0x3c8] sm:$0xff] }
 0x694   : > { %7115 = vmatprep.subr.bf16.mxu1 %v7114_v15  ;;  %7227 = vmatprep.subr.bf16.mxu0 %v7226_v16  ;;  %v3513_v15 = vld [vmem:[#allocation12 + $0x3f8] sm:$0xff]  ;;  %v3412_v16 = vld [vmem:[#allocation11 + $0x10] sm:$0xff]  ;;  %v7308_v14 = vpack.c.bf16 %v3504_v55, %v3500_v0  ;;  %v7254_v20 = vpack.c.bf16 %v3511_v10, %v3507_v9  ;;  %v3543_v0 = vld [vmem:[#allocation12 + $0x4e8] sm:$0xff] }
 0x695   : > { %v3541_v55 = vld [vmem:[#allocation12 + $0x4d8] sm:$0xff] }
 0x696   : > { %v3545_v9 = vld [vmem:[#allocation12 + $0x4f8] sm:$0xff] }
 0x697   : > { %7117 = vmatpush1.bf16.msra.mxu1 %v7116_v21  ;;  %7229 = vmatpush1.bf16.msra.mxu0 %v7228_v22  ;;  %v7310_v21 = vpack.c.bf16 %v3513_v15, %v3509_v12  ;;  %v3508_v22 = vld [vmem:[#allocation12 + $0x3d0] sm:$0xff]  ;;  %v3538_v15 = vld [vmem:[#allocation12 + $0x4c0] sm:$0xff] }
 0x698   : > { %7119 = vmatprep.subr.bf16.mxu1 %v7118_v13  ;;  %7231 = vmatprep.subr.bf16.mxu0 %v7230_v17  ;;  %v3519_v13 = vld [vmem:[#allocation12 + $0x428] sm:$0xff]  ;;  %v3517_v17 = vld [vmem:[#allocation12 + $0x418] sm:$0xff]  ;;  %v7312_v27 = vpack.c.bf16 %v3512_v1, %v3508_v22 }
 0x699   : > { %v7314_v31 = vpack.c.bf16 %v3521_v24, %v3517_v17  ;;  %v3553_v22 = vld [vmem:[#allocation12 + $0x538] sm:$0xff]  ;;  %v3550_v17 = vld [vmem:[#allocation12 + $0x520] sm:$0xff] }
 0x69b   : > { %7121 = vmatpush1.bf16.msra.mxu1 %v7120_v30  ;;  %7233 = vmatpush1.bf16.msra.mxu0 %v7232_v44  ;;  %v3518_v30 = vld [vmem:[#allocation12 + $0x420] sm:$0xff]  ;;  %v7258_v44 = vpack.c.bf16 %v3519_v13, %v3515_v11 }
 0x69c   : > { %7123 = vmatprep.subr.bf16.mxu1 %v7122_v33  ;;  %7235 = vmatprep.subr.bf16.mxu0 %v7234_v34  ;;  %v3516_v33 = vld [vmem:[#allocation12 + $0x410] sm:$0xff]  ;;  %v3546_v13 = vld [vmem:[#allocation12 + $0x500] sm:$0xff] }
 0x69d   : > { %v3520_v34 = vld [vmem:[#allocation12 + $0x430] sm:$0xff] }
 0x69f   : > { %7125 = vmatpush1.bf16.msra.mxu1 %v7124_v38  ;;  %7237 = vmatpush1.bf16.msra.mxu0 %v7236_v3  ;;  %v3529_v38 = vld [vmem:[#allocation12 + $0x478] sm:$0xff]  ;;  %v7260_v3 = vpack.c.bf16 %v3518_v30, %v3514_v29  ;;  %v3559_v29 = vld [vmem:[#allocation12 + $0x568] sm:$0xff] }
 0x6a0   : > { %v3557_v30 = vld [vmem:[#allocation12 + $0x558] sm:$0xff] }
 0x6a2   : > { %2923 = vmatmul.mubr.f32.vlgmr.msra.gmra.mrb[36].mxu1 %v9451_v60  ;;  %3190 = vmatmul.mubr.f32.vlgmr.msra.gmra.mrb[24].mxu0 %v9451_v60 }
 0x6a3   : > { %6619 = vmatprep.mubr.msk.f32.mxu1 %vm2774_vm4, %v9457_v28  ;;  %6621 = vmatprep.mubr.msk.f32.mxu0 %vm2774_vm4, %v9457_v28 }
 0x6a6   : > { %2929 = vmatmul.mubr.f32.gmra.mrb[38].mxu1 %v9455_v23  ;;  %3196 = vmatmul.mubr.f32.gmra.mrb[26].mxu0 %v9455_v23  ;;  %v3505_v23 = vld [vmem:[#allocation12 + $0x3b8] sm:$0xff] }
 0x6a7   : > { %3484 = vmatprep.mubr.f32.mxu0 %v8754_v32  ;;  %3286 = vmatprep.mubr.f32.mxu1 %v8754_v32  ;;  %v7306_v58 = vpack.c.bf16 %v3505_v23, %v3501_v51  ;;  %v3530_v51 = vld [vmem:[#allocation12 + $0x480] sm:$0xff] }
 0x6a8   : > { %v3534_v23 = vld [vmem:[#allocation12 + $0x4a0] sm:$0xff] }
 0x6a9   : > { %v7268_v10 = vpack.c.bf16 %v3534_v23, %v3530_v51  ;;  %v3575_v51 = vld [vmem:[#allocation12 + $0x5e8] sm:$0xff]  ;;  %v3573_v23 = vld [vmem:[#allocation12 + $0x5d8] sm:$0xff] }
 0x775   : > { %v2924_v45 = vpop.f32.mrb[36].mxu1  ;;  %v3191_v39 = vpop.f32.mrb[24].mxu0 }
 0x776   : > { %v3202_v40 = vmax.f32 %v2924_v45, %v3191_v39  ;;  %v2926_v41 = vpop.f32.mrb[37].mxu1  ;;  %v3193_v42 = vpop.f32.mrb[25].mxu0  ;;  %v7316_v45 = vpack.c.bf16 %v3520_v34, %v3516_v33  ;;  %v3522_v39 = vld [vmem:[#allocation12 + $0x440] sm:$0xff] }
 0x777   : > { %v3203_v60 = vmax.f32 %v2926_v41, %v3193_v42  ;;  %v7262_v41 = vpack.c.bf16 %v3527_v36, %v3523_v35  ;;  %v7318_v42 = vpack.c.bf16 %v3529_v38, %v3525_v37  ;;  %v3554_v34 = vld [vmem:[#allocation12 + $0x540] sm:$0xff]  ;;  %v3556_v38 = vld [vmem:[#allocation12 + $0x550] sm:$0xff] }
 0x778   : > { %v3558_v35 = vld [vmem:[#allocation12 + $0x560] sm:$0xff] }
 0x779   : > { %v2930_v7 = vpop.f32.mrb[38].mxu1  ;;  %v3197_v6 = vpop.f32.mrb[26].mxu0 }
 0x77a   : > { %v3204_v48 = vmax.f32 %v2930_v7, %v3197_v6  ;;  %v2932_v28 = vpop.f32.mrb[39].mxu1  ;;  %v3199_v49 = vpop.f32.mrb[27].mxu0  ;;  %v3528_v7 = vld [vmem:[#allocation12 + $0x470] sm:$0xff]  ;;  %v3531_v6 = vld [vmem:[#allocation12 + $0x488] sm:$0xff] }
 0x77b   : > { %v3205_v52 = vmax.f32 %v2932_v28, %v3199_v49  ;;  %v3537_v28 = vld [vmem:[#allocation12 + $0x4b8] sm:$0xff] }
 0x77c   : > { %v9473_v53 = vpack.c.bf16 %v3204_v48, %v3202_v40  ;;  %v3526_v40 = vld [vmem:[#allocation12 + $0x460] sm:$0xff]  ;;  %v3533_v48 = vld [vmem:[#allocation12 + $0x498] sm:$0xff] }
 0x77d   : > { %v9480_v56 = vpack.c.bf16 %v3205_v52, %v3203_v60  ;;  %v3524_v60 = vld [vmem:[#allocation12 + $0x450] sm:$0xff]  ;;  %v7264_v49 = vpack.c.bf16 %v3526_v40, %v3522_v39  ;;  %v7266_v52 = vpack.c.bf16 %v3535_v46, %v3531_v6  ;;  %v3567_v39 = vld [vmem:[#allocation12 + $0x5a8] sm:$0xff]  ;;  %v3565_v40 = vld [vmem:[#allocation12 + $0x598] sm:$0xff] }
 0x77e   : > { %v7320_v50 = vpack.c.bf16 %v3528_v7, %v3524_v60  ;;  %v3562_v7 = vld [vmem:[#allocation12 + $0x580] sm:$0xff] }
 0x77f   : > { %7240 = vmatprep.subr.msk.bf16.mxu1 %vm9476_vm6, %v9480_v56  ;;  %7246 = vmatprep.subr.msk.bf16.mxu0 %vm9476_vm6, %v9480_v56  ;;  %v3566_v6 = vld [vmem:[#allocation12 + $0x5a0] sm:$0xff] }
 0x780   : > { %7243 = vmatpush1.bf16.msk.msra.mxu1 %vm9476_vm6, %v9473_v53  ;;  %7249 = vmatpush1.bf16.msk.msra.mxu0 %vm9476_vm6, %v9473_v53 }
 0x781   : > { %7251 = vmatprep.subr.bf16.mxu1 %v7250_v57  ;;  %7307 = vmatprep.subr.bf16.mxu0 %v7306_v58  ;;  %v7322_v57 = vpack.c.bf16 %v3537_v28, %v3533_v48  ;;  %v3532_v58 = vld [vmem:[#allocation12 + $0x490] sm:$0xff] }
 0x782   : > { %v7324_v12 = vpack.c.bf16 %v3536_v47, %v3532_v58  ;;  %v3564_v28 = vld [vmem:[#allocation12 + $0x590] sm:$0xff]  ;;  %v3570_v47 = vld [vmem:[#allocation12 + $0x5c0] sm:$0xff] }
 0x783   : > { %6628 = vmatmul.mubr.msk.f32.vlgmr.msra.gmra.mrb[28].mxu0 %vm3208_vm7, %v3412_v16  ;;  %6624 = vmatmul.mubr.msk.f32.vlgmr.msra.gmra.mrb[40].mxu1 %vm3208_vm7, %v3206_v18  ;;  %v3542_v16 = vld [vmem:[#allocation12 + $0x4e0] sm:$0xff]  ;;  %v7270_v18 = vpack.c.bf16 %v3543_v0, %v3539_v59 }
 0x784   : > { %3490 = vmatprep.mubr.f32.mxu0 %v8754_v32  ;;  %3292 = vmatprep.mubr.f32.mxu1 %v8754_v32  ;;  %v7272_v1 = vpack.c.bf16 %v3542_v16, %v3538_v15  ;;  %v3574_v59 = vld [vmem:[#allocation12 + $0x5e0] sm:$0xff]  ;;  %v3583_v15 = vld [vmem:[#allocation12 + $0x628] sm:$0xff]  ;;  %v3581_v16 = vld [vmem:[#allocation12 + $0x618] sm:$0xff] }
 0x785   : > { %7253 = vmatpush1.bf16.msra.mxu1 %v7252_v19  ;;  %7309 = vmatpush1.bf16.msra.mxu0 %v7308_v14  ;;  %v7326_v19 = vpack.c.bf16 %v3545_v9, %v3541_v55  ;;  %v3540_v14 = vld [vmem:[#allocation12 + $0x4d0] sm:$0xff] }
 0x786   : > { %7255 = vmatprep.subr.bf16.mxu1 %v7254_v20  ;;  %7311 = vmatprep.subr.bf16.mxu0 %v7310_v21  ;;  %v3551_v20 = vld [vmem:[#allocation12 + $0x528] sm:$0xff]  ;;  %v3549_v21 = vld [vmem:[#allocation12 + $0x518] sm:$0xff]  ;;  %v7328_v11 = vpack.c.bf16 %v3544_v62, %v3540_v14  ;;  %v3572_v9 = vld [vmem:[#allocation12 + $0x5d0] sm:$0xff] }
 0x787   : > { %6629 = vmatmul.mubr.msk.f32.gmra.mrb[30].mxu0 %vm3208_vm7, %v3413_v25  ;;  %6625 = vmatmul.mubr.msk.f32.gmra.mrb[42].mxu1 %vm3208_vm7, %v3207_v43  ;;  %v7274_v24 = vpack.c.bf16 %v3551_v20, %v3547_v8  ;;  %v7330_v25 = vpack.c.bf16 %v3553_v22, %v3549_v21  ;;  %v3548_v43 = vld [vmem:[#allocation12 + $0x510] sm:$0xff]  ;;  %v3578_v62 = vld [vmem:[#allocation12 + $0x600] sm:$0xff] }
 0x788   : > { %v3582_v8 = vld [vmem:[#allocation12 + $0x620] sm:$0xff]  ;;  %v3580_v22 = vld [vmem:[#allocation12 + $0x610] sm:$0xff] }
 0x789   : > { %7257 = vmatpush1.bf16.msra.mxu1 %v7256_v26  ;;  %7313 = vmatpush1.bf16.msra.mxu0 %v7312_v27  ;;  %v3552_v26 = vld [vmem:[#allocation12 + $0x530] sm:$0xff]  ;;  %v3555_v27 = vld [vmem:[#allocation12 + $0x548] sm:$0xff] }
 0x78a   : > { %7259 = vmatprep.subr.bf16.mxu1 %v7258_v44  ;;  %7315 = vmatprep.subr.bf16.mxu0 %v7314_v31  ;;  %v3561_v44 = vld [vmem:[#allocation12 + $0x578] sm:$0xff]  ;;  %v7276_v31 = vpack.c.bf16 %v3550_v17, %v3546_v13  ;;  %v7332_v33 = vpack.c.bf16 %v3552_v26, %v3548_v43  ;;  %v7278_v36 = vpack.c.bf16 %v3559_v29, %v3555_v27  ;;  %v3591_v13 = vld [vmem:[#allocation12 + $0x668] sm:$0xff]  ;;  %v3586_v26 = vld [vmem:[#allocation12 + $0x640] sm:$0xff] }
 0x78b   : > { %v7334_v37 = vpack.c.bf16 %v3561_v44, %v3557_v30  ;;  %v3589_v17 = vld [vmem:[#allocation12 + $0x658] sm:$0xff]  ;;  %v3590_v27 = vld [vmem:[#allocation12 + $0x660] sm:$0xff]  ;;  %v3588_v44 = vld [vmem:[#allocation12 + $0x650] sm:$0xff] }
 0x78d   : > { %7261 = vmatpush1.bf16.msra.mxu1 %v7260_v3  ;;  %7317 = vmatpush1.bf16.msra.mxu0 %v7316_v45  ;;  %v3560_v3 = vld [vmem:[#allocation12 + $0x570] sm:$0xff]  ;;  %v3563_v45 = vld [vmem:[#allocation12 + $0x588] sm:$0xff] }
 0x78e   : > { %7263 = vmatprep.subr.bf16.mxu1 %v7262_v41  ;;  %7319 = vmatprep.subr.bf16.mxu0 %v7318_v42  ;;  %v3569_v41 = vld [vmem:[#allocation12 + $0x5b8] sm:$0xff]  ;;  %v7280_v42 = vpack.c.bf16 %v3558_v35, %v3554_v34  ;;  %v7336_v60 = vpack.c.bf16 %v3560_v3, %v3556_v38  ;;  %v7282_v46 = vpack.c.bf16 %v3567_v39, %v3563_v45  ;;  %v3599_v34 = vld [vmem:[#allocation12 + $0x6a8] sm:$0xff]  ;;  %v3594_v3 = vld [vmem:[#allocation12 + $0x680] sm:$0xff] }
 0x78f   : > { %v7338_v48 = vpack.c.bf16 %v3569_v41, %v3565_v40  ;;  %v3597_v35 = vld [vmem:[#allocation12 + $0x698] sm:$0xff]  ;;  %v3598_v45 = vld [vmem:[#allocation12 + $0x6a0] sm:$0xff]  ;;  %v3596_v41 = vld [vmem:[#allocation12 + $0x690] sm:$0xff] }
 0x791   : > { %7265 = vmatpush1.bf16.msra.mxu1 %v7264_v49  ;;  %7321 = vmatpush1.bf16.msra.mxu0 %v7320_v50  ;;  %v3568_v49 = vld [vmem:[#allocation12 + $0x5b0] sm:$0xff]  ;;  %v3571_v50 = vld [vmem:[#allocation12 + $0x5c8] sm:$0xff] }
 0x792   : > { %7267 = vmatprep.subr.bf16.mxu1 %v7266_v52  ;;  %7323 = vmatprep.subr.bf16.mxu0 %v7322_v57  ;;  %v3577_v52 = vld [vmem:[#allocation12 + $0x5f8] sm:$0xff]  ;;  %v7284_v57 = vpack.c.bf16 %v3566_v6, %v3562_v7  ;;  %v7340_v58 = vpack.c.bf16 %v3568_v49, %v3564_v28  ;;  %v7286_v0 = vpack.c.bf16 %v3575_v51, %v3571_v50  ;;  %v3607_v7 = vld [vmem:[#allocation12 + $0x6e8] sm:$0xff]  ;;  %v3602_v49 = vld [vmem:[#allocation12 + $0x6c0] sm:$0xff] }
 0x793   : > { %v7342_v55 = vpack.c.bf16 %v3577_v52, %v3573_v23  ;;  %v3605_v6 = vld [vmem:[#allocation12 + $0x6d8] sm:$0xff]  ;;  %v3606_v23 = vld [vmem:[#allocation12 + $0x6e0] sm:$0xff]  ;;  %v3604_v52 = vld [vmem:[#allocation12 + $0x6d0] sm:$0xff] }
 0x795   : > { %7269 = vmatpush1.bf16.msra.mxu1 %v7268_v10  ;;  %7325 = vmatpush1.bf16.msra.mxu0 %v7324_v12  ;;  %v3576_v10 = vld [vmem:[#allocation12 + $0x5f0] sm:$0xff]  ;;  %v3579_v12 = vld [vmem:[#allocation12 + $0x608] sm:$0xff] }
 0x796   : > { %7271 = vmatprep.subr.bf16.mxu1 %v7270_v18  ;;  %7327 = vmatprep.subr.bf16.mxu0 %v7326_v19  ;;  %v3585_v18 = vld [vmem:[#allocation12 + $0x638] sm:$0xff]  ;;  %v7288_v19 = vpack.c.bf16 %v3574_v59, %v3570_v47  ;;  %v7344_v14 = vpack.c.bf16 %v3576_v10, %v3572_v9  ;;  %v7290_v20 = vpack.c.bf16 %v3583_v15, %v3579_v12  ;;  %v3300_v59 = vld [vmem:[#allocation12 + $0x8] sm:$0xff]  ;;  %v3299_v15 = vld [vmem:[#allocation12] sm:$0xff] }
 0x797   : > { %v7346_v21 = vpack.c.bf16 %v3585_v18, %v3581_v16  ;;  %v3306_v10 = vld [vmem:[#allocation12 + $0x38] sm:$0xff]  ;;  %v3303_v16 = vld [vmem:[#allocation12 + $0x20] sm:$0xff]  ;;  %v3301_v18 = vld [vmem:[#allocation12 + $0x10] sm:$0xff] }
 0x799   : > { %7273 = vmatpush1.bf16.msra.mxu1 %v7272_v1  ;;  %7329 = vmatpush1.bf16.msra.mxu0 %v7328_v11  ;;  %v3584_v1 = vld [vmem:[#allocation12 + $0x630] sm:$0xff]  ;;  %v3587_v11 = vld [vmem:[#allocation12 + $0x648] sm:$0xff] }
 0x79a   : > { %7275 = vmatprep.subr.bf16.mxu1 %v7274_v24  ;;  %7331 = vmatprep.subr.bf16.mxu0 %v7330_v25  ;;  %v3593_v24 = vld [vmem:[#allocation12 + $0x678] sm:$0xff]  ;;  %v7292_v25 = vpack.c.bf16 %v3582_v8, %v3578_v62  ;;  %v7348_v43 = vpack.c.bf16 %v3584_v1, %v3580_v22  ;;  %v7294_v29 = vpack.c.bf16 %v3591_v13, %v3587_v11  ;;  %v3312_v62 = vld [vmem:[#allocation12 + $0x68] sm:$0xff]  ;;  %v3307_v11 = vld [vmem:[#allocation12 + $0x40] sm:$0xff] }
 0x79b   : > { %v7350_v30 = vpack.c.bf16 %v3593_v24, %v3589_v17  ;;  %v3310_v8 = vld [vmem:[#allocation12 + $0x58] sm:$0xff]  ;;  %v7364_v22 = vpack.c.bf16 %v3303_v16, %v3299_v15  ;;  %v3311_v13 = vld [vmem:[#allocation12 + $0x60] sm:$0xff] }
 0x79c   : > { %v3335_v15 = vld [vmem:[#allocation12 + $0x120] sm:$0xff] }
 0x79d   : > { %7277 = vmatpush1.bf16.msra.mxu1 %v7276_v31  ;;  %7333 = vmatpush1.bf16.msra.mxu0 %v7332_v33  ;;  %v3592_v31 = vld [vmem:[#allocation12 + $0x670] sm:$0xff]  ;;  %v3595_v33 = vld [vmem:[#allocation12 + $0x688] sm:$0xff] }
 0x79e   : > { %7279 = vmatprep.subr.bf16.mxu1 %v7278_v36  ;;  %7335 = vmatprep.subr.bf16.mxu0 %v7334_v37  ;;  %v3601_v36 = vld [vmem:[#allocation12 + $0x6b8] sm:$0xff]  ;;  %v7296_v37 = vpack.c.bf16 %v3590_v27, %v3586_v26  ;;  %v7352_v38 = vpack.c.bf16 %v3592_v31, %v3588_v44  ;;  %v7298_v39 = vpack.c.bf16 %v3599_v34, %v3595_v33  ;;  %v3309_v26 = vld [vmem:[#allocation12 + $0x50] sm:$0xff]  ;;  %v3320_v44 = vld [vmem:[#allocation12 + $0xa8] sm:$0xff] }
 0x79f   : > { %v7354_v40 = vpack.c.bf16 %v3601_v36, %v3597_v35  ;;  %v3313_v27 = vld [vmem:[#allocation12 + $0x70] sm:$0xff]  ;;  %v3318_v31 = vld [vmem:[#allocation12 + $0x98] sm:$0xff]  ;;  %v7368_v34 = vpack.c.bf16 %v3311_v13, %v3307_v11  ;;  %v3315_v36 = vld [vmem:[#allocation12 + $0x80] sm:$0xff] }
 0x7a0   : > { %v3322_v33 = vld [vmem:[#allocation12 + $0xb8] sm:$0xff]  ;;  %v7424_v35 = vpack.c.bf16 %v3313_v27, %v3309_v26  ;;  %v3339_v11 = vld [vmem:[#allocation12 + $0x140] sm:$0xff]  ;;  %v3345_v26 = vld [vmem:[#allocation12 + $0x170] sm:$0xff] }
 0x7a1   : > { %7281 = vmatpush1.bf16.msra.mxu1 %v7280_v42  ;;  %7337 = vmatpush1.bf16.msra.mxu0 %v7336_v60  ;;  %v3600_v42 = vld [vmem:[#allocation12 + $0x6b0] sm:$0xff]  ;;  %v3603_v60 = vld [vmem:[#allocation12 + $0x6c8] sm:$0xff]  ;;  %v3343_v13 = vld [vmem:[#allocation12 + $0x160] sm:$0xff] }
 0x7a2   : > { %7283 = vmatprep.subr.bf16.mxu1 %v7282_v46  ;;  %7339 = vmatprep.subr.bf16.mxu0 %v7338_v48  ;;  %v3609_v46 = vld [vmem:[#allocation12 + $0x6f8] sm:$0xff]  ;;  %v7300_v48 = vpack.c.bf16 %v3598_v45, %v3594_v3  ;;  %v7356_v28 = vpack.c.bf16 %v3600_v42, %v3596_v41  ;;  %v7302_v50 = vpack.c.bf16 %v3607_v7, %v3603_v60  ;;  %v3321_v41 = vld [vmem:[#allocation12 + $0xb0] sm:$0xff]  ;;  %v3324_v42 = vld [vmem:[#allocation12 + $0xc8] sm:$0xff] }
 0x7a3   : > { %v7358_v51 = vpack.c.bf16 %v3609_v46, %v3605_v6  ;;  %v3328_v6 = vld [vmem:[#allocation12 + $0xe8] sm:$0xff]  ;;  %v3326_v46 = vld [vmem:[#allocation12 + $0xd8] sm:$0xff] }
 0x7a4   : > { %v3348_v27 = vld [vmem:[#allocation12 + $0x188] sm:$0xff] }
 0x7a5   : > { %7285 = vmatpush1.bf16.msra.mxu1 %v7284_v57  ;;  %7341 = vmatpush1.bf16.msra.mxu0 %v7340_v58  ;;  %v3608_v57 = vld [vmem:[#allocation12 + $0x6f0] sm:$0xff]  ;;  %v7304_v58 = vpack.c.bf16 %v3606_v23, %v3602_v49  ;;  %v7374_v23 = vpack.c.bf16 %v3328_v6, %v3324_v42  ;;  %v3362_v42 = vld [vmem:[#allocation12 + $0x1f8] sm:$0xff] }
 0x7a6   : > { %7287 = vmatprep.subr.bf16.mxu1 %v7286_v0  ;;  %7343 = vmatprep.subr.bf16.mxu0 %v7342_v55  ;;  %v7360_v47 = vpack.c.bf16 %v3608_v57, %v3604_v52  ;;  %v3304_v0 = vld [vmem:[#allocation12 + $0x28] sm:$0xff]  ;;  %v3302_v55 = vld [vmem:[#allocation12 + $0x18] sm:$0xff]  ;;  %v3325_v57 = vld [vmem:[#allocation12 + $0xd0] sm:$0xff] }
 0x7a7   : > { %v7362_v9 = vpack.c.bf16 %v3304_v0, %v3300_v59  ;;  %v7418_v12 = vpack.c.bf16 %v3306_v10, %v3302_v55  ;;  %v3336_v59 = vld [vmem:[#allocation12 + $0x128] sm:$0xff]  ;;  %v3334_v0 = vld [vmem:[#allocation12 + $0x118] sm:$0xff] }
 0x7a8   : > { %v3338_v55 = vld [vmem:[#allocation12 + $0x138] sm:$0xff] }
 0x7a9   : > { %7289 = vmatpush1.bf16.msra.mxu1 %v7288_v19  ;;  %7345 = vmatpush1.bf16.msra.mxu0 %v7344_v14  ;;  %v3305_v19 = vld [vmem:[#allocation12 + $0x30] sm:$0xff]  ;;  %v3308_v14 = vld [vmem:[#allocation12 + $0x48] sm:$0xff] }
 0x7aa   : > { %7291 = vmatprep.subr.bf16.mxu1 %v7290_v20  ;;  %7347 = vmatprep.subr.bf16.mxu0 %v7346_v21  ;;  %v3314_v20 = vld [vmem:[#allocation12 + $0x78] sm:$0xff]  ;;  %v7420_v1 = vpack.c.bf16 %v3305_v19, %v3301_v18  ;;  %v7434_v18 = vpack.c.bf16 %v3338_v55, %v3334_v0  ;;  %v3333_v19 = vld [vmem:[#allocation12 + $0x110] sm:$0xff]  ;;  %v3363_v0 = vld [vmem:[#allocation12 + $0x200] sm:$0xff] }
 0x7ab   : > { %v3367_v55 = vld [vmem:[#allocation12 + $0x220] sm:$0xff] }
 0x7ad   : > { %7293 = vmatpush1.bf16.msra.mxu1 %v7292_v25  ;;  %7349 = vmatpush1.bf16.msra.mxu0 %v7348_v43  ;;  %v7366_v25 = vpack.c.bf16 %v3312_v62, %v3308_v14  ;;  %v7422_v43 = vpack.c.bf16 %v3314_v20, %v3310_v8  ;;  %v3337_v14 = vld [vmem:[#allocation12 + $0x130] sm:$0xff]  ;;  %v3340_v62 = vld [vmem:[#allocation12 + $0x148] sm:$0xff]  ;;  %v3342_v20 = vld [vmem:[#allocation12 + $0x158] sm:$0xff] }
 0x7ae   : > { %7295 = vmatprep.subr.bf16.mxu1 %v7294_v29  ;;  %7351 = vmatprep.subr.bf16.mxu0 %v7350_v30  ;;  %v3316_v29 = vld [vmem:[#allocation12 + $0x88] sm:$0xff] }
 0x7af   : > { %v7370_v45 = vpack.c.bf16 %v3320_v44, %v3316_v29  ;;  %v3344_v8 = vld [vmem:[#allocation12 + $0x168] sm:$0xff]  ;;  %v3354_v44 = vld [vmem:[#allocation12 + $0x1b8] sm:$0xff] }
 0x7b0   : > { %v3352_v29 = vld [vmem:[#allocation12 + $0x1a8] sm:$0xff] }
 0x7b1   : > { %7297 = vmatpush1.bf16.msra.mxu1 %v7296_v37  ;;  %7353 = vmatpush1.bf16.msra.mxu0 %v7352_v38  ;;  %v3319_v37 = vld [vmem:[#allocation12 + $0xa0] sm:$0xff] }
 0x7b2   : > { %7299 = vmatprep.subr.bf16.mxu1 %v7298_v39  ;;  %7355 = vmatprep.subr.bf16.mxu0 %v7354_v40  ;;  %v7426_v39 = vpack.c.bf16 %v3322_v33, %v3318_v31  ;;  %v3317_v40 = vld [vmem:[#allocation12 + $0x90] sm:$0xff]  ;;  %v7384_v31 = vpack.c.bf16 %v3343_v13, %v3339_v11 }
 0x7b3   : > { %v7428_v49 = vpack.c.bf16 %v3321_v41, %v3317_v40  ;;  %v3360_v40 = vld [vmem:[#allocation12 + $0x1e8] sm:$0xff]  ;;  %v3358_v41 = vld [vmem:[#allocation12 + $0x1d8] sm:$0xff]  ;;  %v3373_v11 = vld [vmem:[#allocation12 + $0x250] sm:$0xff] }
 0x7b4   : > { %v3377_v13 = vld [vmem:[#allocation12 + $0x270] sm:$0xff] }
 0x7b5   : > { %7301 = vmatpush1.bf16.msra.mxu1 %v7300_v48  ;;  %7357 = vmatpush1.bf16.msra.mxu0 %v7356_v28  ;;  %v3330_v48 = vld [vmem:[#allocation12 + $0xf8] sm:$0xff]  ;;  %v7372_v28 = vpack.c.bf16 %v3319_v37, %v3315_v36  ;;  %v7386_v36 = vpack.c.bf16 %v3352_v29, %v3348_v27  ;;  %v7456_v29 = vpack.c.bf16 %v3377_v13, %v3373_v11 }
 0x7b6   : > { %7303 = vmatprep.subr.bf16.mxu1 %v7302_v50  ;;  %7359 = vmatprep.subr.bf16.mxu0 %v7358_v51  ;;  %v3323_v50 = vld [vmem:[#allocation12 + $0xc0] sm:$0xff]  ;;  %v7430_v52 = vpack.c.bf16 %v3330_v48, %v3326_v46 }
 0x7b7   : > { %v3327_v51 = vld [vmem:[#allocation12 + $0xe0] sm:$0xff] }
 0x7b8   : > { %v3355_v46 = vld [vmem:[#allocation12 + $0x1c0] sm:$0xff] }
 0x7b9   : > { %7305 = vmatpush1.bf16.msra.mxu1 %v7304_v58  ;;  %7361 = vmatpush1.bf16.msra.mxu0 %v7360_v47  ;;  %v3329_v58 = vld [vmem:[#allocation12 + $0xf0] sm:$0xff]  ;;  %v3332_v47 = vld [vmem:[#allocation12 + $0x108] sm:$0xff]  ;;  %v3359_v48 = vld [vmem:[#allocation12 + $0x1e0] sm:$0xff] }
 0x7ba   : > { %7363 = vmatprep.subr.bf16.mxu1 %v7362_v9  ;;  %7419 = vmatprep.subr.bf16.mxu0 %v7418_v12  ;;  %v7376_v9 = vpack.c.bf16 %v3327_v51, %v3323_v50  ;;  %v7432_v10 = vpack.c.bf16 %v3329_v58, %v3325_v57  ;;  %v3331_v12 = vld [vmem:[#allocation12 + $0x100] sm:$0xff]  ;;  %v7378_v16 = vpack.c.bf16 %v3336_v59, %v3332_v47  ;;  %v3357_v50 = vld [vmem:[#allocation12 + $0x1d0] sm:$0xff]  ;;  %v3366_v57 = vld [vmem:[#allocation12 + $0x218] sm:$0xff] }
 0x7bb   : > { %v3361_v51 = vld [vmem:[#allocation12 + $0x1f0] sm:$0xff]  ;;  %v3370_v58 = vld [vmem:[#allocation12 + $0x238] sm:$0xff]  ;;  %v7392_v47 = vpack.c.bf16 %v3359_v48, %v3355_v46 }
 0x7bc   : > { %v7448_v59 = vpack.c.bf16 %v3361_v51, %v3357_v50  ;;  %v3389_v46 = vld [vmem:[#allocation12 + $0x2d0] sm:$0xff]  ;;  %v3398_v50 = vld [vmem:[#allocation12 + $0x318] sm:$0xff] }
 0x7bd   : > { %v3393_v48 = vld [vmem:[#allocation12 + $0x2f0] sm:$0xff]  ;;  %v3402_v51 = vld [vmem:[#allocation12 + $0x338] sm:$0xff] }
 0x856   : > { %v3486_v21 = vpop.f32.mrb[28].mxu0  ;;  %v9500_v17 = vpop.f32.mrb[40].mxu1 }
 0x857   : > { %v3488_v24 = vpop.f32.mrb[29].mxu0  ;;  %v3290_v30 = vpop.f32.mrb[41].mxu1 }
 0x858   : > { %6630 = vmatprep.mubr.msk.f32.mxu1 %vm3610_vm8, %v3488_v24  ;;  %6632 = vmatprep.mubr.msk.f32.mxu0 %vm3610_vm8, %v3488_v24  ;;  %v7382_v24 = vpack.c.bf16 %v3344_v8, %v3340_v62  ;;  %v7396_v62 = vpack.c.bf16 %v3367_v55, %v3363_v0  ;;  %v3397_v0 = vld [vmem:[#allocation12 + $0x310] sm:$0xff] }
 0x859   : > { %3682 = vmatmul.mubr.f32.vlgmr.msra.gmra.mrb[44].mxu1 %v3486_v21  ;;  %3759 = vmatmul.mubr.f32.vlgmr.msra.gmra.mrb[32].mxu0 %v3486_v21  ;;  %v3346_v21 = vld [vmem:[#allocation12 + $0x178] sm:$0xff]  ;;  %v3401_v55 = vld [vmem:[#allocation12 + $0x330] sm:$0xff] }
 0x85a   : > { %7365 = vmatpush1.bf16.msra.mxu1 %v7364_v22  ;;  %7421 = vmatpush1.bf16.msra.mxu0 %v7420_v1  ;;  %v3492_v38 = vpop.f32.mrb[30].mxu0  ;;  %v9504_v3 = vpop.f32.mrb[42].mxu1  ;;  %v7380_v22 = vpack.c.bf16 %v3335_v15, %v3331_v12  ;;  %v7436_v1 = vpack.c.bf16 %v3337_v14, %v3333_v19  ;;  %v3365_v12 = vld [vmem:[#allocation12 + $0x210] sm:$0xff]  ;;  %v3374_v19 = vld [vmem:[#allocation12 + $0x258] sm:$0xff] }
 0x85b   : > { %7367 = vmatprep.subr.bf16.mxu1 %v7366_v25  ;;  %7423 = vmatprep.subr.bf16.mxu0 %v7422_v43  ;;  %v3494_v60 = vpop.f32.mrb[31].mxu0  ;;  %v9506_v7 = vpop.f32.mrb[43].mxu1  ;;  %v7438_v25 = vpack.c.bf16 %v3346_v21, %v3342_v20  ;;  %v3341_v43 = vld [vmem:[#allocation12 + $0x150] sm:$0xff]  ;;  %v3378_v14 = vld [vmem:[#allocation12 + $0x278] sm:$0xff]  ;;  %v3371_v20 = vld [vmem:[#allocation12 + $0x240] sm:$0xff] }
 0x85c   : > { %6631 = vmatprep.mubr.msk.f32.mxu1 %vm3610_vm8, %v3494_v60  ;;  %6633 = vmatprep.mubr.msk.f32.mxu0 %vm3610_vm8, %v3494_v60  ;;  %v7440_v33 = vpack.c.bf16 %v3345_v26, %v3341_v43  ;;  %v3369_v15 = vld [vmem:[#allocation12 + $0x230] sm:$0xff]  ;;  %v3375_v21 = vld [vmem:[#allocation12 + $0x260] sm:$0xff]  ;;  %v3382_v43 = vld [vmem:[#allocation12 + $0x298] sm:$0xff] }
 0x85d   : > { %3688 = vmatmul.mubr.f32.gmra.mrb[46].mxu1 %v3492_v38  ;;  %3765 = vmatmul.mubr.f32.gmra.mrb[34].mxu0 %v3492_v38  ;;  %v3349_v38 = vld [vmem:[#allocation12 + $0x190] sm:$0xff]  ;;  %v7452_v8 = vpack.c.bf16 %v3369_v15, %v3365_v12  ;;  %v3386_v26 = vld [vmem:[#allocation12 + $0x2b8] sm:$0xff]  ;;  %v7400_v27 = vpack.c.bf16 %v3375_v21, %v3371_v20 }
 0x85e   : > { %7369 = vmatpush1.bf16.msra.mxu1 %v7368_v34  ;;  %7425 = vmatpush1.bf16.msra.mxu0 %v7424_v35  ;;  %v3347_v34 = vld [vmem:[#allocation12 + $0x180] sm:$0xff]  ;;  %v3406_v12 = vld [vmem:[#allocation12 + $0x358] sm:$0xff]  ;;  %v3405_v20 = vld [vmem:[#allocation12 + $0x350] sm:$0xff] }
 0x85f   : > { %7371 = vmatprep.subr.bf16.mxu1 %v7370_v45  ;;  %7427 = vmatprep.subr.bf16.mxu0 %v7426_v39  ;;  %v3351_v35 = vld [vmem:[#allocation12 + $0x1a0] sm:$0xff]  ;;  %v3353_v45 = vld [vmem:[#allocation12 + $0x1b0] sm:$0xff]  ;;  %v3356_v39 = vld [vmem:[#allocation12 + $0x1c8] sm:$0xff] }
 0x860   : > { %6634 = vmatprep.mubr.msk.f32.mxu1 %vm3610_vm8, %v3290_v30  ;;  %6636 = vmatprep.mubr.msk.f32.mxu0 %vm3610_vm8, %v3290_v30  ;;  %v3350_v30 = vld [vmem:[#allocation12 + $0x198] sm:$0xff]  ;;  %v7388_v60 = vpack.c.bf16 %v3351_v35, %v3347_v34  ;;  %v7444_v6 = vpack.c.bf16 %v3353_v45, %v3349_v38  ;;  %v3381_v34 = vld [vmem:[#allocation12 + $0x290] sm:$0xff] }
 0x861   : > { %v7442_v37 = vpack.c.bf16 %v3354_v44, %v3350_v30  ;;  %v3379_v30 = vld [vmem:[#allocation12 + $0x280] sm:$0xff]  ;;  %v3385_v35 = vld [vmem:[#allocation12 + $0x2b0] sm:$0xff]  ;;  %v3390_v38 = vld [vmem:[#allocation12 + $0x2d8] sm:$0xff] }
 0x862   : > { %7373 = vmatpush1.bf16.msra.mxu1 %v7372_v28  ;;  %7429 = vmatpush1.bf16.msra.mxu0 %v7428_v49  ;;  %v7390_v28 = vpack.c.bf16 %v3360_v40, %v3356_v39  ;;  %v7446_v49 = vpack.c.bf16 %v3362_v42, %v3358_v41  ;;  %v3383_v44 = vld [vmem:[#allocation12 + $0x2a0] sm:$0xff]  ;;  %v3394_v45 = vld [vmem:[#allocation12 + $0x2f8] sm:$0xff]  ;;  %v7460_v40 = vpack.c.bf16 %v3385_v35, %v3381_v34  ;;  %v3409_v21 = vld [vmem:[#allocation12 + $0x370] sm:$0xff] }
 0x863   : > { %7375 = vmatprep.subr.bf16.mxu1 %v7374_v23  ;;  %7431 = vmatprep.subr.bf16.mxu0 %v7430_v52  ;;  %v3364_v23 = vld [vmem:[#allocation12 + $0x208] sm:$0xff]  ;;  %v7404_v39 = vpack.c.bf16 %v3383_v44, %v3379_v30  ;;  %v3387_v41 = vld [vmem:[#allocation12 + $0x2c0] sm:$0xff]  ;;  %v3410_v15 = vld [vmem:[#allocation12 + $0x378] sm:$0xff]  ;;  %v7472_v13 = vpack.c.bf16 %v3409_v21, %v3405_v20 }
 0x864   : > { %v3368_v52 = vld [vmem:[#allocation12 + $0x228] sm:$0xff]  ;;  %v3391_v42 = vld [vmem:[#allocation12 + $0x2e0] sm:$0xff]  ;;  %v4037_v35 = vld [vmem:[#allocation12 + $0x798] sm:$0xff] }
 0x865   : > { %v4023_v30 = vld [vmem:[#allocation12 + $0x728] sm:$0xff] }
 0x866   : > { %7377 = vmatpush1.bf16.msra.mxu1 %v7376_v9  ;;  %7433 = vmatpush1.bf16.msra.mxu0 %v7432_v10  ;;  %v7394_v9 = vpack.c.bf16 %v3368_v52, %v3364_v23  ;;  %v7450_v10 = vpack.c.bf16 %v3370_v58, %v3366_v57  ;;  %v7408_v23 = vpack.c.bf16 %v3391_v42, %v3387_v41  ;;  %v3395_v57 = vld [vmem:[#allocation12 + $0x300] sm:$0xff]  ;;  %v4045_v41 = vld [vmem:[#allocation12 + $0x7d8] sm:$0xff]  ;;  %v4047_v20 = vld [vmem:[#allocation12 + $0x7e8] sm:$0xff] }
 0x867   : > { %7379 = vmatprep.subr.bf16.mxu1 %v7378_v16  ;;  %7435 = vmatprep.subr.bf16.mxu0 %v7434_v18  ;;  %v3372_v16 = vld [vmem:[#allocation12 + $0x248] sm:$0xff]  ;;  %v7464_v52 = vpack.c.bf16 %v3393_v48, %v3389_v46  ;;  %v3399_v58 = vld [vmem:[#allocation12 + $0x320] sm:$0xff]  ;;  %v4049_v42 = vld [vmem:[#allocation12 + $0x7f8] sm:$0xff] }
 0x868   : > { %v3376_v18 = vld [vmem:[#allocation12 + $0x268] sm:$0xff]  ;;  %v3932_v48 = vld [vmem:[#allocation11 + $0x20] sm:$0xff] }
 0x869   : > { %v4031_v46 = vld [vmem:[#allocation12 + $0x768] sm:$0xff] }
 0x86a   : > { %7381 = vmatpush1.bf16.msra.mxu1 %v7380_v22  ;;  %7437 = vmatpush1.bf16.msra.mxu0 %v7436_v1  ;;  %v7398_v22 = vpack.c.bf16 %v3376_v18, %v3372_v16  ;;  %v7454_v1 = vpack.c.bf16 %v3378_v14, %v3374_v19  ;;  %v7412_v16 = vpack.c.bf16 %v3399_v58, %v3395_v57  ;;  %v3403_v19 = vld [vmem:[#allocation12 + $0x340] sm:$0xff] }
 0x86b   : > { %7383 = vmatprep.subr.bf16.mxu1 %v7382_v24  ;;  %7439 = vmatprep.subr.bf16.mxu0 %v7438_v25  ;;  %v3380_v24 = vld [vmem:[#allocation12 + $0x288] sm:$0xff]  ;;  %v7468_v18 = vpack.c.bf16 %v3401_v55, %v3397_v0  ;;  %v4026_v58 = vld [vmem:[#allocation12 + $0x740] sm:$0xff]  ;;  %v3933_v0 = vld [vmem:[#allocation11 + $0x28] sm:$0x3f] }
 0x86c   : > { %v3384_v25 = vld [vmem:[#allocation12 + $0x2a8] sm:$0xff] }
 0x86e   : > { %7385 = vmatpush1.bf16.msra.mxu1 %v7384_v31  ;;  %7441 = vmatpush1.bf16.msra.mxu0 %v7440_v33  ;;  %v7402_v31 = vpack.c.bf16 %v3384_v25, %v3380_v24  ;;  %v7458_v33 = vpack.c.bf16 %v3386_v26, %v3382_v43  ;;  %v4020_v25 = vld [vmem:[#allocation12 + $0x710] sm:$0xff]  ;;  %v4029_v26 = vld [vmem:[#allocation12 + $0x758] sm:$0xff] }
 0x86f   : > { %7387 = vmatprep.subr.bf16.mxu1 %v7386_v36  ;;  %7443 = vmatprep.subr.bf16.mxu0 %v7442_v37  ;;  %v3388_v36 = vld [vmem:[#allocation12 + $0x2c8] sm:$0xff]  ;;  %v4024_v43 = vld [vmem:[#allocation12 + $0x730] sm:$0xff] }
 0x870   : > { %v3392_v37 = vld [vmem:[#allocation12 + $0x2e8] sm:$0xff]  ;;  %v7538_v44 = vpack.c.bf16 %v4024_v43, %v4020_v25  ;;  %v4073_v25 = vld [vmem:[#allocation12 + $0x8b8] sm:$0xff] }
 0x872   : > { %7389 = vmatpush1.bf16.msra.mxu1 %v7388_v60  ;;  %7445 = vmatpush1.bf16.msra.mxu0 %v7444_v6  ;;  %v7406_v60 = vpack.c.bf16 %v3392_v37, %v3388_v36  ;;  %v7462_v6 = vpack.c.bf16 %v3394_v45, %v3390_v38  ;;  %v4041_v36 = vld [vmem:[#allocation12 + $0x7b8] sm:$0xff] }
 0x873   : > { %7391 = vmatprep.subr.bf16.mxu1 %v7390_v28  ;;  %7447 = vmatprep.subr.bf16.mxu0 %v7446_v49  ;;  %v3396_v28 = vld [vmem:[#allocation12 + $0x308] sm:$0xff]  ;;  %v7544_v45 = vpack.c.bf16 %v4041_v36, %v4037_v35  ;;  %v4077_v35 = vld [vmem:[#allocation12 + $0x8d8] sm:$0xff] }
 0x874   : > { %v3400_v49 = vld [vmem:[#allocation12 + $0x328] sm:$0xff] }
 0x876   : > { %7393 = vmatpush1.bf16.msra.mxu1 %v7392_v47  ;;  %7449 = vmatpush1.bf16.msra.mxu0 %v7448_v59  ;;  %v7410_v47 = vpack.c.bf16 %v3400_v49, %v3396_v28  ;;  %v7466_v59 = vpack.c.bf16 %v3402_v51, %v3398_v50  ;;  %v7548_v28 = vpack.c.bf16 %v4049_v42, %v4045_v41  ;;  %v4044_v49 = vld [vmem:[#allocation12 + $0x7d0] sm:$0xff]  ;;  %v4053_v51 = vld [vmem:[#allocation12 + $0x818] sm:$0xff]  ;;  %v4063_v41 = vld [vmem:[#allocation12 + $0x868] sm:$0xff] }
 0x877   : > { %7395 = vmatprep.subr.bf16.mxu1 %v7394_v9  ;;  %7451 = vmatprep.subr.bf16.mxu0 %v7450_v10  ;;  %v3404_v9 = vld [vmem:[#allocation12 + $0x348] sm:$0xff]  ;;  %v4048_v50 = vld [vmem:[#allocation12 + $0x7f0] sm:$0xff] }
 0x878   : > { %v3408_v10 = vld [vmem:[#allocation12 + $0x368] sm:$0xff]  ;;  %v7550_v55 = vpack.c.bf16 %v4048_v50, %v4044_v49  ;;  %v4058_v49 = vld [vmem:[#allocation12 + $0x840] sm:$0xff] }
 0x879   : > { %v7414_v14 = vpack.c.bf16 %v3408_v10, %v3404_v9  ;;  %v4052_v10 = vld [vmem:[#allocation12 + $0x810] sm:$0xff]  ;;  %v4062_v50 = vld [vmem:[#allocation12 + $0x860] sm:$0xff] }
 0x87a   : > { %7397 = vmatpush1.bf16.msra.mxu1 %v7396_v62  ;;  %7453 = vmatpush1.bf16.msra.mxu0 %v7452_v8  ;;  %v7470_v62 = vpack.c.bf16 %v3410_v15, %v3406_v12  ;;  %v3407_v8 = vld [vmem:[#allocation12 + $0x360] sm:$0xff]  ;;  %v4056_v12 = vld [vmem:[#allocation12 + $0x830] sm:$0xff]  ;;  %v4061_v15 = vld [vmem:[#allocation12 + $0x858] sm:$0xff] }
 0x87b   : > { %7399 = vmatprep.subr.bf16.mxu1 %v7398_v22  ;;  %7455 = vmatprep.subr.bf16.mxu0 %v7454_v1  ;;  %v4021_v22 = vld [vmem:[#allocation12 + $0x718] sm:$0xff]  ;;  %v7416_v11 = vpack.c.bf16 %v3407_v8, %v3403_v19  ;;  %v4043_v8 = vld [vmem:[#allocation12 + $0x7c8] sm:$0xff]  ;;  %v7554_v21 = vpack.c.bf16 %v4056_v12, %v4052_v10  ;;  %v4070_v10 = vld [vmem:[#allocation12 + $0x8a0] sm:$0xff] }
 0x87c   : > { %v4025_v1 = vld [vmem:[#allocation12 + $0x738] sm:$0xff]  ;;  %v7492_v43 = vpack.c.bf16 %v4047_v20, %v4043_v8  ;;  %v4075_v12 = vld [vmem:[#allocation12 + $0x8c8] sm:$0xff] }
 0x87d   : > { %v7536_v24 = vpack.c.bf16 %v4025_v1, %v4021_v22  ;;  %v4060_v1 = vld [vmem:[#allocation12 + $0x850] sm:$0xff]  ;;  %v4105_v20 = vld [vmem:[#allocation12 + $0x9b8] sm:$0xff] }
 0x87e   : > { %7401 = vmatpush1.bf16.msra.mxu1 %v7400_v27  ;;  %7457 = vmatpush1.bf16.msra.mxu0 %v7456_v29  ;;  %v4033_v27 = vld [vmem:[#allocation12 + $0x778] sm:$0xff]  ;;  %v4019_v29 = vld [vmem:[#allocation12 + $0x708] sm:$0xff] }
 0x87f   : > { %7403 = vmatprep.subr.bf16.mxu1 %v7402_v31  ;;  %7459 = vmatprep.subr.bf16.mxu0 %v7458_v33  ;;  %v4028_v31 = vld [vmem:[#allocation12 + $0x750] sm:$0xff]  ;;  %v7540_v34 = vpack.c.bf16 %v4033_v27, %v4029_v26  ;;  %v7480_v37 = vpack.c.bf16 %v4023_v30, %v4019_v29  ;;  %v4042_v26 = vld [vmem:[#allocation12 + $0x7c0] sm:$0xff]  ;;  %v4051_v29 = vld [vmem:[#allocation12 + $0x808] sm:$0xff] }
 0x880   : > { %v4032_v33 = vld [vmem:[#allocation12 + $0x770] sm:$0xff]  ;;  %v4046_v27 = vld [vmem:[#allocation12 + $0x7e0] sm:$0xff]  ;;  %v4055_v30 = vld [vmem:[#allocation12 + $0x828] sm:$0xff] }
 0x881   : > { %v7542_v38 = vpack.c.bf16 %v4032_v33, %v4028_v31  ;;  %v4068_v33 = vld [vmem:[#allocation12 + $0x890] sm:$0xff]  ;;  %v7494_v36 = vpack.c.bf16 %v4046_v27, %v4042_v26  ;;  %v4109_v27 = vld [vmem:[#allocation12 + $0x9d8] sm:$0xff] }
 0x882   : > { %7405 = vmatpush1.bf16.msra.mxu1 %v7404_v39  ;;  %7461 = vmatpush1.bf16.msra.mxu0 %v7460_v40  ;;  %v4036_v39 = vld [vmem:[#allocation12 + $0x790] sm:$0xff] }
 0x883   : > { %7407 = vmatprep.subr.bf16.mxu1 %v7406_v60  ;;  %7463 = vmatprep.subr.bf16.mxu0 %v7462_v6  ;;  %v4040_v40 = vld [vmem:[#allocation12 + $0x7b0] sm:$0xff]  ;;  %v4022_v60 = vld [vmem:[#allocation12 + $0x720] sm:$0xff]  ;;  %v4027_v6 = vld [vmem:[#allocation12 + $0x748] sm:$0xff] }
 0x884   : > { %v7484_v57 = vpack.c.bf16 %v4031_v46, %v4027_v6  ;;  %v4080_v6 = vld [vmem:[#allocation12 + $0x8f0] sm:$0xff]  ;;  %v4085_v46 = vld [vmem:[#allocation12 + $0x918] sm:$0xff] }
 0x885   : > { %v4104_v26 = vld [vmem:[#allocation12 + $0x9b0] sm:$0xff] }
 0x886   : > { %7409 = vmatpush1.bf16.msra.mxu1 %v7408_v23  ;;  %7465 = vmatpush1.bf16.msra.mxu0 %v7464_v52  ;;  %v4057_v52 = vld [vmem:[#allocation12 + $0x838] sm:$0xff] }
 0x887   : > { %7411 = vmatprep.subr.bf16.mxu1 %v7410_v47  ;;  %7467 = vmatprep.subr.bf16.mxu0 %v7466_v59  ;;  %v4030_v47 = vld [vmem:[#allocation12 + $0x760] sm:$0xff]  ;;  %v4039_v59 = vld [vmem:[#allocation12 + $0x7a8] sm:$0xff]  ;;  %v7552_v9 = vpack.c.bf16 %v4057_v52, %v4053_v51 }
 0x888   : > { %v4067_v51 = vld [vmem:[#allocation12 + $0x888] sm:$0xff] }
 0x88a   : > { %7413 = vmatpush1.bf16.msra.mxu1 %v7412_v16  ;;  %7469 = vmatpush1.bf16.msra.mxu0 %v7468_v18  ;;  %v7486_v16 = vpack.c.bf16 %v4030_v47, %v4026_v58  ;;  %v4065_v18 = vld [vmem:[#allocation12 + $0x878] sm:$0xff]  ;;  %v4084_v58 = vld [vmem:[#allocation12 + $0x910] sm:$0xff] }
 0x88b   : > { %7415 = vmatprep.subr.bf16.mxu1 %v7414_v14  ;;  %7471 = vmatprep.subr.bf16.mxu0 %v7470_v62  ;;  %v4034_v14 = vld [vmem:[#allocation12 + $0x780] sm:$0xff]  ;;  %v7556_v22 = vpack.c.bf16 %v4065_v18, %v4061_v15  ;;  %v4088_v47 = vld [vmem:[#allocation12 + $0x930] sm:$0xff]  ;;  %v4079_v15 = vld [vmem:[#allocation12 + $0x8e8] sm:$0xff] }
 0x88c   : > { %v4038_v62 = vld [vmem:[#allocation12 + $0x7a0] sm:$0xff] }
 0x88e   : > { %7417 = vmatpush1.bf16.msra.mxu1 %v7416_v11  ;;  %7473 = vmatpush1.bf16.msra.mxu0 %v7472_v13  ;;  %v4064_v11 = vld [vmem:[#allocation12 + $0x870] sm:$0xff]  ;;  %v4069_v13 = vld [vmem:[#allocation12 + $0x898] sm:$0xff] }
 0x88f   : > { %7476 = vmatprep.subr.msk.bf16.mxu1 %vm9476_vm6, %v9480_v56  ;;  %7537 = vmatprep.subr.bf16.mxu0 %v7536_v24  ;;  %v7490_v24 = vpack.c.bf16 %v4038_v62, %v4034_v14  ;;  %v7560_v31 = vpack.c.bf16 %v4073_v25, %v4069_v13  ;;  %v4096_v14 = vld [vmem:[#allocation12 + $0x970] sm:$0xff]  ;;  %v4101_v62 = vld [vmem:[#allocation12 + $0x998] sm:$0xff]  ;;  %v4087_v13 = vld [vmem:[#allocation12 + $0x928] sm:$0xff] }
 0x890   : > { %v7576_v25 = vpack.c.bf16 %v4105_v20, %v4101_v62  ;;  %v4114_v20 = vld [vmem:[#allocation12 + $0xa00] sm:$0xff] }
 0x891   : > { %3842 = vmatmul.mubr.f32.vlgmr.msra.gmra.mrb[44].mxu1 %v9500_v17  ;;  %3919 = vmatmul.mubr.f32.vlgmr.msra.gmra.mrb[32].mxu0 %v9500_v17  ;;  %v4018_v17 = vld [vmem:[#allocation12 + $0x700] sm:$0xff] }
 0x892   : > { %7479 = vmatpush1.bf16.msk.msra.mxu1 %vm9476_vm6, %v9473_v53  ;;  %7539 = vmatpush1.bf16.msra.mxu0 %v7538_v44  ;;  %v7482_v23 = vpack.c.bf16 %v4022_v60, %v4018_v17  ;;  %v7558_v44 = vpack.c.bf16 %v4064_v11, %v4060_v1  ;;  %v4076_v60 = vld [vmem:[#allocation12 + $0x8d0] sm:$0xff]  ;;  %v4078_v1 = vld [vmem:[#allocation12 + $0x8e0] sm:$0xff]  ;;  %v4083_v11 = vld [vmem:[#allocation12 + $0x908] sm:$0xff] }
 0x893   : > { %6635 = vmatprep.mubr.msk.f32.mxu1 %vm3610_vm8, %v9506_v7  ;;  %6637 = vmatprep.mubr.msk.f32.mxu0 %vm3610_vm8, %v9506_v7  ;;  %v7546_v7 = vpack.c.bf16 %v4040_v40, %v4036_v39  ;;  %v4054_v39 = vld [vmem:[#allocation12 + $0x820] sm:$0xff]  ;;  %v4059_v40 = vld [vmem:[#allocation12 + $0x848] sm:$0xff]  ;;  %v7566_v52 = vpack.c.bf16 %v4080_v6, %v4076_v60 }
 0x894   : > { %7541 = vmatprep.subr.bf16.mxu0 %v7540_v34  ;;  %7481 = vmatprep.subr.bf16.mxu1 %v7480_v37  ;;  %v4072_v34 = vld [vmem:[#allocation12 + $0x8b0] sm:$0xff]  ;;  %v4081_v37 = vld [vmem:[#allocation12 + $0x8f8] sm:$0xff]  ;;  %v4094_v60 = vld [vmem:[#allocation12 + $0x960] sm:$0xff] }
 0x895   : > { %3848 = vmatmul.mubr.f32.gmra.mrb[46].mxu1 %v9504_v3  ;;  %3925 = vmatmul.mubr.f32.gmra.mrb[34].mxu0 %v9504_v3  ;;  %v4035_v3 = vld [vmem:[#allocation12 + $0x788] sm:$0xff]  ;;  %v7562_v42 = vpack.c.bf16 %v4072_v34, %v4068_v33  ;;  %v7564_v17 = vpack.c.bf16 %v4081_v37, %v4077_v35  ;;  %v4086_v33 = vld [vmem:[#allocation12 + $0x920] sm:$0xff] }
 0x896   : > { %7543 = vmatpush1.bf16.msra.mxu0 %v7542_v38  ;;  %4004 = vmatprep.mubr.f32.mxu1 %v8754_v32  ;;  %v7488_v19 = vpack.c.bf16 %v4039_v59, %v4035_v3  ;;  %v7496_v38 = vpack.c.bf16 %v4055_v30, %v4051_v29  ;;  %v4093_v3 = vld [vmem:[#allocation12 + $0x958] sm:$0xff]  ;;  %v7502_v59 = vpack.c.bf16 %v4062_v50, %v4058_v49  ;;  %v4091_v34 = vld [vmem:[#allocation12 + $0x948] sm:$0xff]  ;;  %v4120_v49 = vld [vmem:[#allocation12 + $0xa30] sm:$0xff] }
 0x897   : > { %7545 = vmatprep.subr.bf16.mxu0 %v7544_v45  ;;  %v4050_v45 = vld [vmem:[#allocation12 + $0x800] sm:$0xff]  ;;  %v4113_v30 = vld [vmem:[#allocation12 + $0x9f8] sm:$0xff]  ;;  %v4095_v35 = vld [vmem:[#allocation12 + $0x968] sm:$0xff] }
 0x898   : > { %v7580_v37 = vpack.c.bf16 %v4113_v30, %v4109_v27  ;;  %v4099_v6 = vld [vmem:[#allocation12 + $0x988] sm:$0xff]  ;;  %v4125_v50 = vld [vmem:[#allocation12 + $0xa58] sm:$0xff]  ;;  %v4385_v30 = vld [vmem:[#allocation12 + $0xa80] sm:$0xff] }
 0x899   : > { %6640 = vmatmul.mubr.msk.f32.vlgmr.msra.gmra.mrb[48].mxu1 %vm3208_vm7, %v3932_v48  ;;  %v7498_v48 = vpack.c.bf16 %v4054_v39, %v4050_v45  ;;  %v4112_v45 = vld [vmem:[#allocation12 + $0x9f0] sm:$0xff]  ;;  %v4117_v39 = vld [vmem:[#allocation12 + $0xa18] sm:$0xff]  ;;  %v4390_v27 = vld [vmem:[#allocation12 + $0xaa8] sm:$0xff] }
 0x89a   : > { %7547 = vmatpush1.bf16.msra.mxu0 %v7546_v7  ;;  %4010 = vmatprep.mubr.f32.mxu1 %v8754_v32  ;;  %v4089_v7 = vld [vmem:[#allocation12 + $0x938] sm:$0xff] }
 0x89b   : > { %7549 = vmatprep.subr.bf16.mxu0 %v7548_v28  ;;  %7483 = vmatpush1.bf16.msra.mxu1 %v7482_v23  ;;  %v7500_v28 = vpack.c.bf16 %v4063_v41, %v4059_v40  ;;  %v4071_v23 = vld [vmem:[#allocation12 + $0x8a8] sm:$0xff]  ;;  %v4121_v41 = vld [vmem:[#allocation12 + $0xa38] sm:$0xff] }
 0x89c   : > { %7485 = vmatprep.subr.bf16.mxu1 %v7484_v57  ;;  %v7568_v57 = vpack.c.bf16 %v4089_v7, %v4085_v46  ;;  %v4103_v46 = vld [vmem:[#allocation12 + $0x9a8] sm:$0xff]  ;;  %v7584_v7 = vpack.c.bf16 %v4121_v41, %v4117_v39  ;;  %v4393_v39 = vld [vmem:[#allocation12 + $0xac0] sm:$0xff] }
 0x89d   : > { %6641 = vmatmul.mubr.msk.f32.gmra.mrb[50].mxu1 %vm3208_vm7, %v3933_v0  ;;  %v4097_v0 = vld [vmem:[#allocation12 + $0x978] sm:$0xff] }
 0x89e   : > { %7551 = vmatpush1.bf16.msra.mxu0 %v7550_v55  ;;  %v7504_v55 = vpack.c.bf16 %v4071_v23, %v4067_v51  ;;  %v7572_v18 = vpack.c.bf16 %v4097_v0, %v4093_v3  ;;  %v4129_v23 = vld [vmem:[#allocation12 + $0xa78] sm:$0xff]  ;;  %v4111_v3 = vld [vmem:[#allocation12 + $0x9e8] sm:$0xff] }
 0x89f   : > { %7553 = vmatprep.subr.bf16.mxu0 %v7552_v9  ;;  %7487 = vmatpush1.bf16.msra.mxu1 %v7486_v16  ;;  %v4066_v9 = vld [vmem:[#allocation12 + $0x880] sm:$0xff]  ;;  %v7570_v16 = vpack.c.bf16 %v4088_v47, %v4084_v58  ;;  %v4107_v47 = vld [vmem:[#allocation12 + $0x9c8] sm:$0xff]  ;;  %v7588_v0 = vpack.c.bf16 %v4129_v23, %v4125_v50  ;;  %v4391_v23 = vld [vmem:[#allocation12 + $0xab0] sm:$0xff] }
 0x8a0   : > { %7489 = vmatprep.subr.bf16.mxu1 %v7488_v19  ;;  %v4092_v19 = vld [vmem:[#allocation12 + $0x950] sm:$0xff]  ;;  %v7506_v8 = vpack.c.bf16 %v4070_v10, %v4066_v9  ;;  %v4102_v58 = vld [vmem:[#allocation12 + $0x9a0] sm:$0xff]  ;;  %v4414_v50 = vld [vmem:[#allocation12 + $0xb68] sm:$0xff] }
 0x8a1   : > { %v4128_v9 = vld [vmem:[#allocation12 + $0xa70] sm:$0xff] }
 0x8a2   : > { %7555 = vmatpush1.bf16.msra.mxu0 %v7554_v21  ;;  %v7508_v21 = vpack.c.bf16 %v4079_v15, %v4075_v12  ;;  %v7524_v12 = vpack.c.bf16 %v4111_v3, %v4107_v47  ;;  %v4106_v15 = vld [vmem:[#allocation12 + $0x9c0] sm:$0xff] }
 0x8a3   : > { %7557 = vmatprep.subr.bf16.mxu0 %v7556_v22  ;;  %7491 = vmatpush1.bf16.msra.mxu1 %v7490_v24  ;;  %v4074_v22 = vld [vmem:[#allocation12 + $0x8c0] sm:$0xff]  ;;  %v7574_v24 = vpack.c.bf16 %v4096_v14, %v4092_v19  ;;  %v4119_v19 = vld [vmem:[#allocation12 + $0xa28] sm:$0xff] }
 0x8a4   : > { %7493 = vmatprep.subr.bf16.mxu1 %v7492_v43  ;;  %v4100_v43 = vld [vmem:[#allocation12 + $0x990] sm:$0xff]  ;;  %v7510_v29 = vpack.c.bf16 %v4078_v1, %v4074_v22  ;;  %v4123_v22 = vld [vmem:[#allocation12 + $0xa48] sm:$0xff] }
 0x8a5   : > { %v4127_v1 = vld [vmem:[#allocation12 + $0xa68] sm:$0xff] }
 0x8a6   : > { %7559 = vmatpush1.bf16.msra.mxu0 %v7558_v44  ;;  %v7512_v44 = vpack.c.bf16 %v4087_v13, %v4083_v11  ;;  %v7532_v13 = vpack.c.bf16 %v4127_v1, %v4123_v22  ;;  %v4426_v22 = vld [vmem:[#allocation12 + $0xbc8] sm:$0xff] }
 0x8a7   : > { %7561 = vmatprep.subr.bf16.mxu0 %v7560_v31  ;;  %7495 = vmatpush1.bf16.msra.mxu1 %v7494_v36  ;;  %v4082_v31 = vld [vmem:[#allocation12 + $0x900] sm:$0xff]  ;;  %v7578_v36 = vpack.c.bf16 %v4104_v26, %v4100_v43  ;;  %v4386_v26 = vld [vmem:[#allocation12 + $0xa88] sm:$0xff] }
 0x8a8   : > { %7497 = vmatprep.subr.bf16.mxu1 %v7496_v38  ;;  %v4108_v38 = vld [vmem:[#allocation12 + $0x9d0] sm:$0xff]  ;;  %v7514_v40 = vpack.c.bf16 %v4086_v33, %v4082_v31  ;;  %v4394_v31 = vld [vmem:[#allocation12 + $0xac8] sm:$0xff] }
 0x8a9   : > { %v4398_v33 = vld [vmem:[#allocation12 + $0xae8] sm:$0xff] }
 0x8aa   : > { %7563 = vmatpush1.bf16.msra.mxu0 %v7562_v42  ;;  %v7516_v42 = vpack.c.bf16 %v4095_v35, %v4091_v34  ;;  %v4388_v34 = vld [vmem:[#allocation12 + $0xa98] sm:$0xff] }
 0x8ab   : > { %7565 = vmatprep.subr.bf16.mxu0 %v7564_v17  ;;  %7499 = vmatpush1.bf16.msra.mxu1 %v7498_v48  ;;  %v4090_v17 = vld [vmem:[#allocation12 + $0x940] sm:$0xff]  ;;  %v7582_v48 = vpack.c.bf16 %v4112_v45, %v4108_v38  ;;  %v4392_v35 = vld [vmem:[#allocation12 + $0xab8] sm:$0xff]  ;;  %v7602_v45 = vpack.c.bf16 %v4398_v33, %v4394_v31  ;;  %v4434_v31 = vld [vmem:[#allocation12 + $0xc08] sm:$0xff] }
 0x8ac   : > { %7501 = vmatprep.subr.bf16.mxu1 %v7500_v28  ;;  %v4116_v28 = vld [vmem:[#allocation12 + $0xa10] sm:$0xff]  ;;  %v7518_v51 = vpack.c.bf16 %v4094_v60, %v4090_v17  ;;  %v7654_v41 = vpack.c.bf16 %v4392_v35, %v4388_v34  ;;  %v4406_v17 = vld [vmem:[#allocation12 + $0xb28] sm:$0xff] }
 0x8ad   : > { %v4438_v34 = vld [vmem:[#allocation12 + $0xc28] sm:$0xff] }
 0x8ae   : > { %7567 = vmatpush1.bf16.msra.mxu0 %v7566_v52  ;;  %v7520_v52 = vpack.c.bf16 %v4103_v46, %v4099_v6 }
 0x8af   : > { %7569 = vmatprep.subr.bf16.mxu0 %v7568_v57  ;;  %7503 = vmatpush1.bf16.msra.mxu1 %v7502_v59  ;;  %v4098_v57 = vld [vmem:[#allocation12 + $0x980] sm:$0xff]  ;;  %v7586_v59 = vpack.c.bf16 %v4120_v49, %v4116_v28  ;;  %v4410_v49 = vld [vmem:[#allocation12 + $0xb48] sm:$0xff] }
 0x8b0   : > { %7505 = vmatprep.subr.bf16.mxu1 %v7504_v55  ;;  %v4124_v55 = vld [vmem:[#allocation12 + $0xa50] sm:$0xff]  ;;  %v7522_v10 = vpack.c.bf16 %v4102_v58, %v4098_v57  ;;  %v4405_v28 = vld [vmem:[#allocation12 + $0xb20] sm:$0xff]  ;;  %v4400_v57 = vld [vmem:[#allocation12 + $0xaf8] sm:$0xff]  ;;  %v7610_v3 = vpack.c.bf16 %v4414_v50, %v4410_v49 }
 0x8b1   : > { %v7590_v14 = vpack.c.bf16 %v4128_v9, %v4124_v55  ;;  %v4299_v58 = vld [vmem:[#allocation11 + $0x30] sm:$0xff]  ;;  %v4418_v55 = vld [vmem:[#allocation12 + $0xb88] sm:$0xff]  ;;  %v4432_v49 = vld [vmem:[#allocation12 + $0xbf8] sm:$0xff] }
 0x8b2   : > { %7571 = vmatpush1.bf16.msra.mxu0 %v7570_v16  ;;  %v4110_v16 = vld [vmem:[#allocation12 + $0x9e0] sm:$0xff] }
 0x8b3   : > { %7573 = vmatprep.subr.bf16.mxu0 %v7572_v18  ;;  %7507 = vmatpush1.bf16.msra.mxu1 %v7506_v8  ;;  %v4115_v18 = vld [vmem:[#allocation12 + $0xa08] sm:$0xff]  ;;  %v7526_v62 = vpack.c.bf16 %v4110_v16, %v4106_v15  ;;  %v4395_v15 = vld [vmem:[#allocation12 + $0xad0] sm:$0xff] }
 0x8b4   : > { %7509 = vmatprep.subr.bf16.mxu1 %v7508_v21  ;;  %v7528_v8 = vpack.c.bf16 %v4119_v19, %v4115_v18  ;;  %v4118_v21 = vld [vmem:[#allocation12 + $0xa20] sm:$0xff]  ;;  %v4399_v16 = vld [vmem:[#allocation12 + $0xaf0] sm:$0xff]  ;;  %v4404_v18 = vld [vmem:[#allocation12 + $0xb18] sm:$0xff] }
 0x8b5   : > { %v7530_v11 = vpack.c.bf16 %v4118_v21, %v4114_v20  ;;  %v4408_v19 = vld [vmem:[#allocation12 + $0xb38] sm:$0xff]  ;;  %v4417_v20 = vld [vmem:[#allocation12 + $0xb80] sm:$0xff]  ;;  %v7660_v1 = vpack.c.bf16 %v4399_v16, %v4395_v15 }
 0x8b6   : > { %7575 = vmatpush1.bf16.msra.mxu0 %v7574_v24  ;;  %v4122_v24 = vld [vmem:[#allocation12 + $0xa40] sm:$0xff] }
 0x8b7   : > { %7577 = vmatprep.subr.bf16.mxu0 %v7576_v25  ;;  %7511 = vmatpush1.bf16.msra.mxu1 %v7510_v29  ;;  %v4126_v25 = vld [vmem:[#allocation12 + $0xa60] sm:$0xff]  ;;  %v7598_v29 = vpack.c.bf16 %v4390_v27, %v4386_v26  ;;  %v4416_v26 = vld [vmem:[#allocation12 + $0xb78] sm:$0xff] }
 0x8b8   : > { %7513 = vmatprep.subr.bf16.mxu1 %v7512_v44  ;;  %v7534_v43 = vpack.c.bf16 %v4126_v25, %v4122_v24  ;;  %v4389_v44 = vld [vmem:[#allocation12 + $0xaa0] sm:$0xff]  ;;  %v4403_v24 = vld [vmem:[#allocation12 + $0xb10] sm:$0xff] }
 0x8b9   : > { %v4421_v21 = vld [vmem:[#allocation12 + $0xba0] sm:$0xff]  ;;  %v4407_v25 = vld [vmem:[#allocation12 + $0xb30] sm:$0xff] }
 0x8ba   : > { %7579 = vmatpush1.bf16.msra.mxu0 %v7578_v36  ;;  %v7616_v27 = vpack.c.bf16 %v4421_v21, %v4417_v20  ;;  %v7664_v33 = vpack.c.bf16 %v4407_v25, %v4403_v24  ;;  %v4449_v15 = vld [vmem:[#allocation12 + $0xc80] sm:$0xff]  ;;  %v4439_v20 = vld [vmem:[#allocation12 + $0xc30] sm:$0xff]  ;;  %v4444_v21 = vld [vmem:[#allocation12 + $0xc58] sm:$0xff] }
 0x8bb   : > { %7581 = vmatprep.subr.bf16.mxu0 %v7580_v37  ;;  %7515 = vmatpush1.bf16.msra.mxu1 %v7514_v40  ;;  %v7600_v37 = vpack.c.bf16 %v4389_v44, %v4385_v30  ;;  %v4397_v40 = vld [vmem:[#allocation12 + $0xae0] sm:$0xff]  ;;  %v4466_v25 = vld [vmem:[#allocation12 + $0xd08] sm:$0xff] }
 0x8bc   : > { %7517 = vmatprep.subr.bf16.mxu1 %v7516_v42  ;;  %v4402_v42 = vld [vmem:[#allocation12 + $0xb08] sm:$0xff]  ;;  %v7604_v6 = vpack.c.bf16 %v4397_v40, %v4393_v39  ;;  %v4425_v30 = vld [vmem:[#allocation12 + $0xbc0] sm:$0xff]  ;;  %v7622_v40 = vpack.c.bf16 %v4438_v34, %v4434_v31  ;;  %v4456_v31 = vld [vmem:[#allocation12 + $0xcb8] sm:$0xff] }
 0x8bd   : > { %v4429_v44 = vld [vmem:[#allocation12 + $0xbe0] sm:$0xff] }
 0x8be   : > { %7583 = vmatpush1.bf16.msra.mxu0 %v7582_v48  ;;  %v7606_v48 = vpack.c.bf16 %v4406_v17, %v4402_v42  ;;  %v7620_v39 = vpack.c.bf16 %v4429_v44, %v4425_v30  ;;  %v4437_v42 = vld [vmem:[#allocation12 + $0xc20] sm:$0xff]  ;;  %v4442_v17 = vld [vmem:[#allocation12 + $0xc48] sm:$0xff]  ;;  %v4447_v30 = vld [vmem:[#allocation12 + $0xc70] sm:$0xff] }
 0x8bf   : > { %7585 = vmatprep.subr.bf16.mxu0 %v7584_v7  ;;  %7519 = vmatpush1.bf16.msra.mxu1 %v7518_v51  ;;  %v4401_v7 = vld [vmem:[#allocation12 + $0xb00] sm:$0xff]  ;;  %v4387_v51 = vld [vmem:[#allocation12 + $0xa90] sm:$0xff]  ;;  %v4452_v44 = vld [vmem:[#allocation12 + $0xc98] sm:$0xff] }
 0x8c0   : > { %7521 = vmatprep.subr.bf16.mxu1 %v7520_v52  ;;  %v4396_v52 = vld [vmem:[#allocation12 + $0xad8] sm:$0xff]  ;;  %v7608_v47 = vpack.c.bf16 %v4405_v28, %v4401_v7  ;;  %v7656_v9 = vpack.c.bf16 %v4391_v23, %v4387_v51  ;;  %v4423_v7 = vld [vmem:[#allocation12 + $0xbb0] sm:$0xff]  ;;  %v4441_v23 = vld [vmem:[#allocation12 + $0xc40] sm:$0xff] }
 0x8c1   : > { %v4428_v28 = vld [vmem:[#allocation12 + $0xbd8] sm:$0xff]  ;;  %v4453_v16 = vld [vmem:[#allocation12 + $0xca0] sm:$0xff] }
 0x8c2   : > { %7587 = vmatpush1.bf16.msra.mxu0 %v7586_v59  ;;  %v4409_v59 = vld [vmem:[#allocation12 + $0xb40] sm:$0xff] }
 0x8c3   : > { %7589 = vmatprep.subr.bf16.mxu0 %v7588_v0  ;;  %7523 = vmatpush1.bf16.msra.mxu1 %v7522_v10  ;;  %v4413_v0 = vld [vmem:[#allocation12 + $0xb60] sm:$0xff]  ;;  %v4422_v10 = vld [vmem:[#allocation12 + $0xba8] sm:$0xff] }
 0x8c4   : > { %7525 = vmatprep.subr.bf16.mxu1 %v7524_v12  ;;  %v7658_v12 = vpack.c.bf16 %v4400_v57, %v4396_v52  ;;  %v4445_v52 = vld [vmem:[#allocation12 + $0xc60] sm:$0xff]  ;;  %v4450_v57 = vld [vmem:[#allocation12 + $0xc88] sm:$0xff] }
 0x8c5   : > { %v4461_v24 = vld [vmem:[#allocation12 + $0xce0] sm:$0xff] }
 0x8c6   : > { %7591 = vmatpush1.bf16.msra.mxu0 %v7590_v14  ;;  %v4300_v14 = vld [vmem:[#allocation11 + $0x38] sm:$0x3f] }
 0x8c7   : > { %7594 = vmatprep.subr.msk.bf16.mxu0 %vm9476_vm6, %v9480_v56  ;;  %7527 = vmatpush1.bf16.msra.mxu1 %v7526_v62  ;;  %v7612_v62 = vpack.c.bf16 %v4413_v0, %v4409_v59  ;;  %v4427_v59 = vld [vmem:[#allocation12 + $0xbd0] sm:$0xff] }
 0x8c8   : > { %7529 = vmatprep.subr.bf16.mxu1 %v7528_v8  ;;  %v7614_v8 = vpack.c.bf16 %v4422_v10, %v4418_v55  ;;  %v4431_v0 = vld [vmem:[#allocation12 + $0xbf0] sm:$0xff]  ;;  %v4436_v55 = vld [vmem:[#allocation12 + $0xc18] sm:$0xff]  ;;  %v7628_v10 = vpack.c.bf16 %v4445_v52, %v4441_v23 }
 0x8c9   : > { %v4463_v23 = vld [vmem:[#allocation12 + $0xcf0] sm:$0xff]  ;;  %v4468_v52 = vld [vmem:[#allocation12 + $0xd18] sm:$0xff] }
 0x8cb   : > { %7531 = vmatpush1.bf16.msra.mxu1 %v7530_v11  ;;  %v4430_v11 = vld [vmem:[#allocation12 + $0xbe8] sm:$0xff] }
 0x8cc   : > { %7533 = vmatprep.subr.bf16.mxu1 %v7532_v13  ;;  %v7662_v13 = vpack.c.bf16 %v4408_v19, %v4404_v18  ;;  %v4458_v18 = vld [vmem:[#allocation12 + $0xcc8] sm:$0xff]  ;;  %v7676_v19 = vpack.c.bf16 %v4431_v0, %v4427_v59  ;;  %v4485_v59 = vld [vmem:[#allocation12 + $0xda0] sm:$0xff] }
 0x8cd   : > { %v4490_v0 = vld [vmem:[#allocation12 + $0xdc8] sm:$0xff] }
 0x8cf   : > { %7535 = vmatpush1.bf16.msra.mxu1 %v7534_v43  ;;  %v4412_v43 = vld [vmem:[#allocation12 + $0xb58] sm:$0xff] }
 0x8d0   : > { %7599 = vmatprep.subr.bf16.mxu1 %v7598_v29  ;;  %v7618_v29 = vpack.c.bf16 %v4430_v11, %v4426_v22  ;;  %v7666_v35 = vpack.c.bf16 %v4416_v26, %v4412_v43  ;;  %v4448_v22 = vld [vmem:[#allocation12 + $0xc78] sm:$0xff]  ;;  %v4470_v26 = vld [vmem:[#allocation12 + $0xd28] sm:$0xff] }
 0x8d1   : > { %v7638_v34 = vpack.c.bf16 %v4470_v26, %v4466_v25  ;;  %v4483_v26 = vld [vmem:[#allocation12 + $0xd90] sm:$0xff] }
 0x96c   : > { %v4006_v36 = vpop.f32.mrb[48].mxu1 }
 0x96d   : > { %v4008_v38 = vpop.f32.mrb[49].mxu1 }
 0x96e   : > { %6642 = vmatprep.mubr.msk.f32.mxu1 %vm3610_vm8, %v4008_v38  ;;  %6644 = vmatprep.mubr.msk.f32.mxu0 %vm3610_vm8, %v4008_v38  ;;  %v4420_v38 = vld [vmem:[#allocation12 + $0xb98] sm:$0xff] }
 0x96f   : > { %4201 = vmatmul.mubr.f32.vlgmr.msra.gmra.mrb[44].mxu1 %v4006_v36  ;;  %4278 = vmatmul.mubr.f32.vlgmr.msra.gmra.mrb[32].mxu0 %v4006_v36  ;;  %v4411_v36 = vld [vmem:[#allocation12 + $0xb50] sm:$0xff] }
 0x970   : > { %7597 = vmatpush1.bf16.msk.msra.mxu0 %vm9476_vm6, %v9473_v53  ;;  %7601 = vmatpush1.bf16.msra.mxu1 %v7600_v37  ;;  %v4012_v60 = vpop.f32.mrb[50].mxu1  ;;  %v4415_v37 = vld [vmem:[#allocation12 + $0xb70] sm:$0xff] }
 0x971   : > { %v4014_v46 = vpop.f32.mrb[51].mxu1  ;;  %7603 = vmatprep.subr.bf16.mxu1 %v7602_v45  ;;  %7655 = vmatprep.subr.bf16.mxu0 %v7654_v41  ;;  %v4424_v45 = vld [vmem:[#allocation12 + $0xbb8] sm:$0xff]  ;;  %v4433_v41 = vld [vmem:[#allocation12 + $0xc00] sm:$0xff] }
 0x972   : > { %6643 = vmatprep.mubr.msk.f32.mxu1 %vm3610_vm8, %v4014_v46  ;;  %6645 = vmatprep.mubr.msk.f32.mxu0 %vm3610_vm8, %v4014_v46  ;;  %v7670_v46 = vpack.c.bf16 %v4424_v45, %v4420_v38  ;;  %v7624_v50 = vpack.c.bf16 %v4437_v42, %v4433_v41  ;;  %v4478_v45 = vld [vmem:[#allocation12 + $0xd68] sm:$0xff]  ;;  %v4455_v41 = vld [vmem:[#allocation12 + $0xcb0] sm:$0xff]  ;;  %v4460_v42 = vld [vmem:[#allocation12 + $0xcd8] sm:$0xff] }
 0x973   : > { %4207 = vmatmul.mubr.f32.gmra.mrb[46].mxu1 %v4012_v60  ;;  %4284 = vmatmul.mubr.f32.gmra.mrb[34].mxu0 %v4012_v60  ;;  %v7668_v60 = vpack.c.bf16 %v4415_v37, %v4411_v36  ;;  %v4469_v36 = vld [vmem:[#allocation12 + $0xd20] sm:$0xff]  ;;  %v4474_v37 = vld [vmem:[#allocation12 + $0xd48] sm:$0xff] }
 0x974   : > { %7605 = vmatpush1.bf16.msra.mxu1 %v7604_v6  ;;  %4371 = vmatprep.mubr.f32.mxu0 %v8754_v32  ;;  %v4446_v6 = vld [vmem:[#allocation12 + $0xc68] sm:$0xff] }
 0x975   : > { %7607 = vmatprep.subr.bf16.mxu1 %v7606_v48  ;;  %v4419_v48 = vld [vmem:[#allocation12 + $0xb90] sm:$0xff]  ;;  %v7626_v51 = vpack.c.bf16 %v4446_v6, %v4442_v17  ;;  %v4464_v17 = vld [vmem:[#allocation12 + $0xcf8] sm:$0xff]  ;;  %v7642_v6 = vpack.c.bf16 %v4478_v45, %v4474_v37  ;;  %v4753_v45 = vld [vmem:[#allocation12 + $0xe08] sm:$0xff] }
 0x976   : > { %v4759_v37 = vld [vmem:[#allocation12 + $0xe38] sm:$0xff] }
 0x977   : > { %6648 = vmatmul.mubr.msk.f32.vlgmr.msra.gmra.mrb[36].mxu0 %vm3208_vm7, %v4299_v58  ;;  %v7672_v58 = vpack.c.bf16 %v4423_v7, %v4419_v48  ;;  %v4477_v48 = vld [vmem:[#allocation12 + $0xd60] sm:$0xff]  ;;  %v4482_v7 = vld [vmem:[#allocation12 + $0xd88] sm:$0xff] }
 0x978   : > { %7609 = vmatpush1.bf16.msra.mxu1 %v7608_v47  ;;  %4377 = vmatprep.mubr.f32.mxu0 %v8754_v32  ;;  %v4454_v47 = vld [vmem:[#allocation12 + $0xca8] sm:$0xff] }
 0x979   : > { %7611 = vmatprep.subr.bf16.mxu1 %v7610_v3  ;;  %7657 = vmatpush1.bf16.msra.mxu0 %v7656_v9  ;;  %v7674_v3 = vpack.c.bf16 %v4432_v49, %v4428_v28  ;;  %v4440_v9 = vld [vmem:[#allocation12 + $0xc38] sm:$0xff]  ;;  %v4486_v49 = vld [vmem:[#allocation12 + $0xda8] sm:$0xff] }
 0x97a   : > { %7659 = vmatprep.subr.bf16.mxu0 %v7658_v12  ;;  %v7630_v12 = vpack.c.bf16 %v4454_v47, %v4450_v57  ;;  %v4472_v57 = vld [vmem:[#allocation12 + $0xd38] sm:$0xff]  ;;  %v7646_v47 = vpack.c.bf16 %v4486_v49, %v4482_v7  ;;  %v4762_v7 = vld [vmem:[#allocation12 + $0xe50] sm:$0xff] }
 0x97b   : > { %6649 = vmatmul.mubr.msk.f32.gmra.mrb[38].mxu0 %vm3208_vm7, %v4300_v14  ;;  %v4462_v14 = vld [vmem:[#allocation12 + $0xce8] sm:$0xff]  ;;  %v4771_v49 = vld [vmem:[#allocation12 + $0xe98] sm:$0xff] }
 0x97c   : > { %7613 = vmatpush1.bf16.msra.mxu1 %v7612_v62  ;;  %v7678_v62 = vpack.c.bf16 %v4440_v9, %v4436_v55  ;;  %v7634_v11 = vpack.c.bf16 %v4462_v14, %v4458_v18  ;;  %v4494_v9 = vld [vmem:[#allocation12 + $0xde8] sm:$0xff]  ;;  %v4480_v18 = vld [vmem:[#allocation12 + $0xd78] sm:$0xff] }
 0x97d   : > { %7615 = vmatprep.subr.bf16.mxu1 %v7614_v8  ;;  %7661 = vmatpush1.bf16.msra.mxu0 %v7660_v1  ;;  %v4435_v8 = vld [vmem:[#allocation12 + $0xc10] sm:$0xff]  ;;  %v7632_v1 = vpack.c.bf16 %v4453_v16, %v4449_v15  ;;  %v4476_v16 = vld [vmem:[#allocation12 + $0xd58] sm:$0xff]  ;;  %v7650_v14 = vpack.c.bf16 %v4494_v9, %v4490_v0 }
 0x97e   : > { %7663 = vmatprep.subr.bf16.mxu0 %v7662_v13  ;;  %v4457_v13 = vld [vmem:[#allocation12 + $0xcc0] sm:$0xff]  ;;  %v7680_v43 = vpack.c.bf16 %v4439_v20, %v4435_v8  ;;  %v4471_v15 = vld [vmem:[#allocation12 + $0xd30] sm:$0xff]  ;;  %v4783_v9 = vld [vmem:[#allocation12 + $0xef8] sm:$0xff] }
 0x97f   : > { %v4493_v8 = vld [vmem:[#allocation12 + $0xde0] sm:$0xff]  ;;  %v4770_v0 = vld [vmem:[#allocation12 + $0xe90] sm:$0xff] }
 0x980   : > { %7617 = vmatpush1.bf16.msra.mxu1 %v7616_v27  ;;  %v7682_v27 = vpack.c.bf16 %v4448_v22, %v4444_v21  ;;  %v7698_v21 = vpack.c.bf16 %v4480_v18, %v4476_v16  ;;  %v4475_v22 = vld [vmem:[#allocation12 + $0xd50] sm:$0xff]  ;;  %v4760_v16 = vld [vmem:[#allocation12 + $0xe40] sm:$0xff] }
 0x981   : > { %7619 = vmatprep.subr.bf16.mxu1 %v7618_v29  ;;  %7665 = vmatpush1.bf16.msra.mxu0 %v7664_v33  ;;  %v4443_v29 = vld [vmem:[#allocation12 + $0xc50] sm:$0xff]  ;;  %v7636_v33 = vpack.c.bf16 %v4461_v24, %v4457_v13  ;;  %v4488_v13 = vld [vmem:[#allocation12 + $0xdb8] sm:$0xff]  ;;  %v4764_v18 = vld [vmem:[#allocation12 + $0xe60] sm:$0xff] }
 0x982   : > { %7667 = vmatprep.subr.bf16.mxu0 %v7666_v35  ;;  %v4465_v35 = vld [vmem:[#allocation12 + $0xd00] sm:$0xff]  ;;  %v7684_v38 = vpack.c.bf16 %v4447_v30, %v4443_v29  ;;  %v4492_v29 = vld [vmem:[#allocation12 + $0xdd8] sm:$0xff] }
 0x983   : > { %v4496_v30 = vld [vmem:[#allocation12 + $0xdf8] sm:$0xff] }
 0x984   : > { %7621 = vmatpush1.bf16.msra.mxu1 %v7620_v39  ;;  %v7686_v39 = vpack.c.bf16 %v4456_v31, %v4452_v44  ;;  %v7706_v31 = vpack.c.bf16 %v4496_v30, %v4492_v29  ;;  %v4781_v29 = vld [vmem:[#allocation12 + $0xee8] sm:$0xff] }
 0x985   : > { %7623 = vmatprep.subr.bf16.mxu1 %v7622_v40  ;;  %7669 = vmatpush1.bf16.msra.mxu0 %v7668_v60  ;;  %v4451_v40 = vld [vmem:[#allocation12 + $0xc90] sm:$0xff]  ;;  %v7640_v60 = vpack.c.bf16 %v4469_v36, %v4465_v35  ;;  %v4755_v36 = vld [vmem:[#allocation12 + $0xe18] sm:$0xff] }
 0x986   : > { %7671 = vmatprep.subr.bf16.mxu0 %v7670_v46  ;;  %v4473_v46 = vld [vmem:[#allocation12 + $0xd40] sm:$0xff]  ;;  %v7688_v28 = vpack.c.bf16 %v4455_v41, %v4451_v40  ;;  %v4758_v40 = vld [vmem:[#allocation12 + $0xe30] sm:$0xff]  ;;  %v4757_v41 = vld [vmem:[#allocation12 + $0xe28] sm:$0xff] }
 0x988   : > { %7625 = vmatpush1.bf16.msra.mxu1 %v7624_v50  ;;  %v7690_v50 = vpack.c.bf16 %v4464_v17, %v4460_v42  ;;  %v4763_v42 = vld [vmem:[#allocation12 + $0xe58] sm:$0xff] }
 0x989   : > { %7627 = vmatprep.subr.bf16.mxu1 %v7626_v51  ;;  %7673 = vmatpush1.bf16.msra.mxu0 %v7672_v58  ;;  %v4459_v51 = vld [vmem:[#allocation12 + $0xcd0] sm:$0xff]  ;;  %v7644_v58 = vpack.c.bf16 %v4477_v48, %v4473_v46  ;;  %v7716_v46 = vpack.c.bf16 %v4757_v41, %v4753_v45  ;;  %v4785_v45 = vld [vmem:[#allocation12 + $0xf08] sm:$0xff] }
 0x98a   : > { %7675 = vmatprep.subr.bf16.mxu0 %v7674_v3  ;;  %v4481_v3 = vld [vmem:[#allocation12 + $0xd80] sm:$0xff]  ;;  %v7692_v55 = vpack.c.bf16 %v4463_v23, %v4459_v51 }
 0x98c   : > { %7629 = vmatpush1.bf16.msra.mxu1 %v7628_v10  ;;  %v7694_v10 = vpack.c.bf16 %v4472_v57, %v4468_v52  ;;  %v4752_v57 = vld [vmem:[#allocation12 + $0xe00] sm:$0xff] }
 0x98d   : > { %7631 = vmatprep.subr.bf16.mxu1 %v7630_v12  ;;  %7677 = vmatpush1.bf16.msra.mxu0 %v7676_v19  ;;  %v4467_v12 = vld [vmem:[#allocation12 + $0xd10] sm:$0xff]  ;;  %v7648_v19 = vpack.c.bf16 %v4485_v59, %v4481_v3  ;;  %v4765_v59 = vld [vmem:[#allocation12 + $0xe68] sm:$0xff] }
 0x98e   : > { %7679 = vmatprep.subr.bf16.mxu0 %v7678_v62  ;;  %v4489_v62 = vld [vmem:[#allocation12 + $0xdc0] sm:$0xff]  ;;  %v7696_v20 = vpack.c.bf16 %v4471_v15, %v4467_v12 }
 0x98f   : > { %v7652_v24 = vpack.c.bf16 %v4493_v8, %v4489_v62  ;;  %v4773_v62 = vld [vmem:[#allocation12 + $0xea8] sm:$0xff] }
 0x990   : > { %7633 = vmatpush1.bf16.msra.mxu1 %v7632_v1  ;;  %v4479_v1 = vld [vmem:[#allocation12 + $0xd70] sm:$0xff] }
 0x991   : > { %7635 = vmatprep.subr.bf16.mxu1 %v7634_v11  ;;  %7681 = vmatpush1.bf16.msra.mxu0 %v7680_v43  ;;  %v4484_v11 = vld [vmem:[#allocation12 + $0xd98] sm:$0xff]  ;;  %v7700_v25 = vpack.c.bf16 %v4479_v1, %v4475_v22 }
 0x992   : > { %7683 = vmatprep.subr.bf16.mxu0 %v7682_v27  ;;  %v7702_v43 = vpack.c.bf16 %v4488_v13, %v4484_v11  ;;  %v4487_v27 = vld [vmem:[#allocation12 + $0xdb0] sm:$0xff]  ;;  %v4787_v22 = vld [vmem:[#allocation12 + $0xf18] sm:$0xff]  ;;  %v7722_v13 = vpack.c.bf16 %v4764_v18, %v4760_v16 }
 0x993   : > { %v7704_v44 = vpack.c.bf16 %v4487_v27, %v4483_v26  ;;  %v4791_v1 = vld [vmem:[#allocation12 + $0xf38] sm:$0xff]  ;;  %v4777_v26 = vld [vmem:[#allocation12 + $0xec8] sm:$0xff] }
 0x994   : > { %7637 = vmatpush1.bf16.msra.mxu1 %v7636_v33  ;;  %v4491_v33 = vld [vmem:[#allocation12 + $0xdd0] sm:$0xff]  ;;  %v4667_v11 = vld [vmem:[#allocation11 + $0x48] sm:$0x3f]  ;;  %v7788_v30 = vpack.c.bf16 %v4791_v1, %v4787_v22  ;;  %v4813_v22 = vld [vmem:[#allocation12 + $0xfe8] sm:$0xff] }
 0x995   : > { %7639 = vmatprep.subr.bf16.mxu1 %v7638_v34  ;;  %7685 = vmatpush1.bf16.msra.mxu0 %v7684_v38  ;;  %v4495_v34 = vld [vmem:[#allocation12 + $0xdf0] sm:$0xff]  ;;  %v7772_v38 = vpack.c.bf16 %v4759_v37, %v4755_v36  ;;  %v7728_v36 = vpack.c.bf16 %v4781_v29, %v4777_v26  ;;  %v4776_v37 = vld [vmem:[#allocation12 + $0xec0] sm:$0xff]  ;;  %v4819_v16 = vld [vmem:[#allocation12 + $0x1018] sm:$0xff] }
 0x996   : > { %7687 = vmatprep.subr.bf16.mxu0 %v7686_v39  ;;  %v7708_v35 = vpack.c.bf16 %v4495_v34, %v4491_v33  ;;  %v4754_v39 = vld [vmem:[#allocation12 + $0xe10] sm:$0xff]  ;;  %v4795_v33 = vld [vmem:[#allocation12 + $0xf58] sm:$0xff]  ;;  %v4812_v29 = vld [vmem:[#allocation12 + $0xfe0] sm:$0xff] }
 0x997   : > { %v4799_v34 = vld [vmem:[#allocation12 + $0xf78] sm:$0xff] }
 0x998   : > { %7641 = vmatpush1.bf16.msra.mxu1 %v7640_v60  ;;  %v7774_v60 = vpack.c.bf16 %v4758_v40, %v4754_v39  ;;  %v4789_v40 = vld [vmem:[#allocation12 + $0xf28] sm:$0xff]  ;;  %v7792_v41 = vpack.c.bf16 %v4799_v34, %v4795_v33  ;;  %v4823_v18 = vld [vmem:[#allocation12 + $0x1038] sm:$0xff]  ;;  %v4826_v34 = vld [vmem:[#allocation12 + $0x1050] sm:$0xff] }
 0x999   : > { %7643 = vmatprep.subr.bf16.mxu1 %v7642_v6  ;;  %7689 = vmatpush1.bf16.msra.mxu0 %v7688_v28  ;;  %v4766_v28 = vld [vmem:[#allocation12 + $0xe70] sm:$0xff]  ;;  %v7804_v1 = vpack.c.bf16 %v4823_v18, %v4819_v16 }
 0x99a   : > { %7691 = vmatprep.subr.bf16.mxu0 %v7690_v50  ;;  %v4775_v50 = vld [vmem:[#allocation12 + $0xeb8] sm:$0xff]  ;;  %v7778_v23 = vpack.c.bf16 %v4766_v28, %v4762_v7  ;;  %v4788_v7 = vld [vmem:[#allocation12 + $0xf20] sm:$0xff]  ;;  %v4793_v28 = vld [vmem:[#allocation12 + $0xf48] sm:$0xff] }
 0x99b   : > { %v7780_v3 = vpack.c.bf16 %v4775_v50, %v4771_v49  ;;  %v4797_v50 = vld [vmem:[#allocation12 + $0xf68] sm:$0xff]  ;;  %v4850_v18 = vld [vmem:[#allocation12 + $0x1110] sm:$0xff] }
 0x99c   : > { %7645 = vmatpush1.bf16.msra.mxu1 %v7644_v58  ;;  %v4756_v58 = vld [vmem:[#allocation12 + $0xe20] sm:$0xff] }
 0x99d   : > { %7647 = vmatprep.subr.bf16.mxu1 %v7646_v47  ;;  %7693 = vmatpush1.bf16.msra.mxu0 %v7692_v55  ;;  %v4761_v47 = vld [vmem:[#allocation12 + $0xe48] sm:$0xff]  ;;  %v4774_v55 = vld [vmem:[#allocation12 + $0xeb0] sm:$0xff]  ;;  %v7718_v12 = vpack.c.bf16 %v4756_v58, %v4752_v57  ;;  %v4811_v57 = vld [vmem:[#allocation12 + $0xfd8] sm:$0xff] }
 0x99e   : > { %7695 = vmatprep.subr.bf16.mxu0 %v7694_v10  ;;  %v4666_v10 = vld [vmem:[#allocation11 + $0x40] sm:$0xff]  ;;  %v7720_v15 = vpack.c.bf16 %v4765_v59, %v4761_v47  ;;  %v4815_v58 = vld [vmem:[#allocation12 + $0xff8] sm:$0xff]  ;;  %v4792_v59 = vld [vmem:[#allocation12 + $0xf40] sm:$0xff] }
 0x9a0   : > { %7649 = vmatpush1.bf16.msra.mxu1 %v7648_v19  ;;  %v4769_v19 = vld [vmem:[#allocation12 + $0xe88] sm:$0xff] }
 0x9a1   : > { %7651 = vmatprep.subr.bf16.mxu1 %v7650_v14  ;;  %7697 = vmatpush1.bf16.msra.mxu0 %v7696_v20  ;;  %v7782_v14 = vpack.c.bf16 %v4774_v55, %v4770_v0  ;;  %v4778_v20 = vld [vmem:[#allocation12 + $0xed0] sm:$0xff]  ;;  %v4796_v0 = vld [vmem:[#allocation12 + $0xf60] sm:$0xff]  ;;  %v4801_v55 = vld [vmem:[#allocation12 + $0xf88] sm:$0xff] }
 0x9a2   : > { %7699 = vmatprep.subr.bf16.mxu0 %v7698_v21  ;;  %v4782_v21 = vld [vmem:[#allocation12 + $0xef0] sm:$0xff] }
 0x9a3   : > { %v7786_v27 = vpack.c.bf16 %v4782_v21, %v4778_v20  ;;  %v4809_v20 = vld [vmem:[#allocation12 + $0xfc8] sm:$0xff] }
 0x9a4   : > { %7653 = vmatpush1.bf16.msra.mxu1 %v7652_v24  ;;  %v7724_v24 = vpack.c.bf16 %v4773_v62, %v4769_v19  ;;  %v7738_v19 = vpack.c.bf16 %v4796_v0, %v4792_v59  ;;  %v4800_v62 = vld [vmem:[#allocation12 + $0xf80] sm:$0xff]  ;;  %v7744_v26 = vpack.c.bf16 %v4813_v22, %v4809_v20  ;;  %v4855_v59 = vld [vmem:[#allocation12 + $0x1138] sm:$0xff] }
 0x9a5   : > { %7712 = vmatprep.subr.msk.bf16.mxu1 %vm9476_vm6, %v9480_v56  ;;  %7701 = vmatpush1.bf16.msra.mxu0 %v7700_v25  ;;  %v4767_v56 = vld [vmem:[#allocation12 + $0xe78] sm:$0xff]  ;;  %v4768_v25 = vld [vmem:[#allocation12 + $0xe80] sm:$0xff] }
 0x9a6   : > { %7703 = vmatprep.subr.bf16.mxu0 %v7702_v43  ;;  %v7776_v48 = vpack.c.bf16 %v4767_v56, %v4763_v42  ;;  %v4772_v43 = vld [vmem:[#allocation12 + $0xea0] sm:$0xff]  ;;  %v4794_v42 = vld [vmem:[#allocation12 + $0xf50] sm:$0xff] }
 0x9a7   : > { %v4798_v56 = vld [vmem:[#allocation12 + $0xf70] sm:$0xff]  ;;  %v4844_v22 = vld [vmem:[#allocation12 + $0x10e0] sm:$0xff] }
 0x9a8   : > { %v7794_v49 = vpack.c.bf16 %v4798_v56, %v4794_v42  ;;  %v4829_v56 = vld [vmem:[#allocation12 + $0x1068] sm:$0xff] }
 0x9a9   : > { %7705 = vmatpush1.bf16.msra.mxu0 %v7704_v44  ;;  %v4786_v44 = vld [vmem:[#allocation12 + $0xf10] sm:$0xff] }
 0x9aa   : > { %7707 = vmatprep.subr.bf16.mxu0 %v7706_v31  ;;  %v4790_v31 = vld [vmem:[#allocation12 + $0xf30] sm:$0xff] }
 0x9ab   : > { %v7790_v39 = vpack.c.bf16 %v4790_v31, %v4786_v44  ;;  %v4821_v31 = vld [vmem:[#allocation12 + $0x1028] sm:$0xff] }
 0x9ad   : > { %7709 = vmatpush1.bf16.msra.mxu0 %v7708_v35  ;;  %v7726_v35 = vpack.c.bf16 %v4772_v43, %v4768_v25  ;;  %v4831_v25 = vld [vmem:[#allocation12 + $0x1078] sm:$0xff] }
 0x9ae   : > { %7773 = vmatprep.subr.bf16.mxu0 %v7772_v38  ;;  %v4780_v38 = vld [vmem:[#allocation12 + $0xee0] sm:$0xff] }
 0xa4a   : > { %v4373_v17 = vpop.f32.mrb[36].mxu0 }
 0xa4b   : > { %v4375_v6 = vpop.f32.mrb[37].mxu0 }
 0xa4c   : > { %6650 = vmatprep.mubr.msk.f32.mxu1 %vm3610_vm8, %v4375_v6  ;;  %6652 = vmatprep.mubr.msk.f32.mxu0 %vm3610_vm8, %v4375_v6  ;;  %v7730_v6 = vpack.c.bf16 %v4780_v38, %v4776_v37  ;;  %v4839_v37 = vld [vmem:[#allocation12 + $0x10b8] sm:$0xff] }
 0xa4d   : > { %4568 = vmatmul.mubr.f32.vlgmr.msra.gmra.mrb[44].mxu1 %v4373_v17  ;;  %4645 = vmatmul.mubr.f32.vlgmr.msra.gmra.mrb[32].mxu0 %v4373_v17  ;;  %v4803_v17 = vld [vmem:[#allocation12 + $0xf98] sm:$0xff] }
 0xa4e   : > { %7715 = vmatpush1.bf16.msk.msra.mxu1 %vm9476_vm6, %v9473_v53  ;;  %v4379_v51 = vpop.f32.mrb[38].mxu0  ;;  %7775 = vmatpush1.bf16.msra.mxu0 %v7774_v60  ;;  %v4779_v53 = vld [vmem:[#allocation12 + $0xed8] sm:$0xff] }
 0xa4f   : > { %v4381_v52 = vpop.f32.mrb[39].mxu0  ;;  %7717 = vmatprep.subr.bf16.mxu1 %v7716_v46  ;;  %7777 = vmatprep.subr.bf16.mxu0 %v7776_v48  ;;  %v7784_v8 = vpack.c.bf16 %v4783_v9, %v4779_v53  ;;  %v4807_v60 = vld [vmem:[#allocation12 + $0xfb8] sm:$0xff]  ;;  %v7732_v46 = vpack.c.bf16 %v4789_v40, %v4785_v45  ;;  %v4784_v48 = vld [vmem:[#allocation12 + $0xf00] sm:$0xff]  ;;  %v4805_v9 = vld [vmem:[#allocation12 + $0xfa8] sm:$0xff] }
 0xa50   : > { %6651 = vmatprep.mubr.msk.f32.mxu1 %vm3610_vm8, %v4381_v52  ;;  %6653 = vmatprep.mubr.msk.f32.mxu0 %vm3610_vm8, %v4381_v52  ;;  %v4806_v52 = vld [vmem:[#allocation12 + $0xfb0] sm:$0xff]  ;;  %v7734_v47 = vpack.c.bf16 %v4788_v7, %v4784_v48  ;;  %v4820_v40 = vld [vmem:[#allocation12 + $0x1020] sm:$0xff]  ;;  %v4847_v48 = vld [vmem:[#allocation12 + $0x10f8] sm:$0xff] }
 0xa51   : > { %4574 = vmatmul.mubr.f32.gmra.mrb[46].mxu1 %v4379_v51  ;;  %4651 = vmatmul.mubr.f32.gmra.mrb[34].mxu0 %v4379_v51  ;;  %v7796_v51 = vpack.c.bf16 %v4807_v60, %v4803_v17  ;;  %v4834_v60 = vld [vmem:[#allocation12 + $0x1090] sm:$0xff] }
 0xa52   : > { %4738 = vmatprep.mubr.f32.mxu1 %v8754_v32  ;;  %7779 = vmatpush1.bf16.msra.mxu0 %v7778_v23  ;;  %v4802_v23 = vld [vmem:[#allocation12 + $0xf90] sm:$0xff] }
 0xa53   : > { %7781 = vmatprep.subr.bf16.mxu0 %v7780_v3  ;;  %v7736_v3 = vpack.c.bf16 %v4797_v50, %v4793_v28  ;;  %v7798_v53 = vpack.c.bf16 %v4806_v52, %v4802_v23  ;;  %v4828_v50 = vld [vmem:[#allocation12 + $0x1060] sm:$0xff]  ;;  %v4837_v52 = vld [vmem:[#allocation12 + $0x10a8] sm:$0xff] }
 0xa55   : > { %6656 = vmatmul.mubr.msk.f32.vlgmr.msra.gmra.mrb[52].mxu1 %vm3208_vm7, %v4666_v10  ;;  %v7800_v10 = vpack.c.bf16 %v4815_v58, %v4811_v57  ;;  %v4842_v58 = vld [vmem:[#allocation12 + $0x10d0] sm:$0xff] }
 0xa56   : > { %4744 = vmatprep.mubr.f32.mxu1 %v8754_v32  ;;  %7719 = vmatpush1.bf16.msra.mxu1 %v7718_v12  ;;  %v4810_v12 = vld [vmem:[#allocation12 + $0xfd0] sm:$0xff] }
 0xa57   : > { %7721 = vmatprep.subr.bf16.mxu1 %v7720_v15  ;;  %7783 = vmatpush1.bf16.msra.mxu0 %v7782_v14  ;;  %v4814_v15 = vld [vmem:[#allocation12 + $0xff0] sm:$0xff]  ;;  %v7740_v14 = vpack.c.bf16 %v4805_v9, %v4801_v55  ;;  %v4836_v9 = vld [vmem:[#allocation12 + $0x10a0] sm:$0xff] }
 0xa58   : > { %7785 = vmatprep.subr.bf16.mxu0 %v7784_v8  ;;  %v4804_v8 = vld [vmem:[#allocation12 + $0xfa0] sm:$0xff]  ;;  %v7802_v21 = vpack.c.bf16 %v4814_v15, %v4810_v12  ;;  %v4845_v15 = vld [vmem:[#allocation12 + $0x10e8] sm:$0xff] }
 0xa59   : > { %6657 = vmatmul.mubr.msk.f32.gmra.mrb[54].mxu1 %vm3208_vm7, %v4667_v11  ;;  %v4818_v11 = vld [vmem:[#allocation12 + $0x1010] sm:$0xff]  ;;  %v7742_v43 = vpack.c.bf16 %v4804_v8, %v4800_v62  ;;  %v4863_v62 = vld [vmem:[#allocation12 + $0x1178] sm:$0xff] }
 0xa5a   : > { %7723 = vmatpush1.bf16.msra.mxu1 %v7722_v13  ;;  %v4822_v13 = vld [vmem:[#allocation12 + $0x1030] sm:$0xff] }
 0xa5b   : > { %7725 = vmatprep.subr.bf16.mxu1 %v7724_v24  ;;  %7787 = vmatpush1.bf16.msra.mxu0 %v7786_v27  ;;  %v4827_v24 = vld [vmem:[#allocation12 + $0x1058] sm:$0xff]  ;;  %v4808_v27 = vld [vmem:[#allocation12 + $0xfc0] sm:$0xff]  ;;  %v7806_v44 = vpack.c.bf16 %v4822_v13, %v4818_v11  ;;  %v4849_v11 = vld [vmem:[#allocation12 + $0x1108] sm:$0xff] }
 0xa5c   : > { %7789 = vmatprep.subr.bf16.mxu0 %v7788_v30  ;;  %v4817_v30 = vld [vmem:[#allocation12 + $0x1008] sm:$0xff]  ;;  %v7808_v33 = vpack.c.bf16 %v4831_v25, %v4827_v24  ;;  %v7746_v38 = vpack.c.bf16 %v4812_v29, %v4808_v27  ;;  %v4852_v27 = vld [vmem:[#allocation12 + $0x1120] sm:$0xff] }
 0xa5d   : > { %v7748_v45 = vpack.c.bf16 %v4821_v31, %v4817_v30  ;;  %v4853_v13 = vld [vmem:[#allocation12 + $0x1128] sm:$0xff] }
 0xa5e   : > { %7727 = vmatpush1.bf16.msra.mxu1 %v7726_v35  ;;  %v4830_v35 = vld [vmem:[#allocation12 + $0x1070] sm:$0xff]  ;;  %v4857_v29 = vld [vmem:[#allocation12 + $0x1148] sm:$0xff] }
 0xa5f   : > { %7729 = vmatprep.subr.bf16.mxu1 %v7728_v36  ;;  %7791 = vmatpush1.bf16.msra.mxu0 %v7790_v39  ;;  %v4835_v36 = vld [vmem:[#allocation12 + $0x1098] sm:$0xff]  ;;  %v4816_v39 = vld [vmem:[#allocation12 + $0x1000] sm:$0xff]  ;;  %v7810_v42 = vpack.c.bf16 %v4830_v35, %v4826_v34  ;;  %v4861_v30 = vld [vmem:[#allocation12 + $0x1168] sm:$0xff] }
 0xa60   : > { %7793 = vmatprep.subr.bf16.mxu0 %v7792_v41  ;;  %v4825_v41 = vld [vmem:[#allocation12 + $0x1048] sm:$0xff]  ;;  %v7812_v17 = vpack.c.bf16 %v4839_v37, %v4835_v36  ;;  %v7750_v7 = vpack.c.bf16 %v4820_v40, %v4816_v39  ;;  %v7768_v31 = vpack.c.bf16 %v4861_v30, %v4857_v29  ;;  %v4860_v34 = vld [vmem:[#allocation12 + $0x1160] sm:$0xff]  ;;  %v4858_v35 = vld [vmem:[#allocation12 + $0x1150] sm:$0xff] }
 0xa61   : > { %v7752_v28 = vpack.c.bf16 %v4829_v56, %v4825_v41  ;;  %v4862_v37 = vld [vmem:[#allocation12 + $0x1170] sm:$0xff] }
 0xa62   : > { %7731 = vmatpush1.bf16.msra.mxu1 %v7730_v6  ;;  %v4838_v6 = vld [vmem:[#allocation12 + $0x10b0] sm:$0xff] }
 0xa63   : > { %7733 = vmatprep.subr.bf16.mxu1 %v7732_v46  ;;  %7795 = vmatpush1.bf16.msra.mxu0 %v7794_v49  ;;  %v4843_v46 = vld [vmem:[#allocation12 + $0x10d8] sm:$0xff]  ;;  %v4824_v49 = vld [vmem:[#allocation12 + $0x1040] sm:$0xff]  ;;  %v7814_v23 = vpack.c.bf16 %v4838_v6, %v4834_v60  ;;  %v5388_v30 = vld [vmem:[#allocation15 + $0x48] sm:$0xff] }
 0xa64   : > { %7797 = vmatprep.subr.bf16.mxu0 %v7796_v51  ;;  %v4833_v51 = vld [vmem:[#allocation12 + $0x1088] sm:$0xff]  ;;  %v7816_v57 = vpack.c.bf16 %v4847_v48, %v4843_v46  ;;  %v7754_v0 = vpack.c.bf16 %v4828_v50, %v4824_v49  ;;  %v5385_v29 = vld [vmem:[#allocation15 + $0x30] sm:$0xff] }
 0xa65   : > { %v7756_v55 = vpack.c.bf16 %v4837_v52, %v4833_v51 }
 0xa66   : > { %7735 = vmatpush1.bf16.msra.mxu1 %v7734_v47  ;;  %v4846_v47 = vld [vmem:[#allocation12 + $0x10f0] sm:$0xff] }
 0xa67   : > { %7737 = vmatprep.subr.bf16.mxu1 %v7736_v3  ;;  %7799 = vmatpush1.bf16.msra.mxu0 %v7798_v53  ;;  %v4851_v3 = vld [vmem:[#allocation12 + $0x1118] sm:$0xff]  ;;  %v4832_v53 = vld [vmem:[#allocation12 + $0x1080] sm:$0xff]  ;;  %v7818_v12 = vpack.c.bf16 %v4846_v47, %v4842_v58 }
 0xa68   : > { %7801 = vmatprep.subr.bf16.mxu0 %v7800_v10  ;;  %v4841_v10 = vld [vmem:[#allocation12 + $0x10c8] sm:$0xff]  ;;  %v7820_v16 = vpack.c.bf16 %v4855_v59, %v4851_v3  ;;  %v7758_v8 = vpack.c.bf16 %v4836_v9, %v4832_v53 }
 0xa69   : > { %v7760_v20 = vpack.c.bf16 %v4845_v15, %v4841_v10  ;;  %v5380_v9 = vld [vmem:[#allocation15 + $0x8] sm:$0xff] }
 0xa6a   : > { %7739 = vmatpush1.bf16.msra.mxu1 %v7738_v19  ;;  %v4854_v19 = vld [vmem:[#allocation12 + $0x1130] sm:$0xff] }
 0xa6b   : > { %7741 = vmatprep.subr.bf16.mxu1 %v7740_v14  ;;  %7803 = vmatpush1.bf16.msra.mxu0 %v7802_v21  ;;  %v4859_v14 = vld [vmem:[#allocation12 + $0x1158] sm:$0xff]  ;;  %v4840_v21 = vld [vmem:[#allocation12 + $0x10c0] sm:$0xff] }
 0xa6c   : > { %7805 = vmatprep.subr.bf16.mxu0 %v7804_v1  ;;  %v7822_v1 = vpack.c.bf16 %v4854_v19, %v4850_v18  ;;  %v7824_v24 = vpack.c.bf16 %v4863_v62, %v4859_v14  ;;  %v7762_v25 = vpack.c.bf16 %v4844_v22, %v4840_v21  ;;  %v5381_v21 = vld [vmem:[#allocation15 + $0x10] sm:$0xff]  ;;  %v5384_v22 = vld [vmem:[#allocation15 + $0x28] sm:$0xff] }
 0xa6e   : > { %7743 = vmatpush1.bf16.msra.mxu1 %v7742_v43  ;;  %v7764_v43 = vpack.c.bf16 %v4853_v13, %v4849_v11  ;;  %v5070_v11 = vld [vmem:[%s9836_s9] sm:$0x7f]  ;;  %v6668_v13 = vld [vmem:[%s9836_s9 + $0x8] sm:$0x7f] }
 0xa6f   : > { %7745 = vmatprep.subr.bf16.mxu1 %v7744_v26  ;;  %7807 = vmatpush1.bf16.msra.mxu0 %v7806_v44  ;;  %v4848_v26 = vld [vmem:[#allocation12 + $0x1100] sm:$0xff] }
 0xa70   : > { %7809 = vmatprep.subr.bf16.mxu0 %v7808_v33  ;;  %v7766_v44 = vpack.c.bf16 %v4852_v27, %v4848_v26  ;;  %v4856_v33 = vld [vmem:[#allocation12 + $0x1140] sm:$0xff] }
 0xa71   : > { %v7770_v36 = vpack.c.bf16 %v4860_v34, %v4856_v33  ;;  %v5383_v27 = vld [vmem:[#allocation15 + $0x20] sm:$0xff]  ;;  %v5639_v34 = vld [vmem:[#allocation15 + $0x390] sm:$0xff] }
 0xa72   : > { %7747 = vmatpush1.bf16.msra.mxu1 %v7746_v38  ;;  %v7826_v38 = vpack.c.bf16 %v4862_v37, %v4858_v35  ;;  %v5637_v33 = vld [vmem:[#allocation15 + $0x380] sm:$0xff]  ;;  %v5642_v35 = vld [vmem:[#allocation15 + $0x3a8] sm:$0xff]  ;;  %v5644_v37 = vld [vmem:[#allocation15 + $0x3b8] sm:$0xff] }
 0xa73   : > { %7749 = vmatprep.subr.bf16.mxu1 %v7748_v45  ;;  %7811 = vmatpush1.bf16.msra.mxu0 %v7810_v42  ;;  %v5032_v42 = vld [vmem:[#allocation14] sm:$0xf] }
 0xa74   : > { %7813 = vmatprep.subr.bf16.mxu0 %v7812_v17  ;;  %v5037_v56 = vrot.slane %v5032_v42, %v2267_v4  ;;  %v5045_v17 = vrot.slane %v5032_v42, %v2275_v63  ;;  %v5041_v46 = vrot.slane %v5032_v42, %v2271_v5  ;;  %v5049_v48 = vrot.slane %v5032_v42, %v2279_v2  ;;  %v5382_v2 = vld [vmem:[#allocation15 + $0x18] sm:$0xff] }
 0xa75   : > { %v7966_v42 = vpack.c.bf16 %v5639_v34, %v5637_v33  ;;  %v5664_v34 = vld [vmem:[#allocation15 + $0x458] sm:$0xff] }
 0xa76   : > { %7751 = vmatpush1.bf16.msra.mxu1 %v7750_v7 }
 0xa77   : > { %7753 = vmatprep.subr.bf16.mxu1 %v7752_v28  ;;  %7815 = vmatpush1.bf16.msra.mxu0 %v7814_v23 }
 0xa78   : > { %7817 = vmatprep.subr.bf16.mxu0 %v7816_v57 }
 0xa7a   : > { %7755 = vmatpush1.bf16.msra.mxu1 %v7754_v0 }
 0xa7b   : > { %7757 = vmatprep.subr.bf16.mxu1 %v7756_v55  ;;  %7819 = vmatpush1.bf16.msra.mxu0 %v7818_v12 }
 0xa7c   : > { %7821 = vmatprep.subr.bf16.mxu0 %v7820_v16 }
 0xa7e   : > { %7759 = vmatpush1.bf16.msra.mxu1 %v7758_v8  ;;  %v7852_v8 = vpack.c.bf16 %v5382_v2, %v5380_v9  ;;  %v5651_v9 = vld [vmem:[#allocation15 + $0x3f0] sm:$0xff]  ;;  %v5654_v2 = vld [vmem:[#allocation15 + $0x408] sm:$0xff] }
 0xa7f   : > { %7761 = vmatprep.subr.bf16.mxu1 %v7760_v20  ;;  %7823 = vmatpush1.bf16.msra.mxu0 %v7822_v1  ;;  %v5379_v20 = vld [vmem:[#allocation15] sm:$0xff]  ;;  %v5386_v1 = vld [vmem:[#allocation15 + $0x38] sm:$0xff] }
 0xa80   : > { %7825 = vmatprep.subr.bf16.mxu0 %v7824_v24  ;;  %v5638_v24 = vld [vmem:[#allocation15 + $0x388] sm:$0xff]  ;;  %v7856_v26 = vpack.c.bf16 %v5386_v1, %v5384_v22 }
 0xa81   : > { %v5658_v22 = vld [vmem:[#allocation15 + $0x428] sm:$0xff] }
 0xa82   : > { %7763 = vmatpush1.bf16.msra.mxu1 %v7762_v25  ;;  %v7854_v25 = vpack.c.bf16 %v5381_v21, %v5379_v20  ;;  %v5653_v20 = vld [vmem:[#allocation15 + $0x400] sm:$0xff]  ;;  %v5655_v21 = vld [vmem:[#allocation15 + $0x410] sm:$0xff] }
 0xa83   : > { %7765 = vmatprep.subr.bf16.mxu1 %v7764_v43  ;;  %7827 = vmatpush1.bf16.msra.mxu0 %v7826_v38  ;;  %v5640_v43 = vld [vmem:[#allocation15 + $0x398] sm:$0xff] }
 0xa86   : > { %7767 = vmatpush1.bf16.msra.mxu1 %v7766_v44  ;;  %v5390_v44 = vld [vmem:[#allocation15 + $0x58] sm:$0xff] }
 0xa87   : > { %7769 = vmatprep.subr.bf16.mxu1 %v7768_v31  ;;  %v7964_v31 = vpack.c.bf16 %v5640_v43, %v5638_v24  ;;  %v7860_v38 = vpack.c.bf16 %v5390_v44, %v5388_v30  ;;  %v5403_v24 = vld [vmem:[#allocation15 + $0xc0] sm:$0xff]  ;;  %v5408_v43 = vld [vmem:[#allocation15 + $0xe8] sm:$0xff]  ;;  %v5659_v44 = vld [vmem:[#allocation15 + $0x430] sm:$0xff] }
 0xa88   : > { %v5657_v30 = vld [vmem:[#allocation15 + $0x420] sm:$0xff] }
 0xa8a   : > { %7771 = vmatpush1.bf16.msra.mxu1 %v7770_v36  ;;  %v7858_v36 = vpack.c.bf16 %v5385_v29, %v5383_v27  ;;  %v7982_v27 = vpack.c.bf16 %v5655_v21, %v5653_v20  ;;  %v5680_v21 = vld [vmem:[#allocation15 + $0x4d8] sm:$0xff] }
 0xb28   : > { %v4740_v45 = vpop.f32.mrb[52].mxu1 }
 0xb29   : > { %v4742_v39 = vpop.f32.mrb[53].mxu1 }
 0xb2a   : > { %6658 = vmatprep.mubr.msk.f32.mxu1 %vm3610_vm8, %v4742_v39  ;;  %6660 = vmatprep.mubr.msk.f32.mxu0 %vm3610_vm8, %v4742_v39  ;;  %v5389_v39 = vld [vmem:[#allocation15 + $0x50] sm:$0xff] }
 0xb2b   : > { %4935 = vmatmul.mubr.f32.vlgmr.msra.gmra.mrb[44].mxu1 %v4740_v45  ;;  %5012 = vmatmul.mubr.f32.vlgmr.msra.gmra.mrb[32].mxu0 %v4740_v45  ;;  %v5387_v45 = vld [vmem:[#allocation15 + $0x40] sm:$0xff] }
 0xb2c   : > { %v4746_v40 = vpop.f32.mrb[54].mxu1 }
 0xb2d   : > { %v4748_v41 = vpop.f32.mrb[55].mxu1 }
 0xb2e   : > { %6659 = vmatprep.mubr.msk.f32.mxu1 %vm3610_vm8, %v4748_v41  ;;  %6661 = vmatprep.mubr.msk.f32.mxu0 %vm3610_vm8, %v4748_v41  ;;  %v5394_v41 = vld [vmem:[#allocation15 + $0x78] sm:$0xff] }
 0xb2f   : > { %4941 = vmatmul.mubr.f32.gmra.mrb[46].mxu1 %v4746_v40  ;;  %5018 = vmatmul.mubr.f32.gmra.mrb[34].mxu0 %v4746_v40  ;;  %v5392_v40 = vld [vmem:[#allocation15 + $0x68] sm:$0xff] }
 0xb30   : > { %5150 = vmatprep.mubr.f32.mxu1 %v8754_v32  ;;  %5297 = vmatprep.mubr.f32.mxu0 %v8754_v32 }
 0xbfe   : > { %v4936_v60 = vpop.f32.mrb[44].mxu1  ;;  %v5013_v6 = vpop.f32.mrb[32].mxu0 }
 0xbff   : > { %v4938_v7 = vpop.f32.mrb[45].mxu1  ;;  %v5015_v28 = vpop.f32.mrb[33].mxu0  ;;  %v5054_v49 = vadd.f32 %v5037_v56, %v4936_v60  ;;  %v5056_v50 = vadd.f32 %v5045_v17, %v5013_v6  ;;  %v5643_v60 = vld [vmem:[#allocation15 + $0x3b0] sm:$0xff]  ;;  %v5646_v6 = vld [vmem:[#allocation15 + $0x3c8] sm:$0xff] }
 0xc00   : > { %v5055_v51 = vadd.f32 %v5041_v46, %v4938_v7  ;;  %v5057_v23 = vadd.f32 %v5049_v48, %v5015_v28  ;;  %v7864_v7 = vpack.c.bf16 %v5394_v41, %v5392_v40  ;;  %v5391_v28 = vld [vmem:[#allocation15 + $0x60] sm:$0xff] }
 0xc01   : > { %v5062_v0 = vmax.f32 %v5054_v49, 0.0  ;;  %v5064_v55 = vmax.f32 %v5056_v50, 0.0  ;;  %v5393_v49 = vld [vmem:[#allocation15 + $0x70] sm:$0xff]  ;;  %v5396_v50 = vld [vmem:[#allocation15 + $0x88] sm:$0xff]  ;;  %v5661_v41 = vld [vmem:[#allocation15 + $0x440] sm:$0xff] }
 0xc02   : > { %v4942_v52 = vpop.f32.mrb[46].mxu1  ;;  %v5019_v57 = vpop.f32.mrb[34].mxu0  ;;  %v5063_v10 = vmax.f32 %v5055_v51, 0.0  ;;  %v5065_v12 = vmax.f32 %v5057_v23, 0.0  ;;  %v5645_v23 = vld [vmem:[#allocation15 + $0x3c0] sm:$0xff] }
 0xc03   : > { %v5058_v4 = vadd.f32 %v5037_v56, %v4942_v52  ;;  %v5060_v58 = vadd.f32 %v5045_v17, %v5019_v57  ;;  %v4944_v47 = vpop.f32.mrb[47].mxu1  ;;  %v5021_v63 = vpop.f32.mrb[35].mxu0  ;;  %v7968_v56 = vpack.c.bf16 %v5644_v37, %v5642_v35  ;;  %v5641_v17 = vld [vmem:[#allocation15 + $0x3a0] sm:$0xff]  ;;  %v5647_v52 = vld [vmem:[#allocation15 + $0x3d0] sm:$0xff]  ;;  %v5650_v57 = vld [vmem:[#allocation15 + $0x3e8] sm:$0xff] }
 0xc04   : > { %v5059_v3 = vadd.f32 %v5041_v46, %v4944_v47  ;;  %v5061_v59 = vadd.f32 %v5049_v48, %v5021_v63  ;;  %v7862_v46 = vpack.c.bf16 %v5389_v39, %v5387_v45  ;;  %v5648_v48 = vld [vmem:[#allocation15 + $0x3d8] sm:$0xff]  ;;  %v7970_v51 = vpack.c.bf16 %v5643_v60, %v5641_v17  ;;  %v5395_v63 = vld [vmem:[#allocation15 + $0x80] sm:$0xff]  ;;  %v5409_v37 = vld [vmem:[#allocation15 + $0xf0] sm:$0xff] }
 0xc05   : > { %v5066_v5 = vmax.f32 %v5058_v4, 0.0  ;;  %v5068_v53 = vmax.f32 %v5060_v58, 0.0  ;;  %v7866_v4 = vpack.c.bf16 %v5393_v49, %v5391_v28  ;;  %v5652_v58 = vld [vmem:[#allocation15 + $0x3f8] sm:$0xff]  ;;  %v7868_v47 = vpack.c.bf16 %v5398_v54, %v5396_v50  ;;  %v5665_v54 = vld [vmem:[#allocation15 + $0x460] sm:$0xff] }
 0xc06   : > { %v5067_v15 = vmax.f32 %v5059_v3, 0.0  ;;  %v5069_v16 = vmax.f32 %v5061_v59, 0.0  ;;  %v5397_v3 = vld [vmem:[#allocation15 + $0x90] sm:$0xff]  ;;  %v5400_v59 = vld [vmem:[#allocation15 + $0xa8] sm:$0xff]  ;;  %v5414_v45 = vld [vmem:[#allocation15 + $0x118] sm:$0xff]  ;;  %v7986_v39 = vpack.c.bf16 %v5659_v44, %v5657_v30 }
 0xc07   : > { %v7831_v18 = vpack.c.bf16 %v5066_v5, %v5062_v0  ;;  %v7837_v19 = vpack.c.bf16 %v5068_v53, %v5064_v55  ;;  %v5402_v0 = vld [vmem:[#allocation15 + $0xb8] sm:$0xff]  ;;  %v7974_v55 = vpack.c.bf16 %v5647_v52, %v5645_v23  ;;  %v7976_v5 = vpack.c.bf16 %v5652_v58, %v5650_v57  ;;  %v5649_v53 = vld [vmem:[#allocation15 + $0x3e0] sm:$0xff]  ;;  %v5417_v58 = vld [vmem:[#allocation15 + $0x130] sm:$0xff] }
 0xc08   : > { %v7828_v14 = vpack.c.bf16 %v5067_v15, %v5063_v10  ;;  %v7834_v62 = vpack.c.bf16 %v5069_v16, %v5065_v12  ;;  %v7870_v10 = vpack.c.bf16 %v5397_v3, %v5395_v63  ;;  %v5656_v12 = vld [vmem:[#allocation15 + $0x418] sm:$0xff]  ;;  %v7872_v15 = vpack.c.bf16 %v5402_v0, %v5400_v59  ;;  %v5399_v16 = vld [vmem:[#allocation15 + $0xa0] sm:$0xff] }
 0xc09   : > { %v5668_v60 = vld [vmem:[#allocation15 + $0x478] sm:$0xff]  ;;  %v5669_v0 = vld [vmem:[#allocation15 + $0x480] sm:$0xff] }
 0xc0a   : > { %7830 = vmatprep.subr.msk.bf16.mxu1 %vm9476_vm6, %v7828_v14  ;;  %7842 = vmatprep.subr.msk.bf16.mxu0 %vm9476_vm6, %v7828_v14  ;;  %v5406_v14 = vld [vmem:[#allocation15 + $0xd8] sm:$0xff] }
 0xc0b   : > { %7833 = vmatpush1.bf16.msk.msra.mxu1 %vm9476_vm6, %v7831_v18  ;;  %7845 = vmatpush1.bf16.msk.msra.mxu0 %vm9476_vm6, %v7831_v18  ;;  %v5401_v18 = vld [vmem:[#allocation15 + $0xb0] sm:$0xff]  ;;  %v5418_v28 = vld [vmem:[#allocation15 + $0x138] sm:$0xff] }
 0xc0c   : > { %7836 = vmatprep.subr.msk.bf16.mxu1 %vm9476_vm6, %v7834_v62  ;;  %7853 = vmatprep.subr.bf16.mxu0 %v7852_v8  ;;  %v7980_v8 = vpack.c.bf16 %v5656_v12, %v5654_v2  ;;  %v7874_v1 = vpack.c.bf16 %v5401_v18, %v5399_v16  ;;  %v5672_v52 = vld [vmem:[#allocation15 + $0x498] sm:$0xff]  ;;  %v5421_v12 = vld [vmem:[#allocation15 + $0x150] sm:$0xff] }
 0xc0d   : > { %v5422_v63 = vld [vmem:[#allocation15 + $0x158] sm:$0xff] }
 0xc0e   : > { %6664 = vmatmul.mubr.msk.f32.vlgmr.msra.gmra.mrb[56].mxu1 %vm3208_vm7, %v5070_v11  ;;  %6671 = vmatmul.mubr.msk.f32.vlgmr.msra.gmra.mrb[40].mxu0 %vm3208_vm7, %v6668_v13  ;;  %v5426_v16 = vld [vmem:[#allocation15 + $0x178] sm:$0xff] }
 0xc0f   : > { %7839 = vmatpush1.bf16.msk.msra.mxu1 %vm9476_vm6, %v7837_v19  ;;  %5221 = vmatprep.mubr.f32.mxu1 %v8754_v32  ;;  %v5684_v44 = vld [vmem:[#allocation15 + $0x4f8] sm:$0xff] }
 0xc10   : > { %7848 = vmatprep.subr.msk.bf16.mxu1 %vm9476_vm6, %v7834_v62  ;;  %7855 = vmatpush1.bf16.msra.mxu0 %v7854_v25  ;;  %v7978_v62 = vpack.c.bf16 %v5651_v9, %v5649_v53  ;;  %v5405_v25 = vld [vmem:[#allocation15 + $0xd0] sm:$0xff]  ;;  %v5676_v9 = vld [vmem:[#allocation15 + $0x4b8] sm:$0xff] }
 0xc11   : > { %7857 = vmatprep.subr.bf16.mxu0 %v7856_v26  ;;  %v5410_v26 = vld [vmem:[#allocation15 + $0xf8] sm:$0xff]  ;;  %v7878_v33 = vpack.c.bf16 %v5405_v25, %v5403_v24 }
 0xc12   : > { %6667 = vmatmul.mubr.msk.f32.vlgmr.msra.gmra.mrb[58].mxu1 %vm3208_vm7, %v5070_v11  ;;  %v5660_v11 = vld [vmem:[#allocation15 + $0x438] sm:$0xff]  ;;  %v7880_v35 = vpack.c.bf16 %v5410_v26, %v5408_v43  ;;  %v5677_v26 = vld [vmem:[#allocation15 + $0x4c0] sm:$0xff] }
 0xc13   : > { %7851 = vmatpush1.bf16.msk.msra.mxu1 %vm9476_vm6, %v7837_v19  ;;  %5368 = vmatprep.mubr.f32.mxu1 %v8754_v32  ;;  %v7972_v32 = vpack.c.bf16 %v5648_v48, %v5646_v6  ;;  %v5404_v19 = vld [vmem:[#allocation15 + $0xc8] sm:$0xff]  ;;  %v7984_v29 = vpack.c.bf16 %v5660_v11, %v5658_v22  ;;  %v5413_v48 = vld [vmem:[#allocation15 + $0x110] sm:$0xff]  ;;  %v5430_v24 = vld [vmem:[#allocation15 + $0x198] sm:$0xff] }
 0xc14   : > { %7965 = vmatprep.subr.bf16.mxu1 %v7964_v31  ;;  %7859 = vmatpush1.bf16.msra.mxu0 %v7858_v36  ;;  %v5662_v31 = vld [vmem:[#allocation15 + $0x448] sm:$0xff]  ;;  %v5407_v36 = vld [vmem:[#allocation15 + $0xe0] sm:$0xff]  ;;  %v5425_v11 = vld [vmem:[#allocation15 + $0x170] sm:$0xff] }
 0xc15   : > { %7861 = vmatprep.subr.bf16.mxu0 %v7860_v38  ;;  %v5412_v38 = vld [vmem:[#allocation15 + $0x108] sm:$0xff]  ;;  %v7988_v40 = vpack.c.bf16 %v5664_v34, %v5662_v31  ;;  %v7882_v17 = vpack.c.bf16 %v5409_v37, %v5407_v36  ;;  %v5429_v34 = vld [vmem:[#allocation15 + $0x190] sm:$0xff]  ;;  %v5434_v36 = vld [vmem:[#allocation15 + $0x1b8] sm:$0xff] }
 0xc16   : > { %6674 = vmatmul.mubr.msk.f32.vlgmr.msra.gmra.mrb[60].mxu1 %vm3208_vm7, %v6668_v13  ;;  %v7876_v13 = vpack.c.bf16 %v5406_v14, %v5404_v19  ;;  %v7884_v6 = vpack.c.bf16 %v5414_v45, %v5412_v38  ;;  %v5673_v14 = vld [vmem:[#allocation15 + $0x4a0] sm:$0xff] }
 0xc17   : > { %7967 = vmatpush1.bf16.msra.mxu1 %v7966_v42  ;;  %v5663_v42 = vld [vmem:[#allocation15 + $0x450] sm:$0xff]  ;;  %v5681_v45 = vld [vmem:[#allocation15 + $0x4e0] sm:$0xff] }
 0xc18   : > { %7969 = vmatprep.subr.bf16.mxu1 %v7968_v56  ;;  %7863 = vmatpush1.bf16.msra.mxu0 %v7862_v46  ;;  %v5666_v56 = vld [vmem:[#allocation15 + $0x468] sm:$0xff]  ;;  %v5411_v46 = vld [vmem:[#allocation15 + $0x100] sm:$0xff]  ;;  %v7990_v49 = vpack.c.bf16 %v5663_v42, %v5661_v41  ;;  %v5688_v42 = vld [vmem:[#allocation15 + $0x518] sm:$0xff] }
 0xc19   : > { %7865 = vmatprep.subr.bf16.mxu0 %v7864_v7  ;;  %v5416_v7 = vld [vmem:[#allocation15 + $0x128] sm:$0xff]  ;;  %v7992_v50 = vpack.c.bf16 %v5668_v60, %v5666_v56  ;;  %v7886_v23 = vpack.c.bf16 %v5413_v48, %v5411_v46  ;;  %v5433_v60 = vld [vmem:[#allocation15 + $0x1b0] sm:$0xff]  ;;  %v5438_v46 = vld [vmem:[#allocation15 + $0x1d8] sm:$0xff] }
 0xc1a   : > { %v7888_v57 = vpack.c.bf16 %v5418_v28, %v5416_v7  ;;  %v5685_v28 = vld [vmem:[#allocation15 + $0x500] sm:$0xff] }
 0xc1b   : > { %7971 = vmatpush1.bf16.msra.mxu1 %v7970_v51  ;;  %v5667_v51 = vld [vmem:[#allocation15 + $0x470] sm:$0xff] }
 0xc1c   : > { %7973 = vmatprep.subr.bf16.mxu1 %v7972_v32  ;;  %7867 = vmatpush1.bf16.msra.mxu0 %v7866_v4  ;;  %v5670_v32 = vld [vmem:[#allocation15 + $0x488] sm:$0xff]  ;;  %v5415_v4 = vld [vmem:[#allocation15 + $0x120] sm:$0xff]  ;;  %v7994_v3 = vpack.c.bf16 %v5667_v51, %v5665_v54  ;;  %v5692_v51 = vld [vmem:[#allocation15 + $0x538] sm:$0xff] }
 0xc1d   : > { %7869 = vmatprep.subr.bf16.mxu0 %v7868_v47  ;;  %v5420_v47 = vld [vmem:[#allocation15 + $0x148] sm:$0xff]  ;;  %v7996_v59 = vpack.c.bf16 %v5672_v52, %v5670_v32  ;;  %v7890_v53 = vpack.c.bf16 %v5417_v58, %v5415_v4  ;;  %v5437_v52 = vld [vmem:[#allocation15 + $0x1d0] sm:$0xff]  ;;  %v5689_v58 = vld [vmem:[#allocation15 + $0x520] sm:$0xff] }
 0xc1e   : > { %v7892_v2 = vpack.c.bf16 %v5422_v63, %v5420_v47  ;;  %v5691_v47 = vld [vmem:[#allocation15 + $0x530] sm:$0xff] }
 0xc1f   : > { %7975 = vmatpush1.bf16.msra.mxu1 %v7974_v55  ;;  %v5671_v55 = vld [vmem:[#allocation15 + $0x490] sm:$0xff] }
 0xc20   : > { %7977 = vmatprep.subr.bf16.mxu1 %v7976_v5  ;;  %7871 = vmatpush1.bf16.msra.mxu0 %v7870_v10  ;;  %v5674_v5 = vld [vmem:[#allocation15 + $0x4a8] sm:$0xff]  ;;  %v5419_v10 = vld [vmem:[#allocation15 + $0x140] sm:$0xff]  ;;  %v7998_v18 = vpack.c.bf16 %v5671_v55, %v5669_v0  ;;  %v8018_v0 = vpack.c.bf16 %v5691_v47, %v5689_v58  ;;  %v5711_v58 = vld [vmem:[#allocation15 + $0x5d0] sm:$0xff] }
 0xc21   : > { %7873 = vmatprep.subr.bf16.mxu0 %v7872_v15  ;;  %v5424_v15 = vld [vmem:[#allocation15 + $0x168] sm:$0xff]  ;;  %v8000_v19 = vpack.c.bf16 %v5676_v9, %v5674_v5  ;;  %v7894_v20 = vpack.c.bf16 %v5421_v12, %v5419_v10  ;;  %v5693_v5 = vld [vmem:[#allocation15 + $0x540] sm:$0xff]  ;;  %v5442_v10 = vld [vmem:[#allocation15 + $0x1f8] sm:$0xff] }
 0xc22   : > { %v7896_v22 = vpack.c.bf16 %v5426_v16, %v5424_v15  ;;  %v5698_v12 = vld [vmem:[#allocation15 + $0x568] sm:$0xff]  ;;  %v5700_v16 = vld [vmem:[#allocation15 + $0x578] sm:$0xff] }
 0xc23   : > { %7979 = vmatpush1.bf16.msra.mxu1 %v7978_v62  ;;  %v5675_v62 = vld [vmem:[#allocation15 + $0x4b0] sm:$0xff]  ;;  %v5456_v47 = vld [vmem:[#allocation15 + $0x268] sm:$0xff] }
 0xc24   : > { %7981 = vmatprep.subr.bf16.mxu1 %v7980_v8  ;;  %7875 = vmatpush1.bf16.msra.mxu0 %v7874_v1  ;;  %v5678_v8 = vld [vmem:[#allocation15 + $0x4c8] sm:$0xff]  ;;  %v5423_v1 = vld [vmem:[#allocation15 + $0x160] sm:$0xff]  ;;  %v8002_v25 = vpack.c.bf16 %v5675_v62, %v5673_v14  ;;  %v8024_v14 = vpack.c.bf16 %v5700_v16, %v5698_v12 }
 0xc25   : > { %7877 = vmatprep.subr.bf16.mxu0 %v7876_v13  ;;  %v5428_v13 = vld [vmem:[#allocation15 + $0x188] sm:$0xff]  ;;  %v8004_v43 = vpack.c.bf16 %v5680_v21, %v5678_v8  ;;  %v7898_v30 = vpack.c.bf16 %v5425_v11, %v5423_v1  ;;  %v5697_v8 = vld [vmem:[#allocation15 + $0x560] sm:$0xff]  ;;  %v5446_v1 = vld [vmem:[#allocation15 + $0x218] sm:$0xff] }
 0xc26   : > { %v7900_v31 = vpack.c.bf16 %v5430_v24, %v5428_v13  ;;  %v5702_v11 = vld [vmem:[#allocation15 + $0x588] sm:$0xff]  ;;  %v5704_v24 = vld [vmem:[#allocation15 + $0x598] sm:$0xff] }
 0xc27   : > { %7983 = vmatpush1.bf16.msra.mxu1 %v7982_v27  ;;  %v5679_v27 = vld [vmem:[#allocation15 + $0x4d0] sm:$0xff] }
 0xc28   : > { %7985 = vmatprep.subr.bf16.mxu1 %v7984_v29  ;;  %7879 = vmatpush1.bf16.msra.mxu0 %v7878_v33  ;;  %v5682_v29 = vld [vmem:[#allocation15 + $0x4e8] sm:$0xff]  ;;  %v5427_v33 = vld [vmem:[#allocation15 + $0x180] sm:$0xff]  ;;  %v8006_v37 = vpack.c.bf16 %v5679_v27, %v5677_v26  ;;  %v5445_v26 = vld [vmem:[#allocation15 + $0x210] sm:$0xff] }
 0xc29   : > { %7881 = vmatprep.subr.bf16.mxu0 %v7880_v35  ;;  %v5432_v35 = vld [vmem:[#allocation15 + $0x1a8] sm:$0xff]  ;;  %v8008_v38 = vpack.c.bf16 %v5684_v44, %v5682_v29  ;;  %v7902_v41 = vpack.c.bf16 %v5429_v34, %v5427_v33  ;;  %v5701_v27 = vld [vmem:[#allocation15 + $0x580] sm:$0xff]  ;;  %v5703_v29 = vld [vmem:[#allocation15 + $0x590] sm:$0xff] }
 0xc2a   : > { %v7904_v56 = vpack.c.bf16 %v5434_v36, %v5432_v35  ;;  %v5450_v33 = vld [vmem:[#allocation15 + $0x238] sm:$0xff]  ;;  %v5706_v34 = vld [vmem:[#allocation15 + $0x5a8] sm:$0xff] }
 0xc2b   : > { %7987 = vmatpush1.bf16.msra.mxu1 %v7986_v39  ;;  %v5683_v39 = vld [vmem:[#allocation15 + $0x4f0] sm:$0xff]  ;;  %v5708_v35 = vld [vmem:[#allocation15 + $0x5b8] sm:$0xff] }
 0xc2c   : > { %7989 = vmatprep.subr.bf16.mxu1 %v7988_v40  ;;  %7883 = vmatpush1.bf16.msra.mxu0 %v7882_v17  ;;  %v5686_v40 = vld [vmem:[#allocation15 + $0x508] sm:$0xff]  ;;  %v5431_v17 = vld [vmem:[#allocation15 + $0x1a0] sm:$0xff]  ;;  %v8010_v48 = vpack.c.bf16 %v5683_v39, %v5681_v45 }
 0xc2d   : > { %7885 = vmatprep.subr.bf16.mxu0 %v7884_v6  ;;  %v5436_v6 = vld [vmem:[#allocation15 + $0x1c8] sm:$0xff]  ;;  %v8012_v7 = vpack.c.bf16 %v5688_v42, %v5686_v40  ;;  %v7906_v54 = vpack.c.bf16 %v5433_v60, %v5431_v17  ;;  %v8030_v40 = vpack.c.bf16 %v5703_v29, %v5701_v27  ;;  %v5449_v42 = vld [vmem:[#allocation15 + $0x230] sm:$0xff]  ;;  %v8032_v17 = vpack.c.bf16 %v5708_v35, %v5706_v34  ;;  %v5705_v60 = vld [vmem:[#allocation15 + $0x5a0] sm:$0xff] }
 0xc2e   : > { %v7908_v32 = vpack.c.bf16 %v5438_v46, %v5436_v6  ;;  %v5707_v6 = vld [vmem:[#allocation15 + $0x5b0] sm:$0xff]  ;;  %v5452_v46 = vld [vmem:[#allocation15 + $0x248] sm:$0xff]  ;;  %v5466_v27 = vld [vmem:[#allocation15 + $0x2b8] sm:$0xff] }
 0xc2f   : > { %7991 = vmatpush1.bf16.msra.mxu1 %v7990_v49  ;;  %v5687_v49 = vld [vmem:[#allocation15 + $0x510] sm:$0xff]  ;;  %v5722_v29 = vld [vmem:[#allocation15 + $0x628] sm:$0xff] }
 0xc30   : > { %7993 = vmatprep.subr.bf16.mxu1 %v7992_v50  ;;  %7887 = vmatpush1.bf16.msra.mxu0 %v7886_v23  ;;  %v5690_v50 = vld [vmem:[#allocation15 + $0x528] sm:$0xff]  ;;  %v5435_v23 = vld [vmem:[#allocation15 + $0x1c0] sm:$0xff]  ;;  %v5465_v34 = vld [vmem:[#allocation15 + $0x2b0] sm:$0xff] }
 0xc31   : > { %7889 = vmatprep.subr.bf16.mxu0 %v7888_v57  ;;  %v8014_v57 = vpack.c.bf16 %v5687_v49, %v5685_v28  ;;  %v8016_v4 = vpack.c.bf16 %v5692_v51, %v5690_v50  ;;  %v7910_v63 = vpack.c.bf16 %v5437_v52, %v5435_v23  ;;  %v5712_v28 = vld [vmem:[#allocation15 + $0x5d8] sm:$0xff]  ;;  %v8034_v51 = vpack.c.bf16 %v5707_v6, %v5705_v60  ;;  %v5453_v23 = vld [vmem:[#allocation15 + $0x250] sm:$0xff] }
 0xc32   : > { %v5469_v60 = vld [vmem:[#allocation15 + $0x2d0] sm:$0xff] }
 0xc33   : > { %7995 = vmatpush1.bf16.msra.mxu1 %v7994_v3  ;;  %v5694_v3 = vld [vmem:[#allocation15 + $0x548] sm:$0xff] }
 0xc34   : > { %7997 = vmatprep.subr.bf16.mxu1 %v7996_v59  ;;  %7891 = vmatpush1.bf16.msra.mxu0 %v7890_v53  ;;  %v5696_v59 = vld [vmem:[#allocation15 + $0x558] sm:$0xff]  ;;  %v5695_v53 = vld [vmem:[#allocation15 + $0x550] sm:$0xff] }
 0xc35   : > { %7893 = vmatprep.subr.bf16.mxu0 %v7892_v2  ;;  %v8020_v55 = vpack.c.bf16 %v5696_v59, %v5694_v3  ;;  %v8022_v9 = vpack.c.bf16 %v5695_v53, %v5693_v5  ;;  %v5440_v2 = vld [vmem:[#allocation15 + $0x1e8] sm:$0xff]  ;;  %v5716_v59 = vld [vmem:[#allocation15 + $0x5f8] sm:$0xff] }
 0xc36   : > { %v7912_v15 = vpack.c.bf16 %v5442_v10, %v5440_v2  ;;  %v5714_v3 = vld [vmem:[#allocation15 + $0x5e8] sm:$0xff]  ;;  %v5455_v2 = vld [vmem:[#allocation15 + $0x260] sm:$0xff]  ;;  %v5457_v10 = vld [vmem:[#allocation15 + $0x270] sm:$0xff] }
 0xc37   : > { %7999 = vmatpush1.bf16.msra.mxu1 %v7998_v18  ;;  %v5439_v18 = vld [vmem:[#allocation15 + $0x1e0] sm:$0xff]  ;;  %v8040_v16 = vpack.c.bf16 %v5716_v59, %v5714_v3  ;;  %v5478_v3 = vld [vmem:[#allocation15 + $0x318] sm:$0xff]  ;;  %v5734_v59 = vld [vmem:[#allocation15 + $0x688] sm:$0xff] }
 0xc38   : > { %8001 = vmatprep.subr.bf16.mxu1 %v8000_v19  ;;  %7895 = vmatpush1.bf16.msra.mxu0 %v7894_v20  ;;  %v5441_v19 = vld [vmem:[#allocation15 + $0x1f0] sm:$0xff] }
 0xc39   : > { %7897 = vmatprep.subr.bf16.mxu0 %v7896_v22  ;;  %v7914_v62 = vpack.c.bf16 %v5441_v19, %v5439_v18  ;;  %v5699_v20 = vld [vmem:[#allocation15 + $0x570] sm:$0xff]  ;;  %v5444_v22 = vld [vmem:[#allocation15 + $0x208] sm:$0xff]  ;;  %v5713_v18 = vld [vmem:[#allocation15 + $0x5e0] sm:$0xff] }
 0xc3a   : > { %v8026_v21 = vpack.c.bf16 %v5699_v20, %v5697_v8  ;;  %v7916_v13 = vpack.c.bf16 %v5446_v1, %v5444_v22  ;;  %v5715_v19 = vld [vmem:[#allocation15 + $0x5f0] sm:$0xff]  ;;  %v5718_v8 = vld [vmem:[#allocation15 + $0x608] sm:$0xff]  ;;  %v5720_v20 = vld [vmem:[#allocation15 + $0x618] sm:$0xff] }
 0xc3b   : > { %8003 = vmatpush1.bf16.msra.mxu1 %v8002_v25  ;;  %v8028_v25 = vpack.c.bf16 %v5704_v24, %v5702_v11  ;;  %v8042_v22 = vpack.c.bf16 %v5715_v19, %v5713_v18  ;;  %v5459_v1 = vld [vmem:[#allocation15 + $0x280] sm:$0xff]  ;;  %v5461_v11 = vld [vmem:[#allocation15 + $0x290] sm:$0xff]  ;;  %v8044_v24 = vpack.c.bf16 %v5720_v20, %v5718_v8  ;;  %v5480_v18 = vld [vmem:[#allocation15 + $0x328] sm:$0xff] }
 0xc3c   : > { %8005 = vmatprep.subr.bf16.mxu1 %v8004_v43  ;;  %7899 = vmatpush1.bf16.msra.mxu0 %v7898_v30  ;;  %v5443_v43 = vld [vmem:[#allocation15 + $0x200] sm:$0xff]  ;;  %v5448_v30 = vld [vmem:[#allocation15 + $0x228] sm:$0xff]  ;;  %v5482_v19 = vld [vmem:[#allocation15 + $0x338] sm:$0xff] }
 0xc3d   : > { %7901 = vmatprep.subr.bf16.mxu0 %v7900_v31  ;;  %v7918_v39 = vpack.c.bf16 %v5445_v26, %v5443_v43  ;;  %v5719_v43 = vld [vmem:[#allocation15 + $0x610] sm:$0xff]  ;;  %v5464_v26 = vld [vmem:[#allocation15 + $0x2a8] sm:$0xff] }
 0xc3e   : > { %v7936_v35 = vpack.c.bf16 %v5466_v27, %v5464_v26  ;;  %v5742_v26 = vld [vmem:[#allocation15 + $0x6c8] sm:$0xff]  ;;  %v5744_v27 = vld [vmem:[#allocation15 + $0x6d8] sm:$0xff] }
 0xc3f   : > { %8007 = vmatpush1.bf16.msra.mxu1 %v8006_v37 }
 0xc40   : > { %8009 = vmatprep.subr.bf16.mxu1 %v8008_v38  ;;  %7903 = vmatpush1.bf16.msra.mxu0 %v7902_v41  ;;  %v5447_v41 = vld [vmem:[#allocation15 + $0x220] sm:$0xff] }
 0xc41   : > { %7905 = vmatprep.subr.bf16.mxu0 %v7904_v56  ;;  %v7920_v56 = vpack.c.bf16 %v5450_v33, %v5448_v30  ;;  %v5724_v30 = vld [vmem:[#allocation15 + $0x638] sm:$0xff]  ;;  %v5463_v33 = vld [vmem:[#allocation15 + $0x2a0] sm:$0xff] }
 0xc43   : > { %8011 = vmatpush1.bf16.msra.mxu1 %v8010_v48  ;;  %v5454_v48 = vld [vmem:[#allocation15 + $0x258] sm:$0xff] }
 0xc44   : > { %8013 = vmatprep.subr.bf16.mxu1 %v8012_v7  ;;  %7907 = vmatpush1.bf16.msra.mxu0 %v7906_v54  ;;  %v5710_v7 = vld [vmem:[#allocation15 + $0x5c8] sm:$0xff]  ;;  %v7922_v54 = vpack.c.bf16 %v5449_v42, %v5447_v41  ;;  %v7924_v52 = vpack.c.bf16 %v5454_v48, %v5452_v46  ;;  %v5728_v41 = vld [vmem:[#allocation15 + $0x658] sm:$0xff]  ;;  %v7938_v42 = vpack.c.bf16 %v5465_v34, %v5463_v33  ;;  %v5725_v48 = vld [vmem:[#allocation15 + $0x640] sm:$0xff] }
 0xc45   : > { %7909 = vmatprep.subr.bf16.mxu0 %v7908_v32  ;;  %v5451_v32 = vld [vmem:[#allocation15 + $0x240] sm:$0xff]  ;;  %v8068_v34 = vpack.c.bf16 %v5744_v27, %v5742_v26  ;;  %v6148_v27 = vld [vmem:[%s9838_s11 + $0xd0] sm:$0xff] }
 0xc46   : > { %v7926_v53 = vpack.c.bf16 %v5453_v23, %v5451_v32  ;;  %v5471_v23 = vld [vmem:[#allocation15 + $0x2e0] sm:$0xff] }
 0xc47   : > { %8015 = vmatpush1.bf16.msra.mxu1 %v8014_v57  ;;  %v8036_v57 = vpack.c.bf16 %v5712_v28, %v5710_v7  ;;  %v5727_v7 = vld [vmem:[#allocation15 + $0x650] sm:$0xff]  ;;  %v5472_v28 = vld [vmem:[#allocation15 + $0x2e8] sm:$0xff] }
 0xc48   : > { %8017 = vmatprep.subr.bf16.mxu1 %v8016_v4  ;;  %7911 = vmatpush1.bf16.msra.mxu0 %v7910_v63  ;;  %v5709_v4 = vld [vmem:[#allocation15 + $0x5c0] sm:$0xff]  ;;  %v5458_v63 = vld [vmem:[#allocation15 + $0x278] sm:$0xff]  ;;  %v8054_v32 = vpack.c.bf16 %v5727_v7, %v5725_v48 }
 0xc49   : > { %7913 = vmatprep.subr.bf16.mxu0 %v7912_v15  ;;  %v7928_v15 = vpack.c.bf16 %v5458_v63, %v5456_v47  ;;  %v5731_v47 = vld [vmem:[#allocation15 + $0x670] sm:$0xff]  ;;  %v5476_v63 = vld [vmem:[#allocation15 + $0x308] sm:$0xff] }
 0xc4b   : > { %8019 = vmatpush1.bf16.msra.mxu1 %v8018_v0 }
 0xc4c   : > { %8021 = vmatprep.subr.bf16.mxu1 %v8020_v55  ;;  %7915 = vmatpush1.bf16.msra.mxu0 %v7914_v62  ;;  %v5462_v62 = vld [vmem:[#allocation15 + $0x298] sm:$0xff] }
 0xc4d   : > { %7917 = vmatprep.subr.bf16.mxu0 %v7916_v13 }
 0xc4f   : > { %8023 = vmatpush1.bf16.msra.mxu1 %v8022_v9  ;;  %v8038_v9 = vpack.c.bf16 %v5711_v58, %v5709_v4  ;;  %v5729_v58 = vld [vmem:[#allocation15 + $0x660] sm:$0xff] }
 0xc50   : > { %8025 = vmatprep.subr.bf16.mxu1 %v8024_v14  ;;  %v5460_v14 = vld [vmem:[#allocation15 + $0x288] sm:$0xff] }
 0xc51   : > { %v7932_v13 = vpack.c.bf16 %v5462_v62, %v5460_v14  ;;  %v5738_v14 = vld [vmem:[#allocation15 + $0x6a8] sm:$0xff]  ;;  %v5740_v62 = vld [vmem:[#allocation15 + $0x6b8] sm:$0xff] }
 0xc53   : > { %8027 = vmatpush1.bf16.msra.mxu1 %v8026_v21  ;;  %v7930_v21 = vpack.c.bf16 %v5457_v10, %v5455_v2  ;;  %v5477_v2 = vld [vmem:[#allocation15 + $0x310] sm:$0xff]  ;;  %v7948_v10 = vpack.c.bf16 %v5478_v3, %v5476_v63  ;;  %v6130_v63 = vld [vmem:[%s9838_s11 + $0x40] sm:$0xff]  ;;  %v6131_v3 = vld [vmem:[%s9838_s11 + $0x48] sm:$0xff] }
 0xc54   : > { %8029 = vmatprep.subr.bf16.mxu1 %v8028_v25  ;;  %v5717_v25 = vld [vmem:[#allocation15 + $0x600] sm:$0xff] }
 0xce1   : > { %v5152_v44 = vpop.f32.mrb[56].mxu1  ;;  %v5299_v31 = vpop.f32.mrb[40].mxu0 }
 0xce2   : > { %v5375_v36 = vmax.f32 %v5152_v44, %v5299_v31  ;;  %v5154_v37 = vpop.f32.mrb[57].mxu1  ;;  %v5301_v38 = vpop.f32.mrb[41].mxu0  ;;  %v7934_v44 = vpack.c.bf16 %v5461_v11, %v5459_v1  ;;  %v8046_v31 = vpack.c.bf16 %v5719_v43, %v5717_v25  ;;  %v7952_v1 = vpack.c.bf16 %v5482_v19, %v5480_v18  ;;  %v5484_v25 = vld [vmem:[#allocation15 + $0x348] sm:$0xff]  ;;  %v5486_v43 = vld [vmem:[#allocation15 + $0x358] sm:$0xff]  ;;  %v6139_v19 = vld [vmem:[%s9838_s11 + $0x88] sm:$0xff] }
 0xce3   : > { %v5376_v45 = vmax.f32 %v5154_v37, %v5301_v38  ;;  %v5721_v37 = vld [vmem:[#allocation15 + $0x620] sm:$0xff]  ;;  %v5723_v38 = vld [vmem:[#allocation15 + $0x630] sm:$0xff]  ;;  %v8064_v11 = vpack.c.bf16 %v5740_v62, %v5738_v14  ;;  %v7956_v33 = vpack.c.bf16 %v5486_v43, %v5484_v25  ;;  %v6138_v18 = vld [vmem:[%s9838_s11 + $0x80] sm:$0xff] }
 0xce4   : > { %v8101_v14 = vpack.c.bf16 %v6139_v19, %v6138_v18  ;;  %v6140_v62 = vld [vmem:[%s9838_s11 + $0x90] sm:$0xff]  ;;  %v6146_v25 = vld [vmem:[%s9838_s11 + $0xc0] sm:$0xff]  ;;  %v6147_v43 = vld [vmem:[%s9838_s11 + $0xc8] sm:$0xff] }
 0xce5   : > { %5558 = vmatprep.mubr.f32.mxu0 %v5376_v45  ;;  %5813 = vmatprep.mubr.f32.mxu1 %v5376_v45  ;;  %v5223_v49 = vpop.f32.mrb[58].mxu1  ;;  %v5468_v45 = vld [vmem:[#allocation15 + $0x2c8] sm:$0xff]  ;;  %v8113_v26 = vpack.c.bf16 %v6147_v43, %v6146_v25 }
 0xce6   : > { %5559 = vmatmul.mubr.f32.vlgmr.msra.gmra.mrb[42].mxu0 %v5375_v36  ;;  %5814 = vmatmul.mubr.f32.vlgmr.msra.gmra.mrb[62].mxu1 %v5375_v36  ;;  %v5225_v50 = vpop.f32.mrb[59].mxu1  ;;  %v8048_v36 = vpack.c.bf16 %v5724_v30, %v5722_v29 }
 0xce7   : > { %7919 = vmatpush1.bf16.msra.mxu0 %v7918_v39  ;;  %8031 = vmatpush1.bf16.msra.mxu1 %v8030_v40  ;;  %v5470_v39 = vld [vmem:[#allocation15 + $0x2d8] sm:$0xff]  ;;  %v5726_v40 = vld [vmem:[#allocation15 + $0x648] sm:$0xff] }
 0xce8   : > { %7921 = vmatprep.subr.bf16.mxu0 %v7920_v56  ;;  %8033 = vmatprep.subr.bf16.mxu1 %v8032_v17  ;;  %v8050_v56 = vpack.c.bf16 %v5723_v38, %v5721_v37  ;;  %v5467_v17 = vld [vmem:[#allocation15 + $0x2c0] sm:$0xff]  ;;  %v7940_v6 = vpack.c.bf16 %v5470_v39, %v5468_v45  ;;  %v8052_v46 = vpack.c.bf16 %v5728_v41, %v5726_v40  ;;  %v5488_v37 = vld [vmem:[#allocation15 + $0x368] sm:$0xff]  ;;  %v5490_v38 = vld [vmem:[#allocation15 + $0x378] sm:$0xff] }
 0xce9   : > { %v5370_v0 = vpop.f32.mrb[60].mxu1  ;;  %v5746_v45 = vld [vmem:[#allocation15 + $0x6e8] sm:$0xff]  ;;  %v5748_v39 = vld [vmem:[#allocation15 + $0x6f8] sm:$0xff] }
 0xcea   : > { %v9600_v55 = vmax.f32 %v5223_v49, %v5370_v0  ;;  %v5372_v5 = vpop.f32.mrb[61].mxu1  ;;  %v5474_v49 = vld [vmem:[#allocation15 + $0x2f8] sm:$0xff] }
 0xceb   : > { %7923 = vmatpush1.bf16.msra.mxu0 %v7922_v54  ;;  %8035 = vmatpush1.bf16.msra.mxu1 %v8034_v51  ;;  %v5378_v12 = vmax.f32 %v5225_v50, %v5372_v5  ;;  %v5730_v50 = vld [vmem:[#allocation15 + $0x668] sm:$0xff]  ;;  %v5732_v54 = vld [vmem:[#allocation15 + $0x678] sm:$0xff]  ;;  %v7942_v51 = vpack.c.bf16 %v5469_v60, %v5467_v17  ;;  %v8072_v17 = vpack.c.bf16 %v5748_v39, %v5746_v45  ;;  %v5489_v60 = vld [vmem:[#allocation15 + $0x370] sm:$0xff] }
 0xcec   : > { %7925 = vmatprep.subr.bf16.mxu0 %v7924_v52  ;;  %8037 = vmatprep.subr.bf16.mxu1 %v8036_v57  ;;  %v5473_v52 = vld [vmem:[#allocation15 + $0x2f0] sm:$0xff]  ;;  %v7944_v57 = vpack.c.bf16 %v5474_v49, %v5472_v28  ;;  %v8056_v4 = vpack.c.bf16 %v5732_v54, %v5730_v50  ;;  %v5736_v0 = vld [vmem:[#allocation15 + $0x698] sm:$0xff]  ;;  %v6123_v49 = vld [vmem:[%s9838_s11 + $0x8] sm:$0xff]  ;;  %v8755_v54 = vmov 0.0|0.0  }
 0xced   : > { %6675 = vmatprep.mubr.msk.f32.mxu0 %vm2774_vm4, %v5378_v12  ;;  %6676 = vmatprep.mubr.msk.f32.mxu1 %vm2774_vm4, %v5378_v12  ;;  %v7946_v5 = vpack.c.bf16 %v5473_v52, %v5471_v23  ;;  %v8060_v12 = vpack.c.bf16 %v5736_v0, %v5734_v59  ;;  %v6122_v28 = vld [vmem:[%s9838_s11] sm:$0xff]  ;;  %v8089_v59 = vpack.c.bf16 %v6131_v3, %v6130_v63  ;;  %v6132_v0 = vld [vmem:[%s9838_s11 + $0x50] sm:$0xff] }
 0xcee   : > { %v8077_v50 = vpack.c.bf16 %v6123_v49, %v6122_v28  ;;  %v6126_v52 = vld [vmem:[%s9838_s11 + $0x20] sm:$0xff] }
 0xcef   : > { %7927 = vmatpush1.bf16.msra.mxu0 %v7926_v53  ;;  %8039 = vmatpush1.bf16.msra.mxu1 %v8038_v9  ;;  %v8058_v53 = vpack.c.bf16 %v5731_v47, %v5729_v58  ;;  %v5475_v9 = vld [vmem:[#allocation15 + $0x300] sm:$0xff]  ;;  %v6129_v58 = vld [vmem:[%s9838_s11 + $0x38] sm:$0xff] }
 0xcf0   : > { %7929 = vmatprep.subr.bf16.mxu0 %v7928_v15  ;;  %8041 = vmatprep.subr.bf16.mxu1 %v8040_v16  ;;  %v5733_v15 = vld [vmem:[#allocation15 + $0x680] sm:$0xff]  ;;  %v5735_v16 = vld [vmem:[#allocation15 + $0x690] sm:$0xff]  ;;  %v7950_v8 = vpack.c.bf16 %v5477_v2, %v5475_v9  ;;  %v6134_v9 = vld [vmem:[%s9838_s11 + $0x60] sm:$0xff] }
 0xcf1   : > { %v8062_v20 = vpack.c.bf16 %v5735_v16, %v5733_v15  ;;  %v6135_v2 = vld [vmem:[%s9838_s11 + $0x68] sm:$0xff]  ;;  %v6137_v15 = vld [vmem:[%s9838_s11 + $0x78] sm:$0xff] }
 0xcf3   : > { %7931 = vmatpush1.bf16.msra.mxu0 %v7930_v21  ;;  %8043 = vmatpush1.bf16.msra.mxu1 %v8042_v22  ;;  %v5479_v21 = vld [vmem:[#allocation15 + $0x320] sm:$0xff]  ;;  %v5481_v22 = vld [vmem:[#allocation15 + $0x330] sm:$0xff] }
 0xcf4   : > { %7933 = vmatprep.subr.bf16.mxu0 %v7932_v13  ;;  %8045 = vmatprep.subr.bf16.mxu1 %v8044_v24  ;;  %v5737_v13 = vld [vmem:[#allocation15 + $0x6a0] sm:$0xff]  ;;  %v5739_v24 = vld [vmem:[#allocation15 + $0x6b0] sm:$0xff]  ;;  %v7954_v29 = vpack.c.bf16 %v5481_v22, %v5479_v21  ;;  %v6142_v21 = vld [vmem:[%s9838_s11 + $0xa0] sm:$0xff] }
 0xcf5   : > { %v8066_v30 = vpack.c.bf16 %v5739_v24, %v5737_v13  ;;  %v6143_v22 = vld [vmem:[%s9838_s11 + $0xa8] sm:$0xff]  ;;  %v6145_v13 = vld [vmem:[%s9838_s11 + $0xb8] sm:$0xff] }
 0xcf7   : > { %7935 = vmatpush1.bf16.msra.mxu0 %v7934_v44  ;;  %8047 = vmatpush1.bf16.msra.mxu1 %v8046_v31  ;;  %v5483_v44 = vld [vmem:[#allocation15 + $0x340] sm:$0xff]  ;;  %v5485_v31 = vld [vmem:[#allocation15 + $0x350] sm:$0xff] }
 0xcf8   : > { %7937 = vmatprep.subr.bf16.mxu0 %v7936_v35  ;;  %8049 = vmatprep.subr.bf16.mxu1 %v8048_v36  ;;  %v5741_v35 = vld [vmem:[#allocation15 + $0x6c0] sm:$0xff]  ;;  %v5743_v36 = vld [vmem:[#allocation15 + $0x6d0] sm:$0xff]  ;;  %v7958_v40 = vpack.c.bf16 %v5485_v31, %v5483_v44 }
 0xcf9   : > { %v8070_v41 = vpack.c.bf16 %v5743_v36, %v5741_v35 }
 0xcfb   : > { %7939 = vmatpush1.bf16.msra.mxu0 %v7938_v42  ;;  %8051 = vmatpush1.bf16.msra.mxu1 %v8050_v56  ;;  %v5487_v42 = vld [vmem:[#allocation15 + $0x360] sm:$0xff]  ;;  %v7960_v56 = vpack.c.bf16 %v5490_v38, %v5488_v37 }
 0xcfc   : > { %7941 = vmatprep.subr.bf16.mxu0 %v7940_v6  ;;  %8053 = vmatprep.subr.bf16.mxu1 %v8052_v46  ;;  %v5745_v6 = vld [vmem:[#allocation15 + $0x6e0] sm:$0xff]  ;;  %v5747_v46 = vld [vmem:[#allocation15 + $0x6f0] sm:$0xff]  ;;  %v7962_v48 = vpack.c.bf16 %v5489_v60, %v5487_v42 }
 0xcfd   : > { %v8074_v7 = vpack.c.bf16 %v5747_v46, %v5745_v6 }
 0xcff   : > { %7943 = vmatpush1.bf16.msra.mxu0 %v7942_v51  ;;  %8055 = vmatpush1.bf16.msra.mxu1 %v8054_v32  ;;  %v6124_v51 = vld [vmem:[%s9838_s11 + $0x10] sm:$0xff]  ;;  %v6125_v32 = vld [vmem:[%s9838_s11 + $0x18] sm:$0xff] }
 0xd00   : > { %7945 = vmatprep.subr.bf16.mxu0 %v7944_v57  ;;  %8057 = vmatprep.subr.bf16.mxu1 %v8056_v4  ;;  %v8080_v23 = vpack.c.bf16 %v6125_v32, %v6124_v51  ;;  %v6127_v57 = vld [vmem:[%s9838_s11 + $0x28] sm:$0xff] }
 0xd01   : > { %v8083_v4 = vpack.c.bf16 %v6127_v57, %v6126_v52 }
 0xd03   : > { %7947 = vmatpush1.bf16.msra.mxu0 %v7946_v5  ;;  %8059 = vmatpush1.bf16.msra.mxu1 %v8058_v53  ;;  %v6133_v5 = vld [vmem:[%s9838_s11 + $0x58] sm:$0xff] }
 0xd04   : > { %7949 = vmatprep.subr.bf16.mxu0 %v7948_v10  ;;  %8061 = vmatprep.subr.bf16.mxu1 %v8060_v12  ;;  %v8092_v53 = vpack.c.bf16 %v6133_v5, %v6132_v0  ;;  %v8095_v10 = vpack.c.bf16 %v6135_v2, %v6134_v9  ;;  %v6136_v12 = vld [vmem:[%s9838_s11 + $0x70] sm:$0xff] }
 0xd05   : > { %v8098_v16 = vpack.c.bf16 %v6137_v15, %v6136_v12 }
 0xd07   : > { %7951 = vmatpush1.bf16.msra.mxu0 %v7950_v8  ;;  %8063 = vmatpush1.bf16.msra.mxu1 %v8062_v20  ;;  %v6141_v8 = vld [vmem:[%s9838_s11 + $0x98] sm:$0xff] }
 0xd08   : > { %7953 = vmatprep.subr.bf16.mxu0 %v7952_v1  ;;  %8065 = vmatprep.subr.bf16.mxu1 %v8064_v11  ;;  %v8104_v20 = vpack.c.bf16 %v6141_v8, %v6140_v62  ;;  %v8107_v1 = vpack.c.bf16 %v6143_v22, %v6142_v21  ;;  %v6144_v11 = vld [vmem:[%s9838_s11 + $0xb0] sm:$0xff] }
 0xd09   : > { %v8110_v24 = vpack.c.bf16 %v6145_v13, %v6144_v11 }
 0xd0b   : > { %7955 = vmatpush1.bf16.msra.mxu0 %v7954_v29  ;;  %8067 = vmatpush1.bf16.msra.mxu1 %v8066_v30  ;;  %v6149_v29 = vld [vmem:[%s9838_s11 + $0xd8] sm:$0xff] }
 0xd0c   : > { %7957 = vmatprep.subr.bf16.mxu0 %v7956_v33  ;;  %8069 = vmatprep.subr.bf16.mxu1 %v8068_v34  ;;  %v8116_v30 = vpack.c.bf16 %v6149_v29, %v6148_v27 }
 0xd0f   : > { %7959 = vmatpush1.bf16.msra.mxu0 %v7958_v40  ;;  %8071 = vmatpush1.bf16.msra.mxu1 %v8070_v41 }
 0xd10   : > { %7961 = vmatprep.subr.bf16.mxu0 %v7960_v56  ;;  %8073 = vmatprep.subr.bf16.mxu1 %v8072_v17 }
 0xd13   : > { %7963 = vmatpush1.bf16.msra.mxu0 %v7962_v48  ;;  %8075 = vmatpush1.bf16.msra.mxu1 %v8074_v7 }
 0xd14   : > { %8076 = vmatprep.subr.bf16.mxu0 %v8755_v54 }
 0xd16   : > { %5630 = vmatmul.mubr.f32.vlgmr.msra.gmra.mrb[42].mxu0 %v9600_v55  ;;  %5885 = vmatmul.mubr.f32.vlgmr.msra.gmra.mrb[62].mxu1 %v9600_v55  ;;  %v6128_v55 = vld [vmem:[%s9838_s11 + $0x30] sm:$0xff] }
 0xd17   : > { %8078 = vmatpush1.bf16.msra.mxu0 %v8077_v50  ;;  %v8086_v47 = vpack.c.bf16 %v6129_v58, %v6128_v55 }
 0xd18   : > { %8079 = vmatprep.subr.bf16.mxu0 %v8755_v54 }
 0xd1b   : > { %8081 = vmatpush1.bf16.msra.mxu0 %v8080_v23 }
 0xd1c   : > { %8082 = vmatprep.subr.bf16.mxu0 %v8755_v54 }
 0xd1f   : > { %8084 = vmatpush1.bf16.msra.mxu0 %v8083_v4 }
 0xd20   : > { %8085 = vmatprep.subr.bf16.mxu0 %v8755_v54 }
 0xd23   : > { %8087 = vmatpush1.bf16.msra.mxu0 %v8086_v47 }
 0xd24   : > { %8088 = vmatprep.subr.bf16.mxu0 %v8755_v54 }
 0xd27   : > { %8090 = vmatpush1.bf16.msra.mxu0 %v8089_v59 }
 0xd28   : > { %8091 = vmatprep.subr.bf16.mxu0 %v8755_v54 }
 0xd2b   : > { %8093 = vmatpush1.bf16.msra.mxu0 %v8092_v53 }
 0xd2c   : > { %8094 = vmatprep.subr.bf16.mxu0 %v8755_v54 }
 0xd2f   : > { %8096 = vmatpush1.bf16.msra.mxu0 %v8095_v10 }
 0xd30   : > { %8097 = vmatprep.subr.bf16.mxu0 %v8755_v54 }
 0xd33   : > { %8099 = vmatpush1.bf16.msra.mxu0 %v8098_v16 }
 0xd34   : > { %8100 = vmatprep.subr.bf16.mxu0 %v8755_v54 }
 0xd37   : > { %8102 = vmatpush1.bf16.msra.mxu0 %v8101_v14 }
 0xd38   : > { %8103 = vmatprep.subr.bf16.mxu0 %v8755_v54 }
 0xd3b   : > { %8105 = vmatpush1.bf16.msra.mxu0 %v8104_v20 }
 0xd3c   : > { %8106 = vmatprep.subr.bf16.mxu0 %v8755_v54 }
 0xd3f   : > { %8108 = vmatpush1.bf16.msra.mxu0 %v8107_v1 }
 0xd40   : > { %8109 = vmatprep.subr.bf16.mxu0 %v8755_v54 }
 0xd43   : > { %8111 = vmatpush1.bf16.msra.mxu0 %v8110_v24 }
 0xd44   : > { %8112 = vmatprep.subr.bf16.mxu0 %v8755_v54 }
 0xd47   : > { %8114 = vmatpush1.bf16.msra.mxu0 %v8113_v26 }
 0xd48   : > { %8115 = vmatprep.subr.bf16.mxu0 %v8755_v54 }
 0xd4b   : > { %8117 = vmatpush1.bf16.msra.mxu0 %v8116_v30 }
 0xde9   : > { %v5631_v44 = vpop.f32.mrb[42].mxu0  ;;  %v5886_v31 = vpop.f32.mrb[62].mxu1 }
 0xdea   : > { %v5891_v33 = vmax.f32 %v5631_v44, %v5886_v31  ;;  %v5633_v34 = vpop.f32.mrb[43].mxu0  ;;  %v5888_v35 = vpop.f32.mrb[63].mxu1 }
 0xdeb   : > { %v5892_v36 = vmax.f32 %v5633_v34, %v5888_v35  ;;  %v8784_v34 = vmov 1966171168  }
 0xdec   : > { %5893 = vst [vmem:[#allocation2] sm:$0x7f] %v5891_v33  ;;  %v6227_v35 = vunpack.c.l.s4 %v8784_v34 }
 0xded   : > { %5895 = vst.msk [vmem:[#allocation2 + $0x8] sm:$0x7f] %vm5894_vm9, %v5892_v36  ;;  %6708 = vmatprep.mubr.msk.f32.mxu0 %vm3610_vm8, %v5892_v36 }
 0xdee   : > { %6218 = vmatmul.mubr.f32.vlgmr.msra.gmra.mrb[44].mxu0 %v5891_v33  ;;  %v6228_v36 = vunpack.c.0.s8 %v6227_v35 }
 0xdf3   : > { %v5896_v37 = vld [vmem:[#allocation2] sm:$0x7f] }
 0xdf4   : > { %v5913_v38 = vld [vmem:[#allocation2] sm:$0x7f]  ;;  %5898 = vst.msk [vmem:[%s9709_s15] sm:$0x7f] %vm5897_vm10, %v5896_v37  ;;  %v6031_v32 = vld [vmem:[#allocation2 + $0x8] sm:$0x7f]  ;;  %v6231_v37 = vsub.s32 %v6228_v36, %v9387_v61 }
 0xdf5   : > { %v5899_v45 = vld [vmem:[#allocation2] sm:$0x7f]  ;;  %5915 = vrot.lane.b32.xlu1 %v5913_v38, %s8756_s18  ;;  %v6019_v23 = vld [vmem:[#allocation2 + $0x8] sm:$0x7f]  ;;  %s8774_s18 = smov 123  }
 0xdf6   : > { %5901 = vrot.lane.b32.xlu0 %v5899_v45, %s8757_s13  ;;  %v6018_v39 = vld [vmem:[#allocation2] sm:$0x7f]  ;;  %v6045_v52 = vld [vmem:[#allocation2 + $0x8] sm:$0x7f]  ;;  %s8775_s13 = smov 109  }
 0xdf7   : > { %v5906_v40 = vld [vmem:[#allocation2] sm:$0x7f]  ;;  %v6038_v57 = vld [vmem:[#allocation2 + $0x8] sm:$0x7f] }
 0xdf8   : > { %v5920_v41 = vld [vmem:[#allocation2] sm:$0x7f]  ;;  %v6059_v4 = vld [vmem:[#allocation2 + $0x8] sm:$0x7f] }
 0xdf9   : > { %6022 = vrot.lane.b32.xlu1 %v6018_v39, %s8758_s25  ;;  %v5927_v42 = vld [vmem:[#allocation2] sm:$0x7f]  ;;  %v6052_v55 = vld [vmem:[#allocation2 + $0x8] sm:$0x7f] }
 0xdfa   : > { %5908 = vrot.lane.b32.xlu0 %v5906_v40, %s8759_s27  ;;  %v5934_v56 = vld [vmem:[#allocation2] sm:$0x7f]  ;;  %s8776_s27 = smov 116   ;;  %v6073_v58 = vld [vmem:[#allocation2 + $0x8] sm:$0x7f] }
 0xdfb   : > { %v5941_v17 = vld [vmem:[#allocation2] sm:$0x7f]  ;;  %v6066_v47 = vld [vmem:[#allocation2 + $0x8] sm:$0x7f] }
 0xdfc   : > { %v5948_v60 = vld [vmem:[#allocation2] sm:$0x7f]  ;;  %v6087_v63 = vld [vmem:[#allocation2 + $0x8] sm:$0x7f] }
 0xdfd   : > { %5922 = vrot.lane.b32.xlu1 %v5920_v41, %s8760_s21  ;;  %v5955_v6 = vld [vmem:[#allocation2] sm:$0x7f]  ;;  %s8777_s21 = smov 95   ;;  %v6080_v3 = vld [vmem:[#allocation2 + $0x8] sm:$0x7f] }
 0xdfe   : > { %5929 = vrot.lane.b32.xlu0 %v5927_v42, %s8761_s30  ;;  %v5962_v46 = vld [vmem:[#allocation2] sm:$0x7f]  ;;  %s8778_s30 = smov 102   ;;  %v6094_v59 = vld [vmem:[#allocation2 + $0x8] sm:$0x7f] }
 0xdff   : > { %v5969_v48 = vld [vmem:[#allocation2] sm:$0x7f] }
 0xe00   : > { %v5976_v7 = vld [vmem:[#allocation2] sm:$0x7f] }
 0xe01   : > { %5936 = vrot.lane.b32.xlu1 %v5934_v56, %s8762_s19  ;;  %v5983_v28 = vld [vmem:[#allocation2] sm:$0x7f]  ;;  %s8779_s19 = smov 81  }
 0xe02   : > { %5943 = vrot.lane.b32.xlu0 %v5941_v17, %s8763_s24  ;;  %v5990_v49 = vld [vmem:[#allocation2] sm:$0x7f]  ;;  %s8780_s24 = smov 88  }
 0xe03   : > { %v5997_v50 = vld [vmem:[#allocation2] sm:$0x7f] }
 0xe04   : > { %v6004_v54 = vld [vmem:[#allocation2] sm:$0x7f] }
 0xe05   : > { %5950 = vrot.lane.b32.xlu1 %v5948_v60, %s8764_s7  ;;  %v6011_v51 = vld [vmem:[#allocation2] sm:$0x7f]  ;;  %s8782_s7 = smov 74  }
 0xe06   : > { %5957 = vrot.lane.b32.xlu0 %v5955_v6, %s8765_s29  ;;  %s8783_s29 = smov 60  }
 0xe09   : > { %5964 = vrot.lane.b32.xlu1 %v5962_v46, %s8766_s22  ;;  %s8785_s22 = smov 118  }
 0xe0a   : > { %5971 = vrot.lane.b32.xlu0 %v5969_v48, %s8767_s16  ;;  %s8786_s16 = smov 108  }
 0xe0d   : > { %5978 = vrot.lane.b32.xlu1 %v5976_v7, %s8768_s2  ;;  %s8787_s2 = smov 98  }
 0xe0e   : > { %5985 = vrot.lane.b32.xlu0 %v5983_v28, %s8769_s20  ;;  %s8788_s20 = smov 78   ;;  %v6101_v28 = vld [vmem:[#allocation2 + $0x8] sm:$0x7f] }
 0xe11   : > { %5992 = vrot.lane.b32.xlu1 %v5990_v49, %s8770_s23  ;;  %s8789_s23 = smov 68   ;;  %v6108_v49 = vld [vmem:[#allocation2 + $0x8] sm:$0x7f] }
 0xe12   : > { %5999 = vrot.lane.b32.xlu0 %v5997_v50, %s8771_s28  ;;  %s9896_s28 = sld [smem:[#allocation26_spill]]  ;;  %v6115_v50 = vld [vmem:[#allocation2 + $0x8] sm:$0x7f] }
 0xe15   : > { %6006 = vrot.lane.b32.xlu1 %v6004_v54, %s8772_s26  ;;  %s8790_s26 = smov 53   ;;  %v6223_v54 = vld [vmem:[#allocation17] sm:$0x1] }
 0xe16   : > { %6013 = vrot.lane.b32.xlu0 %v6011_v51, %s8773_s5  ;;  %s8791_s5 = smov 46  }
 0xe19   : > { %6033 = vrot.lane.b32.xlu1 %v6031_v32, %s8774_s18  ;;  %s8792_s18 = smov 39  }
 0xe1a   : > { %6024 = vrot.lane.b32.xlu0 %v6019_v23, %s8758_s25  ;;  %s8781_s25 = smov 67  }
 0xe1d   : > { %6047 = vrot.lane.b32.xlu1 %v6045_v52, %s8775_s13  ;;  %s584_s13 = sand.u32 1, %s9896_s28  }
 0xe1e   : > { %6040 = vrot.lane.b32.xlu0 %v6038_v57, %s8776_s27  ;;  %s6709_s27 = sshll.u32 %s8890_s17, 4  ;;  %s6301_s17 = scalar_lea.sflag [#allocation5], %s584_s13 }
 0xe21   : > { %6061 = vrot.lane.b32.xlu1 %v6059_v4, %s8777_s21  ;;  %s9897_s21 = sld [smem:[#allocation31_spill]] }
 0xe22   : > { %6054 = vrot.lane.b32.xlu0 %v6052_v55, %s8778_s30  ;;  %s585_s30 = scalar_lea.vmem [#allocation18], %s584_s13 }
 0xe25   : > { %6075 = vrot.lane.b32.xlu1 %v6073_v58, %s8779_s19  ;;  %s6318_s19 = sshll.u32 %s585_s30, 4  ;;  %s9781_s19 = int_to_ptr.vmem [resolvable:$true] %s6318_s19 }
 0xe26   : > { %6068 = vrot.lane.b32.xlu0 %v6066_v47, %s8780_s24 }
 0xe27   : > { %p9899_p11 = scmp.ne.s32.totalorder %s9897_s21, 0 }
 0xe29   : > { %6089 = vrot.lane.b32.xlu1 %v6087_v63, %s8781_s25 }
 0xe2a   : > { %6082 = vrot.lane.b32.xlu0 %v6080_v3, %s8782_s7  ;;  %s9898_s7 = sld [smem:[#allocation36_spill]] }
 0xe2e   : > { %6096 = vrot.lane.b32.xlu0 %v6094_v59, %s8783_s29 }
 0xe30   : > { %s9779_s29 = scalar_lea.hbm %s9898_s7, %s6709_s27 }
 0xe67   : > { %v5916_v0 = vpop.permute.xlu1 %5915 }
 0xe68   : > { %v5902_v5 = vpop.permute.xlu0 %5901  ;;  %6679 = vst.msk [vmem:[%s9709_s15 + $0x18] sm:$0x7f] %vm5897_vm10, %v5916_v0 }
 0xe69   : > { %6677 = vst.msk [vmem:[%s9709_s15 + $0x8] sm:$0x7f] %vm5897_vm10, %v5902_v5 }
 0xe6b   : > { %v6023_v53 = vpop.permute.xlu1 %6022 }
 0xe6c   : > { %v5909_v9 = vpop.permute.xlu0 %5908 }
 0xe6d   : > { %6678 = vst.msk [vmem:[%s9709_s15 + $0x10] sm:$0x7f] %vm5897_vm10, %v5909_v9 }
 0xe6f   : > { %v5923_v2 = vpop.permute.xlu1 %5922 }
 0xe70   : > { %v5930_v10 = vpop.permute.xlu0 %5929  ;;  %6680 = vst.msk [vmem:[%s9709_s15 + $0x20] sm:$0x7f] %vm5897_vm10, %v5923_v2 }
 0xe71   : > { %6681 = vst.msk [vmem:[%s9709_s15 + $0x28] sm:$0x7f] %vm5897_vm10, %v5930_v10 }
 0xe73   : > { %v5937_v12 = vpop.permute.xlu1 %5936 }
 0xe74   : > { %v5944_v15 = vpop.permute.xlu0 %5943  ;;  %6682 = vst.msk [vmem:[%s9709_s15 + $0x30] sm:$0x7f] %vm5897_vm10, %v5937_v12 }
 0xe75   : > { %6683 = vst.msk [vmem:[%s9709_s15 + $0x38] sm:$0x7f] %vm5897_vm10, %v5944_v15 }
 0xe77   : > { %v5951_v16 = vpop.permute.xlu1 %5950 }
 0xe78   : > { %v5958_v18 = vpop.permute.xlu0 %5957  ;;  %6684 = vst.msk [vmem:[%s9709_s15 + $0x40] sm:$0x7f] %vm5897_vm10, %v5951_v16 }
 0xe79   : > { %6685 = vst.msk [vmem:[%s9709_s15 + $0x48] sm:$0x7f] %vm5897_vm10, %v5958_v18 }
 0xe7b   : > { %v5965_v19 = vpop.permute.xlu1 %5964 }
 0xe7c   : > { %v5972_v14 = vpop.permute.xlu0 %5971  ;;  %6686 = vst.msk [vmem:[%s9709_s15 + $0x50] sm:$0x7f] %vm5897_vm10, %v5965_v19 }
 0xe7d   : > { %6687 = vst.msk [vmem:[%s9709_s15 + $0x58] sm:$0x7f] %vm5897_vm10, %v5972_v14 }
 0xe7f   : > { %v5979_v62 = vpop.permute.xlu1 %5978 }
 0xe80   : > { %v5986_v8 = vpop.permute.xlu0 %5985  ;;  %6688 = vst.msk [vmem:[%s9709_s15 + $0x60] sm:$0x7f] %vm5897_vm10, %v5979_v62 }
 0xe81   : > { %6689 = vst.msk [vmem:[%s9709_s15 + $0x68] sm:$0x7f] %vm5897_vm10, %v5986_v8 }
 0xe83   : > { %v5993_v20 = vpop.permute.xlu1 %5992 }
 0xe84   : > { %v6000_v21 = vpop.permute.xlu0 %5999  ;;  %6690 = vst.msk [vmem:[%s9709_s15 + $0x70] sm:$0x7f] %vm5897_vm10, %v5993_v20 }
 0xe85   : > { %6691 = vst.msk [vmem:[%s9709_s15 + $0x78] sm:$0x7f] %vm5897_vm10, %v6000_v21 }
 0xe87   : > { %v6007_v22 = vpop.permute.xlu1 %6006 }
 0xe88   : > { %v6014_v1 = vpop.permute.xlu0 %6013  ;;  %6692 = vst.msk [vmem:[%s9709_s15 + $0x80] sm:$0x7f] %vm5897_vm10, %v6007_v22 }
 0xe89   : > { %6693 = vst.msk [vmem:[%s9709_s15 + $0x88] sm:$0x7f] %vm5897_vm10, %v6014_v1 }
 0xe8b   : > { %v6034_v11 = vpop.permute.xlu1 %6033 }
 0xe8c   : > { %v6025_v13 = vpop.permute.xlu0 %6024  ;;  %6695 = vst.msk [vmem:[%s9709_s15 + $0x98] sm:$0x7f] %vm5897_vm10, %v6034_v11 }
 0xe8d   : > { %v6027_v24 = vsel %vm6026_vm11, %v6023_v53, %v6025_v13 }
 0xe8e   : > { %6694 = vst.msk [vmem:[%s9709_s15 + $0x90] sm:$0x7f] %vm5897_vm10, %v6027_v24 }
 0xe8f   : > { %v6048_v25 = vpop.permute.xlu1 %6047 }
 0xe90   : > { %v6041_v43 = vpop.permute.xlu0 %6040  ;;  %6697 = vst.msk [vmem:[%s9709_s15 + $0xa8] sm:$0x7f] %vm5897_vm10, %v6048_v25 }
 0xe91   : > { %6696 = vst.msk [vmem:[%s9709_s15 + $0xa0] sm:$0x7f] %vm5897_vm10, %v6041_v43 }
 0xe93   : > { %v6062_v26 = vpop.permute.xlu1 %6061 }
 0xe94   : > { %v6055_v27 = vpop.permute.xlu0 %6054  ;;  %6699 = vst.msk [vmem:[%s9709_s15 + $0xb8] sm:$0x7f] %vm5897_vm10, %v6062_v26 }
 0xe95   : > { %6698 = vst.msk [vmem:[%s9709_s15 + $0xb0] sm:$0x7f] %vm5897_vm10, %v6055_v27 }
 0xe97   : > { %v6076_v29 = vpop.permute.xlu1 %6075 }
 0xe98   : > { %v6069_v30 = vpop.permute.xlu0 %6068  ;;  %6701 = vst.msk [vmem:[%s9709_s15 + $0xc8] sm:$0x7f] %vm5897_vm10, %v6076_v29 }
 0xe99   : > { %6700 = vst.msk [vmem:[%s9709_s15 + $0xc0] sm:$0x7f] %vm5897_vm10, %v6069_v30 }
 0xe9b   : > { %v6090_v44 = vpop.permute.xlu1 %6089 }
 0xe9c   : > { %v6083_v31 = vpop.permute.xlu0 %6082  ;;  %6703 = vst.msk [vmem:[%s9709_s15 + $0xd8] sm:$0x7f] %vm5897_vm10, %v6090_v44 }
 0xe9d   : > { %6702 = vst.msk [vmem:[%s9709_s15 + $0xd0] sm:$0x7f] %vm5897_vm10, %v6083_v31 }
 0xea0   : > { %v6097_v33 = vpop.permute.xlu0 %6096 }
 0xea1   : > { %6704 = vst.msk [vmem:[%s9709_s15 + $0xe0] sm:$0x7f] %vm5897_vm10, %v6097_v33 }
 0xec1   : > { %v6219_v38 = vpop.f32.mrb[44].mxu0 }
 0xec2   : > { %v6232_v45 = vrot.slane %v6219_v38, %v6231_v37  ;;  %v6262_v39 = vcombine.high %v6219_v38, %v6219_v38  ;;  %v6221_v40 = vpop.f32.mrb[45].mxu0  ;;  %v6224_v51 = vadd.f32 %v6223_v54, %v6219_v38 }
 0xec4   : > { %v6233_v41 = vcombine.high %v6232_v45, %v6232_v45  ;;  %v6240_v42 = vrot.slane %v6232_v45, %v6231_v37  ;;  %v6269_v56 = vrot.slane %v6262_v39, %v6231_v37 }
 0xec6   : > { %v6247_v17 = vrot.slane %v6233_v41, %v6231_v37  ;;  %v6252_v60 = vcombine.high %v6240_v42, %v6240_v42  ;;  %v6276_v46 = vrot.slane %v6269_v56, %v6231_v37  ;;  %v6281_v48 = vcombine.high %v6269_v56, %v6269_v56 }
 0xec8   : > { %6248 = vrot.lane.b32.xlu1 %v6247_v17, %s8785_s22  ;;  %6253 = vrot.lane.b32.xlu0 %v6252_v60, %s8786_s16  ;;  %v6257_v6 = vcombine.high %v6247_v17, %v6247_v17  ;;  %v6288_v61 = vrot.slane %v6281_v48, %v6231_v37  ;;  %v6293_v7 = vcombine.high %v6276_v46, %v6276_v46  ;;  %s8654_s22 = scalar_lea.vmem %s9781_s19, 16  ;;  %s8793_s16 = smov [#allocation18]  }
 0xec9   : > { %p8655_p8 = scmp.ne.s32.totalorder %s9781_s19, %s8654_s22 }
 0xecb   : > { %p8656_p5 = pnand %p8655_p8, %p9899_p11 }
 0xecc   : > { %6258 = vrot.lane.b32.xlu1 %v6257_v6, %s8787_s2  ;;  %6277 = vrot.lane.b32.xlu0 %v6276_v46, %s8780_s24  ;;  %s8658_s2 = sshll.u32 %s8793_s16, 4  ;;  %s8659_s2 = int_to_ptr.vmem [resolvable:$false] %s8658_s2 }
 0xecd   : > { %p8657_p6 = pneg %p8656_p5  ;;  %p8661_p0 = scmp.lt.s32.totalorder %s9781_s19, %s8659_s2 }
 0xed0   : > { %6289 = vrot.lane.b32.xlu1 %v6288_v61, %s8788_s20  ;;  %6294 = vrot.lane.b32.xlu0 %v6293_v7, %s8789_s23  ;;  %s8660_s20 = scalar_lea.vmem %s8659_s2, 32 }
 0xed1   : > { %p8662_p9 = scmp.lt.s32.totalorder %s8660_s20, %s8654_s22 }
 0xed3   : > { %p8663_p10 = por %p8662_p9, %p8661_p0 }
 0xed4   : > { %6103 = vrot.lane.b32.xlu1 %v6101_v28, %s8790_s26  ;;  %6110 = vrot.lane.b32.xlu0 %v6108_v49, %s8791_s5 }
 0xed5   : > { %p8664_p13 = pnand %p8663_p10, %p8657_p6 }
 0xed8   : > { %6117 = vrot.lane.b32.xlu1 %v6115_v50, %s8792_s18 }
 0xf3a   : > { %v6249_v32 = vpop.permute.xlu1 %6248  ;;  %v6254_v23 = vpop.permute.xlu0 %6253 }
 0xf3b   : > { %v6251_v52 = vadd.f32 %v6249_v32, %v6224_v51 }
 0xf3d   : > { %v6256_v57 = vadd.f32 %v6254_v23, %v6251_v52 }
 0xf3e   : > { %v6259_v4 = vpop.permute.xlu1 %6258  ;;  %v6278_v55 = vpop.permute.xlu0 %6277 }
 0xf3f   : > { %v6261_v58 = vadd.f32 %v6259_v4, %v6256_v57 }
 0xf41   : > { %v6280_v47 = vadd.f32 %v6278_v55, %v6261_v58 }
 0xf42   : > { %v6290_v63 = vpop.permute.xlu1 %6289  ;;  %v6295_v3 = vpop.permute.xlu0 %6294 }
 0xf43   : > { %v6292_v59 = vadd.f32 %v6290_v63, %v6280_v47 }
 0xf45   : > { %v6297_v0 = vadd.f32 %v6295_v3, %v6292_v59 }
 0xf46   : > { %v6104_v5 = vpop.permute.xlu1 %6103  ;;  %v6111_v53 = vpop.permute.xlu0 %6110 }
 0xf47   : > { %6705 = vst.msk [vmem:[%s9709_s15 + $0xe8] sm:$0x7f] %vm5897_vm10, %v6104_v5  ;;  %6706 = vst.msk [vmem:[%s9709_s15 + $0xf0] sm:$0x7f] %vm5897_vm10, %v6111_v53 }
 0xf48   : > { %6299 = vst.msk [vmem:[%s585_s30] sm:$0x1] %vm6298_vm12, %v6297_v0 }
 0xf49   : > { %8667 = shalt.err (!%p8664_p13)
}
 0xf4a   : > { %s8668_s23 = scalar_lea.hbm %s9779_s29, 16  ;;  %s8672_s5 = scalar_lea.hbm %s9898_s7, 32 }
 0xf4b   : > { %p8669_p12 = scmp.ne.s32.totalorder %s9779_s29, %s8668_s23  ;;  %p8673_p3 = scmp.lt.u32.totalorder %s9779_s29, %s9898_s7 }
 0xf4c   : > { %p8674_p4 = scmp.lt.u32.totalorder %s8672_s5, %s8668_s23  ;;  %p8676_p8 = scmp.lt.u32.totalorder %s8668_s23, %s9779_s29 }
 0xf4d   : > { %p8670_p1 = pnand %p8669_p12, %p9899_p11 }
 0xf4e   : > { %p8675_p7 = por %p8674_p4, %p8673_p3 }
 0xf4f   : > { %p8671_p2 = pneg %p8670_p1 }
 0xf50   : > { %p8677_p5 = por %p8676_p8, %p8675_p7 }
 0xf52   : > { %p8678_p6 = pnand %p8677_p5, %p8671_p2 }
 0xf54   : > { %8681 = shalt.err (!%p8678_p6)
}
 0xf55   : > { %8262 = dma.vmem_to_hbm [thread:$0]  (%p9899_p11), %s9781_s19, 16, %s9779_s29, %s6301_s17   ;;  %v6118_v9 = vpop.permute.xlu1 %6117 }
 0xf56   : > { %6707 = vst.msk [vmem:[%s9709_s15 + $0xf8] sm:$0x7f] %vm5897_vm10, %v6118_v9 }
 0xf57 PF: > { %s9900_s27 = sld [smem:[#allocation28_spill]]  ;;  %s9901_s30 = sld [smem:[#allocation25_spill]] }
 0xf58   : > { %s9902_s24 = sld [smem:[#allocation32_spill]] }
 0xf5d   : > { %p8314_p0 = scmp.ge.s32.totalorder %s9900_s27, 2  ;;  %s6333_s25 = sand.u32 1, %s9901_s30  }
 0xf5e   : > { %p9903_p9 = scmp.ne.s32.totalorder %s9902_s24, 0  ;;  %s6334_s22 = scalar_lea.sflag [#allocation5], %s6333_s25 }
 0xf60   : > { %p8293_p10 = pnand %p8314_p0, %p9903_p9 }
 0xf62   : > { %8719 = dma.done.wait (!%p8293_p10), %s6334_s22, 16  }
 0xf63   : > { %8721 = vsyncadd (!%p8293_p10), %s6334_s22, 4294967280  ;;  %s9904_s16 = sld [smem:[#allocation29_spill]]  ;;  %s9905_s29 = sld [smem:[#allocation26_spill]] }
 0xf64   : > { %s9906_s30 = sld [smem:[#allocation27_spill]]  ;;  %s9907_s15 = sld [smem:[#allocation30_spill]] }
 0xf69   : > { %p30_p11 = scmp.ge.s32.totalorder %s9904_s16, 4  }
 0xf6b   :  { %32 = sbr.rel (!%p30_p11) target bundleno = 13 (0xd), region = 207 }
 0xf72   :  { %6346 = vsyncpa [#allocation4], 1 }
 0xf73   :  { %6348 = vsyncpa [#allocation4 + $0x1], 1 }
 0xf74   :  { %6349 = vsyncpa [#allocation7], 1 }
 0xf75   :  { %6350 = vsyncpa [#allocation10], 1 }
 0xf76   :  { %6351 = vsyncpa [#allocation13], 1 }
 0xf77   :  { %6352 = vsyncpa [#allocation16], 1 }
 0xf78   :  { %6353 = vsyncpa [#allocation5], 1 }
 0xf79   :  { %6355 = vsyncpa [#allocation5 + $0x1], 1 }

</bundles_post_ra>
